<compile_context>
chip_gen: v5e
topology: v5e:2x2
jax: 0.10.0
libtpu: 0.0.40
codegen_flags: <defaults>
</compile_context>

<pallas_src>
import functools

import jax
import jax.numpy as jnp
from jax.experimental import pallas as pl
from jax.experimental.pallas import tpu as pltpu


def _detect_vmem_capacity_bytes():
    try:
        return int(pltpu.get_tpu_info().vmem_capacity_bytes)
    except Exception:
        return 64 << 20  # conservative: v7x per-TensorCore VMEM


_VMEM_CAPACITY = _detect_vmem_capacity_bytes()


def _round_up(v, m):
    return ((v + m - 1) // m) * m


def _pick_tile_m(m_tokens, target):
    """Token-tile size: sublane-aligned, capped at `target`, kept small enough
    that the parallel token axis has >=2 tiles whenever M allows (v7x has two
    TensorCores)."""
    if m_tokens <= 8:
        return 8
    half = _round_up((m_tokens + 1) // 2, 8)
    return max(8, min(target, half))


def _pick_tile_h(hidden, target):
    """Largest multiple of 128 dividing H that is <= target; falls back to the
    full H (single reduction step) if no such divisor exists.  Exact
    divisibility avoids garbage partial products from padded hidden chunks."""
    t = min(target, hidden)
    t = (t // 128) * 128
    while t >= 128:
        if hidden % t == 0:
            return t
        t -= 128
    return hidden


def _vmem_limit(est_bytes):
    return min(max(int(est_bytes * 1.5) + (4 << 20), 16 << 20),
               int(_VMEM_CAPACITY * 0.9))


# ---------------------------------------------------------------------------
# Kernels
# ---------------------------------------------------------------------------
def _ffn_resident_kernel(x_ref, w1_ref, b1_ref, w2_ref, b2_ref, o_ref):
    # x_ref: (TM, E) native dtype; w1_ref: (E, H) bf16; b1_ref: (1, H) f32
    # w2_ref: (H, E) bf16; b2_ref: (1, E) f32; o_ref: (TM, E).
    x = x_ref[...].astype(jnp.bfloat16)
    h = jnp.dot(x, w1_ref[...], preferred_element_type=jnp.float32)
    h = jnp.maximum(h + b1_ref[...], 0.0)
    y = jnp.dot(h.astype(jnp.bfloat16), w2_ref[...],
                preferred_element_type=jnp.float32)
    o_ref[...] = (y + b2_ref[...]).astype(o_ref.dtype)


def _ffn_chunked_kernel_f32out(x_ref, w1_ref, b1_ref, w2_ref, b2_ref, o_ref,
                               *, tile_h):
    # 2-D grid (token tile i, hidden chunk k).  o_ref is f32 and its block
    # index ignores k, so it stays VMEM-resident: accumulate into it directly.
    k = pl.program_id(1)
    x = x_ref[...].astype(jnp.bfloat16)
    h = jnp.dot(x, w1_ref[...], preferred_element_type=jnp.float32)
    b1 = b1_ref[:, pl.ds(pl.multiple_of(k * tile_h, 128), tile_h)]
    h = jnp.maximum(h + b1, 0.0)
    partial_sum = jnp.dot(h.astype(jnp.bfloat16), w2_ref[...],
                          preferred_element_type=jnp.float32)

    @pl.when(k == 0)
    def _():
        o_ref[...] = partial_sum + b2_ref[...]

    @pl.when(k != 0)
    def _():
        o_ref[...] = o_ref[...] + partial_sum


def _ffn_chunked_kernel_scratch(x_ref, w1_ref, b1_ref, w2_ref, b2_ref, o_ref,
                                acc_ref, *, tile_h):
    # Same as above but with an f32 accumulator scratch for narrow output
    # dtypes (e.g. bf16); single cast + store in the epilogue.
    k = pl.program_id(1)

    @pl.when(k == 0)
    def _():
        acc_ref[...] = jnp.zeros_like(acc_ref)

    x = x_ref[...].astype(jnp.bfloat16)
    h = jnp.dot(x, w1_ref[...], preferred_element_type=jnp.float32)
    b1 = b1_ref[:, pl.ds(pl.multiple_of(k * tile_h, 128), tile_h)]
    h = jnp.maximum(h + b1, 0.0)
    acc_ref[...] += jnp.dot(h.astype(jnp.bfloat16), w2_ref[...],
                            preferred_element_type=jnp.float32)

    @pl.when(k == pl.num_programs(1) - 1)
    def _():
        o_ref[...] = (acc_ref[...] + b2_ref[...]).astype(o_ref.dtype)


# ---------------------------------------------------------------------------
# Wrapper
# ---------------------------------------------------------------------------
@jax.jit
def feedforward(x, w1, b1, w2, b2):
    """FeedForward forward: relu(x @ W1 + b1) @ W2 + b2 (eval-mode dropout).

    x:  (B, T, E), any float dtype (cast to bf16 inside the kernel).
    w1: (E, H), w2: (H, E) -- stored (in_features, out_features), i.e. already
        transposed vs. nn.Linear.weight; pre-cast to bf16 via prepare_params()
        so no per-call recast pass is needed.
    b1: (1, H), b2: (1, E) float32.  Returns (B, T, E) in x.dtype.
    """
    B, T, E = x.shape
    H = w1.shape[1]
    M = B * T

    # No-ops when prepare_params() was used; keeps correctness otherwise.
    w1 = w1.astype(jnp.bfloat16)
    w2 = w2.astype(jnp.bfloat16)
    b1f = b1.reshape(1, H).astype(jnp.float32)
    b2f = b2.reshape(1, E).astype(jnp.float32)
    x2 = x.reshape(M, E)

    x_item = jnp.dtype(x.dtype).itemsize
    out_item = x_item
    budget = int(_VMEM_CAPACITY * 0.7)

    # ---- Fast path: weights fully VMEM-resident, 1-D grid over token tiles.
    tile_m = _pick_tile_m(M, 256)
    resident_bytes = (
        2 * tile_m * E * x_item          # x tile (double-buffered)
        + 2 * E * H * 2                  # W1 (bf16, buffer pair)
        + 2 * H * E * 2                  # W2
        + 2 * H * 4 + 2 * E * 4          # biases
        + 2 * tile_m * E * out_item      # out tile
        + tile_m * H * 6                 # h intermediate: f32 + bf16 cast
    )

    if resident_bytes <= budget:
        grid = (pl.cdiv(M, tile_m),)
        out = pl.pallas_call(
            _ffn_resident_kernel,
            out_shape=jax.ShapeDtypeStruct((M, E), x.dtype),
            grid_spec=pltpu.PrefetchScalarGridSpec(
                num_scalar_prefetch=0,
                grid=grid,
                in_specs=[
                    pl.BlockSpec((tile_m, E), lambda i: (i, 0)),  # x tile
                    pl.BlockSpec((E, H), lambda i: (0, 0)),       # W1 resident
                    pl.BlockSpec((1, H), lambda i: (0, 0)),       # b1 resident
                    pl.BlockSpec((H, E), lambda i: (0, 0)),       # W2 resident
                    pl.BlockSpec((1, E), lambda i: (0, 0)),       # b2 resident
                ],
                out_specs=pl.BlockSpec((tile_m, E), lambda i: (i, 0)),
            ),
            compiler_params=pltpu.CompilerParams(
                dimension_semantics=("parallel",),
                vmem_limit_bytes=_vmem_limit(resident_bytes),
            ),
        )(x2, w1, b1f, w2, b2f)
        return out.reshape(B, T, E)

    # ---- Fallback: 2-D grid, hidden dim streamed in chunks.  Pick the largest
    # token tile that fits (weight HBM traffic scales with ceil(M/tile_m)).
    def chunked_bytes(tm, th):
        return (
            2 * tm * E * x_item
            + 2 * E * th * 2 + 2 * th * E * 2   # W1/W2 chunks, double-buffered
            + 2 * H * 4 + 2 * E * 4             # b1 (full, resident) + b2
            + 2 * tm * E * out_item             # out tile (resident over k)
            + tm * E * 4                        # f32 accumulator (worst case)
            + tm * th * 6                       # h intermediate
        )

    tile_m, tile_h = None, None
    for tm_target in (1024, 512, 256, 128):
        tm = _pick_tile_m(M, tm_target)
        for th_target in (512, 256, 128):
            th = _pick_tile_h(H, th_target)
            if chunked_bytes(tm, th) <= budget:
                tile_m, tile_h = tm, th
                break
        if tile_m is not None:
            break
    if tile_m is None:  # last resort: smallest tiles
        tile_m, tile_h = _pick_tile_m(M, 128), _pick_tile_h(H, 128)

    grid = (pl.cdiv(M, tile_m), H // tile_h)
    f32_out = jnp.dtype(x.dtype) == jnp.dtype(jnp.float32)
    if f32_out:
        kernel = functools.partial(_ffn_chunked_kernel_f32out, tile_h=tile_h)
        scratch = []
    else:
        kernel = functools.partial(_ffn_chunked_kernel_scratch, tile_h=tile_h)
        scratch = [pltpu.VMEM((tile_m, E), jnp.float32)]

    out = pl.pallas_call(
        kernel,
        out_shape=jax.ShapeDtypeStruct((M, E), x.dtype),
        grid_spec=pltpu.PrefetchScalarGridSpec(
            num_scalar_prefetch=0,
            grid=grid,
            in_specs=[
                pl.BlockSpec((tile_m, E), lambda i, k: (i, 0)),   # x (reused over k)
                pl.BlockSpec((E, tile_h), lambda i, k: (0, k)),   # W1 chunk
                pl.BlockSpec((1, H), lambda i, k: (0, 0)),        # b1 resident
                pl.BlockSpec((tile_h, E), lambda i, k: (k, 0)),   # W2 chunk
                pl.BlockSpec((1, E), lambda i, k: (0, 0)),        # b2 resident
            ],
            out_specs=pl.BlockSpec((tile_m, E), lambda i, k: (i, 0)),
            scratch_shapes=scratch,
        ),
        compiler_params=pltpu.CompilerParams(
            dimension_semantics=("parallel", "arbitrary"),
            vmem_limit_bytes=_vmem_limit(chunked_bytes(tile_m, tile_h)),
        ),
    )(x2, w1, b1f, w2, b2f)
    return out.reshape(B, T, E)


# ---------------------------------------------------------------------------
# Params
# ---------------------------------------------------------------------------
def init_params(key, n_embd):
    """Deterministic init matching nn.Linear parameter shapes / init.

    PyTorch nn.Linear(in, out): weight (out, in), bias (out,), both
    U(-1/sqrt(in), 1/sqrt(in)).  We store weights transposed as (in, out).
    """
    hidden = 4 * n_embd
    k1, k2, k3, k4 = jax.random.split(key, 4)
    bound1 = 1.0 / (n_embd ** 0.5)
    bound2 = 1.0 / (hidden ** 0.5)
    w1 = jax.random.uniform(k1, (n_embd, hidden), jnp.float32, -bound1, bound1)
    b1 = jax.random.uniform(k2, (1, hidden), jnp.float32, -bound1, bound1)
    w2 = jax.random.uniform(k3, (hidden, n_embd), jnp.float32, -bound2, bound2)
    b2 = jax.random.uniform(k4, (1, n_embd), jnp.float32, -bound2, bound2)
    return w1, b1, w2, b2


def prepare_params(w1, b1, w2, b2):
    """One-time (outside jit) cast of weights to bf16 (MXU-rate matmuls, half
    the weight-streaming bytes); biases stay f32."""
    return (jnp.asarray(w1, jnp.bfloat16), jnp.asarray(b1, jnp.float32),
            jnp.asarray(w2, jnp.bfloat16), jnp.asarray(b2, jnp.float32))


if __name__ == "__main__":
    key = jax.random.PRNGKey(0)
    kx, kp = jax.random.split(key)

    # Config from the module: n_embd=256 (hidden = 4*256 = 1024),
    # block_size=128; small batch.  M = 512 tokens -> 2 token tiles, so the
    # "parallel" grid axis can split across v7x's two TensorCores.
    B, T, n_embd = 4, 128, 256
    x = jax.random.normal(kx, (B, T, n_embd), dtype=jnp.float32)
    w1, b1, w2, b2 = prepare_params(*init_params(kp, n_embd))

    y = feedforward(x, w1, b1, w2, b2)
    y = jax.block_until_ready(y)

    # Plain-JAX reference with the same mixed precision (bf16 operands,
    # f32 accumulation, eval-mode dropout = identity).
    xb = x.reshape(-1, n_embd).astype(jnp.bfloat16)
    h_ref = jnp.maximum(
        jnp.dot(xb, w1, preferred_element_type=jnp.float32) + b1, 0.0)
    y_ref = (jnp.dot(h_ref.astype(jnp.bfloat16), w2,
                     preferred_element_type=jnp.float32) + b2)
    y_ref = y_ref.reshape(B, T, n_embd).astype(x.dtype)

    assert y.shape == (B, T, n_embd)
    assert jnp.allclose(y, y_ref, atol=2e-2, rtol=2e-2), "mismatch vs reference"

    print("KERNEL_OK")
</pallas_src>

<mosaic_0001>
module attributes {stable_mosaic.version = 11 : i64} {
  func.func @_ffn_resident_kernel(%arg0: i32, %arg1: memref<256x256xf32, #tpu.memory_space<vmem>>, %arg2: memref<256x1024xbf16, #tpu.memory_space<vmem>>, %arg3: memref<1x1024xf32, #tpu.memory_space<vmem>>, %arg4: memref<1024x256xbf16, #tpu.memory_space<vmem>>, %arg5: memref<1x256xf32, #tpu.memory_space<vmem>>, %arg6: memref<256x256xf32, #tpu.memory_space<vmem>>) attributes {dimension_semantics = [#tpu.dimension_semantics<parallel>], iteration_bounds = array<i64: 2>, scalar_prefetch = 0 : i64, scratch_operands = 0 : i64, tpu.core_type = #tpu.core_type<tc>, window_params = [{transform_indices = @transform_0, window_bounds = array<i64: 256, 256>}, {pipeline_mode = #tpu.pipeline_mode<synchronous>, transform_indices = @transform_1, window_bounds = array<i64: 256, 1024>}, {pipeline_mode = #tpu.pipeline_mode<synchronous>, transform_indices = @transform_2, window_bounds = array<i64: 1, 1024>}, {pipeline_mode = #tpu.pipeline_mode<synchronous>, transform_indices = @transform_3, window_bounds = array<i64: 1024, 256>}, {pipeline_mode = #tpu.pipeline_mode<synchronous>, transform_indices = @transform_4, window_bounds = array<i64: 1, 256>}, {transform_indices = @transform_5, window_bounds = array<i64: 256, 256>}]} {
    %c0 = arith.constant 0 : index
    %c0_0 = arith.constant 0 : index
    %0 = vector.load %arg1[%c0, %c0_0] : memref<256x256xf32, #tpu.memory_space<vmem>>, vector<256x256xf32>
    %1 = arith.truncf %0 : vector<256x256xf32> to vector<256x256xbf16>
    %c0_1 = arith.constant 0 : index
    %c0_2 = arith.constant 0 : index
    %2 = vector.load %arg2[%c0_1, %c0_2] : memref<256x1024xbf16, #tpu.memory_space<vmem>>, vector<256x1024xbf16>
    %cst = arith.constant dense<0.000000e+00> : vector<256x1024xf32>
    %3 = tpu.matmul %1, %2, %cst {dimension_numbers = #tpu.dot_dimension_numbers<[1], [0], [0], [1], [0, 0, 1, 1], [], []>} : vector<256x256xbf16>, vector<256x1024xbf16>, vector<256x1024xf32> -> vector<256x1024xf32>
    %c0_3 = arith.constant 0 : index
    %c0_4 = arith.constant 0 : index
    %4 = vector.load %arg3[%c0_3, %c0_4] : memref<1x1024xf32, #tpu.memory_space<vmem>>, vector<1x1024xf32>
    %5 = vector.broadcast %4 : vector<1x1024xf32> to vector<256x1024xf32>
    %6 = arith.addf %3, %5 : vector<256x1024xf32>
    %cst_5 = arith.constant 0.000000e+00 : f32
    %7 = vector.broadcast %cst_5 : f32 to vector<256x1024xf32>
    %8 = arith.maximumf %6, %7 : vector<256x1024xf32>
    %9 = arith.truncf %8 : vector<256x1024xf32> to vector<256x1024xbf16>
    %c0_6 = arith.constant 0 : index
    %c0_7 = arith.constant 0 : index
    %10 = vector.load %arg4[%c0_6, %c0_7] : memref<1024x256xbf16, #tpu.memory_space<vmem>>, vector<1024x256xbf16>
    %cst_8 = arith.constant dense<0.000000e+00> : vector<256x256xf32>
    %11 = tpu.matmul %9, %10, %cst_8 {dimension_numbers = #tpu.dot_dimension_numbers<[1], [0], [0], [1], [0, 0, 1, 1], [], []>} : vector<256x1024xbf16>, vector<1024x256xbf16>, vector<256x256xf32> -> vector<256x256xf32>
    %c0_9 = arith.constant 0 : index
    %c0_10 = arith.constant 0 : index
    %12 = vector.load %arg5[%c0_9, %c0_10] : memref<1x256xf32, #tpu.memory_space<vmem>>, vector<1x256xf32>
    %13 = vector.broadcast %12 : vector<1x256xf32> to vector<256x256xf32>
    %14 = arith.addf %11, %13 : vector<256x256xf32>
    %c0_11 = arith.constant 0 : index
    %c0_12 = arith.constant 0 : index
    %15 = vector.load %arg6[%c0_11, %c0_12] : memref<256x256xf32, #tpu.memory_space<vmem>>, vector<256x256xf32>
    tpu.vector_store %arg6[%c0_11, %c0_12], %14 {strides = array<i32>} : memref<256x256xf32, #tpu.memory_space<vmem>>, vector<256x256xf32>,
    return
  }
  func.func @transform_0(%arg0: i32) -> (i32, i32) {
    %c0_i32 = arith.constant 0 : i32
    %c0_i32_0 = arith.constant 0 : i32
    return %arg0, %c0_i32 : i32, i32
  }
  func.func @transform_1(%arg0: i32) -> (i32, i32) {
    %c0_i32 = arith.constant 0 : i32
    %c0_i32_0 = arith.constant 0 : i32
    %c0_i32_1 = arith.constant 0 : i32
    return %c0_i32, %c0_i32_0 : i32, i32
  }
  func.func @transform_2(%arg0: i32) -> (i32, i32) {
    %c0_i32 = arith.constant 0 : i32
    %c0_i32_0 = arith.constant 0 : i32
    %c0_i32_1 = arith.constant 0 : i32
    return %c0_i32, %c0_i32_0 : i32, i32
  }
  func.func @transform_3(%arg0: i32) -> (i32, i32) {
    %c0_i32 = arith.constant 0 : i32
    %c0_i32_0 = arith.constant 0 : i32
    %c0_i32_1 = arith.constant 0 : i32
    return %c0_i32, %c0_i32_0 : i32, i32
  }
  func.func @transform_4(%arg0: i32) -> (i32, i32) {
    %c0_i32 = arith.constant 0 : i32
    %c0_i32_0 = arith.constant 0 : i32
    %c0_i32_1 = arith.constant 0 : i32
    return %c0_i32, %c0_i32_0 : i32, i32
  }
  func.func @transform_5(%arg0: i32) -> (i32, i32) {
    %c0_i32 = arith.constant 0 : i32
    %c0_i32_0 = arith.constant 0 : i32
    return %arg0, %c0_i32 : i32, i32
  }
}

</mosaic_0001>

<bundles_post_ra>
// kernel: feedforward.1
= control target key start
LH: loop header
LB: loop body
LE: loop exit
PB: predicated region body
PF: predicated region fallthrough
CT: control target
= control target key end

     0   :  { %10 = vsyncpa [#allocation3], 0  ;;  %s8666_s0 = inlined_call_operand.hbm [shape: f32[512,256], index: 0, kind: input, shape index: {}]   ;;  %s8667_s1 = inlined_call_operand.hbm [shape: bf16[256,1024], index: 1, kind: input, shape index: {}]   ;;  %s8668_s2 = inlined_call_operand.hbm [shape: f32[1,1024], index: 2, kind: input, shape index: {}]   ;;  %s8669_s3 = inlined_call_operand.hbm [shape: bf16[1024,256], index: 3, kind: input, shape index: {}]   ;;  %s8670_s4 = inlined_call_operand.vmem [shape: f32[1,256], index: 4, kind: input, shape index: {}]   ;;  %s8671_s5 = inlined_call_operand.hbm [shape: f32[512,256], index: 5, kind: output, shape index: {}]  }
   0x1   :  { %12 = vsyncpa [#allocation3 + $0x1], 0 }
   0x2   :  { %13 = vsyncpa [#allocation6], 0 }
   0x3   :  { %14 = vsyncpa [#allocation9], 0 }
   0x4   :  { %15 = vsyncpa [#allocation4], 0 }
   0x5   :  { %17 = vsyncpa [#allocation4 + $0x1], 0  ;;  %s6999_s18 = smov 0   ;;  %s7001_s19 = smov 0  }
   0x6   :  { %s7003_s20 = smov 0   ;;  %s7005_s21 = smov 0  }
   0x7 LB: > { %s7020_s22 = sadd.s32 4294967295, %s6956_s21   ;;  %s5367_s23 = sadd.s32 4294967294, %s6956_s21   ;;  %s6956_s21 = sphi %s7005_s21, %s9118_s21   ;;  %s6952_s20 = sphi %s7003_s20, %s9117_s20   ;;  %s6948_s19 = sphi %s7001_s19, %s9116_s19   ;;  %s6944_s18 = sphi %s6999_s18, %s9115_s18  }
   0x8   : > { %p43_p0 = scmp.ne.s32.totalorder %s6948_s19, %s6944_s18  ;;  %p44_p1 = scmp.eq.s32.totalorder %s7020_s22, 0 }
   0x9   : > { %p151_p2 = scmp.eq.s32.totalorder %s7020_s22, 1  ;;  %p157_p3 = scmp.eq.s32.totalorder %s5367_s23, 1 }
   0xa   : > { %p7029_p4 = por %p44_p1, %p43_p0  ;;  %p5368_p5 = scmp.ge.s32.totalorder %s6956_s21, 1 }
   0xb   : > { %p7034_p6 = por %p157_p3, %p43_p0  ;;  %p164_p7 = scmp.lt.s32.totalorder %s6956_s21, 3 }
   0xc   : > { %s175_s28 = sshll.u32 %s8667_s1, 4  ;;  %s6958_s30 = smov [#allocation5]   ;;  %s176_s28 = int_to_ptr.hbm [resolvable:$true] %s175_s28 }
   0xd   : > { %p7042_p8 = pnand %p5368_p5, %p164_p7  ;;  %s177_s6 = sshll.u32 %s6958_s30, 4  ;;  %s178_s6 = int_to_ptr.vmem [resolvable:$true] %s177_s6 }
   0xe   : > { %s190_s10 = sshll.u32 %s8668_s2, 4  ;;  %s6959_s11 = smov 512   ;;  %s191_s10 = int_to_ptr.hbm [resolvable:$true] %s190_s10 }
   0xf   : > { %p6689_p9 = pneg %p7042_p8  ;;  %s6960_s12 = smov 32  }
  0x10   : > { %s6961_s13 = smov [#allocation7]   ;;  %s201_s17 = sshll.u32 %s8669_s3, 4  ;;  %s202_s17 = int_to_ptr.hbm [resolvable:$true] %s201_s17 }
  0x11   : > { %p7050_p10 = pnand %p6689_p9, %p44_p1  ;;  %s192_s14 = sshll.u32 %s6961_s13, 4  ;;  %s193_s14 = int_to_ptr.vmem [resolvable:$true] %s192_s14 }
  0x12   : > { %s6962_s23 = smov [#allocation8]   ;;  %s6963_s27 = smov 128  }
  0x13   : > { %6692 = dma.hbm_to_vmem [thread:$0]  (!%p7050_p10), %s176_s28, 16384, %s178_s6, [#allocation6], %s6959_s11, %s6959_s11, %s6960_s12  }
  0x14   : > { %6695 = dma.hbm_to_vmem [thread:$0]  (!%p7050_p10), %s191_s10, 128, %s193_s14, [#allocation6]  }
  0x15   : > { %s203_s26 = sshll.u32 %s6962_s23, 4  ;;  %s6964_s28 = smov 8   ;;  %s204_s26 = int_to_ptr.vmem [resolvable:$true] %s203_s26 }
  0x16   : > { %6698 = dma.hbm_to_vmem [thread:$0]  (!%p7050_p10), %s202_s17, 16384, %s204_s26, [#allocation9], %s6963_s27, %s6963_s27, %s6964_s28  }
  0x17   : > { %s7068_s30 = sadd.s32 1, %s6956_s21   ;;  %s30_s8 = sadd.s32 1, %s6952_s20 }
  0x18   : > { %s27_s6 = ssub.s32 %s6956_s21, %s7068_s30  ;;  %p37_p13 = scmp.ne.s32.totalorder %s6952_s20, %s6948_s19 }
  0x19   : > { %p28_p12 = scmp.eq.s32.totalorder %s27_s6, 0  ;;  %p38_p0 = scmp.eq.s32.totalorder %s6956_s21, 0 }
  0x1a   : > { %p6710_p3 = scmp.lt.s32.totalorder %s6956_s21, 2  ;;  %p7082_p7 = por %p151_p2, %p37_p13 }
  0x1b   : > { %s7078_s9 = scalar_select %p28_p12, %s6952_s20, %s30_s8  }
  0x1c   : > { %p39_p5 = por %p38_p0, %p37_p13  ;;  %s220_s7 = sand.u32 1, %s6952_s20  }
  0x1d   : > { %s6414_s11 = sshll.u32 %s6956_s21, 9  ;;  %s5373_s12 = sshll.u32 %s220_s7, 9 }
  0x1e   : > { %s230_s15 = scalar_lea.hbm %s8666_s0, %s6414_s11  ;;  %s224_s17 = scalar_lea.vmem [#allocation2], %s5373_s12 }
  0x1f   : > { %s231_s16 = sshll.u32 %s230_s15, 4  ;;  %s233_s23 = sshll.u32 %s224_s17, 4  ;;  %s232_s16 = int_to_ptr.hbm [resolvable:$true] %s231_s16  ;;  %s234_s23 = int_to_ptr.vmem [resolvable:$true] %s233_s23 }
  0x20   : > { %p7093_p9 = pnand %p6710_p3, %p39_p5  ;;  %s221_s27 = scalar_lea.sflag [#allocation3], %s220_s7 }
  0x21   : > { %s6852_s28 = sshra.s32 %s232_s16, 4  ;;  %s6859_s12 = scalar_lea.hbm %s8666_s0, 1024  ;;  %s6853_s28 = int_to_ptr.hbm [resolvable:$true] %s6852_s28 }
  0x22   : > { %s6854_s6 = scalar_lea.hbm %s6853_s28, 512  ;;  %p6856_p10 = pneg %p7093_p9 }
  0x23   : > { %p6855_p2 = scmp.ne.s32.totalorder %s6853_s28, %s6854_s6  ;;  %p6860_p0 = scmp.lt.s32.totalorder %s6853_s28, %s8666_s0 }
  0x24   : > { %p6861_p3 = scmp.lt.s32.totalorder %s6859_s12, %s6854_s6 }
  0x25   : > { %p6857_p12 = pnand %p6856_p10, %p6855_p2 }
  0x26   : > { %p6862_p5 = por %p6861_p3, %p6860_p0 }
  0x27   : > { %p6858_p13 = pneg %p6857_p12 }
  0x29   : > { %p6863_p11 = pnand %p6862_p5, %p6858_p13 }
  0x2b   : > { %6866 = shalt.err (!%p6863_p11)
}
  0x2c   : > { %s6965_s7 = smov 256   ;;  %s6966_s15 = smov 16  }
  0x2d   : > { %6702 = dma.hbm_to_vmem [thread:$0]  (!%p7093_p9), %s232_s16, 8192, %s234_s23, %s221_s27, %s6965_s7, %s6965_s7, %s6966_s15  }
  0x2e   : > { %245 = sbr.rel (%p7042_p8) target bundleno = 2274 (0x8e2), region = 40 }
  0x33   : > { %s7110_s17 = sand.u32 1, %s6948_s19  }
  0x34   : > { %s5378_s28 = sshll.u32 %s7110_s17, 9  ;;  %s248_s6 = scalar_lea.sflag [#allocation3], %s7110_s17 }
  0x35   : > { %s7116_s8 = scalar_lea.vmem [#allocation2], %s5378_s28 }
  0x36   : > { %6927 = dma.done.wait (%p7029_p4), %s248_s6, 8192  }
  0x37   : > { %6929 = vsyncadd (%p7029_p4), %s248_s6, 4294959104 }
  0x38   : > { %6931 = dma.done.wait (%p44_p1), [#allocation6], 16512  }
  0x39   : > { %6933 = vsyncadd (%p44_p1), [#allocation6], 4294950784 }
  0x3a   : > { %6935 = dma.done.wait (%p44_p1), [#allocation9], 16384  }
  0x3b   : > { %6937 = vsyncadd (%p44_p1), [#allocation9], 4294950912  ;;  %v5609_v0 = vld [vmem:[#allocation5 + $0x1c0] sm:$0xf]  ;;  %v6471_v5 = vld [vmem:[#allocation5 + $0x1c4] sm:$0xf] }
  0x3c   : > { %v6475_v1 = vld [vmem:[#allocation5 + $0x1dc] sm:$0xf0]  ;;  %v5611_v6 = vld [vmem:[#allocation5 + $0x1e0] sm:$0xf0]  ;;  %s8247_s16 = scalar_lea.vmem [#allocation10], %s5378_s28  ;;  %s6672_s27 = sshll.u32 %s7020_s22, 9 }
  0x3d   : > { %v5865_v2 = vld [vmem:[#allocation5 + $0x3c0] sm:$0xf]  ;;  %v5610_v3 = vor.u32 %v6475_v1, %v5609_v0  ;;  %v5614_v8 = vor.u32 %v6471_v5, %v5611_v6  ;;  %v6535_v9 = vld [vmem:[#allocation5 + $0x3c4] sm:$0xf]  ;;  %s5261_s13 = scalar_lea.hbm %s8671_s5, %s6672_s27  ;;  %s5262_s14 = sshll.u32 %s8247_s16, 4  ;;  %s5263_s14 = int_to_ptr.vmem [resolvable:$true] %s5262_s14 }
  0x3e   : > { %v6539_v4 = vld [vmem:[#allocation5 + $0x3dc] sm:$0xf0]  ;;  %v5867_v10 = vld [vmem:[#allocation5 + $0x3e0] sm:$0xf0]  ;;  %s5264_s7 = sshll.u32 %s5261_s13, 4  ;;  %s5249_s22 = scalar_lea.sflag [#allocation4], %s7110_s17  ;;  %s5265_s7 = int_to_ptr.hbm [resolvable:$true] %s5264_s7 }
  0x3f   : > { %v5866_v7 = vor.u32 %v6539_v4, %v5865_v2  ;;  %v5577_v11 = vld [vmem:[#allocation5 + $0x180] sm:$0xf]  ;;  %1178 = vmatpush.bf16.msra.mxu0 %v5610_v3  ;;  %v5870_v12 = vor.u32 %v6535_v9, %v5867_v10  ;;  %1356 = vmatpush.bf16.msra.mxu2 %v5614_v8  ;;  %v6463_v18 = vld [vmem:[#allocation5 + $0x184] sm:$0xf]  ;;  %s6896_s15 = sshra.s32 %s5265_s7, 4  ;;  %s6902_s24 = scalar_lea.hbm %s8671_s5, 1024  ;;  %s6897_s15 = int_to_ptr.hbm [resolvable:$true] %s6896_s15 }
  0x40   : > { %v6467_v13 = vld [vmem:[#allocation5 + $0x19c] sm:$0xf0]  ;;  %v5579_v19 = vld [vmem:[#allocation5 + $0x1a0] sm:$0xf0]  ;;  %s6898_s28 = scalar_lea.hbm %s6897_s15, 512  ;;  %p6903_p11 = scmp.lt.s32.totalorder %s6897_s15, %s8671_s5 }
  0x41   : > { %v5833_v14 = vld [vmem:[#allocation5 + $0x380] sm:$0xf]  ;;  %1267 = vmatpush.bf16.msra.mxu1 %v5866_v7  ;;  %v5578_v16 = vor.u32 %v6467_v13, %v5577_v11  ;;  %v6527_v20 = vld [vmem:[#allocation5 + $0x384] sm:$0xf]  ;;  %1445 = vmatpush.bf16.msra.mxu3 %v5870_v12  ;;  %v5582_v21 = vor.u32 %v6463_v18, %v5579_v19  ;;  %p6899_p1 = scmp.ne.s32.totalorder %s6897_s15, %s6898_s28  ;;  %p6904_p9 = scmp.lt.s32.totalorder %s6902_s24, %s6898_s28 }
  0x42   : > { %v6531_v15 = vld [vmem:[#allocation5 + $0x39c] sm:$0xf0]  ;;  %v5835_v22 = vld [vmem:[#allocation5 + $0x3a0] sm:$0xf0] }
  0x43   : > { %v5834_v17 = vor.u32 %v6531_v15, %v5833_v14  ;;  %v5545_v23 = vld [vmem:[#allocation5 + $0x140] sm:$0xf]  ;;  %v5838_v25 = vor.u32 %v6527_v20, %v5835_v22  ;;  %v6455_v28 = vld [vmem:[#allocation5 + $0x144] sm:$0xf]  ;;  %1179 = vmatpush.bf16.msra.mxu0 %v5578_v16  ;;  %1357 = vmatpush.bf16.msra.mxu2 %v5582_v21  ;;  %p6900_p4 = pnand %p6899_p1, %p7082_p7  ;;  %p6905_p2 = por %p6904_p9, %p6903_p11 }
  0x44   : > { %v6459_v24 = vld [vmem:[#allocation5 + $0x15c] sm:$0xf0]  ;;  %v5547_v30 = vld [vmem:[#allocation5 + $0x160] sm:$0xf0] }
  0x45   : > { %v5801_v26 = vld [vmem:[#allocation5 + $0x340] sm:$0xf]  ;;  %v5546_v29 = vor.u32 %v6459_v24, %v5545_v23  ;;  %v6519_v31 = vld [vmem:[#allocation5 + $0x344] sm:$0xf]  ;;  %1268 = vmatpush.bf16.msra.mxu1 %v5834_v17  ;;  %v5550_v34 = vor.u32 %v6455_v28, %v5547_v30  ;;  %1446 = vmatpush.bf16.msra.mxu3 %v5838_v25  ;;  %v5619_v30 = vld [vmem:[#allocation5 + $0x1e8] sm:$0xf0]  ;;  %p6901_p8 = pneg %p6900_p4 }
  0x46   : > { %v6523_v27 = vld [vmem:[#allocation5 + $0x35c] sm:$0xf0]  ;;  %v5803_v32 = vld [vmem:[#allocation5 + $0x360] sm:$0xf0] }
  0x47   : > { %v5802_v33 = vor.u32 %v6523_v27, %v5801_v26  ;;  %v5513_v35 = vld [vmem:[#allocation5 + $0x100] sm:$0xf]  ;;  %v5806_v38 = vor.u32 %v6519_v31, %v5803_v32  ;;  %v6447_v40 = vld [vmem:[#allocation5 + $0x104] sm:$0xf]  ;;  %1180 = vmatpush.bf16.msra.mxu0 %v5546_v29  ;;  %1358 = vmatpush.bf16.msra.mxu2 %v5550_v34  ;;  %v6472_v29 = vld [vmem:[#allocation5 + $0x1cc] sm:$0xf]  ;;  %p6906_p10 = pnand %p6905_p2, %p6901_p8 }
  0x48   : > { %v6451_v36 = vld [vmem:[#allocation5 + $0x11c] sm:$0xf0]  ;;  %v5515_v41 = vld [vmem:[#allocation5 + $0x120] sm:$0xf0]  ;;  %v298_v32 = vld [vmem:[%s7116_s8 + $0x10] sm:$0xff] }
  0x49   : > { %v5769_v37 = vld [vmem:[#allocation5 + $0x300] sm:$0xf]  ;;  %v6511_v42 = vld [vmem:[#allocation5 + $0x304] sm:$0xf]  ;;  %v5514_v44 = vor.u32 %v6451_v36, %v5513_v35  ;;  %1269 = vmatpush.bf16.msra.mxu1 %v5802_v33  ;;  %v5518_v46 = vor.u32 %v6447_v40, %v5515_v41  ;;  %1447 = vmatpush.bf16.msra.mxu3 %v5806_v38  ;;  %v6536_v33 = vld [vmem:[#allocation5 + $0x3cc] sm:$0xf]  ;;  %v5622_v40 = vor.u32 %v6472_v29, %v5619_v30 }
  0x4a   : > { %v6515_v39 = vld [vmem:[#allocation5 + $0x31c] sm:$0xf0]  ;;  %v5771_v43 = vld [vmem:[#allocation5 + $0x320] sm:$0xf0]  ;;  %v5875_v34 = vld [vmem:[#allocation5 + $0x3e8] sm:$0xf0] }
  0x4b   : > { %v5770_v45 = vor.u32 %v6515_v39, %v5769_v37  ;;  %v5481_v47 = vld [vmem:[#allocation5 + $0xc0] sm:$0xf]  ;;  %v5774_v50 = vor.u32 %v6511_v42, %v5771_v43  ;;  %v6439_v52 = vld [vmem:[#allocation5 + $0xc4] sm:$0xf]  ;;  %1181 = vmatpush.bf16.msra.mxu0 %v5514_v44  ;;  %1359 = vmatpush.bf16.msra.mxu2 %v5518_v46  ;;  %v297_v37 = vld [vmem:[%s7116_s8 + $0x8] sm:$0xff]  ;;  %v5878_v44 = vor.u32 %v6536_v33, %v5875_v34 }
  0x4c   : > { %v6443_v48 = vld [vmem:[#allocation5 + $0xdc] sm:$0xf0]  ;;  %v5483_v53 = vld [vmem:[#allocation5 + $0xe0] sm:$0xf0]  ;;  %v299_v38 = vld [vmem:[%s7116_s8 + $0x18] sm:$0xff] }
  0x4d   : > { %v5737_v49 = vld [vmem:[#allocation5 + $0x2c0] sm:$0xf]  ;;  %v6503_v54 = vld [vmem:[#allocation5 + $0x2c4] sm:$0xf]  ;;  %v5482_v56 = vor.u32 %v6443_v48, %v5481_v47  ;;  %1270 = vmatpush.bf16.msra.mxu1 %v5770_v45  ;;  %v5486_v58 = vor.u32 %v6439_v52, %v5483_v53  ;;  %1448 = vmatpush.bf16.msra.mxu3 %v5774_v50  ;;  %v5617_v41 = vld [vmem:[#allocation5 + $0x1c8] sm:$0xf]  ;;  %v7136_v47 = vpack.c.bf16 %v299_v38, %v297_v37 }
  0x4e   : > { %v6507_v51 = vld [vmem:[#allocation5 + $0x2dc] sm:$0xf0]  ;;  %v5739_v55 = vld [vmem:[#allocation5 + $0x2e0] sm:$0xf0]  ;;  %v6476_v42 = vld [vmem:[#allocation5 + $0x1e4] sm:$0xf0] }
  0x4f   : > { %v5738_v57 = vor.u32 %v6507_v51, %v5737_v49  ;;  %v5449_v59 = vld [vmem:[#allocation5 + $0x80] sm:$0xf]  ;;  %v5742_v62 = vor.u32 %v6503_v54, %v5739_v55  ;;  %v6431_v0 = vld [vmem:[#allocation5 + $0x84] sm:$0xf]  ;;  %1182 = vmatpush.bf16.msra.mxu0 %v5482_v56  ;;  %1360 = vmatpush.bf16.msra.mxu2 %v5486_v58  ;;  %v5873_v45 = vld [vmem:[#allocation5 + $0x3c8] sm:$0xf]  ;;  %v5618_v48 = vor.u32 %v6476_v42, %v5617_v41 }
  0x50   : > { %v6435_v60 = vld [vmem:[#allocation5 + $0x9c] sm:$0xf0]  ;;  %v5451_v1 = vld [vmem:[#allocation5 + $0xa0] sm:$0xf0]  ;;  %v6540_v46 = vld [vmem:[#allocation5 + $0x3e4] sm:$0xf0] }
  0x51   : > { %v5705_v61 = vld [vmem:[#allocation5 + $0x280] sm:$0xf]  ;;  %v6495_v2 = vld [vmem:[#allocation5 + $0x284] sm:$0xf]  ;;  %v5450_v4 = vor.u32 %v6435_v60, %v5449_v59  ;;  %1271 = vmatpush.bf16.msra.mxu1 %v5738_v57  ;;  %v5454_v6 = vor.u32 %v6431_v0, %v5451_v1  ;;  %1449 = vmatpush.bf16.msra.mxu3 %v5742_v62  ;;  %v5874_v49 = vor.u32 %v6540_v46, %v5873_v45  ;;  %v6464_v50 = vld [vmem:[#allocation5 + $0x18c] sm:$0xf] }
  0x52   : > { %v6499_v63 = vld [vmem:[#allocation5 + $0x29c] sm:$0xf0]  ;;  %v5707_v3 = vld [vmem:[#allocation5 + $0x2a0] sm:$0xf0]  ;;  %v5587_v51 = vld [vmem:[#allocation5 + $0x1a8] sm:$0xf0] }
  0x53   : > { %v5706_v5 = vor.u32 %v6499_v63, %v5705_v61  ;;  %v5417_v7 = vld [vmem:[#allocation5 + $0x40] sm:$0xf]  ;;  %v5710_v10 = vor.u32 %v6495_v2, %v5707_v3  ;;  %v6423_v12 = vld [vmem:[#allocation5 + $0x44] sm:$0xf]  ;;  %1183 = vmatpush.bf16.msra.mxu0 %v5450_v4  ;;  %1361 = vmatpush.bf16.msra.mxu2 %v5454_v6  ;;  %v5585_v52 = vld [vmem:[#allocation5 + $0x188] sm:$0xf]  ;;  %v5590_v53 = vor.u32 %v6464_v50, %v5587_v51 }
  0x54   : > { %v6427_v8 = vld [vmem:[#allocation5 + $0x5c] sm:$0xf0]  ;;  %v5419_v13 = vld [vmem:[#allocation5 + $0x60] sm:$0xf0]  ;;  %v6468_v54 = vld [vmem:[#allocation5 + $0x1a4] sm:$0xf0] }
  0x55   : > { %v5673_v9 = vld [vmem:[#allocation5 + $0x240] sm:$0xf]  ;;  %v6487_v14 = vld [vmem:[#allocation5 + $0x244] sm:$0xf]  ;;  %v5418_v16 = vor.u32 %v6427_v8, %v5417_v7  ;;  %1272 = vmatpush.bf16.msra.mxu1 %v5706_v5  ;;  %v5422_v20 = vor.u32 %v6423_v12, %v5419_v13  ;;  %1450 = vmatpush.bf16.msra.mxu3 %v5710_v10  ;;  %v6528_v55 = vld [vmem:[#allocation5 + $0x38c] sm:$0xf]  ;;  %v5586_v57 = vor.u32 %v6468_v54, %v5585_v52 }
  0x56   : > { %v6491_v11 = vld [vmem:[#allocation5 + $0x25c] sm:$0xf0]  ;;  %v5675_v15 = vld [vmem:[#allocation5 + $0x260] sm:$0xf0]  ;;  %v5843_v56 = vld [vmem:[#allocation5 + $0x3a8] sm:$0xf0] }
  0x57   : > { %v5385_v17 = vld [vmem:[#allocation5] sm:$0xf]  ;;  %v5674_v19 = vor.u32 %v6491_v11, %v5673_v9  ;;  %v6415_v23 = vld [vmem:[#allocation5 + $0x4] sm:$0xf]  ;;  %v5678_v24 = vor.u32 %v6487_v14, %v5675_v15  ;;  %1184 = vmatpush.bf16.msra.mxu0 %v5418_v16  ;;  %1362 = vmatpush.bf16.msra.mxu2 %v5422_v20  ;;  %v5846_v58 = vor.u32 %v6528_v55, %v5843_v56  ;;  %v5841_v59 = vld [vmem:[#allocation5 + $0x388] sm:$0xf] }
  0x58   : > { %v6419_v18 = vld [vmem:[#allocation5 + $0x1c] sm:$0xf0]  ;;  %v5387_v25 = vld [vmem:[#allocation5 + $0x20] sm:$0xf0]  ;;  %v6532_v60 = vld [vmem:[#allocation5 + $0x3a4] sm:$0xf0] }
  0x59   : > { %v5641_v21 = vld [vmem:[#allocation5 + $0x200] sm:$0xf]  ;;  %v6479_v26 = vld [vmem:[#allocation5 + $0x204] sm:$0xf]  ;;  %v5386_v31 = vor.u32 %v6419_v18, %v5385_v17  ;;  %1273 = vmatpush.bf16.msra.mxu1 %v5674_v19  ;;  %v5390_v36 = vor.u32 %v6415_v23, %v5387_v25  ;;  %1451 = vmatpush.bf16.msra.mxu3 %v5678_v24  ;;  %v5842_v61 = vor.u32 %v6532_v60, %v5841_v59  ;;  %v302_v63 = vld [vmem:[%s7116_s8 + $0x30] sm:$0xff] }
  0x5a   : > { %v6483_v22 = vld [vmem:[#allocation5 + $0x21c] sm:$0xf0]  ;;  %v5643_v27 = vld [vmem:[#allocation5 + $0x220] sm:$0xf0]  ;;  %v301_v0 = vld [vmem:[%s7116_s8 + $0x28] sm:$0xff] }
  0x5b   : > { %v296_v28 = vld [vmem:[%s7116_s8] sm:$0xff]  ;;  %v5642_v35 = vor.u32 %v6483_v22, %v5641_v21  ;;  %v5646_v39 = vor.u32 %v6479_v26, %v5643_v27  ;;  %1185 = vmatpush.bf16.msra.mxu0 %v5386_v31  ;;  %1363 = vmatpush.bf16.msra.mxu2 %v5390_v36  ;;  %v303_v1 = vld [vmem:[%s7116_s8 + $0x38] sm:$0xff]  ;;  %v306_v5 = vld [vmem:[%s7116_s8 + $0x50] sm:$0xff] }
  0x5c   : > { %v7134_v43 = vpack.c.bf16 %v298_v32, %v296_v28  ;;  %v300_v62 = vld [vmem:[%s7116_s8 + $0x20] sm:$0xff]  ;;  %v7148_v3 = vpack.c.bf16 %v303_v1, %v301_v0  ;;  %v305_v6 = vld [vmem:[%s7116_s8 + $0x48] sm:$0xff]  ;;  %v307_v7 = vld [vmem:[%s7116_s8 + $0x58] sm:$0xff] }
  0x5d   : > { %1274 = vmatpush.bf16.msra.mxu1 %v5642_v35  ;;  %1452 = vmatpush.bf16.msra.mxu3 %v5646_v39  ;;  %v7146_v2 = vpack.c.bf16 %v302_v63, %v300_v62  ;;  %v304_v4 = vld [vmem:[%s7116_s8 + $0x40] sm:$0xff]  ;;  %v7160_v9 = vpack.c.bf16 %v307_v7, %v305_v6  ;;  %v6456_v10 = vld [vmem:[#allocation5 + $0x14c] sm:$0xf]  ;;  %v5553_v12 = vld [vmem:[#allocation5 + $0x148] sm:$0xf] }
  0x5e   : > { %1186 = vmatmul.bf16.vlgmr.msra.gmra.mxu0 %v7134_v43  ;;  %1364 = vmatmul.bf16.vlgmr.msra.gmra.mxu2 %v7134_v43  ;;  %v7158_v8 = vpack.c.bf16 %v306_v5, %v304_v4  ;;  %v5555_v11 = vld [vmem:[#allocation5 + $0x168] sm:$0xf0]  ;;  %v6460_v14 = vld [vmem:[#allocation5 + $0x164] sm:$0xf0]  ;;  %v308_v22 = vld [vmem:[%s7116_s8 + $0x60] sm:$0xff] }
  0x5f   : > { %1712 = vmatpush.bf16.msrb.mxu2 %v5622_v40  ;;  %1534 = vmatpush.bf16.msrb.mxu0 %v5618_v48  ;;  %v5558_v13 = vor.u32 %v6456_v10, %v5555_v11  ;;  %v6520_v15 = vld [vmem:[#allocation5 + $0x34c] sm:$0xf]  ;;  %v5554_v17 = vor.u32 %v6460_v14, %v5553_v12  ;;  %v5809_v19 = vld [vmem:[#allocation5 + $0x348] sm:$0xf]  ;;  %v310_v23 = vld [vmem:[%s7116_s8 + $0x70] sm:$0xff] }
  0x60   : > { %1275 = vmatmul.bf16.vlgmr.msra.gmra.mxu1 %v7136_v47  ;;  %1453 = vmatmul.bf16.vlgmr.msra.gmra.mxu3 %v7136_v47  ;;  %v5811_v16 = vld [vmem:[#allocation5 + $0x368] sm:$0xf0]  ;;  %v6524_v20 = vld [vmem:[#allocation5 + $0x364] sm:$0xf0]  ;;  %v311_v25 = vld [vmem:[%s7116_s8 + $0x78] sm:$0xff]  ;;  %v7170_v26 = vpack.c.bf16 %v310_v23, %v308_v22 }
  0x61   : > { %1801 = vmatpush.bf16.msrb.mxu3 %v5878_v44  ;;  %1623 = vmatpush.bf16.msrb.mxu1 %v5874_v49  ;;  %v5814_v18 = vor.u32 %v6520_v15, %v5811_v16  ;;  %v5810_v21 = vor.u32 %v6524_v20, %v5809_v19  ;;  %v309_v24 = vld [vmem:[%s7116_s8 + $0x68] sm:$0xff]  ;;  %v312_v28 = vld [vmem:[%s7116_s8 + $0x80] sm:$0xff]  ;;  %v314_v29 = vld [vmem:[%s7116_s8 + $0x90] sm:$0xff] }
  0x62   : > { %v7172_v27 = vpack.c.bf16 %v311_v25, %v309_v24  ;;  %v313_v30 = vld [vmem:[%s7116_s8 + $0x88] sm:$0xff]  ;;  %v315_v31 = vld [vmem:[%s7116_s8 + $0x98] sm:$0xff]  ;;  %v7182_v32 = vpack.c.bf16 %v314_v29, %v312_v28  ;;  %v316_v48 = vld [vmem:[%s7116_s8 + $0xa0] sm:$0xff] }
  0x63   : > { %1713 = vmatpush.bf16.msrb.mxu2 %v5590_v53  ;;  %1535 = vmatpush.bf16.msrb.mxu0 %v5586_v57  ;;  %v7184_v33 = vpack.c.bf16 %v315_v31, %v313_v30  ;;  %v6448_v34 = vld [vmem:[#allocation5 + $0x10c] sm:$0xf]  ;;  %v5521_v36 = vld [vmem:[#allocation5 + $0x108] sm:$0xf]  ;;  %v318_v49 = vld [vmem:[%s7116_s8 + $0xb0] sm:$0xff] }
  0x64   : > { %v5523_v35 = vld [vmem:[#allocation5 + $0x128] sm:$0xf0]  ;;  %v6452_v38 = vld [vmem:[#allocation5 + $0x124] sm:$0xf0]  ;;  %v319_v51 = vld [vmem:[%s7116_s8 + $0xb8] sm:$0xff]  ;;  %v7194_v52 = vpack.c.bf16 %v318_v49, %v316_v48 }
  0x65   : > { %1802 = vmatpush.bf16.msrb.mxu3 %v5846_v58  ;;  %1624 = vmatpush.bf16.msrb.mxu1 %v5842_v61  ;;  %v5526_v37 = vor.u32 %v6448_v34, %v5523_v35  ;;  %v6512_v39 = vld [vmem:[#allocation5 + $0x30c] sm:$0xf]  ;;  %v5522_v41 = vor.u32 %v6452_v38, %v5521_v36  ;;  %v5777_v44 = vld [vmem:[#allocation5 + $0x308] sm:$0xf]  ;;  %v320_v54 = vld [vmem:[%s7116_s8 + $0xc0] sm:$0xff] }
  0x66   : > { %v5779_v40 = vld [vmem:[#allocation5 + $0x328] sm:$0xf0]  ;;  %v6516_v45 = vld [vmem:[#allocation5 + $0x324] sm:$0xf0]  ;;  %v322_v55 = vld [vmem:[%s7116_s8 + $0xd0] sm:$0xff] }
  0x67   : > { %1714 = vmatpush.bf16.msrb.mxu2 %v5558_v13  ;;  %1536 = vmatpush.bf16.msrb.mxu0 %v5554_v17  ;;  %v5782_v42 = vor.u32 %v6512_v39, %v5779_v40  ;;  %v5778_v46 = vor.u32 %v6516_v45, %v5777_v44  ;;  %v317_v50 = vld [vmem:[%s7116_s8 + $0xa8] sm:$0xff]  ;;  %v323_v57 = vld [vmem:[%s7116_s8 + $0xd8] sm:$0xff]  ;;  %v7206_v58 = vpack.c.bf16 %v322_v55, %v320_v54  ;;  %v324_v7 = vld [vmem:[%s7116_s8 + $0xe0] sm:$0xff] }
  0x68   : > { %v7196_v53 = vpack.c.bf16 %v319_v51, %v317_v50  ;;  %v321_v56 = vld [vmem:[%s7116_s8 + $0xc8] sm:$0xff]  ;;  %v326_v10 = vld [vmem:[%s7116_s8 + $0xf0] sm:$0xff]  ;;  %v327_v14 = vld [vmem:[%s7116_s8 + $0xf8] sm:$0xff] }
  0x69   : > { %1803 = vmatpush.bf16.msrb.mxu3 %v5814_v18  ;;  %1625 = vmatpush.bf16.msrb.mxu1 %v5810_v21  ;;  %v7208_v59 = vpack.c.bf16 %v323_v57, %v321_v56  ;;  %v6440_v60 = vld [vmem:[#allocation5 + $0xcc] sm:$0xf]  ;;  %v5489_v62 = vld [vmem:[#allocation5 + $0xc8] sm:$0xf]  ;;  %v7218_v16 = vpack.c.bf16 %v326_v10, %v324_v7  ;;  %v520_v18 = vld [vmem:[#allocation7] sm:$0xff] }
  0x6a   : > { %v5491_v61 = vld [vmem:[#allocation5 + $0xe8] sm:$0xf0]  ;;  %v6444_v0 = vld [vmem:[#allocation5 + $0xe4] sm:$0xf0]  ;;  %v328_v19 = vld [vmem:[%s7116_s8 + $0x100] sm:$0xff]  ;;  %v7228_v21 = vperm.slane %v520_v18, 0 }
  0x6b   : > { %1715 = vmatpush.bf16.msrb.mxu2 %v5526_v37  ;;  %1537 = vmatpush.bf16.msrb.mxu0 %v5522_v41  ;;  %v5494_v63 = vor.u32 %v6440_v60, %v5491_v61  ;;  %v6504_v1 = vld [vmem:[#allocation5 + $0x2cc] sm:$0xf]  ;;  %v5490_v5 = vor.u32 %v6444_v0, %v5489_v62  ;;  %v5745_v11 = vld [vmem:[#allocation5 + $0x2c8] sm:$0xf]  ;;  %v330_v20 = vld [vmem:[%s7116_s8 + $0x110] sm:$0xff]  ;;  %v7240_v34 = vperm.slane %v520_v18, 1 }
  0x6c   : > { %v5747_v4 = vld [vmem:[#allocation5 + $0x2e8] sm:$0xf0]  ;;  %v6508_v12 = vld [vmem:[#allocation5 + $0x2e4] sm:$0xf0]  ;;  %v331_v23 = vld [vmem:[%s7116_s8 + $0x118] sm:$0xff]  ;;  %v7232_v24 = vpack.c.bf16 %v330_v20, %v328_v19 }
  0x6d   : > { %1804 = vmatpush.bf16.msrb.mxu3 %v5782_v42  ;;  %1626 = vmatpush.bf16.msrb.mxu1 %v5778_v46  ;;  %v5750_v6 = vor.u32 %v6504_v1, %v5747_v4  ;;  %v325_v13 = vld [vmem:[%s7116_s8 + $0xe8] sm:$0xff]  ;;  %v5746_v15 = vor.u32 %v6508_v12, %v5745_v11  ;;  %v332_v56 = vld [vmem:[%s7116_s8 + $0x120] sm:$0xff]  ;;  %v334_v57 = vld [vmem:[%s7116_s8 + $0x130] sm:$0xff] }
  0x6e   : > { %1191 = vmatmul.bf16.gmra.mxu0 %v7146_v2  ;;  %1369 = vmatmul.bf16.gmra.mxu2 %v7146_v2  ;;  %v7220_v17 = vpack.c.bf16 %v327_v14, %v325_v13  ;;  %v329_v22 = vld [vmem:[%s7116_s8 + $0x108] sm:$0xff]  ;;  %v335_v1 = vld [vmem:[%s7116_s8 + $0x138] sm:$0xff]  ;;  %v7251_v7 = vpack.c.bf16 %v334_v57, %v332_v56 }
  0x6f   : > { %1716 = vmatpush.bf16.msrb.mxu2 %v5494_v63  ;;  %1538 = vmatpush.bf16.msrb.mxu0 %v5490_v5  ;;  %v7234_v28 = vpack.c.bf16 %v331_v23, %v329_v22  ;;  %v6432_v35 = vld [vmem:[#allocation5 + $0x8c] sm:$0xf]  ;;  %v5457_v38 = vld [vmem:[#allocation5 + $0x88] sm:$0xf] }
  0x70   : > { %1280 = vmatmul.bf16.gmra.mxu1 %v7148_v3  ;;  %1458 = vmatmul.bf16.gmra.mxu3 %v7148_v3  ;;  %v5459_v36 = vld [vmem:[#allocation5 + $0xa8] sm:$0xf0]  ;;  %v6436_v39 = vld [vmem:[#allocation5 + $0xa4] sm:$0xf0] }
  0x71   : > { %1805 = vmatpush.bf16.msrb.mxu3 %v5750_v6  ;;  %1627 = vmatpush.bf16.msrb.mxu1 %v5746_v15  ;;  %v5462_v37 = vor.u32 %v6432_v35, %v5459_v36  ;;  %v6496_v40 = vld [vmem:[#allocation5 + $0x28c] sm:$0xf]  ;;  %v5458_v42 = vor.u32 %v6436_v39, %v5457_v38  ;;  %v5713_v60 = vld [vmem:[#allocation5 + $0x288] sm:$0xf]  ;;  %v336_v39 = vld [vmem:[%s7116_s8 + $0x140] sm:$0xff] }
  0x72   : > { %v5715_v44 = vld [vmem:[#allocation5 + $0x2a8] sm:$0xf0]  ;;  %v6500_v61 = vld [vmem:[#allocation5 + $0x2a4] sm:$0xf0] }
  0x73   : > { %1717 = vmatpush.bf16.msrb.mxu2 %v5462_v37  ;;  %v5718_v49 = vor.u32 %v6496_v40, %v5715_v44  ;;  %1539 = vmatpush.bf16.msrb.mxu0 %v5458_v42  ;;  %v333_v0 = vld [vmem:[%s7116_s8 + $0x128] sm:$0xff]  ;;  %v5714_v4 = vor.u32 %v6500_v61, %v5713_v60  ;;  %v338_v40 = vld [vmem:[%s7116_s8 + $0x150] sm:$0xff] }
  0x74   : > { %v7254_v13 = vpack.c.bf16 %v335_v1, %v333_v0  ;;  %v337_v44 = vld [vmem:[%s7116_s8 + $0x148] sm:$0xff] }
  0x75   : > { %1806 = vmatpush.bf16.msrb.mxu3 %v5718_v49  ;;  %1628 = vmatpush.bf16.msrb.mxu1 %v5714_v4  ;;  %v6424_v0 = vld [vmem:[#allocation5 + $0x4c] sm:$0xf] }
  0x76   : > { %v5427_v1 = vld [vmem:[#allocation5 + $0x68] sm:$0xf0] }
  0x77   : > { %v5430_v4 = vor.u32 %v6424_v0, %v5427_v1 }
  0x79   : > { %1718 = vmatpush.bf16.msrb.mxu2 %v5430_v4 }
  0x7e   : > { %1196 = vmatmul.bf16.gmra.mxu0 %v7158_v8  ;;  %1374 = vmatmul.bf16.gmra.mxu2 %v7158_v8 }
  0x80   : > { %1285 = vmatmul.bf16.gmra.mxu1 %v7160_v9  ;;  %1463 = vmatmul.bf16.gmra.mxu3 %v7160_v9 }
  0x8e   : > { %1201 = vmatmul.bf16.gmra.mxu0 %v7170_v26  ;;  %1379 = vmatmul.bf16.gmra.mxu2 %v7170_v26 }
  0x90   : > { %1290 = vmatmul.bf16.gmra.mxu1 %v7172_v27  ;;  %1468 = vmatmul.bf16.gmra.mxu3 %v7172_v27 }
  0x9e   : > { %1206 = vmatmul.bf16.gmra.mxu0 %v7182_v32  ;;  %1384 = vmatmul.bf16.gmra.mxu2 %v7182_v32 }
  0xa0   : > { %1295 = vmatmul.bf16.gmra.mxu1 %v7184_v33  ;;  %1473 = vmatmul.bf16.gmra.mxu3 %v7184_v33 }
  0xae   : > { %1211 = vmatmul.bf16.gmra.mxu0 %v7194_v52  ;;  %1389 = vmatmul.bf16.gmra.mxu2 %v7194_v52 }
  0xb0   : > { %1300 = vmatmul.bf16.gmra.mxu1 %v7196_v53  ;;  %1478 = vmatmul.bf16.gmra.mxu3 %v7196_v53 }
  0xbe   : > { %1216 = vmatmul.bf16.gmra.mxu0 %v7206_v58  ;;  %1394 = vmatmul.bf16.gmra.mxu2 %v7206_v58 }
  0xc0   : > { %1305 = vmatmul.bf16.gmra.mxu1 %v7208_v59  ;;  %1483 = vmatmul.bf16.gmra.mxu3 %v7208_v59 }
  0xce   : > { %1221 = vmatmul.bf16.gmra.mxu0 %v7218_v16  ;;  %1399 = vmatmul.bf16.gmra.mxu2 %v7218_v16 }
  0xd0   : > { %1310 = vmatmul.bf16.gmra.mxu1 %v7220_v17  ;;  %1488 = vmatmul.bf16.gmra.mxu3 %v7220_v17 }
  0xdb   : > { %v1187_v25 = vpop.f32.mrf.mxu0 }
  0xdc   : > { %v1188_v29 = vadd.f32 %v1187_v25, %v7228_v21 }
  0xdd   : > { %v1276_v30 = vpop.f32.mrf.mxu1 }
  0xde   : > { %v1277_v31 = vadd.f32 %v1276_v30, %v1188_v29  ;;  %1226 = vmatmul.bf16.gmra.mxu0 %v7232_v24  ;;  %1404 = vmatmul.bf16.gmra.mxu2 %v7232_v24 }
  0xe0   : > { %1315 = vmatmul.bf16.gmra.mxu1 %v7234_v28  ;;  %1493 = vmatmul.bf16.gmra.mxu3 %v7234_v28  ;;  %v2602_v62 = vmax.f32 %v1277_v31, 0.0 }
  0xe1   : > { %v1365_v41 = vpop.f32.mrf.mxu2 }
  0xe2   : > { %v1366_v45 = vadd.f32 %v1365_v41, %v7240_v34 }
  0xe3   : > { %v1454_v46 = vpop.f32.mrf.mxu3  ;;  %v1189_v48 = vpop.f32.mrf.mxu0 }
  0xe4   : > { %v1190_v50 = vadd.f32 %v1189_v48, %v7228_v21  ;;  %v1455_v54 = vadd.f32 %v1454_v46, %v1366_v45  ;;  %v339_v45 = vld [vmem:[%s7116_s8 + $0x158] sm:$0xff]  ;;  %v7269_v48 = vpack.c.bf16 %v338_v40, %v336_v39  ;;  %v6492_v39 = vld [vmem:[#allocation5 + $0x264] sm:$0xf0] }
  0xe5   : > { %v1278_v51 = vpop.f32.mrf.mxu1 }
  0xe6   : > { %v1279_v55 = vadd.f32 %v1278_v51, %v1190_v50  ;;  %v2603_v20 = vmax.f32 %v1455_v54, 0.0 }
  0xe8   : > { %v2610_v63 = vmax.f32 %v1279_v55, 0.0  ;;  %v7274_v55 = vpack.c.bf16 %v339_v45, %v337_v44  ;;  %v343_v44 = vld [vmem:[%s7116_s8 + $0x178] sm:$0xff] }
  0xe9   : > { %v1367_v6 = vpop.f32.mrf.mxu2 }
  0xea   : > { %v7249_v5 = vpack.c.bf16 %v2610_v63, %v2602_v62  ;;  %v1368_v10 = vadd.f32 %v1367_v6, %v7240_v34  ;;  %v5425_v6 = vld [vmem:[#allocation5 + $0x48] sm:$0xf] }
  0xeb   : > { %v1456_v11 = vpop.f32.mrf.mxu3  ;;  %v1192_v12 = vpop.f32.mrf.mxu0 }
  0xec   : > { %8788 = vst [vmem:[#allocation15_spill] sm:$0xff] %v7249_v5  ;;  %v1193_v14 = vadd.f32 %v1192_v12, %v7228_v21  ;;  %v1457_v18 = vadd.f32 %v1456_v11, %v1368_v10  ;;  %v6428_v10 = vld [vmem:[#allocation5 + $0x64] sm:$0xf0]  ;;  %v6488_v11 = vld [vmem:[#allocation5 + $0x24c] sm:$0xf] }
  0xed   : > { %v1281_v15 = vpop.f32.mrf.mxu1 }
  0xee   : > { %v1282_v19 = vadd.f32 %v1281_v15, %v1193_v14  ;;  %1231 = vmatmul.bf16.gmra.mxu0 %v7251_v7  ;;  %v2611_v22 = vmax.f32 %v1457_v18, 0.0  ;;  %1409 = vmatmul.bf16.gmra.mxu2 %v7251_v7  ;;  %v5426_v15 = vor.u32 %v6428_v10, %v5425_v6  ;;  %v5683_v18 = vld [vmem:[#allocation5 + $0x268] sm:$0xf0] }
  0xf0   : > { %1320 = vmatmul.bf16.gmra.mxu1 %v7254_v13  ;;  %1498 = vmatmul.bf16.gmra.mxu3 %v7254_v13  ;;  %v7261_v23 = vpack.c.bf16 %v2611_v22, %v2603_v20  ;;  %v2618_v41 = vmax.f32 %v1282_v19, 0.0 }
  0xf1   : > { %v1370_v25 = vpop.f32.mrf.mxu2  ;;  %1540 = vmatpush.bf16.msrb.mxu0 %v5426_v15 }
  0xf2   : > { %8789 = vst [vmem:[#allocation16_spill] sm:$0xff] %v7261_v23  ;;  %v1371_v29 = vadd.f32 %v1370_v25, %v7240_v34  ;;  %v5686_v25 = vor.u32 %v6488_v11, %v5683_v18 }
  0xf3   : > { %v1459_v30 = vpop.f32.mrf.mxu3  ;;  %v1194_v31 = vpop.f32.mrf.mxu0 }
  0xf4   : > { %v1195_v35 = vadd.f32 %v1194_v31, %v7228_v21  ;;  %v1460_v37 = vadd.f32 %v1459_v30, %v1371_v29  ;;  %1807 = vmatpush.bf16.msrb.mxu3 %v5686_v25  ;;  %v344_v25 = vld [vmem:[%s7116_s8 + $0x180] sm:$0xff] }
  0xf5   : > { %v1283_v36 = vpop.f32.mrf.mxu1 }
  0xf6   : > { %v1284_v38 = vadd.f32 %v1283_v36, %v1195_v35  ;;  %v2619_v62 = vmax.f32 %v1460_v37, 0.0  ;;  %v340_v36 = vld [vmem:[%s7116_s8 + $0x160] sm:$0xff]  ;;  %v342_v37 = vld [vmem:[%s7116_s8 + $0x170] sm:$0xff] }
  0xf8   : > { %v2626_v42 = vmax.f32 %v1284_v38, 0.0  ;;  %v5681_v38 = vld [vmem:[#allocation5 + $0x248] sm:$0xf] }
  0xf9   : > { %v1372_v46 = vpop.f32.mrf.mxu2  ;;  %v5682_v45 = vor.u32 %v6492_v39, %v5681_v38 }
  0xfa   : > { %v7271_v49 = vpack.c.bf16 %v2626_v42, %v2618_v41  ;;  %v1373_v50 = vadd.f32 %v1372_v46, %v7240_v34  ;;  %v341_v42 = vld [vmem:[%s7116_s8 + $0x168] sm:$0xff] }
  0xfb   : > { %v1461_v51 = vpop.f32.mrf.mxu3  ;;  %v1197_v54 = vpop.f32.mrf.mxu0  ;;  %1629 = vmatpush.bf16.msrb.mxu1 %v5682_v45 }
  0xfc   : > { %8790 = vst [vmem:[#allocation17_spill] sm:$0xff] %v7271_v49  ;;  %v1198_v56 = vadd.f32 %v1197_v54, %v7228_v21  ;;  %v1462_v60 = vadd.f32 %v1461_v51, %v1373_v50  ;;  %v7289_v50 = vpack.c.bf16 %v342_v37, %v340_v36  ;;  %v347_v36 = vld [vmem:[%s7116_s8 + $0x198] sm:$0xff] }
  0xfd   : > { %v1286_v57 = vpop.f32.mrf.mxu1 }
  0xfe   : > { %v1287_v61 = vadd.f32 %v1286_v57, %v1198_v56  ;;  %1236 = vmatmul.bf16.gmra.mxu0 %v7269_v48  ;;  %v2627_v63 = vmax.f32 %v1462_v60, 0.0  ;;  %1414 = vmatmul.bf16.gmra.mxu2 %v7269_v48  ;;  %v7294_v60 = vpack.c.bf16 %v343_v44, %v341_v42 }
 0x100   : > { %1325 = vmatmul.bf16.gmra.mxu1 %v7274_v55  ;;  %1503 = vmatmul.bf16.gmra.mxu3 %v7274_v55  ;;  %v7281_v12 = vpack.c.bf16 %v2627_v63, %v2619_v62  ;;  %v2634_v40 = vmax.f32 %v1287_v61, 0.0 }
 0x101   : > { %v1375_v14 = vpop.f32.mrf.mxu2 }
 0x102   : > { %8791 = vst [vmem:[#allocation18_spill] sm:$0xff] %v7281_v12  ;;  %v1376_v19 = vadd.f32 %v1375_v14, %v7240_v34 }
 0x103   : > { %v1464_v20 = vpop.f32.mrf.mxu3  ;;  %v1199_v22 = vpop.f32.mrf.mxu0 }
 0x104   : > { %v1200_v29 = vadd.f32 %v1199_v22, %v7228_v21  ;;  %v1465_v31 = vadd.f32 %v1464_v20, %v1376_v19 }
 0x105   : > { %v1288_v30 = vpop.f32.mrf.mxu1 }
 0x106   : > { %v1289_v35 = vadd.f32 %v1288_v30, %v1200_v29  ;;  %v2635_v1 = vmax.f32 %v1465_v31, 0.0  ;;  %v346_v29 = vld [vmem:[%s7116_s8 + $0x190] sm:$0xff] }
 0x107   : > { %v7309_v38 = vpack.c.bf16 %v346_v29, %v344_v25 }
 0x108   : > { %v2642_v41 = vmax.f32 %v1289_v35, 0.0  ;;  %v345_v35 = vld [vmem:[%s7116_s8 + $0x188] sm:$0xff] }
 0x109   : > { %v1377_v46 = vpop.f32.mrf.mxu2  ;;  %v7314_v44 = vpack.c.bf16 %v347_v36, %v345_v35  ;;  %v348_v36 = vld [vmem:[%s7116_s8 + $0x1a0] sm:$0xff] }
 0x10a   : > { %v7291_v51 = vpack.c.bf16 %v2642_v41, %v2634_v40  ;;  %v1378_v54 = vadd.f32 %v1377_v46, %v7240_v34 }
 0x10b   : > { %v1466_v56 = vpop.f32.mrf.mxu3  ;;  %v1202_v57 = vpop.f32.mrf.mxu0 }
 0x10c   : > { %8792 = vst [vmem:[#allocation19_spill] sm:$0xff] %v7291_v51  ;;  %v1203_v62 = vadd.f32 %v1202_v57, %v7228_v21  ;;  %v1467_v61 = vadd.f32 %v1466_v56, %v1378_v54 }
 0x10d   : > { %v1291_v63 = vpop.f32.mrf.mxu1 }
 0x10e   : > { %v1292_v0 = vadd.f32 %v1291_v63, %v1203_v62  ;;  %1241 = vmatmul.bf16.gmra.mxu0 %v7289_v50  ;;  %v2643_v4 = vmax.f32 %v1467_v61, 0.0  ;;  %1419 = vmatmul.bf16.gmra.mxu2 %v7289_v50  ;;  %v6416_v63 = vld [vmem:[#allocation5 + $0xc] sm:$0xf] }
 0x10f   : > { %v5395_v61 = vld [vmem:[#allocation5 + $0x28] sm:$0xf0] }
 0x110   : > { %1330 = vmatmul.bf16.gmra.mxu1 %v7294_v60  ;;  %1508 = vmatmul.bf16.gmra.mxu3 %v7294_v60  ;;  %v7301_v6 = vpack.c.bf16 %v2643_v4, %v2635_v1  ;;  %v2650_v30 = vmax.f32 %v1292_v0, 0.0  ;;  %v5398_v0 = vor.u32 %v6416_v63, %v5395_v61  ;;  %v5393_v1 = vld [vmem:[#allocation5 + $0x8] sm:$0xf] }
 0x111   : > { %v1380_v10 = vpop.f32.mrf.mxu2  ;;  %v6420_v4 = vld [vmem:[#allocation5 + $0x24] sm:$0xf0] }
 0x112   : > { %8793 = vst [vmem:[#allocation20_spill] sm:$0xff] %v7301_v6  ;;  %v1381_v11 = vadd.f32 %v1380_v10, %v7240_v34  ;;  %v6480_v10 = vld [vmem:[#allocation5 + $0x20c] sm:$0xf]  ;;  %1719 = vmatpush.bf16.msrb.mxu2 %v5398_v0 }
 0x113   : > { %v1469_v14 = vpop.f32.mrf.mxu3  ;;  %v1204_v15 = vpop.f32.mrf.mxu0 }
 0x114   : > { %v1205_v18 = vadd.f32 %v1204_v15, %v7228_v21  ;;  %v1470_v20 = vadd.f32 %v1469_v14, %v1381_v11  ;;  %v5394_v15 = vor.u32 %v6420_v4, %v5393_v1 }
 0x115   : > { %v1293_v19 = vpop.f32.mrf.mxu1 }
 0x116   : > { %v1294_v22 = vadd.f32 %v1293_v19, %v1205_v18  ;;  %v2651_v57 = vmax.f32 %v1470_v20, 0.0  ;;  %v5651_v18 = vld [vmem:[#allocation5 + $0x228] sm:$0xf0]  ;;  %1541 = vmatpush.bf16.msrb.mxu0 %v5394_v15 }
 0x117   : > { %v5654_v25 = vor.u32 %v6480_v10, %v5651_v18 }
 0x118   : > { %v2658_v31 = vmax.f32 %v1294_v22, 0.0 }
 0x119   : > { %v1382_v37 = vpop.f32.mrf.mxu2  ;;  %1808 = vmatpush.bf16.msrb.mxu3 %v5654_v25 }
 0x11a   : > { %v7311_v39 = vpack.c.bf16 %v2658_v31, %v2650_v30  ;;  %v1383_v40 = vadd.f32 %v1382_v37, %v7240_v34  ;;  %v350_v37 = vld [vmem:[%s7116_s8 + $0x1b0] sm:$0xff] }
 0x11b   : > { %v1471_v41 = vpop.f32.mrf.mxu3  ;;  %v1207_v42 = vpop.f32.mrf.mxu0  ;;  %v7329_v63 = vpack.c.bf16 %v350_v37, %v348_v36 }
 0x11c   : > { %8794 = vst [vmem:[#allocation21_spill] sm:$0xff] %v7311_v39  ;;  %v1208_v45 = vadd.f32 %v1207_v42, %v7228_v21  ;;  %v1472_v54 = vadd.f32 %v1471_v41, %v1383_v40  ;;  %v5649_v40 = vld [vmem:[#allocation5 + $0x208] sm:$0xf]  ;;  %v6493_v39 = vld [vmem:[#allocation5 + $0x26c] sm:$0xf0] }
 0x11d   : > { %v1296_v46 = vpop.f32.mrf.mxu1  ;;  %v6484_v41 = vld [vmem:[#allocation5 + $0x224] sm:$0xf0] }
 0x11e   : > { %v1297_v56 = vadd.f32 %v1296_v46, %v1208_v45  ;;  %1246 = vmatmul.bf16.gmra.mxu0 %v7309_v38  ;;  %v2659_v62 = vmax.f32 %v1472_v54, 0.0  ;;  %1424 = vmatmul.bf16.gmra.mxu2 %v7309_v38  ;;  %v349_v46 = vld [vmem:[%s7116_s8 + $0x1a8] sm:$0xff]  ;;  %v351_v54 = vld [vmem:[%s7116_s8 + $0x1b8] sm:$0xff] }
 0x11f   : > { %v7334_v10 = vpack.c.bf16 %v351_v54, %v349_v46  ;;  %v353_v54 = vld [vmem:[%s7116_s8 + $0x1c8] sm:$0xff] }
 0x120   : > { %1335 = vmatmul.bf16.gmra.mxu1 %v7314_v44  ;;  %1513 = vmatmul.bf16.gmra.mxu3 %v7314_v44  ;;  %v7321_v11 = vpack.c.bf16 %v2659_v62, %v2651_v57  ;;  %v2666_v42 = vmax.f32 %v1297_v56, 0.0  ;;  %v5650_v57 = vor.u32 %v6484_v41, %v5649_v40  ;;  %v352_v41 = vld [vmem:[%s7116_s8 + $0x1c0] sm:$0xff] }
 0x121   : > { %v1385_v14 = vpop.f32.mrf.mxu2 }
 0x122   : > { %8795 = vst [vmem:[#allocation22_spill] sm:$0xff] %v7321_v11  ;;  %v1386_v19 = vadd.f32 %v1385_v14, %v7240_v34  ;;  %1630 = vmatpush.bf16.msrb.mxu1 %v5650_v57  ;;  %v355_v57 = vld [vmem:[%s7116_s8 + $0x1d8] sm:$0xff] }
 0x123   : > { %v1474_v20 = vpop.f32.mrf.mxu3  ;;  %v1209_v22 = vpop.f32.mrf.mxu0 }
 0x124   : > { %v1210_v29 = vadd.f32 %v1209_v22, %v7228_v21  ;;  %v1475_v31 = vadd.f32 %v1474_v20, %v1386_v19 }
 0x125   : > { %v1298_v30 = vpop.f32.mrf.mxu1 }
 0x126   : > { %v1299_v35 = vadd.f32 %v1298_v30, %v1210_v29  ;;  %v2667_v19 = vmax.f32 %v1475_v31, 0.0 }
 0x128   : > { %v2674_v45 = vmax.f32 %v1299_v35, 0.0 }
 0x129   : > { %v1387_v62 = vpop.f32.mrf.mxu2 }
 0x12a   : > { %v7331_v61 = vpack.c.bf16 %v2674_v45, %v2666_v42  ;;  %v1388_v0 = vadd.f32 %v1387_v62, %v7240_v34  ;;  %v354_v42 = vld [vmem:[%s7116_s8 + $0x1d0] sm:$0xff] }
 0x12b   : > { %v1476_v1 = vpop.f32.mrf.mxu3  ;;  %v1212_v4 = vpop.f32.mrf.mxu0 }
 0x12c   : > { %8796 = vst [vmem:[#allocation23_spill] sm:$0xff] %v7331_v61  ;;  %v1213_v14 = vadd.f32 %v1212_v4, %v7228_v21  ;;  %v1477_v56 = vadd.f32 %v1476_v1, %v1388_v0  ;;  %v7349_v0 = vpack.c.bf16 %v354_v42, %v352_v41  ;;  %v6477_v41 = vld [vmem:[#allocation5 + $0x1ec] sm:$0xf0]  ;;  %v6537_v42 = vld [vmem:[#allocation5 + $0x3d4] sm:$0xf] }
 0x12d   : > { %v1301_v15 = vpop.f32.mrf.mxu1 }
 0x12e   : > { %v1302_v18 = vadd.f32 %v1301_v15, %v1213_v14  ;;  %1251 = vmatmul.bf16.gmra.mxu0 %v7329_v63  ;;  %v2675_v20 = vmax.f32 %v1477_v56, 0.0  ;;  %1429 = vmatmul.bf16.gmra.mxu2 %v7329_v63  ;;  %v7354_v56 = vpack.c.bf16 %v355_v57, %v353_v54 }
 0x130   : > { %1340 = vmatmul.bf16.gmra.mxu1 %v7334_v10  ;;  %1518 = vmatmul.bf16.gmra.mxu3 %v7334_v10  ;;  %v7341_v22 = vpack.c.bf16 %v2675_v20, %v2667_v19  ;;  %v2682_v45 = vmax.f32 %v1302_v18, 0.0 }
 0x131   : > { %v1390_v25 = vpop.f32.mrf.mxu2 }
 0x132   : > { %8797 = vst [vmem:[#allocation24_spill] sm:$0xff] %v7341_v22  ;;  %v1391_v29 = vadd.f32 %v1390_v25, %v7240_v34 }
 0x133   : > { %v1479_v30 = vpop.f32.mrf.mxu3  ;;  %v1214_v35 = vpop.f32.mrf.mxu0 }
 0x134   : > { %v1215_v36 = vadd.f32 %v1214_v35, %v7228_v21  ;;  %v1480_v31 = vadd.f32 %v1479_v30, %v1391_v29  ;;  %v6473_v35 = vld [vmem:[#allocation5 + $0x1d4] sm:$0xf] }
 0x135   : > { %v1303_v37 = vpop.f32.mrf.mxu1 }
 0x136   : > { %v1304_v40 = vadd.f32 %v1303_v37, %v1215_v36  ;;  %v2683_v18 = vmax.f32 %v1480_v31, 0.0  ;;  %v5627_v36 = vld [vmem:[#allocation5 + $0x1f0] sm:$0xf0] }
 0x137   : > { %v5630_v37 = vor.u32 %v6473_v35, %v5627_v36  ;;  %v5883_v31 = vld [vmem:[#allocation5 + $0x3f0] sm:$0xf0]  ;;  %v5881_v35 = vld [vmem:[#allocation5 + $0x3d0] sm:$0xf] }
 0x138   : > { %v2690_v46 = vmax.f32 %v1304_v40, 0.0  ;;  %v5625_v40 = vld [vmem:[#allocation5 + $0x1d0] sm:$0xf] }
 0x139   : > { %v1392_v62 = vpop.f32.mrf.mxu2  ;;  %v5626_v54 = vor.u32 %v6477_v41, %v5625_v40  ;;  %2068 = vmatpush.bf16.msra.mxu2 %v5630_v37  ;;  %v6541_v36 = vld [vmem:[#allocation5 + $0x3ec] sm:$0xf0] }
 0x13a   : > { %v7351_v1 = vpack.c.bf16 %v2690_v46, %v2682_v45  ;;  %v1393_v4 = vadd.f32 %v1392_v62, %v7240_v34 }
 0x13b   : > { %v1481_v14 = vpop.f32.mrf.mxu3  ;;  %v1217_v15 = vpop.f32.mrf.mxu0  ;;  %1890 = vmatpush.bf16.msra.mxu0 %v5626_v54 }
 0x13c   : > { %8798 = vst [vmem:[#allocation25_spill] sm:$0xff] %v7351_v1  ;;  %v1218_v19 = vadd.f32 %v1217_v15, %v7228_v21  ;;  %v1482_v25 = vadd.f32 %v1481_v14, %v1393_v4  ;;  %v5886_v14 = vor.u32 %v6537_v42, %v5883_v31  ;;  %v5882_v1 = vor.u32 %v6541_v36, %v5881_v35 }
 0x13d   : > { %v1306_v20 = vpop.f32.mrf.mxu1 }
 0x13e   : > { %v1307_v29 = vadd.f32 %v1306_v20, %v1218_v19  ;;  %1256 = vmatmul.bf16.gmra.mxu0 %v7349_v0  ;;  %v2691_v30 = vmax.f32 %v1482_v25, 0.0  ;;  %1434 = vmatmul.bf16.gmra.mxu2 %v7349_v0 }
 0x13f   : > { %2157 = vmatpush.bf16.msra.mxu3 %v5886_v14  ;;  %1979 = vmatpush.bf16.msra.mxu1 %v5882_v1 }
 0x140   : > { %1345 = vmatmul.bf16.gmra.mxu1 %v7354_v56  ;;  %1523 = vmatmul.bf16.gmra.mxu3 %v7354_v56  ;;  %v7361_v45 = vpack.c.bf16 %v2691_v30, %v2683_v18  ;;  %v356_v18 = vld [vmem:[%s7116_s8 + $0x1e0] sm:$0xff]  ;;  %v358_v30 = vld [vmem:[%s7116_s8 + $0x1f0] sm:$0xff]  ;;  %v2698_v40 = vmax.f32 %v1307_v29, 0.0 }
 0x141   : > { %v1395_v46 = vpop.f32.mrf.mxu2  ;;  %v7369_v61 = vpack.c.bf16 %v358_v30, %v356_v18 }
 0x142   : > { %8799 = vst [vmem:[#allocation26_spill] sm:$0xff] %v7361_v45  ;;  %v1396_v57 = vadd.f32 %v1395_v46, %v7240_v34  ;;  %v357_v46 = vld [vmem:[%s7116_s8 + $0x1e8] sm:$0xff]  ;;  %v359_v45 = vld [vmem:[%s7116_s8 + $0x1f8] sm:$0xff] }
 0x143   : > { %v1484_v62 = vpop.f32.mrf.mxu3  ;;  %v1219_v4 = vpop.f32.mrf.mxu0 }
 0x144   : > { %v1220_v15 = vadd.f32 %v1219_v4, %v7228_v21  ;;  %v1485_v20 = vadd.f32 %v1484_v62, %v1396_v57  ;;  %v7374_v57 = vpack.c.bf16 %v359_v45, %v357_v46 }
 0x145   : > { %v1308_v19 = vpop.f32.mrf.mxu1 }
 0x146   : > { %v1309_v25 = vadd.f32 %v1308_v19, %v1220_v15  ;;  %v2699_v15 = vmax.f32 %v1485_v20, 0.0 }
 0x148   : > { %v2706_v41 = vmax.f32 %v1309_v25, 0.0 }
 0x149   : > { %v1397_v22 = vpop.f32.mrf.mxu2 }
 0x14a   : > { %v7371_v37 = vpack.c.bf16 %v2706_v41, %v2698_v40  ;;  %v1398_v42 = vadd.f32 %v1397_v22, %v7240_v34 }
 0x14b   : > { %v1486_v54 = vpop.f32.mrf.mxu3  ;;  %v1222_v31 = vpop.f32.mrf.mxu0 }
 0x14c   : > { %8800 = vst [vmem:[#allocation27_spill] sm:$0xff] %v7371_v37  ;;  %v1223_v62 = vadd.f32 %v1222_v31, %v7228_v21  ;;  %v1487_v29 = vadd.f32 %v1486_v54, %v1398_v42 }
 0x14d   : > { %v1311_v4 = vpop.f32.mrf.mxu1 }
 0x14e   : > { %v1312_v14 = vadd.f32 %v1311_v4, %v1223_v62  ;;  %1261 = vmatmul.bf16.gmra.mxu0 %v7369_v61  ;;  %v2707_v19 = vmax.f32 %v1487_v29, 0.0  ;;  %1439 = vmatmul.bf16.gmra.mxu2 %v7369_v61 }
 0x150   : > { %1350 = vmatmul.bf16.gmra.mxu1 %v7374_v57  ;;  %1528 = vmatmul.bf16.gmra.mxu3 %v7374_v57  ;;  %v7381_v22 = vpack.c.bf16 %v2707_v19, %v2699_v15  ;;  %v2714_v20 = vmax.f32 %v1312_v14, 0.0  ;;  %v6465_v14 = vld [vmem:[#allocation5 + $0x194] sm:$0xf] }
 0x151   : > { %v1400_v1 = vpop.f32.mrf.mxu2 }
 0x152   : > { %8801 = vst [vmem:[#allocation28_spill] sm:$0xff] %v7381_v22  ;;  %v1401_v45 = vadd.f32 %v1400_v1, %v7240_v34  ;;  %v6533_v22 = vld [vmem:[#allocation5 + $0x3ac] sm:$0xf0] }
 0x153   : > { %v1489_v25 = vpop.f32.mrf.mxu3  ;;  %v1224_v18 = vpop.f32.mrf.mxu0 }
 0x154   : > { %v1225_v30 = vadd.f32 %v1224_v18, %v7228_v21  ;;  %v1490_v36 = vadd.f32 %v1489_v25, %v1401_v45  ;;  %v5595_v45 = vld [vmem:[#allocation5 + $0x1b0] sm:$0xf0] }
 0x155   : > { %v1313_v35 = vpop.f32.mrf.mxu1  ;;  %v5598_v25 = vor.u32 %v6465_v14, %v5595_v45  ;;  %v5849_v45 = vld [vmem:[#allocation5 + $0x390] sm:$0xf] }
 0x156   : > { %v1314_v40 = vadd.f32 %v1313_v35, %v1225_v30  ;;  %v2715_v1 = vmax.f32 %v1490_v36, 0.0  ;;  %v5593_v30 = vld [vmem:[#allocation5 + $0x190] sm:$0xf] }
 0x157   : > { %v6469_v35 = vld [vmem:[#allocation5 + $0x1ac] sm:$0xf0]  ;;  %2069 = vmatpush.bf16.msra.mxu2 %v5598_v25 }
 0x158   : > { %v2722_v41 = vmax.f32 %v1314_v40, 0.0  ;;  %v6529_v40 = vld [vmem:[#allocation5 + $0x394] sm:$0xf] }
 0x159   : > { %v1402_v46 = vpop.f32.mrf.mxu2 }
 0x15a   : > { %v7385_v42 = vpack.c.bf16 %v2722_v41, %v2714_v20  ;;  %v1403_v54 = vadd.f32 %v1402_v46, %v7240_v34  ;;  %v5594_v46 = vor.u32 %v6469_v35, %v5593_v30 }
 0x15b   : > { %v1491_v31 = vpop.f32.mrf.mxu3  ;;  %v1227_v62 = vpop.f32.mrf.mxu0 }
 0x15c   : > { %8802 = vst [vmem:[#allocation29_spill] sm:$0xff] %v7385_v42  ;;  %v1228_v4 = vadd.f32 %v1227_v62, %v7228_v21  ;;  %v1492_v15 = vadd.f32 %v1491_v31, %v1403_v54  ;;  %v5851_v54 = vld [vmem:[#allocation5 + $0x3b0] sm:$0xf0]  ;;  %1891 = vmatpush.bf16.msra.mxu0 %v5594_v46 }
 0x15d   : > { %v1316_v29 = vpop.f32.mrf.mxu1 }
 0x15e   : > { %v1317_v19 = vadd.f32 %v1316_v29, %v1228_v4  ;;  %1542 = vmatmul.bf16.vlgmr.msrb.gmra.mxu0 %v7134_v43  ;;  %v2723_v18 = vmax.f32 %v1492_v15, 0.0  ;;  %1720 = vmatmul.bf16.vlgmr.msrb.gmra.mxu2 %v7134_v43  ;;  %v5854_v4 = vor.u32 %v6529_v40, %v5851_v54 }
 0x160   : > { %1631 = vmatmul.bf16.vlgmr.msrb.gmra.mxu1 %v7136_v47  ;;  %1809 = vmatmul.bf16.vlgmr.msrb.gmra.mxu3 %v7136_v47  ;;  %v7393_v20 = vpack.c.bf16 %v2723_v18, %v2715_v1  ;;  %v2730_v1 = vmax.f32 %v1317_v19, 0.0 }
 0x161   : > { %v1405_v41 = vpop.f32.mrf.mxu2  ;;  %2158 = vmatpush.bf16.msra.mxu3 %v5854_v4 }
 0x162   : > { %8803 = vst [vmem:[#allocation30_spill] sm:$0xff] %v7393_v20  ;;  %v1406_v36 = vadd.f32 %v1405_v41, %v7240_v34  ;;  %v5850_v20 = vor.u32 %v6533_v22, %v5849_v45 }
 0x163   : > { %v1494_v31 = vpop.f32.mrf.mxu3  ;;  %v1229_v62 = vpop.f32.mrf.mxu0 }
 0x164   : > { %v1230_v29 = vadd.f32 %v1229_v62, %v7228_v21  ;;  %v1495_v42 = vadd.f32 %v1494_v31, %v1406_v36  ;;  %1980 = vmatpush.bf16.msra.mxu1 %v5850_v20 }
 0x165   : > { %v1318_v15 = vpop.f32.mrf.mxu1 }
 0x166   : > { %v1319_v14 = vadd.f32 %v1318_v15, %v1230_v29  ;;  %v2731_v31 = vmax.f32 %v1495_v42, 0.0 }
 0x168   : > { %v2738_v18 = vmax.f32 %v1319_v14, 0.0 }
 0x169   : > { %v1407_v30 = vpop.f32.mrf.mxu2 }
 0x16a   : > { %v7397_v35 = vpack.c.bf16 %v2738_v18, %v2730_v1  ;;  %v1408_v41 = vadd.f32 %v1407_v30, %v7240_v34 }
 0x16b   : > { %v1496_v25 = vpop.f32.mrf.mxu3  ;;  %v1232_v40 = vpop.f32.mrf.mxu0 }
 0x16c   : > { %8804 = vst [vmem:[#allocation31_spill] sm:$0xff] %v7397_v35  ;;  %v1233_v54 = vadd.f32 %v1232_v40, %v7228_v21  ;;  %v1497_v46 = vadd.f32 %v1496_v25, %v1408_v41  ;;  %v6525_v35 = vld [vmem:[#allocation5 + $0x36c] sm:$0xf0] }
 0x16d   : > { %v1321_v62 = vpop.f32.mrf.mxu1 }
 0x16e   : > { %v1322_v36 = vadd.f32 %v1321_v62, %v1233_v54  ;;  %1547 = vmatmul.bf16.gmra.mxu0 %v7146_v2  ;;  %v2739_v4 = vmax.f32 %v1497_v46, 0.0  ;;  %1725 = vmatmul.bf16.gmra.mxu2 %v7146_v2 }
 0x170   : > { %1636 = vmatmul.bf16.gmra.mxu1 %v7148_v3  ;;  %1814 = vmatmul.bf16.gmra.mxu3 %v7148_v3  ;;  %v7405_v22 = vpack.c.bf16 %v2739_v4, %v2731_v31  ;;  %v2746_v42 = vmax.f32 %v1322_v36, 0.0  ;;  %v6457_v36 = vld [vmem:[#allocation5 + $0x154] sm:$0xf] }
 0x171   : > { %v1410_v19 = vpop.f32.mrf.mxu2 }
 0x172   : > { %8805 = vst [vmem:[#allocation32_spill] sm:$0xff] %v7405_v22  ;;  %v1411_v20 = vadd.f32 %v1410_v19, %v7240_v34 }
 0x173   : > { %v1499_v29 = vpop.f32.mrf.mxu3  ;;  %v1234_v15 = vpop.f32.mrf.mxu0 }
 0x174   : > { %v1235_v14 = vadd.f32 %v1234_v15, %v7228_v21  ;;  %v1500_v1 = vadd.f32 %v1499_v29, %v1411_v20  ;;  %v5563_v20 = vld [vmem:[#allocation5 + $0x170] sm:$0xf0] }
 0x175   : > { %v1323_v45 = vpop.f32.mrf.mxu1  ;;  %v5566_v29 = vor.u32 %v6457_v36, %v5563_v20  ;;  %v5817_v20 = vld [vmem:[#allocation5 + $0x350] sm:$0xf] }
 0x176   : > { %v1324_v18 = vadd.f32 %v1323_v45, %v1235_v14  ;;  %v2747_v15 = vmax.f32 %v1500_v1, 0.0  ;;  %v5561_v14 = vld [vmem:[#allocation5 + $0x150] sm:$0xf] }
 0x177   : > { %v6461_v45 = vld [vmem:[#allocation5 + $0x16c] sm:$0xf0]  ;;  %2070 = vmatpush.bf16.msra.mxu2 %v5566_v29 }
 0x178   : > { %v2754_v30 = vmax.f32 %v1324_v18, 0.0  ;;  %v6521_v18 = vld [vmem:[#allocation5 + $0x354] sm:$0xf] }
 0x179   : > { %v1412_v41 = vpop.f32.mrf.mxu2 }
 0x17a   : > { %v7409_v25 = vpack.c.bf16 %v2754_v30, %v2746_v42  ;;  %v1413_v40 = vadd.f32 %v1412_v41, %v7240_v34  ;;  %v5562_v41 = vor.u32 %v6461_v45, %v5561_v14 }
 0x17b   : > { %v1501_v54 = vpop.f32.mrf.mxu3  ;;  %v1237_v62 = vpop.f32.mrf.mxu0 }
 0x17c   : > { %8806 = vst [vmem:[#allocation33_spill] sm:$0xff] %v7409_v25  ;;  %v1238_v46 = vadd.f32 %v1237_v62, %v7228_v21  ;;  %v1502_v4 = vadd.f32 %v1501_v54, %v1413_v40  ;;  %v5819_v40 = vld [vmem:[#allocation5 + $0x370] sm:$0xf0]  ;;  %1892 = vmatpush.bf16.msra.mxu0 %v5562_v41 }
 0x17d   : > { %v1326_v31 = vpop.f32.mrf.mxu1 }
 0x17e   : > { %v1327_v19 = vadd.f32 %v1326_v31, %v1238_v46  ;;  %1552 = vmatmul.bf16.gmra.mxu0 %v7158_v8  ;;  %v2755_v22 = vmax.f32 %v1502_v4, 0.0  ;;  %1730 = vmatmul.bf16.gmra.mxu2 %v7158_v8  ;;  %v5822_v46 = vor.u32 %v6521_v18, %v5819_v40 }
 0x180   : > { %1641 = vmatmul.bf16.gmra.mxu1 %v7160_v9  ;;  %1819 = vmatmul.bf16.gmra.mxu3 %v7160_v9  ;;  %v7417_v42 = vpack.c.bf16 %v2755_v22, %v2747_v15  ;;  %v2762_v22 = vmax.f32 %v1327_v19, 0.0 }
 0x181   : > { %v1415_v30 = vpop.f32.mrf.mxu2  ;;  %2159 = vmatpush.bf16.msra.mxu3 %v5822_v46 }
 0x182   : > { %8807 = vst [vmem:[#allocation34_spill] sm:$0xff] %v7417_v42  ;;  %v1416_v1 = vadd.f32 %v1415_v30, %v7240_v34  ;;  %v5818_v42 = vor.u32 %v6525_v35, %v5817_v20 }
 0x183   : > { %v1504_v54 = vpop.f32.mrf.mxu3  ;;  %v1239_v62 = vpop.f32.mrf.mxu0 }
 0x184   : > { %v1240_v31 = vadd.f32 %v1239_v62, %v7228_v21  ;;  %v1505_v25 = vadd.f32 %v1504_v54, %v1416_v1  ;;  %1981 = vmatpush.bf16.msra.mxu1 %v5818_v42 }
 0x185   : > { %v1328_v4 = vpop.f32.mrf.mxu1 }
 0x186   : > { %v1329_v36 = vadd.f32 %v1328_v4, %v1240_v31  ;;  %v2763_v54 = vmax.f32 %v1505_v25, 0.0 }
 0x188   : > { %v2770_v15 = vmax.f32 %v1329_v36, 0.0 }
 0x189   : > { %v1417_v14 = vpop.f32.mrf.mxu2 }
 0x18a   : > { %v7421_v45 = vpack.c.bf16 %v2770_v15, %v2762_v22  ;;  %v1418_v30 = vadd.f32 %v1417_v14, %v7240_v34 }
 0x18b   : > { %v1506_v29 = vpop.f32.mrf.mxu3  ;;  %v1242_v18 = vpop.f32.mrf.mxu0 }
 0x18c   : > { %8808 = vst [vmem:[#allocation35_spill] sm:$0xff] %v7421_v45  ;;  %v1243_v40 = vadd.f32 %v1242_v18, %v7228_v21  ;;  %v1507_v41 = vadd.f32 %v1506_v29, %v1418_v30  ;;  %v6517_v45 = vld [vmem:[#allocation5 + $0x32c] sm:$0xf0] }
 0x18d   : > { %v1331_v62 = vpop.f32.mrf.mxu1 }
 0x18e   : > { %v1332_v1 = vadd.f32 %v1331_v62, %v1243_v40  ;;  %1557 = vmatmul.bf16.gmra.mxu0 %v7170_v26  ;;  %v2771_v46 = vmax.f32 %v1507_v41, 0.0  ;;  %1735 = vmatmul.bf16.gmra.mxu2 %v7170_v26 }
 0x190   : > { %1646 = vmatmul.bf16.gmra.mxu1 %v7172_v27  ;;  %1824 = vmatmul.bf16.gmra.mxu3 %v7172_v27  ;;  %v7429_v35 = vpack.c.bf16 %v2771_v46, %v2763_v54  ;;  %v2778_v25 = vmax.f32 %v1332_v1, 0.0  ;;  %v6449_v1 = vld [vmem:[#allocation5 + $0x114] sm:$0xf] }
 0x191   : > { %v1420_v19 = vpop.f32.mrf.mxu2 }
 0x192   : > { %8809 = vst [vmem:[#allocation36_spill] sm:$0xff] %v7429_v35  ;;  %v1421_v42 = vadd.f32 %v1420_v19, %v7240_v34 }
 0x193   : > { %v1509_v31 = vpop.f32.mrf.mxu3  ;;  %v1244_v4 = vpop.f32.mrf.mxu0 }
 0x194   : > { %v1245_v36 = vadd.f32 %v1244_v4, %v7228_v21  ;;  %v1510_v22 = vadd.f32 %v1509_v31, %v1421_v42  ;;  %v5531_v42 = vld [vmem:[#allocation5 + $0x130] sm:$0xf0] }
 0x195   : > { %v1333_v20 = vpop.f32.mrf.mxu1  ;;  %v5534_v31 = vor.u32 %v6449_v1, %v5531_v42  ;;  %v5785_v42 = vld [vmem:[#allocation5 + $0x310] sm:$0xf] }
 0x196   : > { %v1334_v15 = vadd.f32 %v1333_v20, %v1245_v36  ;;  %v2779_v4 = vmax.f32 %v1510_v22, 0.0  ;;  %v5529_v36 = vld [vmem:[#allocation5 + $0x110] sm:$0xf] }
 0x197   : > { %v6453_v20 = vld [vmem:[#allocation5 + $0x12c] sm:$0xf0]  ;;  %2071 = vmatpush.bf16.msra.mxu2 %v5534_v31 }
 0x198   : > { %v2786_v14 = vmax.f32 %v1334_v15, 0.0  ;;  %v6513_v15 = vld [vmem:[#allocation5 + $0x314] sm:$0xf] }
 0x199   : > { %v1422_v30 = vpop.f32.mrf.mxu2 }
 0x19a   : > { %v7433_v29 = vpack.c.bf16 %v2786_v14, %v2778_v25  ;;  %v1423_v18 = vadd.f32 %v1422_v30, %v7240_v34  ;;  %v5530_v30 = vor.u32 %v6453_v20, %v5529_v36 }
 0x19b   : > { %v1511_v40 = vpop.f32.mrf.mxu3  ;;  %v1247_v62 = vpop.f32.mrf.mxu0 }
 0x19c   : > { %8810 = vst [vmem:[#allocation37_spill] sm:$0xff] %v7433_v29  ;;  %v1248_v41 = vadd.f32 %v1247_v62, %v7228_v21  ;;  %v1512_v46 = vadd.f32 %v1511_v40, %v1423_v18  ;;  %v5787_v18 = vld [vmem:[#allocation5 + $0x330] sm:$0xf0]  ;;  %1893 = vmatpush.bf16.msra.mxu0 %v5530_v30 }
 0x19d   : > { %v1336_v54 = vpop.f32.mrf.mxu1 }
 0x19e   : > { %v1337_v19 = vadd.f32 %v1336_v54, %v1248_v41  ;;  %1562 = vmatmul.bf16.gmra.mxu0 %v7182_v32  ;;  %v2787_v35 = vmax.f32 %v1512_v46, 0.0  ;;  %1740 = vmatmul.bf16.gmra.mxu2 %v7182_v32  ;;  %v5790_v41 = vor.u32 %v6513_v15, %v5787_v18 }
 0x1a0   : > { %1651 = vmatmul.bf16.gmra.mxu1 %v7184_v33  ;;  %1829 = vmatmul.bf16.gmra.mxu3 %v7184_v33  ;;  %v7441_v25 = vpack.c.bf16 %v2787_v35, %v2779_v4  ;;  %v2794_v35 = vmax.f32 %v1337_v19, 0.0 }
 0x1a1   : > { %v1425_v14 = vpop.f32.mrf.mxu2  ;;  %2160 = vmatpush.bf16.msra.mxu3 %v5790_v41 }
 0x1a2   : > { %8811 = vst [vmem:[#allocation38_spill] sm:$0xff] %v7441_v25  ;;  %v1426_v22 = vadd.f32 %v1425_v14, %v7240_v34  ;;  %v5786_v25 = vor.u32 %v6517_v45, %v5785_v42 }
 0x1a3   : > { %v1514_v40 = vpop.f32.mrf.mxu3  ;;  %v1249_v62 = vpop.f32.mrf.mxu0 }
 0x1a4   : > { %v1250_v54 = vadd.f32 %v1249_v62, %v7228_v21  ;;  %v1515_v29 = vadd.f32 %v1514_v40, %v1426_v22  ;;  %1982 = vmatpush.bf16.msra.mxu1 %v5786_v25 }
 0x1a5   : > { %v1338_v46 = vpop.f32.mrf.mxu1 }
 0x1a6   : > { %v1339_v1 = vadd.f32 %v1338_v46, %v1250_v54  ;;  %v2795_v40 = vmax.f32 %v1515_v29, 0.0 }
 0x1a8   : > { %v2802_v4 = vmax.f32 %v1339_v1, 0.0 }
 0x1a9   : > { %v1427_v36 = vpop.f32.mrf.mxu2 }
 0x1aa   : > { %v7445_v20 = vpack.c.bf16 %v2802_v4, %v2794_v35  ;;  %v1428_v14 = vadd.f32 %v1427_v36, %v7240_v34 }
 0x1ab   : > { %v1516_v31 = vpop.f32.mrf.mxu3  ;;  %v1252_v15 = vpop.f32.mrf.mxu0 }
 0x1ac   : > { %8812 = vst [vmem:[#allocation39_spill] sm:$0xff] %v7445_v20  ;;  %v1253_v18 = vadd.f32 %v1252_v15, %v7228_v21  ;;  %v1517_v30 = vadd.f32 %v1516_v31, %v1428_v14  ;;  %v6509_v20 = vld [vmem:[#allocation5 + $0x2ec] sm:$0xf0] }
 0x1ad   : > { %v1341_v62 = vpop.f32.mrf.mxu1 }
 0x1ae   : > { %v1342_v22 = vadd.f32 %v1341_v62, %v1253_v18  ;;  %1567 = vmatmul.bf16.gmra.mxu0 %v7194_v52  ;;  %v2803_v41 = vmax.f32 %v1517_v30, 0.0  ;;  %1745 = vmatmul.bf16.gmra.mxu2 %v7194_v52 }
 0x1b0   : > { %1656 = vmatmul.bf16.gmra.mxu1 %v7196_v53  ;;  %1834 = vmatmul.bf16.gmra.mxu3 %v7196_v53  ;;  %v7453_v45 = vpack.c.bf16 %v2803_v41, %v2795_v40  ;;  %v2810_v29 = vmax.f32 %v1342_v22, 0.0  ;;  %v6441_v22 = vld [vmem:[#allocation5 + $0xd4] sm:$0xf] }
 0x1b1   : > { %v1430_v19 = vpop.f32.mrf.mxu2 }
 0x1b2   : > { %8813 = vst [vmem:[#allocation40_spill] sm:$0xff] %v7453_v45  ;;  %v1431_v25 = vadd.f32 %v1430_v19, %v7240_v34 }
 0x1b3   : > { %v1519_v54 = vpop.f32.mrf.mxu3  ;;  %v1254_v46 = vpop.f32.mrf.mxu0 }
 0x1b4   : > { %v1255_v1 = vadd.f32 %v1254_v46, %v7228_v21  ;;  %v1520_v35 = vadd.f32 %v1519_v54, %v1431_v25  ;;  %v5499_v25 = vld [vmem:[#allocation5 + $0xf0] sm:$0xf0] }
 0x1b5   : > { %v1343_v42 = vpop.f32.mrf.mxu1  ;;  %v5502_v54 = vor.u32 %v6441_v22, %v5499_v25  ;;  %v5753_v25 = vld [vmem:[#allocation5 + $0x2d0] sm:$0xf] }
 0x1b6   : > { %v1344_v4 = vadd.f32 %v1343_v42, %v1255_v1  ;;  %v2811_v46 = vmax.f32 %v1520_v35, 0.0  ;;  %v5497_v1 = vld [vmem:[#allocation5 + $0xd0] sm:$0xf] }
 0x1b7   : > { %v6445_v42 = vld [vmem:[#allocation5 + $0xec] sm:$0xf0]  ;;  %2072 = vmatpush.bf16.msra.mxu2 %v5502_v54 }
 0x1b8   : > { %v2818_v36 = vmax.f32 %v1344_v4, 0.0  ;;  %v6505_v4 = vld [vmem:[#allocation5 + $0x2d4] sm:$0xf] }
 0x1b9   : > { %v1432_v14 = vpop.f32.mrf.mxu2 }
 0x1ba   : > { %v7457_v31 = vpack.c.bf16 %v2818_v36, %v2810_v29  ;;  %v1433_v15 = vadd.f32 %v1432_v14, %v7240_v34  ;;  %v5498_v14 = vor.u32 %v6445_v42, %v5497_v1 }
 0x1bb   : > { %v1521_v18 = vpop.f32.mrf.mxu3  ;;  %v1257_v62 = vpop.f32.mrf.mxu0 }
 0x1bc   : > { %8814 = vst [vmem:[#allocation41_spill] sm:$0xff] %v7457_v31  ;;  %v1258_v30 = vadd.f32 %v1257_v62, %v7228_v21  ;;  %v1522_v41 = vadd.f32 %v1521_v18, %v1433_v15  ;;  %v5755_v15 = vld [vmem:[#allocation5 + $0x2f0] sm:$0xf0]  ;;  %1894 = vmatpush.bf16.msra.mxu0 %v5498_v14 }
 0x1bd   : > { %v1346_v40 = vpop.f32.mrf.mxu1 }
 0x1be   : > { %v1347_v19 = vadd.f32 %v1346_v40, %v1258_v30  ;;  %1572 = vmatmul.bf16.gmra.mxu0 %v7206_v58  ;;  %v2819_v45 = vmax.f32 %v1522_v41, 0.0  ;;  %1750 = vmatmul.bf16.gmra.mxu2 %v7206_v58  ;;  %v5758_v30 = vor.u32 %v6505_v4, %v5755_v15 }
 0x1c0   : > { %1661 = vmatmul.bf16.gmra.mxu1 %v7208_v59  ;;  %1839 = vmatmul.bf16.gmra.mxu3 %v7208_v59  ;;  %v7465_v29 = vpack.c.bf16 %v2819_v45, %v2811_v46  ;;  %v2826_v45 = vmax.f32 %v1347_v19, 0.0 }
 0x1c1   : > { %v1435_v36 = vpop.f32.mrf.mxu2  ;;  %2161 = vmatpush.bf16.msra.mxu3 %v5758_v30 }
 0x1c2   : > { %8815 = vst [vmem:[#allocation42_spill] sm:$0xff] %v7465_v29  ;;  %v1436_v35 = vadd.f32 %v1435_v36, %v7240_v34  ;;  %v5754_v29 = vor.u32 %v6509_v20, %v5753_v25 }
 0x1c3   : > { %v1524_v18 = vpop.f32.mrf.mxu3  ;;  %v1259_v62 = vpop.f32.mrf.mxu0 }
 0x1c4   : > { %v1260_v40 = vadd.f32 %v1259_v62, %v7228_v21  ;;  %v1525_v31 = vadd.f32 %v1524_v18, %v1436_v35  ;;  %1983 = vmatpush.bf16.msra.mxu1 %v5754_v29 }
 0x1c5   : > { %v1348_v41 = vpop.f32.mrf.mxu1 }
 0x1c6   : > { %v1349_v22 = vadd.f32 %v1348_v41, %v1260_v40  ;;  %v2827_v18 = vmax.f32 %v1525_v31, 0.0 }
 0x1c8   : > { %v2834_v46 = vmax.f32 %v1349_v22, 0.0 }
 0x1c9   : > { %v1437_v1 = vpop.f32.mrf.mxu2 }
 0x1ca   : > { %v7469_v42 = vpack.c.bf16 %v2834_v46, %v2826_v45  ;;  %v1438_v36 = vadd.f32 %v1437_v1, %v7240_v34 }
 0x1cb   : > { %v1526_v54 = vpop.f32.mrf.mxu3  ;;  %v1262_v4 = vpop.f32.mrf.mxu0 }
 0x1cc   : > { %8816 = vst [vmem:[#allocation43_spill] sm:$0xff] %v7469_v42  ;;  %v1263_v15 = vadd.f32 %v1262_v4, %v7228_v21  ;;  %v1527_v14 = vadd.f32 %v1526_v54, %v1438_v36  ;;  %v6758_v36 = vld [vmem:[#allocation7] sm:$0xff]  ;;  %v6501_v42 = vld [vmem:[#allocation5 + $0x2ac] sm:$0xf0] }
 0x1cd   : > { %v1351_v62 = vpop.f32.mrf.mxu1  ;;  %v7481_v54 = vperm.slane %v6758_v36, 2 }
 0x1ce   : > { %v1352_v35 = vadd.f32 %v1351_v62, %v1263_v15  ;;  %1577 = vmatmul.bf16.gmra.mxu0 %v7218_v16  ;;  %v2835_v30 = vmax.f32 %v1527_v14, 0.0  ;;  %1755 = vmatmul.bf16.gmra.mxu2 %v7218_v16 }
 0x1d0   : > { %1666 = vmatmul.bf16.gmra.mxu1 %v7220_v17  ;;  %1844 = vmatmul.bf16.gmra.mxu3 %v7220_v17  ;;  %v7477_v20 = vpack.c.bf16 %v2835_v30, %v2827_v18  ;;  %v2842_v31 = vmax.f32 %v1352_v35, 0.0 }
 0x1d1   : > { %v1440_v19 = vpop.f32.mrf.mxu2 }
 0x1d2   : > { %8817 = vst [vmem:[#allocation44_spill] sm:$0xff] %v7477_v20  ;;  %v1441_v29 = vadd.f32 %v1440_v19, %v7240_v34 }
 0x1d3   : > { %v1529_v40 = vpop.f32.mrf.mxu3  ;;  %v1264_v41 = vpop.f32.mrf.mxu0 }
 0x1d4   : > { %v1265_v22 = vadd.f32 %v1264_v41, %v7228_v21  ;;  %v1530_v45 = vadd.f32 %v1529_v40, %v1441_v29  ;;  %v7490_v40 = vperm.slane %v6758_v36, 3  ;;  %v5467_v41 = vld [vmem:[#allocation5 + $0xb0] sm:$0xf0] }
 0x1d5   : > { %v1353_v25 = vpop.f32.mrf.mxu1 }
 0x1d6   : > { %v1354_v46 = vadd.f32 %v1353_v25, %v1265_v22  ;;  %v2843_v29 = vmax.f32 %v1530_v45, 0.0  ;;  %v5465_v25 = vld [vmem:[#allocation5 + $0x90] sm:$0xf]  ;;  %v5723_v45 = vld [vmem:[#allocation5 + $0x2b0] sm:$0xf0] }
 0x1d8   : > { %v2850_v1 = vmax.f32 %v1354_v46, 0.0  ;;  %v6437_v46 = vld [vmem:[#allocation5 + $0xac] sm:$0xf0] }
 0x1d9   : > { %v1442_v4 = vpop.f32.mrf.mxu2 }
 0x1da   : > { %v7483_v15 = vpack.c.bf16 %v2850_v1, %v2842_v31  ;;  %v1443_v62 = vadd.f32 %v1442_v4, %v7240_v34  ;;  %v6433_v34 = vld [vmem:[#allocation5 + $0x94] sm:$0xf] }
 0x1db   : > { %v1531_v14 = vpop.f32.mrf.mxu3  ;;  %v1543_v18 = vpop.f32.mrf.mxu0  ;;  %v5470_v22 = vor.u32 %v6433_v34, %v5467_v41  ;;  %v6497_v31 = vld [vmem:[#allocation5 + $0x294] sm:$0xf]  ;;  %v5721_v41 = vld [vmem:[#allocation5 + $0x290] sm:$0xf] }
 0x1dc   : > { %8818 = vst [vmem:[#allocation45_spill] sm:$0xff] %v7483_v15  ;;  %v1544_v30 = vadd.f32 %v1543_v18, %v7481_v54  ;;  %v1532_v20 = vadd.f32 %v1531_v14, %v1443_v62  ;;  %v5466_v62 = vor.u32 %v6437_v46, %v5465_v25  ;;  %v5726_v36 = vor.u32 %v6497_v31, %v5723_v45 }
 0x1dd   : > { %v1632_v19 = vpop.f32.mrf.mxu1  ;;  %2073 = vmatpush.bf16.msra.mxu2 %v5470_v22 }
 0x1de   : > { %v1633_v21 = vadd.f32 %v1632_v19, %v1544_v30  ;;  %1582 = vmatmul.bf16.gmra.mxu0 %v7232_v24  ;;  %v2851_v35 = vmax.f32 %v1532_v20, 0.0  ;;  %1760 = vmatmul.bf16.gmra.mxu2 %v7232_v24 }
 0x1df   : > { %1895 = vmatpush.bf16.msra.mxu0 %v5466_v62  ;;  %2162 = vmatpush.bf16.msra.mxu3 %v5726_v36 }
 0x1e0   : > { %1671 = vmatmul.bf16.gmra.mxu1 %v7234_v28  ;;  %1849 = vmatmul.bf16.gmra.mxu3 %v7234_v28  ;;  %v7493_v1 = vpack.c.bf16 %v2851_v35, %v2843_v29  ;;  %v2604_v29 = vmax.f32 %v1633_v21, 0.0 }
 0x1e1   : > { %v1721_v4 = vpop.f32.mrf.mxu2 }
 0x1e2   : > { %8819 = vst [vmem:[#allocation46_spill] sm:$0xff] %v7493_v1  ;;  %v1722_v20 = vadd.f32 %v1721_v4, %v7490_v40  ;;  %v5722_v1 = vor.u32 %v6501_v42, %v5721_v41 }
 0x1e3   : > { %v1810_v14 = vpop.f32.mrf.mxu3  ;;  %v1545_v18 = vpop.f32.mrf.mxu0 }
 0x1e4   : > { %v1546_v30 = vadd.f32 %v1545_v18, %v7481_v54  ;;  %v1811_v15 = vadd.f32 %v1810_v14, %v1722_v20  ;;  %1984 = vmatpush.bf16.msra.mxu1 %v5722_v1 }
 0x1e5   : > { %v1634_v19 = vpop.f32.mrf.mxu1 }
 0x1e6   : > { %v1635_v34 = vadd.f32 %v1634_v19, %v1546_v30  ;;  %v2605_v14 = vmax.f32 %v1811_v15, 0.0 }
 0x1e8   : > { %v2612_v35 = vmax.f32 %v1635_v34, 0.0 }
 0x1e9   : > { %v1723_v46 = vpop.f32.mrf.mxu2 }
 0x1ea   : > { %v7497_v25 = vpack.c.bf16 %v2612_v35, %v2604_v29  ;;  %v1724_v4 = vadd.f32 %v1723_v46, %v7490_v40 }
 0x1eb   : > { %v1812_v22 = vpop.f32.mrf.mxu3  ;;  %v1548_v31 = vpop.f32.mrf.mxu0 }
 0x1ec   : > { %8820 = vst [vmem:[#allocation47_spill] sm:$0xff] %v7497_v25  ;;  %v1549_v45 = vadd.f32 %v1548_v31, %v7481_v54  ;;  %v1813_v62 = vadd.f32 %v1812_v22, %v1724_v4 }
 0x1ed   : > { %v1637_v18 = vpop.f32.mrf.mxu1 }
 0x1ee   : > { %v1638_v20 = vadd.f32 %v1637_v18, %v1549_v45  ;;  %1587 = vmatmul.bf16.gmra.mxu0 %v7251_v7  ;;  %v2613_v36 = vmax.f32 %v1813_v62, 0.0  ;;  %1765 = vmatmul.bf16.gmra.mxu2 %v7251_v7 }
 0x1f0   : > { %1676 = vmatmul.bf16.gmra.mxu1 %v7254_v13  ;;  %1854 = vmatmul.bf16.gmra.mxu3 %v7254_v13  ;;  %v7505_v42 = vpack.c.bf16 %v2613_v36, %v2605_v14  ;;  %v2620_v15 = vmax.f32 %v1638_v20, 0.0  ;;  %v6425_v20 = vld [vmem:[#allocation5 + $0x54] sm:$0xf] }
 0x1f1   : > { %v1726_v21 = vpop.f32.mrf.mxu2 }
 0x1f2   : > { %8821 = vst [vmem:[#allocation48_spill] sm:$0xff] %v7505_v42  ;;  %v1727_v1 = vadd.f32 %v1726_v21, %v7490_v40 }
 0x1f3   : > { %v1815_v30 = vpop.f32.mrf.mxu3  ;;  %v1550_v19 = vpop.f32.mrf.mxu0 }
 0x1f4   : > { %v1551_v34 = vadd.f32 %v1550_v19, %v7481_v54  ;;  %v1816_v29 = vadd.f32 %v1815_v30, %v1727_v1  ;;  %v5435_v1 = vld [vmem:[#allocation5 + $0x70] sm:$0xf0] }
 0x1f5   : > { %v1639_v41 = vpop.f32.mrf.mxu1  ;;  %v5438_v30 = vor.u32 %v6425_v20, %v5435_v1  ;;  %v5689_v1 = vld [vmem:[#allocation5 + $0x250] sm:$0xf] }
 0x1f6   : > { %v1640_v35 = vadd.f32 %v1639_v41, %v1551_v34  ;;  %v2621_v19 = vmax.f32 %v1816_v29, 0.0  ;;  %v5433_v34 = vld [vmem:[#allocation5 + $0x50] sm:$0xf]  ;;  %v5690_v6 = vor.u32 %v6493_v39, %v5689_v1 }
 0x1f7   : > { %v6429_v41 = vld [vmem:[#allocation5 + $0x6c] sm:$0xf0]  ;;  %2074 = vmatpush.bf16.msra.mxu2 %v5438_v30 }
 0x1f8   : > { %v2628_v46 = vmax.f32 %v1640_v35, 0.0  ;;  %v6489_v35 = vld [vmem:[#allocation5 + $0x254] sm:$0xf]  ;;  %1985 = vmatpush.bf16.msra.mxu1 %v5690_v6 }
 0x1f9   : > { %v1728_v4 = vpop.f32.mrf.mxu2 }
 0x1fa   : > { %v7509_v22 = vpack.c.bf16 %v2628_v46, %v2620_v15  ;;  %v1729_v31 = vadd.f32 %v1728_v4, %v7490_v40  ;;  %v5434_v4 = vor.u32 %v6429_v41, %v5433_v34 }
 0x1fb   : > { %v1817_v45 = vpop.f32.mrf.mxu3  ;;  %v1553_v18 = vpop.f32.mrf.mxu0 }
 0x1fc   : > { %8822 = vst [vmem:[#allocation49_spill] sm:$0xff] %v7509_v22  ;;  %v1554_v62 = vadd.f32 %v1553_v18, %v7481_v54  ;;  %v1818_v36 = vadd.f32 %v1817_v45, %v1729_v31  ;;  %v5691_v31 = vld [vmem:[#allocation5 + $0x270] sm:$0xf0]  ;;  %1896 = vmatpush.bf16.msra.mxu0 %v5434_v4 }
 0x1fd   : > { %v1642_v14 = vpop.f32.mrf.mxu1 }
 0x1fe   : > { %v1643_v21 = vadd.f32 %v1642_v14, %v1554_v62  ;;  %1592 = vmatmul.bf16.gmra.mxu0 %v7269_v48  ;;  %v2629_v37 = vmax.f32 %v1818_v36, 0.0  ;;  %1770 = vmatmul.bf16.gmra.mxu2 %v7269_v48  ;;  %v5694_v62 = vor.u32 %v6489_v35, %v5691_v31 }
 0x200   : > { %1681 = vmatmul.bf16.gmra.mxu1 %v7274_v55  ;;  %1859 = vmatmul.bf16.gmra.mxu3 %v7274_v55  ;;  %v7517_v15 = vpack.c.bf16 %v2629_v37, %v2621_v19  ;;  %v2636_v37 = vmax.f32 %v1643_v21, 0.0 }
 0x201   : > { %v1731_v46 = vpop.f32.mrf.mxu2  ;;  %2163 = vmatpush.bf16.msra.mxu3 %v5694_v62 }
 0x202   : > { %8823 = vst [vmem:[#allocation50_spill] sm:$0xff] %v7517_v15  ;;  %v1732_v29 = vadd.f32 %v1731_v46, %v7490_v40 }
 0x203   : > { %v1820_v45 = vpop.f32.mrf.mxu3  ;;  %v1555_v18 = vpop.f32.mrf.mxu0 }
 0x204   : > { %v1556_v14 = vadd.f32 %v1555_v18, %v7481_v54  ;;  %v1821_v11 = vadd.f32 %v1820_v45, %v1732_v29 }
 0x205   : > { %v1644_v36 = vpop.f32.mrf.mxu1 }
 0x206   : > { %v1645_v20 = vadd.f32 %v1644_v36, %v1556_v14  ;;  %v2637_v45 = vmax.f32 %v1821_v11, 0.0 }
 0x208   : > { %v2644_v19 = vmax.f32 %v1645_v20, 0.0 }
 0x209   : > { %v1733_v34 = vpop.f32.mrf.mxu2 }
 0x20a   : > { %v7521_v41 = vpack.c.bf16 %v2644_v19, %v2636_v37  ;;  %v1734_v46 = vadd.f32 %v1733_v34, %v7490_v40 }
 0x20b   : > { %v1822_v30 = vpop.f32.mrf.mxu3  ;;  %v1558_v35 = vpop.f32.mrf.mxu0 }
 0x20c   : > { %8824 = vst [vmem:[#allocation51_spill] sm:$0xff] %v7521_v41  ;;  %v1559_v31 = vadd.f32 %v1558_v35, %v7481_v54  ;;  %v1823_v4 = vadd.f32 %v1822_v30, %v1734_v46  ;;  %v6485_v41 = vld [vmem:[#allocation5 + $0x22c] sm:$0xf0] }
 0x20d   : > { %v1647_v18 = vpop.f32.mrf.mxu1 }
 0x20e   : > { %v1648_v29 = vadd.f32 %v1647_v18, %v1559_v31  ;;  %1597 = vmatmul.bf16.gmra.mxu0 %v7289_v50  ;;  %v2645_v62 = vmax.f32 %v1823_v4, 0.0  ;;  %1775 = vmatmul.bf16.gmra.mxu2 %v7289_v50 }
 0x210   : > { %1686 = vmatmul.bf16.gmra.mxu1 %v7294_v60  ;;  %1864 = vmatmul.bf16.gmra.mxu3 %v7294_v60  ;;  %v7529_v6 = vpack.c.bf16 %v2645_v62, %v2637_v45  ;;  %v2652_v11 = vmax.f32 %v1648_v29, 0.0  ;;  %v6417_v29 = vld [vmem:[#allocation5 + $0x14] sm:$0xf] }
 0x211   : > { %v1736_v39 = vpop.f32.mrf.mxu2 }
 0x212   : > { %8825 = vst [vmem:[#allocation52_spill] sm:$0xff] %v7529_v6  ;;  %v1737_v21 = vadd.f32 %v1736_v39, %v7490_v40 }
 0x213   : > { %v1825_v14 = vpop.f32.mrf.mxu3  ;;  %v1560_v36 = vpop.f32.mrf.mxu0 }
 0x214   : > { %v1561_v20 = vadd.f32 %v1560_v36, %v7481_v54  ;;  %v1826_v37 = vadd.f32 %v1825_v14, %v1737_v21  ;;  %v5403_v21 = vld [vmem:[#allocation5 + $0x30] sm:$0xf0] }
 0x215   : > { %v1649_v1 = vpop.f32.mrf.mxu1  ;;  %v5406_v14 = vor.u32 %v6417_v29, %v5403_v21  ;;  %v5657_v21 = vld [vmem:[#allocation5 + $0x210] sm:$0xf] }
 0x216   : > { %v1650_v19 = vadd.f32 %v1649_v1, %v1561_v20  ;;  %v2653_v36 = vmax.f32 %v1826_v37, 0.0  ;;  %v5401_v20 = vld [vmem:[#allocation5 + $0x10] sm:$0xf] }
 0x217   : > { %v6421_v1 = vld [vmem:[#allocation5 + $0x2c] sm:$0xf0]  ;;  %2075 = vmatpush.bf16.msra.mxu2 %v5406_v14 }
 0x218   : > { %v2660_v34 = vmax.f32 %v1650_v19, 0.0  ;;  %v6481_v19 = vld [vmem:[#allocation5 + $0x214] sm:$0xf] }
 0x219   : > { %v1738_v46 = vpop.f32.mrf.mxu2 }
 0x21a   : > { %v7533_v30 = vpack.c.bf16 %v2660_v34, %v2652_v11  ;;  %v1739_v35 = vadd.f32 %v1738_v46, %v7490_v40  ;;  %v5402_v46 = vor.u32 %v6421_v1, %v5401_v20 }
 0x21b   : > { %v1827_v31 = vpop.f32.mrf.mxu3  ;;  %v1563_v18 = vpop.f32.mrf.mxu0 }
 0x21c   : > { %8826 = vst [vmem:[#allocation53_spill] sm:$0xff] %v7533_v30  ;;  %v1564_v4 = vadd.f32 %v1563_v18, %v7481_v54  ;;  %v1828_v62 = vadd.f32 %v1827_v31, %v1739_v35  ;;  %v5659_v35 = vld [vmem:[#allocation5 + $0x230] sm:$0xf0]  ;;  %1897 = vmatpush.bf16.msra.mxu0 %v5402_v46 }
 0x21d   : > { %v1652_v45 = vpop.f32.mrf.mxu1 }
 0x21e   : > { %v1653_v39 = vadd.f32 %v1652_v45, %v1564_v4  ;;  %1602 = vmatmul.bf16.gmra.mxu0 %v7309_v38  ;;  %v2661_v6 = vmax.f32 %v1828_v62, 0.0  ;;  %1780 = vmatmul.bf16.gmra.mxu2 %v7309_v38  ;;  %v5662_v4 = vor.u32 %v6481_v19, %v5659_v35 }
 0x220   : > { %1691 = vmatmul.bf16.gmra.mxu1 %v7314_v44  ;;  %1869 = vmatmul.bf16.gmra.mxu3 %v7314_v44  ;;  %v7541_v11 = vpack.c.bf16 %v2661_v6, %v2653_v36  ;;  %v2668_v6 = vmax.f32 %v1653_v39, 0.0 }
 0x221   : > { %v1741_v34 = vpop.f32.mrf.mxu2  ;;  %2164 = vmatpush.bf16.msra.mxu3 %v5662_v4 }
 0x222   : > { %8827 = vst [vmem:[#allocation54_spill] sm:$0xff] %v7541_v11  ;;  %v1742_v37 = vadd.f32 %v1741_v34, %v7490_v40  ;;  %v5658_v11 = vor.u32 %v6485_v41, %v5657_v21 }
 0x223   : > { %v1830_v31 = vpop.f32.mrf.mxu3  ;;  %v1565_v18 = vpop.f32.mrf.mxu0 }
 0x224   : > { %v1566_v45 = vadd.f32 %v1565_v18, %v7481_v54  ;;  %v1831_v30 = vadd.f32 %v1830_v31, %v1742_v37  ;;  %1986 = vmatpush.bf16.msra.mxu1 %v5658_v11 }
 0x225   : > { %v1654_v62 = vpop.f32.mrf.mxu1 }
 0x226   : > { %v1655_v29 = vadd.f32 %v1654_v62, %v1566_v45  ;;  %v2669_v31 = vmax.f32 %v1831_v30, 0.0 }
 0x228   : > { %v2676_v36 = vmax.f32 %v1655_v29, 0.0 }
 0x229   : > { %v1743_v20 = vpop.f32.mrf.mxu2 }
 0x22a   : > { %v7545_v1 = vpack.c.bf16 %v2676_v36, %v2668_v6  ;;  %v1744_v34 = vadd.f32 %v1743_v20, %v7490_v40 }
 0x22b   : > { %v1832_v14 = vpop.f32.mrf.mxu3  ;;  %v1568_v19 = vpop.f32.mrf.mxu0 }
 0x22c   : > { %8828 = vst [vmem:[#allocation55_spill] sm:$0xff] %v7545_v1  ;;  %v1569_v35 = vadd.f32 %v1568_v19, %v7481_v54  ;;  %v1833_v46 = vadd.f32 %v1832_v14, %v1744_v34  ;;  %v6542_v1 = vld [vmem:[#allocation5 + $0x3f4] sm:$0xf0] }
 0x22d   : > { %v1657_v18 = vpop.f32.mrf.mxu1 }
 0x22e   : > { %v1658_v37 = vadd.f32 %v1657_v18, %v1569_v35  ;;  %1607 = vmatmul.bf16.gmra.mxu0 %v7329_v63  ;;  %v2677_v4 = vmax.f32 %v1833_v46, 0.0  ;;  %1785 = vmatmul.bf16.gmra.mxu2 %v7329_v63 }
 0x230   : > { %1696 = vmatmul.bf16.gmra.mxu1 %v7334_v10  ;;  %1874 = vmatmul.bf16.gmra.mxu3 %v7334_v10  ;;  %v7553_v41 = vpack.c.bf16 %v2677_v4, %v2669_v31  ;;  %v2684_v30 = vmax.f32 %v1658_v37, 0.0  ;;  %v6474_v37 = vld [vmem:[#allocation5 + $0x1dc] sm:$0xf] }
 0x231   : > { %v1746_v39 = vpop.f32.mrf.mxu2 }
 0x232   : > { %8829 = vst [vmem:[#allocation56_spill] sm:$0xff] %v7553_v41  ;;  %v1747_v11 = vadd.f32 %v1746_v39, %v7490_v40 }
 0x233   : > { %v1835_v45 = vpop.f32.mrf.mxu3  ;;  %v1570_v62 = vpop.f32.mrf.mxu0 }
 0x234   : > { %v1571_v29 = vadd.f32 %v1570_v62, %v7481_v54  ;;  %v1836_v6 = vadd.f32 %v1835_v45, %v1747_v11  ;;  %v5635_v11 = vld [vmem:[#allocation5 + $0x1f8] sm:$0xf0] }
 0x235   : > { %v1659_v21 = vpop.f32.mrf.mxu1  ;;  %v5638_v45 = vor.u32 %v6474_v37, %v5635_v11  ;;  %v5889_v11 = vld [vmem:[#allocation5 + $0x3d8] sm:$0xf] }
 0x236   : > { %v1660_v36 = vadd.f32 %v1659_v21, %v1571_v29  ;;  %v2685_v62 = vmax.f32 %v1836_v6, 0.0  ;;  %v5633_v29 = vld [vmem:[#allocation5 + $0x1d8] sm:$0xf] }
 0x237   : > { %v6478_v21 = vld [vmem:[#allocation5 + $0x1f4] sm:$0xf0]  ;;  %2424 = vmatpush.bf16.msrb.mxu2 %v5638_v45 }
 0x238   : > { %v2692_v20 = vmax.f32 %v1660_v36, 0.0  ;;  %v6538_v36 = vld [vmem:[#allocation5 + $0x3dc] sm:$0xf] }
 0x239   : > { %v1748_v34 = vpop.f32.mrf.mxu2 }
 0x23a   : > { %v7557_v14 = vpack.c.bf16 %v2692_v20, %v2684_v30  ;;  %v1749_v19 = vadd.f32 %v1748_v34, %v7490_v40  ;;  %v5634_v34 = vor.u32 %v6478_v21, %v5633_v29 }
 0x23b   : > { %v1837_v35 = vpop.f32.mrf.mxu3  ;;  %v1573_v18 = vpop.f32.mrf.mxu0 }
 0x23c   : > { %8830 = vst [vmem:[#allocation57_spill] sm:$0xff] %v7557_v14  ;;  %v1574_v46 = vadd.f32 %v1573_v18, %v7481_v54  ;;  %v1838_v4 = vadd.f32 %v1837_v35, %v1749_v19  ;;  %v5891_v19 = vld [vmem:[#allocation5 + $0x3f8] sm:$0xf0]  ;;  %2246 = vmatpush.bf16.msrb.mxu0 %v5634_v34 }
 0x23d   : > { %v1662_v31 = vpop.f32.mrf.mxu1 }
 0x23e   : > { %v1663_v39 = vadd.f32 %v1662_v31, %v1574_v46  ;;  %1612 = vmatmul.bf16.gmra.mxu0 %v7349_v0  ;;  %v2693_v41 = vmax.f32 %v1838_v4, 0.0  ;;  %1790 = vmatmul.bf16.gmra.mxu2 %v7349_v0  ;;  %v5894_v46 = vor.u32 %v6538_v36, %v5891_v19 }
 0x240   : > { %1701 = vmatmul.bf16.gmra.mxu1 %v7354_v56  ;;  %1879 = vmatmul.bf16.gmra.mxu3 %v7354_v56  ;;  %v7565_v30 = vpack.c.bf16 %v2693_v41, %v2685_v62  ;;  %v2700_v41 = vmax.f32 %v1663_v39, 0.0 }
 0x241   : > { %v1751_v20 = vpop.f32.mrf.mxu2  ;;  %2513 = vmatpush.bf16.msrb.mxu3 %v5894_v46 }
 0x242   : > { %8831 = vst [vmem:[#allocation58_spill] sm:$0xff] %v7565_v30  ;;  %v1752_v6 = vadd.f32 %v1751_v20, %v7490_v40  ;;  %v5890_v30 = vor.u32 %v6542_v1, %v5889_v11 }
 0x243   : > { %v1840_v35 = vpop.f32.mrf.mxu3  ;;  %v1575_v18 = vpop.f32.mrf.mxu0 }
 0x244   : > { %v1576_v31 = vadd.f32 %v1575_v18, %v7481_v54  ;;  %v1841_v14 = vadd.f32 %v1840_v35, %v1752_v6  ;;  %2335 = vmatpush.bf16.msrb.mxu1 %v5890_v30 }
 0x245   : > { %v1664_v4 = vpop.f32.mrf.mxu1 }
 0x246   : > { %v1665_v37 = vadd.f32 %v1664_v4, %v1576_v31  ;;  %v2701_v35 = vmax.f32 %v1841_v14, 0.0 }
 0x248   : > { %v2708_v62 = vmax.f32 %v1665_v37, 0.0 }
 0x249   : > { %v1753_v29 = vpop.f32.mrf.mxu2 }
 0x24a   : > { %v7569_v21 = vpack.c.bf16 %v2708_v62, %v2700_v41  ;;  %v1754_v20 = vadd.f32 %v1753_v29, %v7490_v40 }
 0x24b   : > { %v1842_v45 = vpop.f32.mrf.mxu3  ;;  %v1578_v36 = vpop.f32.mrf.mxu0 }
 0x24c   : > { %8832 = vst [vmem:[#allocation59_spill] sm:$0xff] %v7569_v21  ;;  %v1579_v19 = vadd.f32 %v1578_v36, %v7481_v54  ;;  %v1843_v34 = vadd.f32 %v1842_v45, %v1754_v20  ;;  %v6534_v21 = vld [vmem:[#allocation5 + $0x3b4] sm:$0xf0] }
 0x24d   : > { %v1667_v18 = vpop.f32.mrf.mxu1 }
 0x24e   : > { %v1668_v6 = vadd.f32 %v1667_v18, %v1579_v19  ;;  %1617 = vmatmul.bf16.gmra.mxu0 %v7369_v61  ;;  %v2709_v46 = vmax.f32 %v1843_v34, 0.0  ;;  %1795 = vmatmul.bf16.gmra.mxu2 %v7369_v61 }
 0x250   : > { %1706 = vmatmul.bf16.gmra.mxu1 %v7374_v57  ;;  %1884 = vmatmul.bf16.gmra.mxu3 %v7374_v57  ;;  %v7577_v1 = vpack.c.bf16 %v2709_v46, %v2701_v35  ;;  %v2716_v14 = vmax.f32 %v1668_v6, 0.0  ;;  %v6466_v6 = vld [vmem:[#allocation5 + $0x19c] sm:$0xf] }
 0x251   : > { %v1756_v39 = vpop.f32.mrf.mxu2 }
 0x252   : > { %8833 = vst [vmem:[#allocation60_spill] sm:$0xff] %v7577_v1  ;;  %v1757_v30 = vadd.f32 %v1756_v39, %v7490_v40 }
 0x253   : > { %v1845_v31 = vpop.f32.mrf.mxu3  ;;  %v1580_v4 = vpop.f32.mrf.mxu0 }
 0x254   : > { %v1581_v37 = vadd.f32 %v1580_v4, %v7481_v54  ;;  %v1846_v41 = vadd.f32 %v1845_v31, %v1757_v30  ;;  %v5603_v30 = vld [vmem:[#allocation5 + $0x1b8] sm:$0xf0] }
 0x255   : > { %v1669_v11 = vpop.f32.mrf.mxu1  ;;  %v5606_v31 = vor.u32 %v6466_v6, %v5603_v30  ;;  %v5857_v30 = vld [vmem:[#allocation5 + $0x398] sm:$0xf] }
 0x256   : > { %v1670_v62 = vadd.f32 %v1669_v11, %v1581_v37  ;;  %v2717_v4 = vmax.f32 %v1846_v41, 0.0  ;;  %v5601_v37 = vld [vmem:[#allocation5 + $0x198] sm:$0xf] }
 0x257   : > { %v6470_v11 = vld [vmem:[#allocation5 + $0x1b4] sm:$0xf0]  ;;  %2425 = vmatpush.bf16.msrb.mxu2 %v5606_v31 }
 0x258   : > { %v2724_v29 = vmax.f32 %v1670_v62, 0.0  ;;  %v6530_v62 = vld [vmem:[#allocation5 + $0x39c] sm:$0xf] }
 0x259   : > { %v1758_v20 = vpop.f32.mrf.mxu2 }
 0x25a   : > { %v7581_v45 = vpack.c.bf16 %v2724_v29, %v2716_v14  ;;  %v1759_v36 = vadd.f32 %v1758_v20, %v7490_v40  ;;  %v5602_v20 = vor.u32 %v6470_v11, %v5601_v37 }
 0x25b   : > { %v1847_v19 = vpop.f32.mrf.mxu3  ;;  %v1583_v18 = vpop.f32.mrf.mxu0 }
 0x25c   : > { %8834 = vst [vmem:[#allocation61_spill] sm:$0xff] %v7581_v45  ;;  %v1584_v34 = vadd.f32 %v1583_v18, %v7481_v54  ;;  %v1848_v46 = vadd.f32 %v1847_v19, %v1759_v36  ;;  %v5859_v36 = vld [vmem:[#allocation5 + $0x3b8] sm:$0xf0]  ;;  %2247 = vmatpush.bf16.msrb.mxu0 %v5602_v20 }
 0x25d   : > { %v1672_v35 = vpop.f32.mrf.mxu1 }
 0x25e   : > { %v1673_v39 = vadd.f32 %v1672_v35, %v1584_v34  ;;  %1898 = vmatmul.bf16.vlgmr.msra.gmra.mxu0 %v7134_v43  ;;  %v2725_v1 = vmax.f32 %v1848_v46, 0.0  ;;  %2076 = vmatmul.bf16.vlgmr.msra.gmra.mxu2 %v7134_v43  ;;  %v5862_v34 = vor.u32 %v6530_v62, %v5859_v36 }
 0x260   : > { %1987 = vmatmul.bf16.vlgmr.msra.gmra.mxu1 %v7136_v47  ;;  %2165 = vmatmul.bf16.vlgmr.msra.gmra.mxu3 %v7136_v47  ;;  %v7589_v14 = vpack.c.bf16 %v2725_v1, %v2717_v4  ;;  %v2732_v1 = vmax.f32 %v1673_v39, 0.0 }
 0x261   : > { %v1761_v29 = vpop.f32.mrf.mxu2  ;;  %2514 = vmatpush.bf16.msrb.mxu3 %v5862_v34 }
 0x262   : > { %8835 = vst [vmem:[#allocation62_spill] sm:$0xff] %v7589_v14  ;;  %v1762_v41 = vadd.f32 %v1761_v29, %v7490_v40  ;;  %v5858_v14 = vor.u32 %v6534_v21, %v5857_v30 }
 0x263   : > { %v1850_v19 = vpop.f32.mrf.mxu3  ;;  %v1585_v18 = vpop.f32.mrf.mxu0 }
 0x264   : > { %v1586_v35 = vadd.f32 %v1585_v18, %v7481_v54  ;;  %v1851_v45 = vadd.f32 %v1850_v19, %v1762_v41  ;;  %2336 = vmatpush.bf16.msrb.mxu1 %v5858_v14 }
 0x265   : > { %v1674_v46 = vpop.f32.mrf.mxu1 }
 0x266   : > { %v1675_v6 = vadd.f32 %v1674_v46, %v1586_v35  ;;  %v2733_v19 = vmax.f32 %v1851_v45, 0.0 }
 0x268   : > { %v2740_v4 = vmax.f32 %v1675_v6, 0.0 }
 0x269   : > { %v1763_v37 = vpop.f32.mrf.mxu2 }
 0x26a   : > { %v7593_v11 = vpack.c.bf16 %v2740_v4, %v2732_v1  ;;  %v1764_v29 = vadd.f32 %v1763_v37, %v7490_v40 }
 0x26b   : > { %v1852_v31 = vpop.f32.mrf.mxu3  ;;  %v1588_v62 = vpop.f32.mrf.mxu0 }
 0x26c   : > { %8836 = vst [vmem:[#allocation63_spill] sm:$0xff] %v7593_v11  ;;  %v1589_v36 = vadd.f32 %v1588_v62, %v7481_v54  ;;  %v1853_v20 = vadd.f32 %v1852_v31, %v1764_v29  ;;  %v6526_v11 = vld [vmem:[#allocation5 + $0x374] sm:$0xf0] }
 0x26d   : > { %v1677_v18 = vpop.f32.mrf.mxu1 }
 0x26e   : > { %v1678_v41 = vadd.f32 %v1677_v18, %v1589_v36  ;;  %1903 = vmatmul.bf16.gmra.mxu0 %v7146_v2  ;;  %v2741_v34 = vmax.f32 %v1853_v20, 0.0  ;;  %2081 = vmatmul.bf16.gmra.mxu2 %v7146_v2 }
 0x270   : > { %1992 = vmatmul.bf16.gmra.mxu1 %v7148_v3  ;;  %2170 = vmatmul.bf16.gmra.mxu3 %v7148_v3  ;;  %v7601_v21 = vpack.c.bf16 %v2741_v34, %v2733_v19  ;;  %v2748_v45 = vmax.f32 %v1678_v41, 0.0  ;;  %v6458_v41 = vld [vmem:[#allocation5 + $0x15c] sm:$0xf] }
 0x271   : > { %v1766_v39 = vpop.f32.mrf.mxu2 }
 0x272   : > { %8837 = vst [vmem:[#allocation64_spill] sm:$0xff] %v7601_v21  ;;  %v1767_v14 = vadd.f32 %v1766_v39, %v7490_v40 }
 0x273   : > { %v1855_v35 = vpop.f32.mrf.mxu3  ;;  %v1590_v46 = vpop.f32.mrf.mxu0 }
 0x274   : > { %v1591_v6 = vadd.f32 %v1590_v46, %v7481_v54  ;;  %v1856_v1 = vadd.f32 %v1855_v35, %v1767_v14  ;;  %v5571_v14 = vld [vmem:[#allocation5 + $0x178] sm:$0xf0] }
 0x275   : > { %v1679_v30 = vpop.f32.mrf.mxu1  ;;  %v5574_v35 = vor.u32 %v6458_v41, %v5571_v14  ;;  %v5825_v14 = vld [vmem:[#allocation5 + $0x358] sm:$0xf] }
 0x276   : > { %v1680_v4 = vadd.f32 %v1679_v30, %v1591_v6  ;;  %v2749_v46 = vmax.f32 %v1856_v1, 0.0  ;;  %v5569_v6 = vld [vmem:[#allocation5 + $0x158] sm:$0xf] }
 0x277   : > { %v6462_v30 = vld [vmem:[#allocation5 + $0x174] sm:$0xf0]  ;;  %2426 = vmatpush.bf16.msrb.mxu2 %v5574_v35 }
 0x278   : > { %v2756_v37 = vmax.f32 %v1680_v4, 0.0  ;;  %v6522_v4 = vld [vmem:[#allocation5 + $0x35c] sm:$0xf] }
 0x279   : > { %v1768_v29 = vpop.f32.mrf.mxu2 }
 0x27a   : > { %v7605_v31 = vpack.c.bf16 %v2756_v37, %v2748_v45  ;;  %v1769_v62 = vadd.f32 %v1768_v29, %v7490_v40  ;;  %v5570_v29 = vor.u32 %v6462_v30, %v5569_v6 }
 0x27b   : > { %v1857_v36 = vpop.f32.mrf.mxu3  ;;  %v1593_v18 = vpop.f32.mrf.mxu0 }
 0x27c   : > { %8838 = vst [vmem:[#allocation65_spill] sm:$0xff] %v7605_v31  ;;  %v1594_v20 = vadd.f32 %v1593_v18, %v7481_v54  ;;  %v1858_v34 = vadd.f32 %v1857_v36, %v1769_v62  ;;  %v5827_v62 = vld [vmem:[#allocation5 + $0x378] sm:$0xf0]  ;;  %2248 = vmatpush.bf16.msrb.mxu0 %v5570_v29 }
 0x27d   : > { %v1682_v19 = vpop.f32.mrf.mxu1 }
 0x27e   : > { %v1683_v39 = vadd.f32 %v1682_v19, %v1594_v20  ;;  %1908 = vmatmul.bf16.gmra.mxu0 %v7158_v8  ;;  %v2757_v21 = vmax.f32 %v1858_v34, 0.0  ;;  %2086 = vmatmul.bf16.gmra.mxu2 %v7158_v8  ;;  %v5830_v20 = vor.u32 %v6522_v4, %v5827_v62 }
 0x280   : > { %1997 = vmatmul.bf16.gmra.mxu1 %v7160_v9  ;;  %2175 = vmatmul.bf16.gmra.mxu3 %v7160_v9  ;;  %v7613_v45 = vpack.c.bf16 %v2757_v21, %v2749_v46  ;;  %v2764_v21 = vmax.f32 %v1683_v39, 0.0 }
 0x281   : > { %v1771_v37 = vpop.f32.mrf.mxu2  ;;  %2515 = vmatpush.bf16.msrb.mxu3 %v5830_v20 }
 0x282   : > { %8839 = vst [vmem:[#allocation66_spill] sm:$0xff] %v7613_v45  ;;  %v1772_v1 = vadd.f32 %v1771_v37, %v7490_v40  ;;  %v5826_v45 = vor.u32 %v6526_v11, %v5825_v14 }
 0x283   : > { %v1860_v36 = vpop.f32.mrf.mxu3  ;;  %v1595_v18 = vpop.f32.mrf.mxu0 }
 0x284   : > { %v1596_v19 = vadd.f32 %v1595_v18, %v7481_v54  ;;  %v1861_v31 = vadd.f32 %v1860_v36, %v1772_v1  ;;  %2337 = vmatpush.bf16.msrb.mxu1 %v5826_v45 }
 0x285   : > { %v1684_v34 = vpop.f32.mrf.mxu1 }
 0x286   : > { %v1685_v41 = vadd.f32 %v1684_v34, %v1596_v19  ;;  %v2765_v36 = vmax.f32 %v1861_v31, 0.0 }
 0x288   : > { %v2772_v46 = vmax.f32 %v1685_v41, 0.0 }
 0x289   : > { %v1773_v6 = vpop.f32.mrf.mxu2 }
 0x28a   : > { %v7617_v30 = vpack.c.bf16 %v2772_v46, %v2764_v21  ;;  %v1774_v37 = vadd.f32 %v1773_v6, %v7490_v40 }
 0x28b   : > { %v1862_v35 = vpop.f32.mrf.mxu3  ;;  %v1598_v4 = vpop.f32.mrf.mxu0 }
 0x28c   : > { %8840 = vst [vmem:[#allocation67_spill] sm:$0xff] %v7617_v30  ;;  %v1599_v62 = vadd.f32 %v1598_v4, %v7481_v54  ;;  %v1863_v29 = vadd.f32 %v1862_v35, %v1774_v37  ;;  %v6518_v30 = vld [vmem:[#allocation5 + $0x334] sm:$0xf0] }
 0x28d   : > { %v1687_v18 = vpop.f32.mrf.mxu1 }
 0x28e   : > { %v1688_v1 = vadd.f32 %v1687_v18, %v1599_v62  ;;  %1913 = vmatmul.bf16.gmra.mxu0 %v7170_v26  ;;  %v2773_v20 = vmax.f32 %v1863_v29, 0.0  ;;  %2091 = vmatmul.bf16.gmra.mxu2 %v7170_v26 }
 0x290   : > { %2002 = vmatmul.bf16.gmra.mxu1 %v7172_v27  ;;  %2180 = vmatmul.bf16.gmra.mxu3 %v7172_v27  ;;  %v7625_v11 = vpack.c.bf16 %v2773_v20, %v2765_v36  ;;  %v2780_v31 = vmax.f32 %v1688_v1, 0.0  ;;  %v6450_v1 = vld [vmem:[#allocation5 + $0x11c] sm:$0xf] }
 0x291   : > { %v1776_v39 = vpop.f32.mrf.mxu2 }
 0x292   : > { %8841 = vst [vmem:[#allocation68_spill] sm:$0xff] %v7625_v11  ;;  %v1777_v45 = vadd.f32 %v1776_v39, %v7490_v40 }
 0x293   : > { %v1865_v19 = vpop.f32.mrf.mxu3  ;;  %v1600_v34 = vpop.f32.mrf.mxu0 }
 0x294   : > { %v1601_v41 = vadd.f32 %v1600_v34, %v7481_v54  ;;  %v1866_v21 = vadd.f32 %v1865_v19, %v1777_v45  ;;  %v5539_v45 = vld [vmem:[#allocation5 + $0x138] sm:$0xf0] }
 0x295   : > { %v1689_v14 = vpop.f32.mrf.mxu1  ;;  %v5542_v19 = vor.u32 %v6450_v1, %v5539_v45  ;;  %v5793_v45 = vld [vmem:[#allocation5 + $0x318] sm:$0xf] }
 0x296   : > { %v1690_v46 = vadd.f32 %v1689_v14, %v1601_v41  ;;  %v2781_v34 = vmax.f32 %v1866_v21, 0.0  ;;  %v5537_v41 = vld [vmem:[#allocation5 + $0x118] sm:$0xf] }
 0x297   : > { %v6454_v14 = vld [vmem:[#allocation5 + $0x134] sm:$0xf0]  ;;  %2427 = vmatpush.bf16.msrb.mxu2 %v5542_v19 }
 0x298   : > { %v2788_v6 = vmax.f32 %v1690_v46, 0.0  ;;  %v6514_v46 = vld [vmem:[#allocation5 + $0x31c] sm:$0xf] }
 0x299   : > { %v1778_v37 = vpop.f32.mrf.mxu2 }
 0x29a   : > { %v7629_v35 = vpack.c.bf16 %v2788_v6, %v2780_v31  ;;  %v1779_v4 = vadd.f32 %v1778_v37, %v7490_v40  ;;  %v5538_v37 = vor.u32 %v6454_v14, %v5537_v41 }
 0x29b   : > { %v1867_v62 = vpop.f32.mrf.mxu3  ;;  %v1603_v18 = vpop.f32.mrf.mxu0 }
 0x29c   : > { %8842 = vst [vmem:[#allocation69_spill] sm:$0xff] %v7629_v35  ;;  %v1604_v29 = vadd.f32 %v1603_v18, %v7481_v54  ;;  %v1868_v20 = vadd.f32 %v1867_v62, %v1779_v4  ;;  %v5795_v4 = vld [vmem:[#allocation5 + $0x338] sm:$0xf0]  ;;  %2249 = vmatpush.bf16.msrb.mxu0 %v5538_v37 }
 0x29d   : > { %v1692_v36 = vpop.f32.mrf.mxu1 }
 0x29e   : > { %v1693_v39 = vadd.f32 %v1692_v36, %v1604_v29  ;;  %1918 = vmatmul.bf16.gmra.mxu0 %v7182_v32  ;;  %v2789_v11 = vmax.f32 %v1868_v20, 0.0  ;;  %2096 = vmatmul.bf16.gmra.mxu2 %v7182_v32  ;;  %v5798_v29 = vor.u32 %v6514_v46, %v5795_v4 }
 0x2a0   : > { %2007 = vmatmul.bf16.gmra.mxu1 %v7184_v33  ;;  %2185 = vmatmul.bf16.gmra.mxu3 %v7184_v33  ;;  %v7637_v31 = vpack.c.bf16 %v2789_v11, %v2781_v34  ;;  %v2796_v11 = vmax.f32 %v1693_v39, 0.0 }
 0x2a1   : > { %v1781_v6 = vpop.f32.mrf.mxu2  ;;  %2516 = vmatpush.bf16.msrb.mxu3 %v5798_v29 }
 0x2a2   : > { %8843 = vst [vmem:[#allocation70_spill] sm:$0xff] %v7637_v31  ;;  %v1782_v21 = vadd.f32 %v1781_v6, %v7490_v40  ;;  %v5794_v31 = vor.u32 %v6518_v30, %v5793_v45 }
 0x2a3   : > { %v1870_v62 = vpop.f32.mrf.mxu3  ;;  %v1605_v18 = vpop.f32.mrf.mxu0 }
 0x2a4   : > { %v1606_v36 = vadd.f32 %v1605_v18, %v7481_v54  ;;  %v1871_v35 = vadd.f32 %v1870_v62, %v1782_v21  ;;  %2338 = vmatpush.bf16.msrb.mxu1 %v5794_v31 }
 0x2a5   : > { %v1694_v20 = vpop.f32.mrf.mxu1 }
 0x2a6   : > { %v1695_v1 = vadd.f32 %v1694_v20, %v1606_v36  ;;  %v2797_v62 = vmax.f32 %v1871_v35, 0.0 }
 0x2a8   : > { %v2804_v34 = vmax.f32 %v1695_v1, 0.0 }
 0x2a9   : > { %v1783_v41 = vpop.f32.mrf.mxu2 }
 0x2aa   : > { %v7641_v14 = vpack.c.bf16 %v2804_v34, %v2796_v11  ;;  %v1784_v6 = vadd.f32 %v1783_v41, %v7490_v40 }
 0x2ab   : > { %v1872_v19 = vpop.f32.mrf.mxu3  ;;  %v1608_v46 = vpop.f32.mrf.mxu0 }
 0x2ac   : > { %8844 = vst [vmem:[#allocation71_spill] sm:$0xff] %v7641_v14  ;;  %v1609_v4 = vadd.f32 %v1608_v46, %v7481_v54  ;;  %v1873_v37 = vadd.f32 %v1872_v19, %v1784_v6  ;;  %v6510_v14 = vld [vmem:[#allocation5 + $0x2f4] sm:$0xf0] }
 0x2ad   : > { %v1697_v18 = vpop.f32.mrf.mxu1 }
 0x2ae   : > { %v1698_v21 = vadd.f32 %v1697_v18, %v1609_v4  ;;  %1923 = vmatmul.bf16.gmra.mxu0 %v7194_v52  ;;  %v2805_v29 = vmax.f32 %v1873_v37, 0.0  ;;  %2101 = vmatmul.bf16.gmra.mxu2 %v7194_v52 }
 0x2b0   : > { %2012 = vmatmul.bf16.gmra.mxu1 %v7196_v53  ;;  %2190 = vmatmul.bf16.gmra.mxu3 %v7196_v53  ;;  %v7649_v30 = vpack.c.bf16 %v2805_v29, %v2797_v62  ;;  %v2812_v35 = vmax.f32 %v1698_v21, 0.0  ;;  %v6442_v21 = vld [vmem:[#allocation5 + $0xdc] sm:$0xf] }
 0x2b1   : > { %v1786_v39 = vpop.f32.mrf.mxu2 }
 0x2b2   : > { %8845 = vst [vmem:[#allocation72_spill] sm:$0xff] %v7649_v30  ;;  %v1787_v31 = vadd.f32 %v1786_v39, %v7490_v40 }
 0x2b3   : > { %v1875_v36 = vpop.f32.mrf.mxu3  ;;  %v1610_v20 = vpop.f32.mrf.mxu0 }
 0x2b4   : > { %v1611_v1 = vadd.f32 %v1610_v20, %v7481_v54  ;;  %v1876_v11 = vadd.f32 %v1875_v36, %v1787_v31  ;;  %v5507_v31 = vld [vmem:[#allocation5 + $0xf8] sm:$0xf0] }
 0x2b5   : > { %v1699_v45 = vpop.f32.mrf.mxu1  ;;  %v5510_v36 = vor.u32 %v6442_v21, %v5507_v31  ;;  %v5761_v31 = vld [vmem:[#allocation5 + $0x2d8] sm:$0xf] }
 0x2b6   : > { %v1700_v34 = vadd.f32 %v1699_v45, %v1611_v1  ;;  %v2813_v20 = vmax.f32 %v1876_v11, 0.0  ;;  %v5505_v1 = vld [vmem:[#allocation5 + $0xd8] sm:$0xf] }
 0x2b7   : > { %v6446_v45 = vld [vmem:[#allocation5 + $0xf4] sm:$0xf0]  ;;  %2428 = vmatpush.bf16.msrb.mxu2 %v5510_v36 }
 0x2b8   : > { %v2820_v41 = vmax.f32 %v1700_v34, 0.0  ;;  %v6506_v34 = vld [vmem:[#allocation5 + $0x2dc] sm:$0xf] }
 0x2b9   : > { %v1788_v6 = vpop.f32.mrf.mxu2 }
 0x2ba   : > { %v7653_v19 = vpack.c.bf16 %v2820_v41, %v2812_v35  ;;  %v1789_v46 = vadd.f32 %v1788_v6, %v7490_v40  ;;  %v5506_v6 = vor.u32 %v6446_v45, %v5505_v1 }
 0x2bb   : > { %v1877_v4 = vpop.f32.mrf.mxu3  ;;  %v1613_v18 = vpop.f32.mrf.mxu0 }
 0x2bc   : > { %8846 = vst [vmem:[#allocation73_spill] sm:$0xff] %v7653_v19  ;;  %v1614_v37 = vadd.f32 %v1613_v18, %v7481_v54  ;;  %v1878_v29 = vadd.f32 %v1877_v4, %v1789_v46  ;;  %v5763_v46 = vld [vmem:[#allocation5 + $0x2f8] sm:$0xf0]  ;;  %2250 = vmatpush.bf16.msrb.mxu0 %v5506_v6 }
 0x2bd   : > { %v1702_v62 = vpop.f32.mrf.mxu1 }
 0x2be   : > { %v1703_v39 = vadd.f32 %v1702_v62, %v1614_v37  ;;  %1928 = vmatmul.bf16.gmra.mxu0 %v7206_v58  ;;  %v2821_v30 = vmax.f32 %v1878_v29, 0.0  ;;  %2106 = vmatmul.bf16.gmra.mxu2 %v7206_v58  ;;  %v5766_v37 = vor.u32 %v6506_v34, %v5763_v46 }
 0x2c0   : > { %2017 = vmatmul.bf16.gmra.mxu1 %v7208_v59  ;;  %2195 = vmatmul.bf16.gmra.mxu3 %v7208_v59  ;;  %v7661_v35 = vpack.c.bf16 %v2821_v30, %v2813_v20  ;;  %v2828_v30 = vmax.f32 %v1703_v39, 0.0 }
 0x2c1   : > { %v1791_v41 = vpop.f32.mrf.mxu2  ;;  %2517 = vmatpush.bf16.msrb.mxu3 %v5766_v37 }
 0x2c2   : > { %8847 = vst [vmem:[#allocation74_spill] sm:$0xff] %v7661_v35  ;;  %v1792_v11 = vadd.f32 %v1791_v41, %v7490_v40  ;;  %v5762_v35 = vor.u32 %v6510_v14, %v5761_v31 }
 0x2c3   : > { %v1880_v4 = vpop.f32.mrf.mxu3  ;;  %v1615_v18 = vpop.f32.mrf.mxu0 }
 0x2c4   : > { %v1616_v62 = vadd.f32 %v1615_v18, %v7481_v54  ;;  %v1881_v19 = vadd.f32 %v1880_v4, %v1792_v11  ;;  %2339 = vmatpush.bf16.msrb.mxu1 %v5762_v35 }
 0x2c5   : > { %v1704_v29 = vpop.f32.mrf.mxu1 }
 0x2c6   : > { %v1705_v21 = vadd.f32 %v1704_v29, %v1616_v62  ;;  %v2829_v4 = vmax.f32 %v1881_v19, 0.0 }
 0x2c8   : > { %v2836_v20 = vmax.f32 %v1705_v21, 0.0 }
 0x2c9   : > { %v1793_v1 = vpop.f32.mrf.mxu2 }
 0x2ca   : > { %v7665_v45 = vpack.c.bf16 %v2836_v20, %v2828_v30  ;;  %v1794_v41 = vadd.f32 %v1793_v1, %v7490_v40 }
 0x2cb   : > { %v1882_v36 = vpop.f32.mrf.mxu3  ;;  %v1618_v34 = vpop.f32.mrf.mxu0 }
 0x2cc   : > { %8848 = vst [vmem:[#allocation75_spill] sm:$0xff] %v7665_v45  ;;  %v1619_v46 = vadd.f32 %v1618_v34, %v7481_v54  ;;  %v1883_v6 = vadd.f32 %v1882_v36, %v1794_v41  ;;  %v6759_v41 = vld [vmem:[#allocation7] sm:$0xff]  ;;  %v6502_v45 = vld [vmem:[#allocation5 + $0x2b4] sm:$0xf0] }
 0x2cd   : > { %v1707_v18 = vpop.f32.mrf.mxu1  ;;  %v7677_v36 = vperm.slane %v6759_v41, 4 }
 0x2ce   : > { %v1708_v11 = vadd.f32 %v1707_v18, %v1619_v46  ;;  %1933 = vmatmul.bf16.gmra.mxu0 %v7218_v16  ;;  %v2837_v37 = vmax.f32 %v1883_v6, 0.0  ;;  %2111 = vmatmul.bf16.gmra.mxu2 %v7218_v16 }
 0x2d0   : > { %2022 = vmatmul.bf16.gmra.mxu1 %v7220_v17  ;;  %2200 = vmatmul.bf16.gmra.mxu3 %v7220_v17  ;;  %v7673_v14 = vpack.c.bf16 %v2837_v37, %v2829_v4  ;;  %v2844_v19 = vmax.f32 %v1708_v11, 0.0 }
 0x2d1   : > { %v1796_v39 = vpop.f32.mrf.mxu2 }
 0x2d2   : > { %8849 = vst [vmem:[#allocation76_spill] sm:$0xff] %v7673_v14  ;;  %v1797_v35 = vadd.f32 %v1796_v39, %v7490_v40 }
 0x2d3   : > { %v1885_v62 = vpop.f32.mrf.mxu3  ;;  %v1620_v29 = vpop.f32.mrf.mxu0 }
 0x2d4   : > { %v1621_v21 = vadd.f32 %v1620_v29, %v7481_v54  ;;  %v1886_v30 = vadd.f32 %v1885_v62, %v1797_v35  ;;  %v7686_v62 = vperm.slane %v6759_v41, 5  ;;  %v5475_v29 = vld [vmem:[#allocation5 + $0xb8] sm:$0xf0] }
 0x2d5   : > { %v1709_v31 = vpop.f32.mrf.mxu1 }
 0x2d6   : > { %v1710_v20 = vadd.f32 %v1709_v31, %v1621_v21  ;;  %v2845_v35 = vmax.f32 %v1886_v30, 0.0  ;;  %v5473_v31 = vld [vmem:[#allocation5 + $0x98] sm:$0xf]  ;;  %v5731_v30 = vld [vmem:[#allocation5 + $0x2b8] sm:$0xf0] }
 0x2d8   : > { %v2852_v1 = vmax.f32 %v1710_v20, 0.0  ;;  %v6438_v20 = vld [vmem:[#allocation5 + $0xb4] sm:$0xf0] }
 0x2d9   : > { %v1798_v34 = vpop.f32.mrf.mxu2 }
 0x2da   : > { %v7679_v46 = vpack.c.bf16 %v2852_v1, %v2844_v19  ;;  %v1799_v18 = vadd.f32 %v1798_v34, %v7490_v40  ;;  %v6434_v40 = vld [vmem:[#allocation5 + $0x9c] sm:$0xf] }
 0x2db   : > { %v1887_v6 = vpop.f32.mrf.mxu3  ;;  %v1899_v4 = vpop.f32.mrf.mxu0  ;;  %v5478_v21 = vor.u32 %v6434_v40, %v5475_v29  ;;  %v6498_v19 = vld [vmem:[#allocation5 + $0x29c] sm:$0xf]  ;;  %v5729_v29 = vld [vmem:[#allocation5 + $0x298] sm:$0xf] }
 0x2dc   : > { %8850 = vst [vmem:[#allocation77_spill] sm:$0xff] %v7679_v46  ;;  %v1900_v37 = vadd.f32 %v1899_v4, %v7677_v36  ;;  %v1888_v14 = vadd.f32 %v1887_v6, %v1799_v18  ;;  %v5474_v18 = vor.u32 %v6438_v20, %v5473_v31  ;;  %v5734_v41 = vor.u32 %v6498_v19, %v5731_v30 }
 0x2dd   : > { %v1988_v39 = vpop.f32.mrf.mxu1  ;;  %2429 = vmatpush.bf16.msrb.mxu2 %v5478_v21 }
 0x2de   : > { %v1989_v54 = vadd.f32 %v1988_v39, %v1900_v37  ;;  %1938 = vmatmul.bf16.gmra.mxu0 %v7232_v24  ;;  %v2853_v11 = vmax.f32 %v1888_v14, 0.0  ;;  %2116 = vmatmul.bf16.gmra.mxu2 %v7232_v24 }
 0x2df   : > { %2251 = vmatpush.bf16.msrb.mxu0 %v5474_v18  ;;  %2518 = vmatpush.bf16.msrb.mxu3 %v5734_v41 }
 0x2e0   : > { %2027 = vmatmul.bf16.gmra.mxu1 %v7234_v28  ;;  %2205 = vmatmul.bf16.gmra.mxu3 %v7234_v28  ;;  %v7689_v1 = vpack.c.bf16 %v2853_v11, %v2845_v35  ;;  %v2606_v35 = vmax.f32 %v1989_v54, 0.0 }
 0x2e1   : > { %v2077_v34 = vpop.f32.mrf.mxu2 }
 0x2e2   : > { %8851 = vst [vmem:[#allocation78_spill] sm:$0xff] %v7689_v1  ;;  %v2078_v14 = vadd.f32 %v2077_v34, %v7686_v62  ;;  %v5730_v1 = vor.u32 %v6502_v45, %v5729_v29 }
 0x2e3   : > { %v2166_v6 = vpop.f32.mrf.mxu3  ;;  %v1901_v4 = vpop.f32.mrf.mxu0 }
 0x2e4   : > { %v1902_v37 = vadd.f32 %v1901_v4, %v7677_v36  ;;  %v2167_v46 = vadd.f32 %v2166_v6, %v2078_v14  ;;  %2340 = vmatpush.bf16.msrb.mxu1 %v5730_v1 }
 0x2e5   : > { %v1990_v39 = vpop.f32.mrf.mxu1 }
 0x2e6   : > { %v1991_v40 = vadd.f32 %v1990_v39, %v1902_v37  ;;  %v2607_v6 = vmax.f32 %v2167_v46, 0.0 }
 0x2e8   : > { %v2614_v11 = vmax.f32 %v1991_v40, 0.0 }
 0x2e9   : > { %v2079_v20 = vpop.f32.mrf.mxu2 }
 0x2ea   : > { %v7693_v31 = vpack.c.bf16 %v2614_v11, %v2606_v35  ;;  %v2080_v34 = vadd.f32 %v2079_v20, %v7686_v62 }
 0x2eb   : > { %v2168_v21 = vpop.f32.mrf.mxu3  ;;  %v1904_v19 = vpop.f32.mrf.mxu0 }
 0x2ec   : > { %8852 = vst [vmem:[#allocation79_spill] sm:$0xff] %v7693_v31  ;;  %v1905_v30 = vadd.f32 %v1904_v19, %v7677_v36  ;;  %v2169_v18 = vadd.f32 %v2168_v21, %v2080_v34  ;;  %v6494_v31 = vld [vmem:[#allocation5 + $0x274] sm:$0xf0] }
 0x2ed   : > { %v1993_v4 = vpop.f32.mrf.mxu1 }
 0x2ee   : > { %v1994_v14 = vadd.f32 %v1993_v4, %v1905_v30  ;;  %1943 = vmatmul.bf16.gmra.mxu0 %v7251_v7  ;;  %v2615_v41 = vmax.f32 %v2169_v18, 0.0  ;;  %2121 = vmatmul.bf16.gmra.mxu2 %v7251_v7 }
 0x2f0   : > { %2032 = vmatmul.bf16.gmra.mxu1 %v7254_v13  ;;  %2210 = vmatmul.bf16.gmra.mxu3 %v7254_v13  ;;  %v7701_v45 = vpack.c.bf16 %v2615_v41, %v2607_v6  ;;  %v2622_v46 = vmax.f32 %v1994_v14, 0.0  ;;  %v6426_v14 = vld [vmem:[#allocation5 + $0x5c] sm:$0xf] }
 0x2f1   : > { %v2082_v54 = vpop.f32.mrf.mxu2 }
 0x2f2   : > { %8853 = vst [vmem:[#allocation80_spill] sm:$0xff] %v7701_v45  ;;  %v2083_v1 = vadd.f32 %v2082_v54, %v7686_v62 }
 0x2f3   : > { %v2171_v37 = vpop.f32.mrf.mxu3  ;;  %v1906_v39 = vpop.f32.mrf.mxu0 }
 0x2f4   : > { %v1907_v40 = vadd.f32 %v1906_v39, %v7677_v36  ;;  %v2172_v35 = vadd.f32 %v2171_v37, %v2083_v1  ;;  %v5443_v1 = vld [vmem:[#allocation5 + $0x78] sm:$0xf0] }
 0x2f5   : > { %v1995_v29 = vpop.f32.mrf.mxu1  ;;  %v5446_v37 = vor.u32 %v6426_v14, %v5443_v1  ;;  %v5697_v1 = vld [vmem:[#allocation5 + $0x258] sm:$0xf] }
 0x2f6   : > { %v1996_v11 = vadd.f32 %v1995_v29, %v1907_v40  ;;  %v2623_v39 = vmax.f32 %v2172_v35, 0.0  ;;  %v5441_v40 = vld [vmem:[#allocation5 + $0x58] sm:$0xf] }
 0x2f7   : > { %v6430_v29 = vld [vmem:[#allocation5 + $0x74] sm:$0xf0]  ;;  %2430 = vmatpush.bf16.msrb.mxu2 %v5446_v37 }
 0x2f8   : > { %v2630_v20 = vmax.f32 %v1996_v11, 0.0  ;;  %v6490_v11 = vld [vmem:[#allocation5 + $0x25c] sm:$0xf] }
 0x2f9   : > { %v2084_v34 = vpop.f32.mrf.mxu2 }
 0x2fa   : > { %v7705_v21 = vpack.c.bf16 %v2630_v20, %v2622_v46  ;;  %v2085_v19 = vadd.f32 %v2084_v34, %v7686_v62  ;;  %v5442_v34 = vor.u32 %v6430_v29, %v5441_v40 }
 0x2fb   : > { %v2173_v30 = vpop.f32.mrf.mxu3  ;;  %v1909_v4 = vpop.f32.mrf.mxu0 }
 0x2fc   : > { %8854 = vst [vmem:[#allocation81_spill] sm:$0xff] %v7705_v21  ;;  %v1910_v18 = vadd.f32 %v1909_v4, %v7677_v36  ;;  %v2174_v41 = vadd.f32 %v2173_v30, %v2085_v19  ;;  %v5699_v19 = vld [vmem:[#allocation5 + $0x278] sm:$0xf0]  ;;  %2252 = vmatpush.bf16.msrb.mxu0 %v5442_v34 }
 0x2fd   : > { %v1998_v6 = vpop.f32.mrf.mxu1 }
 0x2fe   : > { %v1999_v54 = vadd.f32 %v1998_v6, %v1910_v18  ;;  %1948 = vmatmul.bf16.gmra.mxu0 %v7269_v48  ;;  %v2631_v45 = vmax.f32 %v2174_v41, 0.0  ;;  %2126 = vmatmul.bf16.gmra.mxu2 %v7269_v48  ;;  %v5702_v18 = vor.u32 %v6490_v11, %v5699_v19 }
 0x300   : > { %2037 = vmatmul.bf16.gmra.mxu1 %v7274_v55  ;;  %2215 = vmatmul.bf16.gmra.mxu3 %v7274_v55  ;;  %v7713_v46 = vpack.c.bf16 %v2631_v45, %v2623_v39  ;;  %v2638_v45 = vmax.f32 %v1999_v54, 0.0 }
 0x301   : > { %v2087_v20 = vpop.f32.mrf.mxu2  ;;  %2519 = vmatpush.bf16.msrb.mxu3 %v5702_v18 }
 0x302   : > { %8855 = vst [vmem:[#allocation82_spill] sm:$0xff] %v7713_v46  ;;  %v2088_v35 = vadd.f32 %v2087_v20, %v7686_v62  ;;  %v5698_v46 = vor.u32 %v6494_v31, %v5697_v1 }
 0x303   : > { %v2176_v30 = vpop.f32.mrf.mxu3  ;;  %v1911_v4 = vpop.f32.mrf.mxu0 }
 0x304   : > { %v1912_v6 = vadd.f32 %v1911_v4, %v7677_v36  ;;  %v2177_v21 = vadd.f32 %v2176_v30, %v2088_v35  ;;  %2341 = vmatpush.bf16.msrb.mxu1 %v5698_v46 }
 0x305   : > { %v2000_v41 = vpop.f32.mrf.mxu1 }
 0x306   : > { %v2001_v14 = vadd.f32 %v2000_v41, %v1912_v6  ;;  %v2639_v30 = vmax.f32 %v2177_v21, 0.0 }
 0x308   : > { %v2646_v39 = vmax.f32 %v2001_v14, 0.0 }
 0x309   : > { %v2089_v40 = vpop.f32.mrf.mxu2 }
 0x30a   : > { %v7717_v29 = vpack.c.bf16 %v2646_v39, %v2638_v45  ;;  %v2090_v20 = vadd.f32 %v2089_v40, %v7686_v62 }
 0x30b   : > { %v2178_v37 = vpop.f32.mrf.mxu3  ;;  %v1914_v11 = vpop.f32.mrf.mxu0 }
 0x30c   : > { %8856 = vst [vmem:[#allocation83_spill] sm:$0xff] %v7717_v29  ;;  %v1915_v19 = vadd.f32 %v1914_v11, %v7677_v36  ;;  %v2179_v34 = vadd.f32 %v2178_v37, %v2090_v20  ;;  %v6486_v29 = vld [vmem:[#allocation5 + $0x234] sm:$0xf0] }
 0x30d   : > { %v2003_v4 = vpop.f32.mrf.mxu1 }
 0x30e   : > { %v2004_v35 = vadd.f32 %v2003_v4, %v1915_v19  ;;  %1953 = vmatmul.bf16.gmra.mxu0 %v7289_v50  ;;  %v2647_v18 = vmax.f32 %v2179_v34, 0.0  ;;  %2131 = vmatmul.bf16.gmra.mxu2 %v7289_v50 }
 0x310   : > { %2042 = vmatmul.bf16.gmra.mxu1 %v7294_v60  ;;  %2220 = vmatmul.bf16.gmra.mxu3 %v7294_v60  ;;  %v7725_v31 = vpack.c.bf16 %v2647_v18, %v2639_v30  ;;  %v2654_v21 = vmax.f32 %v2004_v35, 0.0  ;;  %v6418_v35 = vld [vmem:[#allocation5 + $0x1c] sm:$0xf] }
 0x311   : > { %v2092_v54 = vpop.f32.mrf.mxu2 }
 0x312   : > { %8857 = vst [vmem:[#allocation84_spill] sm:$0xff] %v7725_v31  ;;  %v2093_v46 = vadd.f32 %v2092_v54, %v7686_v62 }
 0x313   : > { %v2181_v6 = vpop.f32.mrf.mxu3  ;;  %v1916_v41 = vpop.f32.mrf.mxu0 }
 0x314   : > { %v1917_v14 = vadd.f32 %v1916_v41, %v7677_v36  ;;  %v2182_v45 = vadd.f32 %v2181_v6, %v2093_v46  ;;  %v5411_v46 = vld [vmem:[#allocation5 + $0x38] sm:$0xf0] }
 0x315   : > { %v2005_v1 = vpop.f32.mrf.mxu1  ;;  %v5414_v6 = vor.u32 %v6418_v35, %v5411_v46  ;;  %v5665_v46 = vld [vmem:[#allocation5 + $0x218] sm:$0xf] }
 0x316   : > { %v2006_v39 = vadd.f32 %v2005_v1, %v1917_v14  ;;  %v2655_v41 = vmax.f32 %v2182_v45, 0.0  ;;  %v5409_v14 = vld [vmem:[#allocation5 + $0x18] sm:$0xf] }
 0x317   : > { %v6422_v1 = vld [vmem:[#allocation5 + $0x34] sm:$0xf0]  ;;  %2431 = vmatpush.bf16.msrb.mxu2 %v5414_v6 }
 0x318   : > { %v2662_v40 = vmax.f32 %v2006_v39, 0.0  ;;  %v6482_v39 = vld [vmem:[#allocation5 + $0x21c] sm:$0xf] }
 0x319   : > { %v2094_v20 = vpop.f32.mrf.mxu2 }
 0x31a   : > { %v7729_v37 = vpack.c.bf16 %v2662_v40, %v2654_v21  ;;  %v2095_v11 = vadd.f32 %v2094_v20, %v7686_v62  ;;  %v5410_v20 = vor.u32 %v6422_v1, %v5409_v14 }
 0x31b   : > { %v2183_v19 = vpop.f32.mrf.mxu3  ;;  %v1919_v4 = vpop.f32.mrf.mxu0 }
 0x31c   : > { %8858 = vst [vmem:[#allocation85_spill] sm:$0xff] %v7729_v37  ;;  %v1920_v34 = vadd.f32 %v1919_v4, %v7677_v36  ;;  %v2184_v18 = vadd.f32 %v2183_v19, %v2095_v11  ;;  %v5667_v11 = vld [vmem:[#allocation5 + $0x238] sm:$0xf0]  ;;  %2253 = vmatpush.bf16.msrb.mxu0 %v5410_v20 }
 0x31d   : > { %v2008_v30 = vpop.f32.mrf.mxu1 }
 0x31e   : > { %v2009_v54 = vadd.f32 %v2008_v30, %v1920_v34  ;;  %1958 = vmatmul.bf16.gmra.mxu0 %v7309_v38  ;;  %v2663_v31 = vmax.f32 %v2184_v18, 0.0  ;;  %2136 = vmatmul.bf16.gmra.mxu2 %v7309_v38  ;;  %v5670_v34 = vor.u32 %v6482_v39, %v5667_v11 }
 0x320   : > { %2047 = vmatmul.bf16.gmra.mxu1 %v7314_v44  ;;  %2225 = vmatmul.bf16.gmra.mxu3 %v7314_v44  ;;  %v7737_v21 = vpack.c.bf16 %v2663_v31, %v2655_v41  ;;  %v2670_v31 = vmax.f32 %v2009_v54, 0.0 }
 0x321   : > { %v2097_v40 = vpop.f32.mrf.mxu2  ;;  %2520 = vmatpush.bf16.msrb.mxu3 %v5670_v34 }
 0x322   : > { %8859 = vst [vmem:[#allocation86_spill] sm:$0xff] %v7737_v21  ;;  %v2098_v45 = vadd.f32 %v2097_v40, %v7686_v62  ;;  %v5666_v21 = vor.u32 %v6486_v29, %v5665_v46 }
 0x323   : > { %v2186_v19 = vpop.f32.mrf.mxu3  ;;  %v1921_v4 = vpop.f32.mrf.mxu0 }
 0x324   : > { %v1922_v30 = vadd.f32 %v1921_v4, %v7677_v36  ;;  %v2187_v37 = vadd.f32 %v2186_v19, %v2098_v45  ;;  %2342 = vmatpush.bf16.msrb.mxu1 %v5666_v21 }
 0x325   : > { %v2010_v18 = vpop.f32.mrf.mxu1 }
 0x326   : > { %v2011_v35 = vadd.f32 %v2010_v18, %v1922_v30  ;;  %v2671_v19 = vmax.f32 %v2187_v37, 0.0 }
 0x328   : > { %v2678_v41 = vmax.f32 %v2011_v35, 0.0 }
 0x329   : > { %v2099_v14 = vpop.f32.mrf.mxu2 }
 0x32a   : > { %v7741_v1 = vpack.c.bf16 %v2678_v41, %v2670_v31  ;;  %v2100_v40 = vadd.f32 %v2099_v14, %v7686_v62 }
 0x32b   : > { %v2188_v6 = vpop.f32.mrf.mxu3  ;;  %v1924_v39 = vpop.f32.mrf.mxu0 }
 0x32c   : > { %8860 = vst [vmem:[#allocation87_spill] sm:$0xff] %v7741_v1  ;;  %v1925_v11 = vadd.f32 %v1924_v39, %v7677_v36  ;;  %v2189_v20 = vadd.f32 %v2188_v6, %v2100_v40  ;;  %v6574_v1 = vld [vmem:[#allocation8 + $0xf4] sm:$0xf0] }
 0x32d   : > { %v2013_v4 = vpop.f32.mrf.mxu1 }
 0x32e   : > { %v2014_v45 = vadd.f32 %v2013_v4, %v1925_v11  ;;  %1963 = vmatmul.bf16.gmra.mxu0 %v7329_v63  ;;  %v2679_v34 = vmax.f32 %v2189_v20, 0.0  ;;  %2141 = vmatmul.bf16.gmra.mxu2 %v7329_v63 }
 0x330   : > { %2052 = vmatmul.bf16.gmra.mxu1 %v7334_v10  ;;  %2230 = vmatmul.bf16.gmra.mxu3 %v7334_v10  ;;  %v7749_v29 = vpack.c.bf16 %v2679_v34, %v2671_v19  ;;  %v2686_v37 = vmax.f32 %v2014_v45, 0.0  ;;  %v6081_v45 = vld [vmem:[#allocation8 + $0x170] sm:$0xf] }
 0x331   : > { %v2102_v54 = vpop.f32.mrf.mxu2 }
 0x332   : > { %8861 = vst [vmem:[#allocation88_spill] sm:$0xff] %v7749_v29  ;;  %v2103_v21 = vadd.f32 %v2102_v54, %v7686_v62 }
 0x333   : > { %v2191_v30 = vpop.f32.mrf.mxu3  ;;  %v1926_v18 = vpop.f32.mrf.mxu0 }
 0x334   : > { %v1927_v35 = vadd.f32 %v1926_v18, %v7677_v36  ;;  %v2192_v31 = vadd.f32 %v2191_v30, %v2103_v21  ;;  %v6590_v21 = vld [vmem:[#allocation8 + $0x174] sm:$0xf0] }
 0x335   : > { %v2015_v46 = vpop.f32.mrf.mxu1  ;;  %v6082_v30 = vor.u32 %v6590_v21, %v6081_v45  ;;  %v6017_v21 = vld [vmem:[#allocation8 + $0xf0] sm:$0xf] }
 0x336   : > { %v2016_v41 = vadd.f32 %v2015_v46, %v1927_v35  ;;  %v2687_v18 = vmax.f32 %v2192_v31, 0.0  ;;  %v5953_v35 = vld [vmem:[#allocation8 + $0x70] sm:$0xf]  ;;  %v6558_v46 = vld [vmem:[#allocation8 + $0x74] sm:$0xf0] }
 0x337   : > { %3938 = vmatpush.bf16.msra.mxu2 %v6082_v30 }
 0x338   : > { %v2694_v14 = vmax.f32 %v2016_v41, 0.0  ;;  %v6145_v41 = vld [vmem:[#allocation8 + $0x1f0] sm:$0xf] }
 0x339   : > { %v2104_v40 = vpop.f32.mrf.mxu2 }
 0x33a   : > { %v7753_v6 = vpack.c.bf16 %v2694_v14, %v2686_v37  ;;  %v2105_v39 = vadd.f32 %v2104_v40, %v7686_v62  ;;  %v5954_v40 = vor.u32 %v6558_v46, %v5953_v35 }
 0x33b   : > { %v2193_v11 = vpop.f32.mrf.mxu3  ;;  %v1929_v4 = vpop.f32.mrf.mxu0 }
 0x33c   : > { %8862 = vst [vmem:[#allocation89_spill] sm:$0xff] %v7753_v6  ;;  %v1930_v20 = vadd.f32 %v1929_v4, %v7677_v36  ;;  %v2194_v34 = vadd.f32 %v2193_v11, %v2105_v39  ;;  %v6606_v39 = vld [vmem:[#allocation8 + $0x1f4] sm:$0xf0]  ;;  %3760 = vmatpush.bf16.msra.mxu0 %v5954_v40 }
 0x33d   : > { %v2018_v19 = vpop.f32.mrf.mxu1 }
 0x33e   : > { %v2019_v54 = vadd.f32 %v2018_v19, %v1930_v20  ;;  %1968 = vmatmul.bf16.gmra.mxu0 %v7349_v0  ;;  %v2695_v29 = vmax.f32 %v2194_v34, 0.0  ;;  %2146 = vmatmul.bf16.gmra.mxu2 %v7349_v0  ;;  %v6146_v20 = vor.u32 %v6606_v39, %v6145_v41 }
 0x340   : > { %2057 = vmatmul.bf16.gmra.mxu1 %v7354_v56  ;;  %2235 = vmatmul.bf16.gmra.mxu3 %v7354_v56  ;;  %v7761_v37 = vpack.c.bf16 %v2695_v29, %v2687_v18  ;;  %v2702_v29 = vmax.f32 %v2019_v54, 0.0 }
 0x341   : > { %v2107_v14 = vpop.f32.mrf.mxu2  ;;  %4027 = vmatpush.bf16.msra.mxu3 %v6146_v20 }
 0x342   : > { %8863 = vst [vmem:[#allocation90_spill] sm:$0xff] %v7761_v37  ;;  %v2108_v31 = vadd.f32 %v2107_v14, %v7686_v62  ;;  %v6018_v37 = vor.u32 %v6574_v1, %v6017_v21 }
 0x343   : > { %v2196_v11 = vpop.f32.mrf.mxu3  ;;  %v1931_v4 = vpop.f32.mrf.mxu0 }
 0x344   : > { %v1932_v19 = vadd.f32 %v1931_v4, %v7677_v36  ;;  %v2197_v6 = vadd.f32 %v2196_v11, %v2108_v31  ;;  %3849 = vmatpush.bf16.msra.mxu1 %v6018_v37 }
 0x345   : > { %v2020_v34 = vpop.f32.mrf.mxu1 }
 0x346   : > { %v2021_v45 = vadd.f32 %v2020_v34, %v1932_v19  ;;  %v2703_v11 = vmax.f32 %v2197_v6, 0.0 }
 0x348   : > { %v2710_v18 = vmax.f32 %v2021_v45, 0.0 }
 0x349   : > { %v2109_v35 = vpop.f32.mrf.mxu2 }
 0x34a   : > { %v7765_v46 = vpack.c.bf16 %v2710_v18, %v2702_v29  ;;  %v2110_v14 = vadd.f32 %v2109_v35, %v7686_v62 }
 0x34b   : > { %v2198_v30 = vpop.f32.mrf.mxu3  ;;  %v1934_v41 = vpop.f32.mrf.mxu0 }
 0x34c   : > { %8864 = vst [vmem:[#allocation91_spill] sm:$0xff] %v7765_v46  ;;  %v1935_v39 = vadd.f32 %v1934_v41, %v7677_v36  ;;  %v2199_v40 = vadd.f32 %v2198_v30, %v2110_v14 }
 0x34d   : > { %v2023_v4 = vpop.f32.mrf.mxu1 }
 0x34e   : > { %v2024_v31 = vadd.f32 %v2023_v4, %v1935_v39  ;;  %1973 = vmatmul.bf16.gmra.mxu0 %v7369_v61  ;;  %v2711_v20 = vmax.f32 %v2199_v40, 0.0  ;;  %2151 = vmatmul.bf16.gmra.mxu2 %v7369_v61 }
 0x350   : > { %2062 = vmatmul.bf16.gmra.mxu1 %v7374_v57  ;;  %2240 = vmatmul.bf16.gmra.mxu3 %v7374_v57  ;;  %v7773_v1 = vpack.c.bf16 %v2711_v20, %v2703_v11  ;;  %v2718_v6 = vmax.f32 %v2024_v31, 0.0  ;;  %v6073_v31 = vld [vmem:[#allocation8 + $0x160] sm:$0xf] }
 0x351   : > { %v2112_v54 = vpop.f32.mrf.mxu2 }
 0x352   : > { %8865 = vst [vmem:[#allocation92_spill] sm:$0xff] %v7773_v1  ;;  %v2113_v37 = vadd.f32 %v2112_v54, %v7686_v62 }
 0x353   : > { %v2201_v19 = vpop.f32.mrf.mxu3  ;;  %v1936_v34 = vpop.f32.mrf.mxu0 }
 0x354   : > { %v1937_v45 = vadd.f32 %v1936_v34, %v7677_v36  ;;  %v2202_v29 = vadd.f32 %v2201_v19, %v2113_v37  ;;  %v6588_v37 = vld [vmem:[#allocation8 + $0x164] sm:$0xf0] }
 0x355   : > { %v2025_v21 = vpop.f32.mrf.mxu1  ;;  %v6074_v19 = vor.u32 %v6588_v37, %v6073_v31  ;;  %v6009_v31 = vld [vmem:[#allocation8 + $0xe0] sm:$0xf]  ;;  %v6572_v37 = vld [vmem:[#allocation8 + $0xe4] sm:$0xf0] }
 0x356   : > { %v2026_v18 = vadd.f32 %v2025_v21, %v1937_v45  ;;  %v2719_v34 = vmax.f32 %v2202_v29, 0.0  ;;  %v5945_v45 = vld [vmem:[#allocation8 + $0x60] sm:$0xf]  ;;  %v6556_v21 = vld [vmem:[#allocation8 + $0x64] sm:$0xf0] }
 0x357   : > { %3939 = vmatpush.bf16.msra.mxu2 %v6074_v19 }
 0x358   : > { %v2726_v35 = vmax.f32 %v2026_v18, 0.0  ;;  %v6137_v18 = vld [vmem:[#allocation8 + $0x1e0] sm:$0xf] }
 0x359   : > { %v2114_v14 = vpop.f32.mrf.mxu2 }
 0x35a   : > { %v7777_v30 = vpack.c.bf16 %v2726_v35, %v2718_v6  ;;  %v2115_v41 = vadd.f32 %v2114_v14, %v7686_v62  ;;  %v5946_v14 = vor.u32 %v6556_v21, %v5945_v45 }
 0x35b   : > { %v2203_v39 = vpop.f32.mrf.mxu3  ;;  %v1939_v4 = vpop.f32.mrf.mxu0 }
 0x35c   : > { %v1940_v40 = vadd.f32 %v1939_v4, %v7677_v36  ;;  %v2204_v20 = vadd.f32 %v2203_v39, %v2115_v41  ;;  %v6604_v41 = vld [vmem:[#allocation8 + $0x1e4] sm:$0xf0]  ;;  %3761 = vmatpush.bf16.msra.mxu0 %v5946_v14 }
 0x35d   : > { %v2028_v11 = vpop.f32.mrf.mxu1 }
 0x35e   : > { %v2029_v54 = vadd.f32 %v2028_v11, %v1940_v40  ;;  %2254 = vmatmul.bf16.vlgmr.msrb.gmra.mxu0 %v7134_v43  ;;  %v2727_v1 = vmax.f32 %v2204_v20, 0.0  ;;  %2432 = vmatmul.bf16.vlgmr.msrb.gmra.mxu2 %v7134_v43  ;;  %v6138_v40 = vor.u32 %v6604_v41, %v6137_v18 }
 0x360   : > { %2343 = vmatmul.bf16.vlgmr.msrb.gmra.mxu1 %v7136_v47  ;;  %2521 = vmatmul.bf16.vlgmr.msrb.gmra.mxu3 %v7136_v47  ;;  %v7785_v6 = vpack.c.bf16 %v2727_v1, %v2719_v34  ;;  %v2734_v1 = vmax.f32 %v2029_v54, 0.0 }
 0x361   : > { %v2117_v35 = vpop.f32.mrf.mxu2  ;;  %4028 = vmatpush.bf16.msra.mxu3 %v6138_v40 }
 0x362   : > { %8866 = vst [vmem:[#allocation93_spill] sm:$0xff] %v7785_v6  ;;  %v2118_v29 = vadd.f32 %v2117_v35, %v7686_v62  ;;  %v6010_v6 = vor.u32 %v6572_v37, %v6009_v31 }
 0x363   : > { %v2206_v39 = vpop.f32.mrf.mxu3  ;;  %v1941_v4 = vpop.f32.mrf.mxu0 }
 0x364   : > { %v1942_v43 = vadd.f32 %v1941_v4, %v7677_v36  ;;  %v2207_v11 = vadd.f32 %v2206_v39, %v2118_v29  ;;  %3850 = vmatpush.bf16.msra.mxu1 %v6010_v6 }
 0x365   : > { %v2030_v47 = vpop.f32.mrf.mxu1 }
 0x366   : > { %v2031_v20 = vadd.f32 %v2030_v47, %v1942_v43  ;;  %v2735_v39 = vmax.f32 %v2207_v11, 0.0 }
 0x368   : > { %v2742_v34 = vmax.f32 %v2031_v20, 0.0 }
 0x369   : > { %v2119_v45 = vpop.f32.mrf.mxu2 }
 0x36a   : > { %v7789_v21 = vpack.c.bf16 %v2742_v34, %v2734_v1  ;;  %v2120_v35 = vadd.f32 %v2119_v45, %v7686_v62 }
 0x36b   : > { %v2208_v19 = vpop.f32.mrf.mxu3  ;;  %v1944_v18 = vpop.f32.mrf.mxu0 }
 0x36c   : > { %v1945_v41 = vadd.f32 %v1944_v18, %v7677_v36  ;;  %v2209_v14 = vadd.f32 %v2208_v19, %v2120_v35 }
 0x36d   : > { %v2033_v4 = vpop.f32.mrf.mxu1 }
 0x36e   : > { %v2034_v29 = vadd.f32 %v2033_v4, %v1945_v41  ;;  %2259 = vmatmul.bf16.gmra.mxu0 %v7146_v2  ;;  %v2743_v40 = vmax.f32 %v2209_v14, 0.0  ;;  %2437 = vmatmul.bf16.gmra.mxu2 %v7146_v2 }
 0x370   : > { %2348 = vmatmul.bf16.gmra.mxu1 %v7148_v3  ;;  %2526 = vmatmul.bf16.gmra.mxu3 %v7148_v3  ;;  %v7797_v54 = vpack.c.bf16 %v2743_v40, %v2735_v39  ;;  %v2750_v11 = vmax.f32 %v2034_v29, 0.0  ;;  %v6065_v29 = vld [vmem:[#allocation8 + $0x150] sm:$0xf] }
 0x371   : > { %v2122_v6 = vpop.f32.mrf.mxu2 }
 0x372   : > { %v2123_v43 = vadd.f32 %v2122_v6, %v7686_v62 }
 0x373   : > { %v2211_v47 = vpop.f32.mrf.mxu3  ;;  %v1946_v20 = vpop.f32.mrf.mxu0 }
 0x374   : > { %v1947_v31 = vadd.f32 %v1946_v20, %v7677_v36  ;;  %v2212_v1 = vadd.f32 %v2211_v47, %v2123_v43  ;;  %v6586_v43 = vld [vmem:[#allocation8 + $0x154] sm:$0xf0]  ;;  %v5937_v20 = vld [vmem:[#allocation8 + $0x50] sm:$0xf] }
 0x375   : > { %v2035_v37 = vpop.f32.mrf.mxu1  ;;  %v6066_v47 = vor.u32 %v6586_v43, %v6065_v29  ;;  %v6570_v29 = vld [vmem:[#allocation8 + $0xd4] sm:$0xf0] }
 0x376   : > { %v2036_v34 = vadd.f32 %v2035_v37, %v1947_v31  ;;  %v2751_v40 = vmax.f32 %v2212_v1, 0.0  ;;  %v6554_v31 = vld [vmem:[#allocation8 + $0x54] sm:$0xf0]  ;;  %v6129_v37 = vld [vmem:[#allocation8 + $0x1d0] sm:$0xf] }
 0x377   : > { %3940 = vmatpush.bf16.msra.mxu2 %v6066_v47 }
 0x378   : > { %v2758_v45 = vmax.f32 %v2036_v34, 0.0 }
 0x379   : > { %v2124_v35 = vpop.f32.mrf.mxu2 }
 0x37a   : > { %v7801_v19 = vpack.c.bf16 %v2758_v45, %v2750_v11  ;;  %v2125_v2 = vadd.f32 %v2124_v35, %v7686_v62  ;;  %v5938_v45 = vor.u32 %v6554_v31, %v5937_v20  ;;  %v6602_v35 = vld [vmem:[#allocation8 + $0x1d4] sm:$0xf0] }
 0x37b   : > { %v2213_v3 = vpop.f32.mrf.mxu3  ;;  %v1949_v18 = vpop.f32.mrf.mxu0 }
 0x37c   : > { %v1950_v41 = vadd.f32 %v1949_v18, %v7677_v36  ;;  %v2214_v14 = vadd.f32 %v2213_v3, %v2125_v2  ;;  %v6130_v18 = vor.u32 %v6602_v35, %v6129_v37  ;;  %3762 = vmatpush.bf16.msra.mxu0 %v5938_v45 }
 0x37d   : > { %v2038_v4 = vpop.f32.mrf.mxu1 }
 0x37e   : > { %v2039_v39 = vadd.f32 %v2038_v4, %v1950_v41  ;;  %2264 = vmatmul.bf16.gmra.mxu0 %v7158_v8  ;;  %v2759_v6 = vmax.f32 %v2214_v14, 0.0  ;;  %2442 = vmatmul.bf16.gmra.mxu2 %v7158_v8  ;;  %v6001_v14 = vld [vmem:[#allocation8 + $0xd0] sm:$0xf] }
 0x37f   : > { %4029 = vmatpush.bf16.msra.mxu3 %v6130_v18  ;;  %v6002_v43 = vor.u32 %v6570_v29, %v6001_v14 }
 0x380   : > { %2353 = vmatmul.bf16.gmra.mxu1 %v7160_v9  ;;  %2531 = vmatmul.bf16.gmra.mxu3 %v7160_v9  ;;  %v7809_v34 = vpack.c.bf16 %v2759_v6, %v2751_v40  ;;  %v2766_v40 = vmax.f32 %v2039_v39, 0.0 }
 0x381   : > { %v2127_v11 = vpop.f32.mrf.mxu2  ;;  %3851 = vmatpush.bf16.msra.mxu1 %v6002_v43 }
 0x382   : > { %v2128_v1 = vadd.f32 %v2127_v11, %v7686_v62 }
 0x383   : > { %v2216_v2 = vpop.f32.mrf.mxu3  ;;  %v1951_v3 = vpop.f32.mrf.mxu0 }
 0x384   : > { %v1952_v8 = vadd.f32 %v1951_v3, %v7677_v36  ;;  %v2217_v41 = vadd.f32 %v2216_v2, %v2128_v1 }
 0x385   : > { %v2040_v9 = vpop.f32.mrf.mxu1 }
 0x386   : > { %v2041_v4 = vadd.f32 %v2040_v9, %v1952_v8  ;;  %v2767_v2 = vmax.f32 %v2217_v41, 0.0 }
 0x388   : > { %v2774_v6 = vmax.f32 %v2041_v4, 0.0 }
 0x389   : > { %v2129_v20 = vpop.f32.mrf.mxu2 }
 0x38a   : > { %v7813_v31 = vpack.c.bf16 %v2774_v6, %v2766_v40  ;;  %v2130_v11 = vadd.f32 %v2129_v20, %v7686_v62 }
 0x38b   : > { %v2218_v47 = vpop.f32.mrf.mxu3  ;;  %v1954_v37 = vpop.f32.mrf.mxu0 }
 0x38c   : > { %v1955_v35 = vadd.f32 %v1954_v37, %v7677_v36  ;;  %v2219_v45 = vadd.f32 %v2218_v47, %v2130_v11 }
 0x38d   : > { %v2043_v3 = vpop.f32.mrf.mxu1 }
 0x38e   : > { %v2044_v1 = vadd.f32 %v2043_v3, %v1955_v35  ;;  %2269 = vmatmul.bf16.gmra.mxu0 %v7170_v26  ;;  %v2775_v18 = vmax.f32 %v2219_v45, 0.0  ;;  %2447 = vmatmul.bf16.gmra.mxu2 %v7170_v26 }
 0x390   : > { %2358 = vmatmul.bf16.gmra.mxu1 %v7172_v27  ;;  %2536 = vmatmul.bf16.gmra.mxu3 %v7172_v27  ;;  %v7821_v39 = vpack.c.bf16 %v2775_v18, %v2767_v2  ;;  %v2782_v41 = vmax.f32 %v2044_v1, 0.0  ;;  %v6057_v1 = vld [vmem:[#allocation8 + $0x140] sm:$0xf] }
 0x391   : > { %v2132_v8 = vpop.f32.mrf.mxu2 }
 0x392   : > { %v2133_v9 = vadd.f32 %v2132_v8, %v7686_v62 }
 0x393   : > { %v2221_v4 = vpop.f32.mrf.mxu3  ;;  %v1956_v14 = vpop.f32.mrf.mxu0 }
 0x394   : > { %v1957_v29 = vadd.f32 %v1956_v14, %v7677_v36  ;;  %v2222_v6 = vadd.f32 %v2221_v4, %v2133_v9  ;;  %v6584_v9 = vld [vmem:[#allocation8 + $0x144] sm:$0xf0]  ;;  %v5929_v14 = vld [vmem:[#allocation8 + $0x40] sm:$0xf] }
 0x395   : > { %v2045_v40 = vpop.f32.mrf.mxu1  ;;  %v6058_v4 = vor.u32 %v6584_v9, %v6057_v1  ;;  %v6568_v1 = vld [vmem:[#allocation8 + $0xc4] sm:$0xf0] }
 0x396   : > { %v2046_v43 = vadd.f32 %v2045_v40, %v1957_v29  ;;  %v2783_v18 = vmax.f32 %v2222_v6, 0.0  ;;  %v6552_v29 = vld [vmem:[#allocation8 + $0x44] sm:$0xf0]  ;;  %v6121_v40 = vld [vmem:[#allocation8 + $0x1c0] sm:$0xf] }
 0x397   : > { %3941 = vmatpush.bf16.msra.mxu2 %v6058_v4 }
 0x398   : > { %v2790_v20 = vmax.f32 %v2046_v43, 0.0 }
 0x399   : > { %v2134_v11 = vpop.f32.mrf.mxu2 }
 0x39a   : > { %v7825_v47 = vpack.c.bf16 %v2790_v20, %v2782_v41  ;;  %v2135_v26 = vadd.f32 %v2134_v11, %v7686_v62  ;;  %v5930_v20 = vor.u32 %v6552_v29, %v5929_v14  ;;  %v6600_v11 = vld [vmem:[#allocation8 + $0x1c4] sm:$0xf0] }
 0x39b   : > { %v2223_v27 = vpop.f32.mrf.mxu3  ;;  %v1959_v37 = vpop.f32.mrf.mxu0 }
 0x39c   : > { %v1960_v35 = vadd.f32 %v1959_v37, %v7677_v36  ;;  %v2224_v45 = vadd.f32 %v2223_v27, %v2135_v26  ;;  %v6122_v37 = vor.u32 %v6600_v11, %v6121_v40  ;;  %3763 = vmatpush.bf16.msra.mxu0 %v5930_v20 }
 0x39d   : > { %v2048_v3 = vpop.f32.mrf.mxu1 }
 0x39e   : > { %v2049_v2 = vadd.f32 %v2048_v3, %v1960_v35  ;;  %2274 = vmatmul.bf16.gmra.mxu0 %v7182_v32  ;;  %v2791_v8 = vmax.f32 %v2224_v45, 0.0  ;;  %2452 = vmatmul.bf16.gmra.mxu2 %v7182_v32  ;;  %v5993_v45 = vld [vmem:[#allocation8 + $0xc0] sm:$0xf] }
 0x39f   : > { %4030 = vmatpush.bf16.msra.mxu3 %v6122_v37  ;;  %v5994_v9 = vor.u32 %v6568_v1, %v5993_v45 }
 0x3a0   : > { %2363 = vmatmul.bf16.gmra.mxu1 %v7184_v33  ;;  %2541 = vmatmul.bf16.gmra.mxu3 %v7184_v33  ;;  %v7833_v43 = vpack.c.bf16 %v2791_v8, %v2783_v18  ;;  %v2798_v18 = vmax.f32 %v2049_v2, 0.0 }
 0x3a1   : > { %v2137_v41 = vpop.f32.mrf.mxu2  ;;  %3852 = vmatpush.bf16.msra.mxu1 %v5994_v9 }
 0x3a2   : > { %v2138_v6 = vadd.f32 %v2137_v41, %v7686_v62 }
 0x3a3   : > { %v2226_v26 = vpop.f32.mrf.mxu3  ;;  %v1961_v27 = vpop.f32.mrf.mxu0 }
 0x3a4   : > { %v1962_v32 = vadd.f32 %v1961_v27, %v7677_v36  ;;  %v2227_v35 = vadd.f32 %v2226_v26, %v2138_v6 }
 0x3a5   : > { %v2050_v33 = vpop.f32.mrf.mxu1 }
 0x3a6   : > { %v2051_v3 = vadd.f32 %v2050_v33, %v1962_v32  ;;  %v2799_v26 = vmax.f32 %v2227_v35, 0.0 }
 0x3a8   : > { %v2806_v8 = vmax.f32 %v2051_v3, 0.0 }
 0x3a9   : > { %v2139_v14 = vpop.f32.mrf.mxu2 }
 0x3aa   : > { %v7837_v29 = vpack.c.bf16 %v2806_v8, %v2798_v18  ;;  %v2140_v41 = vadd.f32 %v2139_v14, %v7686_v62 }
 0x3ab   : > { %v2228_v4 = vpop.f32.mrf.mxu3  ;;  %v1964_v40 = vpop.f32.mrf.mxu0 }
 0x3ac   : > { %8867 = vst [vmem:[#allocation94_spill] sm:$0xff] %v7837_v29  ;;  %v1965_v11 = vadd.f32 %v1964_v40, %v7677_v36  ;;  %v2229_v20 = vadd.f32 %v2228_v4, %v2140_v41 }
 0x3ad   : > { %v2053_v27 = vpop.f32.mrf.mxu1 }
 0x3ae   : > { %v2054_v6 = vadd.f32 %v2053_v27, %v1965_v11  ;;  %2279 = vmatmul.bf16.gmra.mxu0 %v7194_v52  ;;  %v2807_v37 = vmax.f32 %v2229_v20, 0.0  ;;  %2457 = vmatmul.bf16.gmra.mxu2 %v7194_v52 }
 0x3b0   : > { %2368 = vmatmul.bf16.gmra.mxu1 %v7196_v53  ;;  %2546 = vmatmul.bf16.gmra.mxu3 %v7196_v53  ;;  %v7845_v2 = vpack.c.bf16 %v2807_v37, %v2799_v26  ;;  %v2814_v35 = vmax.f32 %v2054_v6, 0.0  ;;  %v6049_v6 = vld [vmem:[#allocation8 + $0x130] sm:$0xf] }
 0x3b1   : > { %v2142_v32 = vpop.f32.mrf.mxu2 }
 0x3b2   : > { %8868 = vst [vmem:[#allocation95_spill] sm:$0xff] %v7845_v2  ;;  %v2143_v33 = vadd.f32 %v2142_v32, %v7686_v62 }
 0x3b3   : > { %v2231_v3 = vpop.f32.mrf.mxu3  ;;  %v1966_v45 = vpop.f32.mrf.mxu0 }
 0x3b4   : > { %v1967_v1 = vadd.f32 %v1966_v45, %v7677_v36  ;;  %v2232_v8 = vadd.f32 %v2231_v3, %v2143_v33  ;;  %v6582_v33 = vld [vmem:[#allocation8 + $0x134] sm:$0xf0]  ;;  %v5921_v45 = vld [vmem:[#allocation8 + $0x30] sm:$0xf] }
 0x3b5   : > { %v2055_v18 = vpop.f32.mrf.mxu1  ;;  %v6050_v3 = vor.u32 %v6582_v33, %v6049_v6  ;;  %v6566_v6 = vld [vmem:[#allocation8 + $0xb4] sm:$0xf0] }
 0x3b6   : > { %v2056_v9 = vadd.f32 %v2055_v18, %v1967_v1  ;;  %v2815_v37 = vmax.f32 %v2232_v8, 0.0  ;;  %v6550_v1 = vld [vmem:[#allocation8 + $0x34] sm:$0xf0]  ;;  %v6113_v18 = vld [vmem:[#allocation8 + $0x1b0] sm:$0xf] }
 0x3b7   : > { %3942 = vmatpush.bf16.msra.mxu2 %v6050_v3 }
 0x3b8   : > { %v2822_v14 = vmax.f32 %v2056_v9, 0.0 }
 0x3b9   : > { %v2144_v41 = vpop.f32.mrf.mxu2 }
 0x3ba   : > { %v7849_v4 = vpack.c.bf16 %v2822_v14, %v2814_v35  ;;  %v2145_v52 = vadd.f32 %v2144_v41, %v7686_v62  ;;  %v5922_v14 = vor.u32 %v6550_v1, %v5921_v45  ;;  %v6598_v41 = vld [vmem:[#allocation8 + $0x1b4] sm:$0xf0] }
 0x3bb   : > { %v2233_v53 = vpop.f32.mrf.mxu3  ;;  %v1969_v40 = vpop.f32.mrf.mxu0 }
 0x3bc   : > { %8869 = vst [vmem:[#allocation96_spill] sm:$0xff] %v7849_v4  ;;  %v1970_v11 = vadd.f32 %v1969_v40, %v7677_v36  ;;  %v2234_v20 = vadd.f32 %v2233_v53, %v2145_v52  ;;  %v6114_v40 = vor.u32 %v6598_v41, %v6113_v18  ;;  %3764 = vmatpush.bf16.msra.mxu0 %v5922_v14 }
 0x3bd   : > { %v2058_v27 = vpop.f32.mrf.mxu1 }
 0x3be   : > { %v2059_v26 = vadd.f32 %v2058_v27, %v1970_v11  ;;  %2284 = vmatmul.bf16.gmra.mxu0 %v7206_v58  ;;  %v2823_v32 = vmax.f32 %v2234_v20, 0.0  ;;  %2462 = vmatmul.bf16.gmra.mxu2 %v7206_v58  ;;  %v5985_v20 = vld [vmem:[#allocation8 + $0xb0] sm:$0xf] }
 0x3bf   : > { %4031 = vmatpush.bf16.msra.mxu3 %v6114_v40  ;;  %v5986_v33 = vor.u32 %v6566_v6, %v5985_v20 }
 0x3c0   : > { %2373 = vmatmul.bf16.gmra.mxu1 %v7208_v59  ;;  %2551 = vmatmul.bf16.gmra.mxu3 %v7208_v59  ;;  %v7857_v9 = vpack.c.bf16 %v2823_v32, %v2815_v37  ;;  %v2830_v37 = vmax.f32 %v2059_v26, 0.0 }
 0x3c1   : > { %v2147_v35 = vpop.f32.mrf.mxu2  ;;  %3853 = vmatpush.bf16.msra.mxu1 %v5986_v33 }
 0x3c2   : > { %8870 = vst [vmem:[#allocation97_spill] sm:$0xff] %v7857_v9  ;;  %v2148_v8 = vadd.f32 %v2147_v35, %v7686_v62 }
 0x3c3   : > { %v2236_v52 = vpop.f32.mrf.mxu3  ;;  %v1971_v53 = vpop.f32.mrf.mxu0 }
 0x3c4   : > { %v1972_v58 = vadd.f32 %v1971_v53, %v7677_v36  ;;  %v2237_v11 = vadd.f32 %v2236_v52, %v2148_v8 }
 0x3c5   : > { %v2060_v59 = vpop.f32.mrf.mxu1 }
 0x3c6   : > { %v2061_v27 = vadd.f32 %v2060_v59, %v1972_v58  ;;  %v2831_v52 = vmax.f32 %v2237_v11, 0.0 }
 0x3c8   : > { %v2838_v32 = vmax.f32 %v2061_v27, 0.0 }
 0x3c9   : > { %v2149_v45 = vpop.f32.mrf.mxu2 }
 0x3ca   : > { %v7861_v1 = vpack.c.bf16 %v2838_v32, %v2830_v37  ;;  %v2150_v35 = vadd.f32 %v2149_v45, %v7686_v62 }
 0x3cb   : > { %v2238_v3 = vpop.f32.mrf.mxu3  ;;  %v1974_v18 = vpop.f32.mrf.mxu0 }
 0x3cc   : > { %8871 = vst [vmem:[#allocation98_spill] sm:$0xff] %v7861_v1  ;;  %v1975_v41 = vadd.f32 %v1974_v18, %v7677_v36  ;;  %v2239_v14 = vadd.f32 %v2238_v3, %v2150_v35  ;;  %v6760_v35 = vld [vmem:[#allocation7] sm:$0xff] }
 0x3cd   : > { %v2063_v53 = vpop.f32.mrf.mxu1  ;;  %v7873_v3 = vperm.slane %v6760_v35, 6 }
 0x3ce   : > { %v2064_v8 = vadd.f32 %v2063_v53, %v1975_v41  ;;  %2289 = vmatmul.bf16.gmra.mxu0 %v7218_v16  ;;  %v2839_v40 = vmax.f32 %v2239_v14, 0.0  ;;  %2467 = vmatmul.bf16.gmra.mxu2 %v7218_v16 }
 0x3d0   : > { %2378 = vmatmul.bf16.gmra.mxu1 %v7220_v17  ;;  %2556 = vmatmul.bf16.gmra.mxu3 %v7220_v17  ;;  %v7869_v26 = vpack.c.bf16 %v2839_v40, %v2831_v52  ;;  %v2846_v11 = vmax.f32 %v2064_v8, 0.0 }
 0x3d1   : > { %v2152_v58 = vpop.f32.mrf.mxu2 }
 0x3d2   : > { %8872 = vst [vmem:[#allocation99_spill] sm:$0xff] %v7869_v26  ;;  %v2153_v59 = vadd.f32 %v2152_v58, %v7686_v62 }
 0x3d3   : > { %v2241_v27 = vpop.f32.mrf.mxu3  ;;  %v1976_v20 = vpop.f32.mrf.mxu0 }
 0x3d4   : > { %v1977_v6 = vadd.f32 %v1976_v20, %v7677_v36  ;;  %v2242_v32 = vadd.f32 %v2241_v27, %v2153_v59  ;;  %v7882_v59 = vperm.slane %v6760_v35, 7  ;;  %v6580_v27 = vld [vmem:[#allocation8 + $0x124] sm:$0xf0] }
 0x3d5   : > { %v2065_v37 = vpop.f32.mrf.mxu1 }
 0x3d6   : > { %v2066_v33 = vadd.f32 %v2065_v37, %v1977_v6  ;;  %v2847_v58 = vmax.f32 %v2242_v32, 0.0  ;;  %v5913_v6 = vld [vmem:[#allocation8 + $0x20] sm:$0xf]  ;;  %v6548_v37 = vld [vmem:[#allocation8 + $0x24] sm:$0xf0] }
 0x3d7   : > { %v6596_v32 = vld [vmem:[#allocation8 + $0x1a4] sm:$0xf0] }
 0x3d8   : > { %v2854_v45 = vmax.f32 %v2066_v33, 0.0  ;;  %v6105_v33 = vld [vmem:[#allocation8 + $0x1a0] sm:$0xf] }
 0x3d9   : > { %v2154_v16 = vpop.f32.mrf.mxu2 }
 0x3da   : > { %v7875_v18 = vpack.c.bf16 %v2854_v45, %v2846_v11  ;;  %v2155_v17 = vadd.f32 %v2154_v16, %v7686_v62  ;;  %v6041_v62 = vld [vmem:[#allocation8 + $0x120] sm:$0xf]  ;;  %v5914_v16 = vor.u32 %v6548_v37, %v5913_v6 }
 0x3db   : > { %v2243_v41 = vpop.f32.mrf.mxu3  ;;  %v2255_v53 = vpop.f32.mrf.mxu0  ;;  %v6042_v20 = vor.u32 %v6580_v27, %v6041_v62  ;;  %v6564_v62 = vld [vmem:[#allocation8 + $0xa4] sm:$0xf0] }
 0x3dc   : > { %8873 = vst [vmem:[#allocation100_spill] sm:$0xff] %v7875_v18  ;;  %v2256_v14 = vadd.f32 %v2255_v53, %v7873_v3  ;;  %v2244_v40 = vadd.f32 %v2243_v41, %v2155_v17  ;;  %3765 = vmatpush.bf16.msra.mxu0 %v5914_v16  ;;  %v8908_v18 = vld [vmem:[#allocation27_spill] sm:$0xff] }
 0x3dd   : > { %v2344_v52 = vpop.f32.mrf.mxu1  ;;  %3943 = vmatpush.bf16.msra.mxu2 %v6042_v20 }
 0x3de   : > { %v2345_v36 = vadd.f32 %v2344_v52, %v2256_v14  ;;  %2294 = vmatmul.bf16.gmra.mxu0 %v7232_v24  ;;  %v2855_v8 = vmax.f32 %v2244_v40, 0.0  ;;  %2472 = vmatmul.bf16.gmra.mxu2 %v7232_v24  ;;  %v6106_v24 = vor.u32 %v6596_v32, %v6105_v33  ;;  %v5977_v40 = vld [vmem:[#allocation8 + $0xa0] sm:$0xf] }
 0x3df   : > { %v5978_v27 = vor.u32 %v6564_v62, %v5977_v40 }
 0x3e0   : > { %2383 = vmatmul.bf16.gmra.mxu1 %v7234_v28  ;;  %2561 = vmatmul.bf16.gmra.mxu3 %v7234_v28  ;;  %v7885_v11 = vpack.c.bf16 %v2855_v8, %v2847_v58  ;;  %v2608_v58 = vmax.f32 %v2345_v36, 0.0 }
 0x3e1   : > { %v2433_v45 = vpop.f32.mrf.mxu2  ;;  %4032 = vmatpush.bf16.msra.mxu3 %v6106_v24  ;;  %3854 = vmatpush.bf16.msra.mxu1 %v5978_v27 }
 0x3e2   : > { %8874 = vst [vmem:[#allocation101_spill] sm:$0xff] %v7885_v11  ;;  %v2434_v17 = vadd.f32 %v2433_v45, %v7882_v59 }
 0x3e3   : > { %v2522_v41 = vpop.f32.mrf.mxu3  ;;  %v2257_v53 = vpop.f32.mrf.mxu0 }
 0x3e4   : > { %v2258_v35 = vadd.f32 %v2257_v53, %v7873_v3  ;;  %v2523_v14 = vadd.f32 %v2522_v41, %v2434_v17 }
 0x3e5   : > { %v2346_v28 = vpop.f32.mrf.mxu1 }
 0x3e6   : > { %v2347_v52 = vadd.f32 %v2346_v28, %v2258_v35  ;;  %v2609_v41 = vmax.f32 %v2523_v14, 0.0 }
 0x3e8   : > { %v2616_v8 = vmax.f32 %v2347_v52, 0.0 }
 0x3e9   : > { %v2435_v37 = vpop.f32.mrf.mxu2 }
 0x3ea   : > { %v7889_v6 = vpack.c.bf16 %v2616_v8, %v2608_v58  ;;  %v2436_v45 = vadd.f32 %v2435_v37, %v7882_v59 }
 0x3eb   : > { %v2524_v20 = vpop.f32.mrf.mxu3  ;;  %v2260_v33 = vpop.f32.mrf.mxu0 }
 0x3ec   : > { %8875 = vst [vmem:[#allocation102_spill] sm:$0xff] %v7889_v6  ;;  %v2261_v32 = vadd.f32 %v2260_v33, %v7873_v3  ;;  %v2525_v16 = vadd.f32 %v2524_v20, %v2436_v45 }
 0x3ed   : > { %v2349_v53 = vpop.f32.mrf.mxu1 }
 0x3ee   : > { %v2350_v17 = vadd.f32 %v2349_v53, %v2261_v32  ;;  %2299 = vmatmul.bf16.gmra.mxu0 %v7251_v7  ;;  %v2617_v24 = vmax.f32 %v2525_v16, 0.0  ;;  %2477 = vmatmul.bf16.gmra.mxu2 %v7251_v7 }
 0x3f0   : > { %2388 = vmatmul.bf16.gmra.mxu1 %v7254_v13  ;;  %2566 = vmatmul.bf16.gmra.mxu3 %v7254_v13  ;;  %v7897_v36 = vpack.c.bf16 %v2617_v24, %v2609_v41  ;;  %v2624_v14 = vmax.f32 %v2350_v17, 0.0  ;;  %v6033_v17 = vld [vmem:[#allocation8 + $0x110] sm:$0xf] }
 0x3f1   : > { %v2438_v35 = vpop.f32.mrf.mxu2 }
 0x3f2   : > { %8876 = vst [vmem:[#allocation103_spill] sm:$0xff] %v7897_v36  ;;  %v2439_v28 = vadd.f32 %v2438_v35, %v7882_v59 }
 0x3f3   : > { %v2527_v52 = vpop.f32.mrf.mxu3  ;;  %v2262_v40 = vpop.f32.mrf.mxu0 }
 0x3f4   : > { %v2263_v62 = vadd.f32 %v2262_v40, %v7873_v3  ;;  %v2528_v8 = vadd.f32 %v2527_v52, %v2439_v28  ;;  %v6578_v28 = vld [vmem:[#allocation8 + $0x114] sm:$0xf0]  ;;  %v5905_v40 = vld [vmem:[#allocation8 + $0x10] sm:$0xf] }
 0x3f5   : > { %v2351_v58 = vpop.f32.mrf.mxu1  ;;  %v6034_v52 = vor.u32 %v6578_v28, %v6033_v17  ;;  %v6562_v17 = vld [vmem:[#allocation8 + $0x94] sm:$0xf0] }
 0x3f6   : > { %v2352_v27 = vadd.f32 %v2351_v58, %v2263_v62  ;;  %v2625_v24 = vmax.f32 %v2528_v8, 0.0  ;;  %v6546_v62 = vld [vmem:[#allocation8 + $0x14] sm:$0xf0]  ;;  %v6097_v58 = vld [vmem:[#allocation8 + $0x190] sm:$0xf] }
 0x3f7   : > { %3944 = vmatpush.bf16.msra.mxu2 %v6034_v52 }
 0x3f8   : > { %v2632_v37 = vmax.f32 %v2352_v27, 0.0 }
 0x3f9   : > { %v2440_v45 = vpop.f32.mrf.mxu2 }
 0x3fa   : > { %v7901_v20 = vpack.c.bf16 %v2632_v37, %v2624_v14  ;;  %v2441_v7 = vadd.f32 %v2440_v45, %v7882_v59  ;;  %v5906_v37 = vor.u32 %v6546_v62, %v5905_v40  ;;  %v6594_v45 = vld [vmem:[#allocation8 + $0x194] sm:$0xf0] }
 0x3fb   : > { %v2529_v13 = vpop.f32.mrf.mxu3  ;;  %v2265_v33 = vpop.f32.mrf.mxu0 }
 0x3fc   : > { %8877 = vst [vmem:[#allocation104_spill] sm:$0xff] %v7901_v20  ;;  %v2266_v32 = vadd.f32 %v2265_v33, %v7873_v3  ;;  %v2530_v16 = vadd.f32 %v2529_v13, %v2441_v7  ;;  %v6098_v33 = vor.u32 %v6594_v45, %v6097_v58  ;;  %3766 = vmatpush.bf16.msra.mxu0 %v5906_v37 }
 0x3fd   : > { %v2354_v53 = vpop.f32.mrf.mxu1 }
 0x3fe   : > { %v2355_v41 = vadd.f32 %v2354_v53, %v2266_v32  ;;  %2304 = vmatmul.bf16.gmra.mxu0 %v7269_v48  ;;  %v2633_v35 = vmax.f32 %v2530_v16, 0.0  ;;  %2482 = vmatmul.bf16.gmra.mxu2 %v7269_v48  ;;  %v5969_v16 = vld [vmem:[#allocation8 + $0x90] sm:$0xf] }
 0x3ff   : > { %4033 = vmatpush.bf16.msra.mxu3 %v6098_v33  ;;  %v5970_v28 = vor.u32 %v6562_v17, %v5969_v16 }
 0x400   : > { %2393 = vmatmul.bf16.gmra.mxu1 %v7274_v55  ;;  %2571 = vmatmul.bf16.gmra.mxu3 %v7274_v55  ;;  %v7909_v27 = vpack.c.bf16 %v2633_v35, %v2625_v24  ;;  %v2640_v24 = vmax.f32 %v2355_v41, 0.0 }
 0x401   : > { %v2443_v14 = vpop.f32.mrf.mxu2  ;;  %3855 = vmatpush.bf16.msra.mxu1 %v5970_v28 }
 0x402   : > { %8878 = vst [vmem:[#allocation105_spill] sm:$0xff] %v7909_v27  ;;  %v2444_v8 = vadd.f32 %v2443_v14, %v7882_v59 }
 0x403   : > { %v2532_v7 = vpop.f32.mrf.mxu3  ;;  %v2267_v13 = vpop.f32.mrf.mxu0 }
 0x404   : > { %v2268_v48 = vadd.f32 %v2267_v13, %v7873_v3  ;;  %v2533_v32 = vadd.f32 %v2532_v7, %v2444_v8 }
 0x405   : > { %v2356_v55 = vpop.f32.mrf.mxu1 }
 0x406   : > { %v2357_v53 = vadd.f32 %v2356_v55, %v2268_v48  ;;  %v2641_v7 = vmax.f32 %v2533_v32, 0.0 }
 0x408   : > { %v2648_v35 = vmax.f32 %v2357_v53, 0.0 }
 0x409   : > { %v2445_v40 = vpop.f32.mrf.mxu2 }
 0x40a   : > { %v7913_v62 = vpack.c.bf16 %v2648_v35, %v2640_v24  ;;  %v2446_v14 = vadd.f32 %v2445_v40, %v7882_v59 }
 0x40b   : > { %v2534_v52 = vpop.f32.mrf.mxu3  ;;  %v2270_v58 = vpop.f32.mrf.mxu0 }
 0x40c   : > { %8879 = vst [vmem:[#allocation106_spill] sm:$0xff] %v7913_v62  ;;  %v2271_v45 = vadd.f32 %v2270_v58, %v7873_v3  ;;  %v2535_v37 = vadd.f32 %v2534_v52, %v2446_v14 }
 0x40d   : > { %v2359_v13 = vpop.f32.mrf.mxu1 }
 0x40e   : > { %v2360_v8 = vadd.f32 %v2359_v13, %v2271_v45  ;;  %2309 = vmatmul.bf16.gmra.mxu0 %v7289_v50  ;;  %v2649_v33 = vmax.f32 %v2535_v37, 0.0  ;;  %2487 = vmatmul.bf16.gmra.mxu2 %v7289_v50 }
 0x410   : > { %2398 = vmatmul.bf16.gmra.mxu1 %v7294_v60  ;;  %2576 = vmatmul.bf16.gmra.mxu3 %v7294_v60  ;;  %v7921_v41 = vpack.c.bf16 %v2649_v33, %v2641_v7  ;;  %v2656_v32 = vmax.f32 %v2360_v8, 0.0  ;;  %v6025_v8 = vld [vmem:[#allocation8 + $0x100] sm:$0xf] }
 0x411   : > { %v2448_v48 = vpop.f32.mrf.mxu2 }
 0x412   : > { %8880 = vst [vmem:[#allocation107_spill] sm:$0xff] %v7921_v41  ;;  %v2449_v55 = vadd.f32 %v2448_v48, %v7882_v59 }
 0x413   : > { %v2537_v53 = vpop.f32.mrf.mxu3  ;;  %v2272_v16 = vpop.f32.mrf.mxu0 }
 0x414   : > { %v2273_v17 = vadd.f32 %v2272_v16, %v7873_v3  ;;  %v2538_v35 = vadd.f32 %v2537_v53, %v2449_v55  ;;  %v6576_v55 = vld [vmem:[#allocation8 + $0x104] sm:$0xf0]  ;;  %v5897_v16 = vld [vmem:[#allocation8] sm:$0xf] }
 0x415   : > { %v2361_v24 = vpop.f32.mrf.mxu1  ;;  %v6026_v53 = vor.u32 %v6576_v55, %v6025_v8  ;;  %v6560_v8 = vld [vmem:[#allocation8 + $0x84] sm:$0xf0] }
 0x416   : > { %v2362_v28 = vadd.f32 %v2361_v24, %v2273_v17  ;;  %v2657_v33 = vmax.f32 %v2538_v35, 0.0  ;;  %v6544_v17 = vld [vmem:[#allocation8 + $0x4] sm:$0xf0]  ;;  %v6089_v24 = vld [vmem:[#allocation8 + $0x180] sm:$0xf] }
 0x417   : > { %3945 = vmatpush.bf16.msra.mxu2 %v6026_v53 }
 0x418   : > { %v2664_v40 = vmax.f32 %v2362_v28, 0.0 }
 0x419   : > { %v2450_v14 = vpop.f32.mrf.mxu2 }
 0x41a   : > { %v7925_v52 = vpack.c.bf16 %v2664_v40, %v2656_v32  ;;  %v2451_v50 = vadd.f32 %v2450_v14, %v7882_v59  ;;  %v5898_v40 = vor.u32 %v6544_v17, %v5897_v16  ;;  %v6592_v14 = vld [vmem:[#allocation8 + $0x184] sm:$0xf0] }
 0x41b   : > { %v2539_v60 = vpop.f32.mrf.mxu3  ;;  %v2275_v58 = vpop.f32.mrf.mxu0 }
 0x41c   : > { %8881 = vst [vmem:[#allocation108_spill] sm:$0xff] %v7925_v52  ;;  %v2276_v45 = vadd.f32 %v2275_v58, %v7873_v3  ;;  %v2540_v37 = vadd.f32 %v2539_v60, %v2451_v50  ;;  %v6090_v58 = vor.u32 %v6592_v14, %v6089_v24  ;;  %3767 = vmatpush.bf16.msra.mxu0 %v5898_v40 }
 0x41d   : > { %v2364_v13 = vpop.f32.mrf.mxu1 }
 0x41e   : > { %v2365_v7 = vadd.f32 %v2364_v13, %v2276_v45  ;;  %2314 = vmatmul.bf16.gmra.mxu0 %v7309_v38  ;;  %v2665_v48 = vmax.f32 %v2540_v37, 0.0  ;;  %2492 = vmatmul.bf16.gmra.mxu2 %v7309_v38  ;;  %v5961_v37 = vld [vmem:[#allocation8 + $0x80] sm:$0xf] }
 0x41f   : > { %4034 = vmatpush.bf16.msra.mxu3 %v6090_v58  ;;  %v5962_v55 = vor.u32 %v6560_v8, %v5961_v37 }
 0x420   : > { %2403 = vmatmul.bf16.gmra.mxu1 %v7314_v44  ;;  %2581 = vmatmul.bf16.gmra.mxu3 %v7314_v44  ;;  %v7933_v28 = vpack.c.bf16 %v2665_v48, %v2657_v33  ;;  %v2672_v33 = vmax.f32 %v2365_v7, 0.0 }
 0x421   : > { %v2453_v32 = vpop.f32.mrf.mxu2  ;;  %3856 = vmatpush.bf16.msra.mxu1 %v5962_v55 }
 0x422   : > { %8882 = vst [vmem:[#allocation109_spill] sm:$0xff] %v7933_v28  ;;  %v2454_v35 = vadd.f32 %v2453_v32, %v7882_v59 }
 0x423   : > { %v2542_v50 = vpop.f32.mrf.mxu3  ;;  %v2277_v60 = vpop.f32.mrf.mxu0 }
 0x424   : > { %v2278_v38 = vadd.f32 %v2277_v60, %v7873_v3  ;;  %v2543_v45 = vadd.f32 %v2542_v50, %v2454_v35 }
 0x425   : > { %v2366_v44 = vpop.f32.mrf.mxu1 }
 0x426   : > { %v2367_v13 = vadd.f32 %v2366_v44, %v2278_v38  ;;  %v2673_v50 = vmax.f32 %v2543_v45, 0.0 }
 0x428   : > { %v2680_v48 = vmax.f32 %v2367_v13, 0.0 }
 0x429   : > { %v2455_v16 = vpop.f32.mrf.mxu2 }
 0x42a   : > { %v7937_v17 = vpack.c.bf16 %v2680_v48, %v2672_v33  ;;  %v2456_v32 = vadd.f32 %v2455_v16, %v7882_v59 }
 0x42b   : > { %v2544_v53 = vpop.f32.mrf.mxu3  ;;  %v2280_v24 = vpop.f32.mrf.mxu0 }
 0x42c   : > { %8883 = vst [vmem:[#allocation110_spill] sm:$0xff] %v7937_v17  ;;  %v2281_v14 = vadd.f32 %v2280_v24, %v7873_v3  ;;  %v2545_v40 = vadd.f32 %v2544_v53, %v2456_v32 }
 0x42d   : > { %v2369_v60 = vpop.f32.mrf.mxu1 }
 0x42e   : > { %v2370_v35 = vadd.f32 %v2369_v60, %v2281_v14  ;;  %2319 = vmatmul.bf16.gmra.mxu0 %v7329_v63  ;;  %v2681_v58 = vmax.f32 %v2545_v40, 0.0  ;;  %2497 = vmatmul.bf16.gmra.mxu2 %v7329_v63 }
 0x430   : > { %2408 = vmatmul.bf16.gmra.mxu1 %v7334_v10  ;;  %2586 = vmatmul.bf16.gmra.mxu3 %v7334_v10  ;;  %v7945_v7 = vpack.c.bf16 %v2681_v58, %v2673_v50  ;;  %v2688_v45 = vmax.f32 %v2370_v35, 0.0  ;;  %v6337_v35 = vld [vmem:[#allocation8 + $0x370] sm:$0xf] }
 0x431   : > { %v2458_v38 = vpop.f32.mrf.mxu2 }
 0x432   : > { %8884 = vst [vmem:[#allocation111_spill] sm:$0xff] %v7945_v7  ;;  %v2459_v44 = vadd.f32 %v2458_v38, %v7882_v59 }
 0x433   : > { %v2547_v13 = vpop.f32.mrf.mxu3  ;;  %v2282_v37 = vpop.f32.mrf.mxu0 }
 0x434   : > { %v2283_v8 = vadd.f32 %v2282_v37, %v7873_v3  ;;  %v2548_v48 = vadd.f32 %v2547_v13, %v2459_v44  ;;  %v6654_v44 = vld [vmem:[#allocation8 + $0x374] sm:$0xf0]  ;;  %v6209_v37 = vld [vmem:[#allocation8 + $0x270] sm:$0xf] }
 0x435   : > { %v2371_v33 = vpop.f32.mrf.mxu1  ;;  %v6338_v13 = vor.u32 %v6654_v44, %v6337_v35  ;;  %v6638_v35 = vld [vmem:[#allocation8 + $0x2f4] sm:$0xf0] }
 0x436   : > { %v2372_v55 = vadd.f32 %v2371_v33, %v2283_v8  ;;  %v2689_v58 = vmax.f32 %v2548_v48, 0.0  ;;  %v6622_v8 = vld [vmem:[#allocation8 + $0x274] sm:$0xf0]  ;;  %v6401_v33 = vld [vmem:[#allocation8 + $0x3f0] sm:$0xf] }
 0x437   : > { %4294 = vmatpush.bf16.msrb.mxu2 %v6338_v13 }
 0x438   : > { %v2696_v16 = vmax.f32 %v2372_v55, 0.0 }
 0x439   : > { %v2460_v32 = vpop.f32.mrf.mxu2 }
 0x43a   : > { %v7949_v53 = vpack.c.bf16 %v2696_v16, %v2688_v45  ;;  %v2461_v63 = vadd.f32 %v2460_v32, %v7882_v59  ;;  %v6210_v16 = vor.u32 %v6622_v8, %v6209_v37  ;;  %v6670_v32 = vld [vmem:[#allocation8 + $0x3f4] sm:$0xf0] }
 0x43b   : > { %v2549_v10 = vpop.f32.mrf.mxu3  ;;  %v2285_v24 = vpop.f32.mrf.mxu0 }
 0x43c   : > { %8885 = vst [vmem:[#allocation112_spill] sm:$0xff] %v7949_v53  ;;  %v2286_v14 = vadd.f32 %v2285_v24, %v7873_v3  ;;  %v2550_v40 = vadd.f32 %v2549_v10, %v2461_v63  ;;  %v6402_v24 = vor.u32 %v6670_v32, %v6401_v33  ;;  %4116 = vmatpush.bf16.msrb.mxu0 %v6210_v16 }
 0x43d   : > { %v2374_v60 = vpop.f32.mrf.mxu1 }
 0x43e   : > { %v2375_v50 = vadd.f32 %v2374_v60, %v2286_v14  ;;  %2324 = vmatmul.bf16.gmra.mxu0 %v7349_v0  ;;  %v2697_v38 = vmax.f32 %v2550_v40, 0.0  ;;  %2502 = vmatmul.bf16.gmra.mxu2 %v7349_v0  ;;  %v6273_v40 = vld [vmem:[#allocation8 + $0x2f0] sm:$0xf] }
 0x43f   : > { %4383 = vmatpush.bf16.msrb.mxu3 %v6402_v24  ;;  %v6274_v44 = vor.u32 %v6638_v35, %v6273_v40 }
 0x440   : > { %2413 = vmatmul.bf16.gmra.mxu1 %v7354_v56  ;;  %2591 = vmatmul.bf16.gmra.mxu3 %v7354_v56  ;;  %v7957_v55 = vpack.c.bf16 %v2697_v38, %v2689_v58  ;;  %v2704_v58 = vmax.f32 %v2375_v50, 0.0 }
 0x441   : > { %v2463_v45 = vpop.f32.mrf.mxu2  ;;  %4205 = vmatpush.bf16.msrb.mxu1 %v6274_v44 }
 0x442   : > { %8886 = vst [vmem:[#allocation113_spill] sm:$0xff] %v7957_v55  ;;  %v2464_v48 = vadd.f32 %v2463_v45, %v7882_v59 }
 0x443   : > { %v2552_v63 = vpop.f32.mrf.mxu3  ;;  %v2287_v10 = vpop.f32.mrf.mxu0 }
 0x444   : > { %v2288_v0 = vadd.f32 %v2287_v10, %v7873_v3  ;;  %v2553_v14 = vadd.f32 %v2552_v63, %v2464_v48 }
 0x445   : > { %v2376_v56 = vpop.f32.mrf.mxu1 }
 0x446   : > { %v2377_v60 = vadd.f32 %v2376_v56, %v2288_v0  ;;  %v2705_v63 = vmax.f32 %v2553_v14, 0.0 }
 0x448   : > { %v2712_v38 = vmax.f32 %v2377_v60, 0.0 }
 0x449   : > { %v2465_v37 = vpop.f32.mrf.mxu2 }
 0x44a   : > { %v7961_v8 = vpack.c.bf16 %v2712_v38, %v2704_v58  ;;  %v2466_v45 = vadd.f32 %v2465_v37, %v7882_v59 }
 0x44b   : > { %v2554_v13 = vpop.f32.mrf.mxu3  ;;  %v2290_v33 = vpop.f32.mrf.mxu0 }
 0x44c   : > { %8887 = vst [vmem:[#allocation114_spill] sm:$0xff] %v7961_v8  ;;  %v2291_v32 = vadd.f32 %v2290_v33, %v7873_v3  ;;  %v2555_v16 = vadd.f32 %v2554_v13, %v2466_v45 }
 0x44d   : > { %v2379_v10 = vpop.f32.mrf.mxu1 }
 0x44e   : > { %v2380_v48 = vadd.f32 %v2379_v10, %v2291_v32  ;;  %2329 = vmatmul.bf16.gmra.mxu0 %v7369_v61  ;;  %v2713_v24 = vmax.f32 %v2555_v16, 0.0  ;;  %2507 = vmatmul.bf16.gmra.mxu2 %v7369_v61 }
 0x450   : > { %2418 = vmatmul.bf16.gmra.mxu1 %v7374_v57  ;;  %2596 = vmatmul.bf16.gmra.mxu3 %v7374_v57  ;;  %v7969_v50 = vpack.c.bf16 %v2713_v24, %v2705_v63  ;;  %v2720_v14 = vmax.f32 %v2380_v48, 0.0  ;;  %v6329_v48 = vld [vmem:[#allocation8 + $0x360] sm:$0xf] }
 0x451   : > { %v2468_v0 = vpop.f32.mrf.mxu2 }
 0x452   : > { %8888 = vst [vmem:[#allocation115_spill] sm:$0xff] %v7969_v50  ;;  %v2469_v56 = vadd.f32 %v2468_v0, %v7882_v59 }
 0x453   : > { %v2557_v60 = vpop.f32.mrf.mxu3  ;;  %v2292_v40 = vpop.f32.mrf.mxu0 }
 0x454   : > { %v2293_v35 = vadd.f32 %v2292_v40, %v7873_v3  ;;  %v2558_v38 = vadd.f32 %v2557_v60, %v2469_v56  ;;  %v6652_v56 = vld [vmem:[#allocation8 + $0x364] sm:$0xf0]  ;;  %v6201_v40 = vld [vmem:[#allocation8 + $0x260] sm:$0xf] }
 0x455   : > { %v2381_v58 = vpop.f32.mrf.mxu1  ;;  %v6330_v60 = vor.u32 %v6652_v56, %v6329_v48  ;;  %v6265_v56 = vld [vmem:[#allocation8 + $0x2e0] sm:$0xf] }
 0x456   : > { %v2382_v44 = vadd.f32 %v2381_v58, %v2293_v35  ;;  %v2721_v24 = vmax.f32 %v2558_v38, 0.0  ;;  %v6620_v35 = vld [vmem:[#allocation8 + $0x264] sm:$0xf0]  ;;  %v6393_v58 = vld [vmem:[#allocation8 + $0x3e0] sm:$0xf] }
 0x457   : > { %4295 = vmatpush.bf16.msrb.mxu2 %v6330_v60 }
 0x458   : > { %v2728_v37 = vmax.f32 %v2382_v44, 0.0 }
 0x459   : > { %v2470_v45 = vpop.f32.mrf.mxu2 }
 0x45a   : > { %v7973_v13 = vpack.c.bf16 %v2728_v37, %v2720_v14  ;;  %v2471_v61 = vadd.f32 %v2470_v45, %v7882_v59  ;;  %v6202_v37 = vor.u32 %v6620_v35, %v6201_v40  ;;  %v6668_v45 = vld [vmem:[#allocation8 + $0x3e4] sm:$0xf0] }
 0x45b   : > { %v2559_v57 = vpop.f32.mrf.mxu3  ;;  %v2295_v33 = vpop.f32.mrf.mxu0 }
 0x45c   : > { %v2296_v32 = vadd.f32 %v2295_v33, %v7873_v3  ;;  %v2560_v16 = vadd.f32 %v2559_v57, %v2471_v61  ;;  %v6394_v33 = vor.u32 %v6668_v45, %v6393_v58  ;;  %4117 = vmatpush.bf16.msrb.mxu0 %v6202_v37 }
 0x45d   : > { %v2384_v10 = vpop.f32.mrf.mxu1 }
 0x45e   : > { %v2385_v63 = vadd.f32 %v2384_v10, %v2296_v32  ;;  %3768 = vmatmul.bf16.vlgmr.msra.gmra.mxu0 %v7249_v5  ;;  %v2729_v0 = vmax.f32 %v2560_v16, 0.0  ;;  %3946 = vmatmul.bf16.vlgmr.msra.gmra.mxu2 %v7497_v25  ;;  %v6632_v5 = vld [vmem:[#allocation8 + $0x2c4] sm:$0xf0] }
 0x45f   : > { %4384 = vmatpush.bf16.msrb.mxu3 %v6394_v33 }
 0x460   : > { %3857 = vmatmul.bf16.vlgmr.msra.gmra.mxu1 %v7261_v23  ;;  %4035 = vmatmul.bf16.vlgmr.msra.gmra.mxu3 %v7505_v42  ;;  %v7981_v44 = vpack.c.bf16 %v2729_v0, %v2721_v24  ;;  %v6636_v42 = vld [vmem:[#allocation8 + $0x2e4] sm:$0xf0]  ;;  %v2736_v24 = vmax.f32 %v2385_v63, 0.0 }
 0x461   : > { %v2473_v14 = vpop.f32.mrf.mxu2  ;;  %v6266_v25 = vor.u32 %v6636_v42, %v6265_v56 }
 0x462   : > { %v2474_v38 = vadd.f32 %v2473_v14, %v7882_v59 }
 0x463   : > { %v2562_v61 = vpop.f32.mrf.mxu3  ;;  %v2297_v57 = vpop.f32.mrf.mxu0  ;;  %4206 = vmatpush.bf16.msrb.mxu1 %v6266_v25 }
 0x464   : > { %v2298_v32 = vadd.f32 %v2297_v57, %v7873_v3  ;;  %v2563_v16 = vadd.f32 %v2562_v61, %v2474_v38 }
 0x465   : > { %v2386_v10 = vpop.f32.mrf.mxu1 }
 0x466   : > { %v2387_v48 = vadd.f32 %v2386_v10, %v2298_v32  ;;  %v2737_v61 = vmax.f32 %v2563_v16, 0.0 }
 0x468   : > { %v2744_v0 = vmax.f32 %v2387_v48, 0.0 }
 0x469   : > { %v2475_v40 = vpop.f32.mrf.mxu2 }
 0x46a   : > { %v7985_v35 = vpack.c.bf16 %v2744_v0, %v2736_v24  ;;  %v2476_v14 = vadd.f32 %v2475_v40, %v7882_v59 }
 0x46b   : > { %v2564_v60 = vpop.f32.mrf.mxu3  ;;  %v2300_v58 = vpop.f32.mrf.mxu0 }
 0x46c   : > { %v2301_v45 = vadd.f32 %v2300_v58, %v7873_v3  ;;  %v2565_v37 = vadd.f32 %v2564_v60, %v2476_v14 }
 0x46d   : > { %v2389_v57 = vpop.f32.mrf.mxu1 }
 0x46e   : > { %v2390_v38 = vadd.f32 %v2389_v57, %v2301_v45  ;;  %3773 = vmatmul.bf16.gmra.mxu0 %v7271_v49  ;;  %v2745_v33 = vmax.f32 %v2565_v37, 0.0  ;;  %3951 = vmatmul.bf16.gmra.mxu2 %v7509_v22  ;;  %v6634_v22 = vld [vmem:[#allocation8 + $0x2d4] sm:$0xf0]  ;;  %v8897_v49 = vld [vmem:[#allocation23_spill] sm:$0xff] }
 0x470   : > { %3862 = vmatmul.bf16.gmra.mxu1 %v7281_v12  ;;  %4040 = vmatmul.bf16.gmra.mxu3 %v7517_v15  ;;  %v7993_v25 = vpack.c.bf16 %v2745_v33, %v2737_v61  ;;  %v2752_v16 = vmax.f32 %v2390_v38, 0.0  ;;  %v8891_v38 = vld [vmem:[#allocation51_spill] sm:$0xff] }
 0x471   : > { %v2478_v42 = vpop.f32.mrf.mxu2 }
 0x472   : > { %8889 = vst [vmem:[#allocation116_spill] sm:$0xff] %v7993_v25  ;;  %v2479_v63 = vadd.f32 %v2478_v42, %v7882_v59 }
 0x473   : > { %v2567_v32 = vpop.f32.mrf.mxu3  ;;  %v2302_v10 = vpop.f32.mrf.mxu0 }
 0x474   : > { %v2303_v48 = vadd.f32 %v2302_v10, %v7873_v3  ;;  %v2568_v24 = vadd.f32 %v2567_v32, %v2479_v63  ;;  %v8890_v63 = vld [vmem:[#allocation20_spill] sm:$0xff] }
 0x475   : > { %v2391_v56 = vpop.f32.mrf.mxu1  ;;  %v8892_v32 = vld [vmem:[#allocation52_spill] sm:$0xff] }
 0x476   : > { %v2392_v0 = vadd.f32 %v2391_v56, %v2303_v48  ;;  %v2753_v10 = vmax.f32 %v2568_v24, 0.0  ;;  %v6321_v48 = vld [vmem:[#allocation8 + $0x350] sm:$0xf]  ;;  %v6650_v56 = vld [vmem:[#allocation8 + $0x354] sm:$0xf0] }
 0x478   : > { %v2760_v40 = vmax.f32 %v2392_v0, 0.0  ;;  %v6322_v0 = vor.u32 %v6650_v56, %v6321_v48  ;;  %v6257_v56 = vld [vmem:[#allocation8 + $0x2d0] sm:$0xf] }
 0x479   : > { %v2480_v14 = vpop.f32.mrf.mxu2  ;;  %v6258_v12 = vor.u32 %v6634_v22, %v6257_v56  ;;  %v8895_v22 = vld [vmem:[#allocation53_spill] sm:$0xff] }
 0x47a   : > { %v7997_v60 = vpack.c.bf16 %v2760_v40, %v2752_v16  ;;  %v2481_v58 = vadd.f32 %v2480_v14, %v7882_v59  ;;  %v6193_v16 = vld [vmem:[#allocation8 + $0x250] sm:$0xf]  ;;  %v6618_v40 = vld [vmem:[#allocation8 + $0x254] sm:$0xf0]  ;;  %4296 = vmatpush.bf16.msrb.mxu2 %v6322_v0 }
 0x47b   : > { %v2569_v45 = vpop.f32.mrf.mxu3  ;;  %v2305_v57 = vpop.f32.mrf.mxu0  ;;  %v6385_v14 = vld [vmem:[#allocation8 + $0x3d0] sm:$0xf]  ;;  %4207 = vmatpush.bf16.msrb.mxu1 %v6258_v12  ;;  %v8896_v12 = vld [vmem:[#allocation54_spill] sm:$0xff] }
 0x47c   : > { %v2306_v37 = vadd.f32 %v2305_v57, %v7873_v3  ;;  %v2570_v33 = vadd.f32 %v2569_v45, %v2481_v58  ;;  %v6194_v45 = vor.u32 %v6618_v40, %v6193_v16 }
 0x47d   : > { %v2394_v61 = vpop.f32.mrf.mxu1 }
 0x47e   : > { %v2395_v42 = vadd.f32 %v2394_v61, %v2306_v37  ;;  %3778 = vmatmul.bf16.gmra.mxu0 %v7291_v51  ;;  %v2761_v15 = vmax.f32 %v2570_v33, 0.0  ;;  %3956 = vmatmul.bf16.gmra.mxu2 %v8891_v38  ;;  %v6666_v37 = vld [vmem:[#allocation8 + $0x3d4] sm:$0xf0] }
 0x47f   : > { %4118 = vmatpush.bf16.msrb.mxu0 %v6194_v45 }
 0x480   : > { %3867 = vmatmul.bf16.gmra.mxu1 %v8890_v63  ;;  %4045 = vmatmul.bf16.gmra.mxu3 %v8892_v32  ;;  %v8005_v57 = vpack.c.bf16 %v2761_v15, %v2753_v10  ;;  %v6386_v63 = vor.u32 %v6666_v37, %v6385_v14  ;;  %v2768_v15 = vmax.f32 %v2395_v42, 0.0  ;;  %v8894_v42 = vld [vmem:[#allocation22_spill] sm:$0xff] }
 0x481   : > { %v2483_v58 = vpop.f32.mrf.mxu2 }
 0x482   : > { %v2484_v24 = vadd.f32 %v2483_v58, %v7882_v59  ;;  %4385 = vmatpush.bf16.msrb.mxu3 %v6386_v63  ;;  %v8893_v63 = vld [vmem:[#allocation21_spill] sm:$0xff] }
 0x483   : > { %v2572_v61 = vpop.f32.mrf.mxu3  ;;  %v2307_v33 = vpop.f32.mrf.mxu0 }
 0x484   : > { %v2308_v38 = vadd.f32 %v2307_v33, %v7873_v3  ;;  %v2573_v51 = vadd.f32 %v2572_v61, %v2484_v24 }
 0x485   : > { %v2396_v32 = vpop.f32.mrf.mxu1 }
 0x486   : > { %v2397_v48 = vadd.f32 %v2396_v32, %v2308_v38  ;;  %v2769_v38 = vmax.f32 %v2573_v51, 0.0 }
 0x488   : > { %v2776_v10 = vmax.f32 %v2397_v48, 0.0 }
 0x489   : > { %v2485_v16 = vpop.f32.mrf.mxu2 }
 0x48a   : > { %v8009_v40 = vpack.c.bf16 %v2776_v10, %v2768_v15  ;;  %v2486_v58 = vadd.f32 %v2485_v16, %v7882_v59 }
 0x48b   : > { %v2574_v0 = vpop.f32.mrf.mxu3  ;;  %v2310_v14 = vpop.f32.mrf.mxu0 }
 0x48c   : > { %v2311_v37 = vadd.f32 %v2310_v14, %v7873_v3  ;;  %v2575_v45 = vadd.f32 %v2574_v0, %v2486_v58 }
 0x48d   : > { %v2399_v33 = vpop.f32.mrf.mxu1 }
 0x48e   : > { %v2400_v24 = vadd.f32 %v2399_v33, %v2311_v37  ;;  %3783 = vmatmul.bf16.gmra.mxu0 %v8893_v63  ;;  %v2777_v32 = vmax.f32 %v2575_v45, 0.0  ;;  %3961 = vmatmul.bf16.gmra.mxu2 %v8895_v22 }
 0x490   : > { %3872 = vmatmul.bf16.gmra.mxu1 %v8894_v42  ;;  %4050 = vmatmul.bf16.gmra.mxu3 %v8896_v12  ;;  %v8017_v61 = vpack.c.bf16 %v2777_v32, %v2769_v38  ;;  %v2784_v51 = vmax.f32 %v2400_v24, 0.0  ;;  %v8899_v24 = vld [vmem:[#allocation55_spill] sm:$0xff] }
 0x491   : > { %v2488_v48 = vpop.f32.mrf.mxu2 }
 0x492   : > { %v2489_v56 = vadd.f32 %v2488_v48, %v7882_v59 }
 0x493   : > { %v2577_v15 = vpop.f32.mrf.mxu3  ;;  %v2312_v10 = vpop.f32.mrf.mxu0 }
 0x494   : > { %v2313_v16 = vadd.f32 %v2312_v10, %v7873_v3  ;;  %v2578_v0 = vadd.f32 %v2577_v15, %v2489_v56  ;;  %v8898_v56 = vld [vmem:[#allocation24_spill] sm:$0xff] }
 0x495   : > { %v2401_v58 = vpop.f32.mrf.mxu1  ;;  %v8900_v15 = vld [vmem:[#allocation56_spill] sm:$0xff] }
 0x496   : > { %v2402_v14 = vadd.f32 %v2401_v58, %v2313_v16  ;;  %v2785_v10 = vmax.f32 %v2578_v0, 0.0  ;;  %v6313_v16 = vld [vmem:[#allocation8 + $0x340] sm:$0xf]  ;;  %v6648_v58 = vld [vmem:[#allocation8 + $0x344] sm:$0xf0] }
 0x498   : > { %v2792_v37 = vmax.f32 %v2402_v14, 0.0  ;;  %v6314_v14 = vor.u32 %v6648_v58, %v6313_v16  ;;  %v6249_v58 = vld [vmem:[#allocation8 + $0x2c0] sm:$0xf] }
 0x499   : > { %v2490_v33 = vpop.f32.mrf.mxu2  ;;  %v6250_v11 = vor.u32 %v6632_v5, %v6249_v58  ;;  %v8904_v5 = vld [vmem:[#allocation57_spill] sm:$0xff] }
 0x49a   : > { %v8021_v45 = vpack.c.bf16 %v2792_v37, %v2784_v51  ;;  %v2491_v22 = vadd.f32 %v2490_v33, %v7882_v59  ;;  %v6185_v51 = vld [vmem:[#allocation8 + $0x240] sm:$0xf]  ;;  %v6616_v37 = vld [vmem:[#allocation8 + $0x244] sm:$0xf0]  ;;  %4297 = vmatpush.bf16.msrb.mxu2 %v6314_v14 }
 0x49b   : > { %v2579_v12 = vpop.f32.mrf.mxu3  ;;  %v2315_v38 = vpop.f32.mrf.mxu0  ;;  %v6377_v33 = vld [vmem:[#allocation8 + $0x3c0] sm:$0xf]  ;;  %4208 = vmatpush.bf16.msrb.mxu1 %v6250_v11  ;;  %v8905_v11 = vld [vmem:[#allocation58_spill] sm:$0xff] }
 0x49c   : > { %v2316_v32 = vadd.f32 %v2315_v38, %v7873_v3  ;;  %v2580_v48 = vadd.f32 %v2579_v12, %v2491_v22  ;;  %v6664_v12 = vld [vmem:[#allocation8 + $0x3c4] sm:$0xf0] }
 0x49d   : > { %v2404_v42 = vpop.f32.mrf.mxu1 }
 0x49e   : > { %v2405_v63 = vadd.f32 %v2404_v42, %v2316_v32  ;;  %3788 = vmatmul.bf16.gmra.mxu0 %v8897_v49  ;;  %v2793_v23 = vmax.f32 %v2580_v48, 0.0  ;;  %3966 = vmatmul.bf16.gmra.mxu2 %v8899_v24  ;;  %v6186_v42 = vor.u32 %v6616_v37, %v6185_v51 }
 0x4a0   : > { %3877 = vmatmul.bf16.gmra.mxu1 %v8898_v56  ;;  %4055 = vmatmul.bf16.gmra.mxu3 %v8900_v15  ;;  %v8029_v38 = vpack.c.bf16 %v2793_v23, %v2785_v10  ;;  %v6378_v56 = vor.u32 %v6664_v12, %v6377_v33  ;;  %v2800_v23 = vmax.f32 %v2405_v63, 0.0  ;;  %v8903_v63 = vld [vmem:[#allocation26_spill] sm:$0xff] }
 0x4a1   : > { %v2493_v22 = vpop.f32.mrf.mxu2  ;;  %4119 = vmatpush.bf16.msrb.mxu0 %v6186_v42 }
 0x4a2   : > { %v2494_v0 = vadd.f32 %v2493_v22, %v7882_v59  ;;  %4386 = vmatpush.bf16.msrb.mxu3 %v6378_v56  ;;  %v8902_v56 = vld [vmem:[#allocation25_spill] sm:$0xff] }
 0x4a3   : > { %v2582_v32 = vpop.f32.mrf.mxu3  ;;  %v2317_v48 = vpop.f32.mrf.mxu0 }
 0x4a4   : > { %v2318_v24 = vadd.f32 %v2317_v48, %v7873_v3  ;;  %v2583_v49 = vadd.f32 %v2582_v32, %v2494_v0 }
 0x4a5   : > { %v2406_v15 = vpop.f32.mrf.mxu1 }
 0x4a6   : > { %v2407_v16 = vadd.f32 %v2406_v15, %v2318_v24  ;;  %v2801_v24 = vmax.f32 %v2583_v49, 0.0 }
 0x4a8   : > { %v2808_v10 = vmax.f32 %v2407_v16, 0.0 }
 0x4a9   : > { %v2495_v51 = vpop.f32.mrf.mxu2 }
 0x4aa   : > { %v8033_v37 = vpack.c.bf16 %v2808_v10, %v2800_v23  ;;  %v2496_v22 = vadd.f32 %v2495_v51, %v7882_v59 }
 0x4ab   : > { %v2584_v14 = vpop.f32.mrf.mxu3  ;;  %v2320_v33 = vpop.f32.mrf.mxu0 }
 0x4ac   : > { %8901 = vst [vmem:[#allocation117_spill] sm:$0xff] %v8033_v37  ;;  %v2321_v12 = vadd.f32 %v2320_v33, %v7873_v3  ;;  %v2585_v42 = vadd.f32 %v2584_v14, %v2496_v22  ;;  %v6624_v37 = vld [vmem:[#allocation8 + $0x284] sm:$0xf0] }
 0x4ad   : > { %v2409_v48 = vpop.f32.mrf.mxu1 }
 0x4ae   : > { %v2410_v0 = vadd.f32 %v2409_v48, %v2321_v12  ;;  %3793 = vmatmul.bf16.gmra.mxu0 %v8902_v56  ;;  %v2809_v15 = vmax.f32 %v2585_v42, 0.0  ;;  %3971 = vmatmul.bf16.gmra.mxu2 %v8904_v5 }
 0x4b0   : > { %3882 = vmatmul.bf16.gmra.mxu1 %v8903_v63  ;;  %4060 = vmatmul.bf16.gmra.mxu3 %v8905_v11  ;;  %v8041_v32 = vpack.c.bf16 %v2809_v15, %v2801_v24  ;;  %v2816_v49 = vmax.f32 %v2410_v0, 0.0  ;;  %v8910_v0 = vld [vmem:[#allocation59_spill] sm:$0xff] }
 0x4b1   : > { %v2498_v16 = vpop.f32.mrf.mxu2 }
 0x4b2   : > { %8906 = vst [vmem:[#allocation118_spill] sm:$0xff] %v8041_v32  ;;  %v2499_v58 = vadd.f32 %v2498_v16, %v7882_v59 }
 0x4b3   : > { %v2587_v23 = vpop.f32.mrf.mxu3  ;;  %v2322_v10 = vpop.f32.mrf.mxu0 }
 0x4b4   : > { %v2323_v51 = vadd.f32 %v2322_v10, %v7873_v3  ;;  %v2588_v14 = vadd.f32 %v2587_v23, %v2499_v58  ;;  %v8909_v58 = vld [vmem:[#allocation28_spill] sm:$0xff] }
 0x4b5   : > { %v2411_v22 = vpop.f32.mrf.mxu1  ;;  %v8911_v23 = vld [vmem:[#allocation60_spill] sm:$0xff] }
 0x4b6   : > { %v2412_v33 = vadd.f32 %v2411_v22, %v2323_v51  ;;  %v2817_v10 = vmax.f32 %v2588_v14, 0.0  ;;  %v6305_v51 = vld [vmem:[#allocation8 + $0x330] sm:$0xf]  ;;  %v6646_v22 = vld [vmem:[#allocation8 + $0x334] sm:$0xf0] }
 0x4b8   : > { %v2824_v12 = vmax.f32 %v2412_v33, 0.0  ;;  %v6306_v33 = vor.u32 %v6646_v22, %v6305_v51  ;;  %v6241_v51 = vld [vmem:[#allocation8 + $0x2b0] sm:$0xf]  ;;  %v6630_v22 = vld [vmem:[#allocation8 + $0x2b4] sm:$0xf0] }
 0x4b9   : > { %v2500_v48 = vpop.f32.mrf.mxu2 }
 0x4ba   : > { %v8045_v42 = vpack.c.bf16 %v2824_v12, %v2816_v49  ;;  %v2501_v5 = vadd.f32 %v2500_v48, %v7882_v59  ;;  %v6177_v49 = vld [vmem:[#allocation8 + $0x230] sm:$0xf]  ;;  %v6614_v12 = vld [vmem:[#allocation8 + $0x234] sm:$0xf0]  ;;  %4298 = vmatpush.bf16.msrb.mxu2 %v6306_v33 }
 0x4bb   : > { %v2589_v11 = vpop.f32.mrf.mxu3  ;;  %v2325_v24 = vpop.f32.mrf.mxu0  ;;  %v6369_v48 = vld [vmem:[#allocation8 + $0x3b0] sm:$0xf] }
 0x4bc   : > { %8907 = vst [vmem:[#allocation119_spill] sm:$0xff] %v8045_v42  ;;  %v2326_v15 = vadd.f32 %v2325_v24, %v7873_v3  ;;  %v2590_v16 = vadd.f32 %v2589_v11, %v2501_v5  ;;  %v6662_v11 = vld [vmem:[#allocation8 + $0x3b4] sm:$0xf0] }
 0x4bd   : > { %v2414_v63 = vpop.f32.mrf.mxu1  ;;  %v6626_v42 = vld [vmem:[#allocation8 + $0x294] sm:$0xf0] }
 0x4be   : > { %v2415_v56 = vadd.f32 %v2414_v63, %v2326_v15  ;;  %3798 = vmatmul.bf16.gmra.mxu0 %v8908_v18  ;;  %v2825_v26 = vmax.f32 %v2590_v16, 0.0  ;;  %3976 = vmatmul.bf16.gmra.mxu2 %v8910_v0  ;;  %v6178_v63 = vor.u32 %v6614_v12, %v6177_v49 }
 0x4c0   : > { %3887 = vmatmul.bf16.gmra.mxu1 %v8909_v58  ;;  %4065 = vmatmul.bf16.gmra.mxu3 %v8911_v23  ;;  %v8053_v24 = vpack.c.bf16 %v2825_v26, %v2817_v10  ;;  %v6370_v58 = vor.u32 %v6662_v11, %v6369_v48  ;;  %v6242_v26 = vor.u32 %v6630_v22, %v6241_v51  ;;  %v2832_v10 = vmax.f32 %v2415_v56, 0.0  ;;  %v8917_v56 = vld [vmem:[#allocation62_spill] sm:$0xff] }
 0x4c1   : > { %v2503_v5 = vpop.f32.mrf.mxu2  ;;  %4120 = vmatpush.bf16.msrb.mxu0 %v6178_v63 }
 0x4c2   : > { %8912 = vst [vmem:[#allocation120_spill] sm:$0xff] %v8053_v24  ;;  %v2504_v14 = vadd.f32 %v2503_v5, %v7882_v59  ;;  %4387 = vmatpush.bf16.msrb.mxu3 %v6370_v58  ;;  %4209 = vmatpush.bf16.msrb.mxu1 %v6242_v26  ;;  %v8914_v58 = vld [vmem:[#allocation29_spill] sm:$0xff] }
 0x4c3   : > { %v2592_v15 = vpop.f32.mrf.mxu3  ;;  %v2327_v16 = vpop.f32.mrf.mxu0 }
 0x4c4   : > { %v2328_v0 = vadd.f32 %v2327_v16, %v7873_v3  ;;  %v2593_v18 = vadd.f32 %v2592_v15, %v2504_v14 }
 0x4c5   : > { %v2416_v23 = vpop.f32.mrf.mxu1 }
 0x4c6   : > { %v2417_v1 = vadd.f32 %v2416_v23, %v2328_v0  ;;  %v2833_v15 = vmax.f32 %v2593_v18, 0.0  ;;  %v8915_v23 = vld [vmem:[#allocation30_spill] sm:$0xff] }
 0x4c7   : > { %v3114_v18 = vld [vmem:[%s8670_s4] sm:$0x3] }
 0x4c8   : > { %v2840_v24 = vmax.f32 %v2417_v1, 0.0  ;;  %v8916_v1 = vld [vmem:[#allocation61_spill] sm:$0xff] }
 0x4c9   : > { %v2505_v49 = vpop.f32.mrf.mxu2 }
 0x4ca   : > { %v8057_v12 = vpack.c.bf16 %v2840_v24, %v2832_v10  ;;  %v2506_v5 = vadd.f32 %v2505_v49, %v7882_v59 }
 0x4cb   : > { %v2594_v33 = vpop.f32.mrf.mxu3  ;;  %v2330_v48 = vpop.f32.mrf.mxu0 }
 0x4cc   : > { %8913 = vst [vmem:[#allocation121_spill] sm:$0xff] %v8057_v12  ;;  %v2331_v11 = vadd.f32 %v2330_v48, %v7873_v3  ;;  %v2595_v63 = vadd.f32 %v2594_v33, %v2506_v5 }
 0x4cd   : > { %v2419_v16 = vpop.f32.mrf.mxu1 }
 0x4ce   : > { %v2420_v14 = vadd.f32 %v2419_v16, %v2331_v11  ;;  %3803 = vmatmul.bf16.gmra.mxu0 %v8914_v58  ;;  %v2841_v0 = vmax.f32 %v2595_v63, 0.0  ;;  %3981 = vmatmul.bf16.gmra.mxu2 %v8916_v1  ;;  %v8072_v63 = vperm.slane %v3114_v18, 0  ;;  %v8923_v18 = vld [vmem:[#allocation64_spill] sm:$0xff] }
 0x4d0   : > { %3892 = vmatmul.bf16.gmra.mxu1 %v8915_v23  ;;  %4070 = vmatmul.bf16.gmra.mxu3 %v8917_v56  ;;  %v8065_v24 = vpack.c.bf16 %v2841_v0, %v2833_v15  ;;  %v2848_v11 = vmax.f32 %v2420_v14, 0.0  ;;  %v8920_v23 = vld [vmem:[#allocation31_spill] sm:$0xff]  ;;  %v8921_v14 = vld [vmem:[#allocation32_spill] sm:$0xff] }
 0x4d1   : > { %v2508_v51 = vpop.f32.mrf.mxu2 }
 0x4d2   : > { %8918 = vst [vmem:[#allocation122_spill] sm:$0xff] %v8065_v24  ;;  %v2509_v22 = vadd.f32 %v2508_v51, %v7882_v59 }
 0x4d3   : > { %v2597_v26 = vpop.f32.mrf.mxu3  ;;  %v2332_v10 = vpop.f32.mrf.mxu0 }
 0x4d4   : > { %v2333_v49 = vadd.f32 %v2332_v10, %v7873_v3  ;;  %v2598_v33 = vadd.f32 %v2597_v26, %v2509_v22 }
 0x4d5   : > { %v2421_v5 = vpop.f32.mrf.mxu1 }
 0x4d6   : > { %v2422_v48 = vadd.f32 %v2421_v5, %v2333_v49  ;;  %v2849_v58 = vmax.f32 %v2598_v33, 0.0  ;;  %v8922_v5 = vld [vmem:[#allocation63_spill] sm:$0xff] }
 0x4d8   : > { %v2856_v16 = vmax.f32 %v2422_v48, 0.0  ;;  %v6297_v48 = vld [vmem:[#allocation8 + $0x320] sm:$0xf] }
 0x4d9   : > { %v2510_v15 = vpop.f32.mrf.mxu2 }
 0x4da   : > { %v8074_v0 = vpack.c.bf16 %v2856_v16, %v2848_v11  ;;  %v2511_v51 = vadd.f32 %v2510_v15, %v7882_v59  ;;  %v6644_v11 = vld [vmem:[#allocation8 + $0x324] sm:$0xf0]  ;;  %v6169_v59 = vld [vmem:[#allocation8 + $0x220] sm:$0xf] }
 0x4db   : > { %v2599_v56 = vpop.f32.mrf.mxu3  ;;  %v3769_v1 = vpop.f32.mrf.mxu0  ;;  %v6298_v16 = vor.u32 %v6644_v11, %v6297_v48  ;;  %v6612_v15 = vld [vmem:[#allocation8 + $0x224] sm:$0xf0]  ;;  %v6233_v48 = vld [vmem:[#allocation8 + $0x2a0] sm:$0xf] }
 0x4dc   : > { %8919 = vst [vmem:[#allocation123_spill] sm:$0xff] %v8074_v0  ;;  %v3770_v3 = vadd.f32 %v3769_v1, %v8072_v63  ;;  %v2600_v22 = vadd.f32 %v2599_v56, %v2511_v51  ;;  %v6361_v0 = vld [vmem:[#allocation8 + $0x3a0] sm:$0xf]  ;;  %v6660_v1 = vld [vmem:[#allocation8 + $0x3a4] sm:$0xf0]  ;;  %v6170_v51 = vor.u32 %v6612_v15, %v6169_v59 }
 0x4dd   : > { %v3858_v10 = vpop.f32.mrf.mxu1  ;;  %4299 = vmatpush.bf16.msrb.mxu2 %v6298_v16  ;;  %v6628_v11 = vld [vmem:[#allocation8 + $0x2a4] sm:$0xf0] }
 0x4de   : > { %v3859_v26 = vadd.f32 %v3858_v10, %v3770_v3  ;;  %3808 = vmatmul.bf16.gmra.mxu0 %v8920_v23  ;;  %v2857_v49 = vmax.f32 %v2600_v22, 0.0  ;;  %3986 = vmatmul.bf16.gmra.mxu2 %v8922_v5  ;;  %v6362_v3 = vor.u32 %v6660_v1, %v6361_v0  ;;  %v6234_v12 = vor.u32 %v6628_v11, %v6233_v48 }
 0x4df   : > { %4121 = vmatpush.bf16.msrb.mxu0 %v6170_v51  ;;  %v8926_v51 = vld [vmem:[#allocation34_spill] sm:$0xff] }
 0x4e0   : > { %3897 = vmatmul.bf16.gmra.mxu1 %v8921_v14  ;;  %4075 = vmatmul.bf16.gmra.mxu3 %v8923_v18  ;;  %v8082_v24 = vpack.c.bf16 %v2857_v49, %v2849_v58 }
 0x4e1   : > { %v3947_v56 = vpop.f32.mrf.mxu2  ;;  %4388 = vmatpush.bf16.msrb.mxu3 %v6362_v3  ;;  %4210 = vmatpush.bf16.msrb.mxu1 %v6234_v12  ;;  %v8927_v3 = vld [vmem:[#allocation65_spill] sm:$0xff] }
 0x4e2   : > { %8924 = vst [vmem:[#allocation124_spill] sm:$0xff] %v8082_v24  ;;  %v3948_v33 = vadd.f32 %v3947_v56, %v3859_v26  ;;  %v8925_v56 = vld [vmem:[#allocation33_spill] sm:$0xff] }
 0x4e3   : > { %v4036_v10 = vpop.f32.mrf.mxu3  ;;  %v3771_v22 = vpop.f32.mrf.mxu0 }
 0x4e4   : > { %v3772_v5 = vadd.f32 %v3771_v22, %v8072_v63  ;;  %v8085_v18 = vadd.f32 %v4036_v10, %v3948_v33  ;;  %v8928_v33 = vld [vmem:[#allocation66_spill] sm:$0xff] }
 0x4e5   : > { %v3860_v14 = vpop.f32.mrf.mxu1 }
 0x4e6   : > { %v3861_v23 = vadd.f32 %v3860_v14, %v3772_v5 }
 0x4e9   : > { %v3949_v58 = vpop.f32.mrf.mxu2 }
 0x4ea   : > { %v3950_v49 = vadd.f32 %v3949_v58, %v3861_v23 }
 0x4eb   : > { %v4038_v59 = vpop.f32.mrf.mxu3  ;;  %v3774_v0 = vpop.f32.mrf.mxu0 }
 0x4ec   : > { %v3775_v26 = vadd.f32 %v3774_v0, %v8072_v63  ;;  %v8088_v16 = vadd.f32 %v4038_v59, %v3950_v49 }
 0x4ed   : > { %v3863_v15 = vpop.f32.mrf.mxu1 }
 0x4ee   : > { %v3864_v1 = vadd.f32 %v3863_v15, %v3775_v26  ;;  %3813 = vmatmul.bf16.gmra.mxu0 %v8925_v56  ;;  %3991 = vmatmul.bf16.gmra.mxu2 %v8927_v3  ;;  %v6658_v56 = vld [vmem:[#allocation8 + $0x394] sm:$0xf0] }
 0x4f0   : > { %3902 = vmatmul.bf16.gmra.mxu1 %v8926_v51  ;;  %4080 = vmatmul.bf16.gmra.mxu3 %v8928_v33  ;;  %v8929_v51 = vld [vmem:[#allocation35_spill] sm:$0xff] }
 0x4f1   : > { %v3952_v14 = vpop.f32.mrf.mxu2 }
 0x4f2   : > { %v3953_v12 = vadd.f32 %v3952_v14, %v3864_v1  ;;  %v8930_v1 = vld [vmem:[#allocation36_spill] sm:$0xff]  ;;  %v8931_v14 = vld [vmem:[#allocation67_spill] sm:$0xff] }
 0x4f3   : > { %v4041_v5 = vpop.f32.mrf.mxu3  ;;  %v3776_v23 = vpop.f32.mrf.mxu0 }
 0x4f4   : > { %v3777_v10 = vadd.f32 %v3776_v23, %v8072_v63  ;;  %v8095_v48 = vadd.f32 %v4041_v5, %v3953_v12  ;;  %v8932_v23 = vld [vmem:[#allocation68_spill] sm:$0xff]  ;;  %v6289_v12 = vld [vmem:[#allocation8 + $0x310] sm:$0xf]  ;;  %v6642_v5 = vld [vmem:[#allocation8 + $0x314] sm:$0xf0] }
 0x4f5   : > { %v3865_v22 = vpop.f32.mrf.mxu1 }
 0x4f6   : > { %v3866_v11 = vadd.f32 %v3865_v22, %v3777_v10  ;;  %v6161_v10 = vld [vmem:[#allocation8 + $0x210] sm:$0xf]  ;;  %v6290_v22 = vor.u32 %v6642_v5, %v6289_v12 }
 0x4f8   : > { %4300 = vmatpush.bf16.msrb.mxu2 %v6290_v22 }
 0x4f9   : > { %v3954_v58 = vpop.f32.mrf.mxu2 }
 0x4fa   : > { %v3955_v49 = vadd.f32 %v3954_v58, %v3866_v11  ;;  %v6610_v11 = vld [vmem:[#allocation8 + $0x214] sm:$0xf0]  ;;  %v6353_v58 = vld [vmem:[#allocation8 + $0x390] sm:$0xf] }
 0x4fb   : > { %v4043_v59 = vpop.f32.mrf.mxu3  ;;  %v3779_v0 = vpop.f32.mrf.mxu0  ;;  %v6162_v24 = vor.u32 %v6610_v11, %v6161_v10 }
 0x4fc   : > { %v3780_v26 = vadd.f32 %v3779_v0, %v8072_v63  ;;  %v8098_v3 = vadd.f32 %v4043_v59, %v3955_v49  ;;  %v6354_v49 = vor.u32 %v6658_v56, %v6353_v58 }
 0x4fd   : > { %v3868_v15 = vpop.f32.mrf.mxu1  ;;  %4122 = vmatpush.bf16.msrb.mxu0 %v6162_v24  ;;  %v8934_v24 = vld [vmem:[#allocation38_spill] sm:$0xff] }
 0x4fe   : > { %v3869_v33 = vadd.f32 %v3868_v15, %v3780_v26  ;;  %3818 = vmatmul.bf16.gmra.mxu0 %v8929_v51  ;;  %3996 = vmatmul.bf16.gmra.mxu2 %v8931_v14  ;;  %v6225_v14 = vld [vmem:[#allocation8 + $0x290] sm:$0xf] }
 0x4ff   : > { %4389 = vmatpush.bf16.msrb.mxu3 %v6354_v49  ;;  %v6226_v5 = vor.u32 %v6626_v42, %v6225_v14  ;;  %v8935_v49 = vld [vmem:[#allocation69_spill] sm:$0xff] }
 0x500   : > { %3907 = vmatmul.bf16.gmra.mxu1 %v8930_v1  ;;  %4085 = vmatmul.bf16.gmra.mxu3 %v8932_v23 }
 0x501   : > { %v3957_v0 = vpop.f32.mrf.mxu2  ;;  %4211 = vmatpush.bf16.msrb.mxu1 %v6226_v5 }
 0x502   : > { %v3958_v59 = vadd.f32 %v3957_v0, %v3869_v33  ;;  %v8933_v0 = vld [vmem:[#allocation37_spill] sm:$0xff] }
 0x503   : > { %v4046_v26 = vpop.f32.mrf.mxu3  ;;  %v3781_v15 = vpop.f32.mrf.mxu0 }
 0x504   : > { %v3782_v1 = vadd.f32 %v3781_v15, %v8072_v63  ;;  %v8105_v23 = vadd.f32 %v4046_v26, %v3958_v59  ;;  %v8936_v59 = vld [vmem:[#allocation70_spill] sm:$0xff] }
 0x505   : > { %v3870_v51 = vpop.f32.mrf.mxu1 }
 0x506   : > { %v3871_v12 = vadd.f32 %v3870_v51, %v3782_v1 }
 0x509   : > { %v3959_v9 = vpop.f32.mrf.mxu2 }
 0x50a   : > { %v3960_v4 = vadd.f32 %v3959_v9, %v3871_v12 }
 0x50b   : > { %v4048_v10 = vpop.f32.mrf.mxu3  ;;  %v3784_v56 = vpop.f32.mrf.mxu0 }
 0x50c   : > { %v3785_v33 = vadd.f32 %v3784_v56, %v8072_v63  ;;  %v8108_v22 = vadd.f32 %v4048_v10, %v3960_v4 }
 0x50d   : > { %v3873_v11 = vpop.f32.mrf.mxu1 }
 0x50e   : > { %v3874_v58 = vadd.f32 %v3873_v11, %v3785_v33  ;;  %3823 = vmatmul.bf16.gmra.mxu0 %v8933_v0  ;;  %4001 = vmatmul.bf16.gmra.mxu2 %v8935_v49  ;;  %v6656_v0 = vld [vmem:[#allocation8 + $0x384] sm:$0xf0] }
 0x510   : > { %3912 = vmatmul.bf16.gmra.mxu1 %v8934_v24  ;;  %4090 = vmatmul.bf16.gmra.mxu3 %v8936_v59  ;;  %v8937_v24 = vld [vmem:[#allocation39_spill] sm:$0xff] }
 0x511   : > { %v3962_v42 = vpop.f32.mrf.mxu2 }
 0x512   : > { %v3963_v51 = vadd.f32 %v3962_v42, %v3874_v58  ;;  %v8938_v58 = vld [vmem:[#allocation40_spill] sm:$0xff]  ;;  %v8939_v42 = vld [vmem:[#allocation71_spill] sm:$0xff] }
 0x513   : > { %v4051_v1 = vpop.f32.mrf.mxu3  ;;  %v3786_v9 = vpop.f32.mrf.mxu0 }
 0x514   : > { %v3787_v14 = vadd.f32 %v3786_v9, %v8072_v63  ;;  %v8115_v15 = vadd.f32 %v4051_v1, %v3963_v51  ;;  %v8940_v9 = vld [vmem:[#allocation72_spill] sm:$0xff]  ;;  %v6281_v51 = vld [vmem:[#allocation8 + $0x300] sm:$0xf] }
 0x515   : > { %v3875_v26 = vpop.f32.mrf.mxu1  ;;  %v6640_v1 = vld [vmem:[#allocation8 + $0x304] sm:$0xf0] }
 0x516   : > { %v3876_v4 = vadd.f32 %v3875_v26, %v3787_v14  ;;  %v6153_v14 = vld [vmem:[#allocation8 + $0x200] sm:$0xf]  ;;  %v6282_v26 = vor.u32 %v6640_v1, %v6281_v51 }
 0x518   : > { %4301 = vmatpush.bf16.msrb.mxu2 %v6282_v26 }
 0x519   : > { %v3964_v12 = vpop.f32.mrf.mxu2 }
 0x51a   : > { %v3965_v5 = vadd.f32 %v3964_v12, %v3876_v4  ;;  %v6608_v4 = vld [vmem:[#allocation8 + $0x204] sm:$0xf0]  ;;  %v6345_v12 = vld [vmem:[#allocation8 + $0x380] sm:$0xf] }
 0x51b   : > { %v4053_v10 = vpop.f32.mrf.mxu3  ;;  %v3789_v56 = vpop.f32.mrf.mxu0  ;;  %v6154_v32 = vor.u32 %v6608_v4, %v6153_v14 }
 0x51c   : > { %v3790_v33 = vadd.f32 %v3789_v56, %v8072_v63  ;;  %v8118_v49 = vadd.f32 %v4053_v10, %v3965_v5  ;;  %v6346_v5 = vor.u32 %v6656_v0, %v6345_v12 }
 0x51d   : > { %v3878_v11 = vpop.f32.mrf.mxu1  ;;  %4123 = vmatpush.bf16.msrb.mxu0 %v6154_v32  ;;  %v8944_v32 = vld [vmem:[#allocation42_spill] sm:$0xff] }
 0x51e   : > { %v3879_v59 = vadd.f32 %v3878_v11, %v3790_v33  ;;  %3828 = vmatmul.bf16.gmra.mxu0 %v8937_v24  ;;  %4006 = vmatmul.bf16.gmra.mxu2 %v8939_v42  ;;  %v6217_v42 = vld [vmem:[#allocation8 + $0x280] sm:$0xf] }
 0x51f   : > { %4390 = vmatpush.bf16.msrb.mxu3 %v6346_v5  ;;  %v6218_v1 = vor.u32 %v6624_v37, %v6217_v42  ;;  %v8945_v5 = vld [vmem:[#allocation73_spill] sm:$0xff] }
 0x520   : > { %3917 = vmatmul.bf16.gmra.mxu1 %v8938_v58  ;;  %4095 = vmatmul.bf16.gmra.mxu3 %v8940_v9 }
 0x521   : > { %v3967_v56 = vpop.f32.mrf.mxu2  ;;  %4212 = vmatpush.bf16.msrb.mxu1 %v6218_v1 }
 0x522   : > { %v3968_v10 = vadd.f32 %v3967_v56, %v3879_v59  ;;  %v8943_v56 = vld [vmem:[#allocation41_spill] sm:$0xff] }
 0x523   : > { %v4056_v33 = vpop.f32.mrf.mxu3  ;;  %v3791_v11 = vpop.f32.mrf.mxu0 }
 0x524   : > { %v3792_v58 = vadd.f32 %v3791_v11, %v8072_v63  ;;  %v8125_v9 = vadd.f32 %v4056_v33, %v3968_v10  ;;  %v8946_v10 = vld [vmem:[#allocation74_spill] sm:$0xff] }
 0x525   : > { %v3880_v24 = vpop.f32.mrf.mxu1 }
 0x526   : > { %8941 = vst [vmem:[#allocation125_spill] sm:$0xff] %v8125_v9  ;;  %v3881_v51 = vadd.f32 %v3880_v24, %v3792_v58 }
 0x529   : > { %v3969_v2 = vpop.f32.mrf.mxu2 }
 0x52a   : > { %v3970_v29 = vadd.f32 %v3969_v2, %v3881_v51 }
 0x52b   : > { %v4058_v14 = vpop.f32.mrf.mxu3  ;;  %v3794_v0 = vpop.f32.mrf.mxu0 }
 0x52c   : > { %v3795_v59 = vadd.f32 %v3794_v0, %v8072_v63  ;;  %v8128_v26 = vadd.f32 %v4058_v14, %v3970_v29 }
 0x52d   : > { %v3883_v4 = vpop.f32.mrf.mxu1 }
 0x52e   : > { %8942 = vst [vmem:[#allocation126_spill] sm:$0xff] %v8128_v26  ;;  %v3884_v12 = vadd.f32 %v3883_v4, %v3795_v59  ;;  %3833 = vmatmul.bf16.gmra.mxu0 %v8943_v56  ;;  %4011 = vmatmul.bf16.gmra.mxu2 %v8945_v5  ;;  %v6147_v56 = vld [vmem:[#allocation8 + $0x1f8] sm:$0xf0] }
 0x530   : > { %3922 = vmatmul.bf16.gmra.mxu1 %v8944_v32  ;;  %4100 = vmatmul.bf16.gmra.mxu3 %v8946_v10  ;;  %v8949_v32 = vld [vmem:[#allocation43_spill] sm:$0xff] }
 0x531   : > { %v3972_v37 = vpop.f32.mrf.mxu2 }
 0x532   : > { %v3973_v24 = vadd.f32 %v3972_v37, %v3884_v12  ;;  %v8950_v12 = vld [vmem:[#allocation44_spill] sm:$0xff]  ;;  %v8951_v37 = vld [vmem:[#allocation75_spill] sm:$0xff] }
 0x533   : > { %v4061_v58 = vpop.f32.mrf.mxu3  ;;  %v3796_v2 = vpop.f32.mrf.mxu0 }
 0x534   : > { %v3797_v42 = vadd.f32 %v3796_v2, %v8072_v63  ;;  %v8135_v11 = vadd.f32 %v4061_v58, %v3973_v24  ;;  %v8952_v2 = vld [vmem:[#allocation76_spill] sm:$0xff]  ;;  %v6589_v24 = vld [vmem:[#allocation8 + $0x174] sm:$0xf]  ;;  %v6083_v58 = vld [vmem:[#allocation8 + $0x178] sm:$0xf0] }
 0x535   : > { %v3885_v33 = vpop.f32.mrf.mxu1 }
 0x536   : > { %8947 = vst [vmem:[#allocation127_spill] sm:$0xff] %v8135_v11  ;;  %v3886_v29 = vadd.f32 %v3885_v33, %v3797_v42  ;;  %v6557_v42 = vld [vmem:[#allocation8 + $0x74] sm:$0xf]  ;;  %v6086_v33 = vor.u32 %v6589_v24, %v6083_v58 }
 0x538   : > { %4650 = vmatpush.bf16.msra.mxu2 %v6086_v33 }
 0x539   : > { %v3974_v51 = vpop.f32.mrf.mxu2 }
 0x53a   : > { %v3975_v1 = vadd.f32 %v3974_v51, %v3886_v29  ;;  %v5955_v29 = vld [vmem:[#allocation8 + $0x78] sm:$0xf0]  ;;  %v6605_v51 = vld [vmem:[#allocation8 + $0x1f4] sm:$0xf] }
 0x53b   : > { %v4063_v14 = vpop.f32.mrf.mxu3  ;;  %v3799_v0 = vpop.f32.mrf.mxu0  ;;  %v5958_v11 = vor.u32 %v6557_v42, %v5955_v29 }
 0x53c   : > { %v3800_v59 = vadd.f32 %v3799_v0, %v8072_v63  ;;  %v8138_v5 = vadd.f32 %v4063_v14, %v3975_v1  ;;  %v6150_v1 = vor.u32 %v6605_v51, %v6147_v56 }
 0x53d   : > { %v3888_v4 = vpop.f32.mrf.mxu1  ;;  %4472 = vmatpush.bf16.msra.mxu0 %v5958_v11  ;;  %v8954_v11 = vld [vmem:[#allocation46_spill] sm:$0xff] }
 0x53e   : > { %8948 = vst [vmem:[#allocation128_spill] sm:$0xff] %v8138_v5  ;;  %v3889_v10 = vadd.f32 %v3888_v4, %v3800_v59  ;;  %3838 = vmatmul.bf16.gmra.mxu0 %v8949_v32  ;;  %4016 = vmatmul.bf16.gmra.mxu2 %v8951_v37  ;;  %v6573_v37 = vld [vmem:[#allocation8 + $0xf4] sm:$0xf]  ;;  %v6019_v5 = vld [vmem:[#allocation8 + $0xf8] sm:$0xf0] }
 0x53f   : > { %4739 = vmatpush.bf16.msra.mxu3 %v6150_v1  ;;  %v6022_v58 = vor.u32 %v6573_v37, %v6019_v5  ;;  %v8955_v1 = vld [vmem:[#allocation77_spill] sm:$0xff] }
 0x540   : > { %3927 = vmatmul.bf16.gmra.mxu1 %v8950_v12  ;;  %4105 = vmatmul.bf16.gmra.mxu3 %v8952_v2 }
 0x541   : > { %v3977_v0 = vpop.f32.mrf.mxu2  ;;  %4561 = vmatpush.bf16.msra.mxu1 %v6022_v58 }
 0x542   : > { %v3978_v14 = vadd.f32 %v3977_v0, %v3889_v10  ;;  %v8953_v0 = vld [vmem:[#allocation45_spill] sm:$0xff] }
 0x543   : > { %v4066_v59 = vpop.f32.mrf.mxu3  ;;  %v3801_v4 = vpop.f32.mrf.mxu0 }
 0x544   : > { %v3802_v12 = vadd.f32 %v3801_v4, %v8072_v63  ;;  %v8145_v2 = vadd.f32 %v4066_v59, %v3978_v14  ;;  %v8956_v14 = vld [vmem:[#allocation78_spill] sm:$0xff] }
 0x545   : > { %v3890_v32 = vpop.f32.mrf.mxu1 }
 0x546   : > { %v3891_v24 = vadd.f32 %v3890_v32, %v3802_v12 }
 0x549   : > { %v3979_v26 = vpop.f32.mrf.mxu2 }
 0x54a   : > { %v3980_v9 = vadd.f32 %v3979_v26, %v3891_v24 }
 0x54b   : > { %v4068_v42 = vpop.f32.mrf.mxu3  ;;  %v3804_v56 = vpop.f32.mrf.mxu0 }
 0x54c   : > { %v3805_v10 = vadd.f32 %v3804_v56, %v8072_v63  ;;  %v8148_v33 = vadd.f32 %v4068_v42, %v3980_v9 }
 0x54d   : > { %v3893_v29 = vpop.f32.mrf.mxu1 }
 0x54e   : > { %v3894_v51 = vadd.f32 %v3893_v29, %v3805_v10  ;;  %3843 = vmatmul.bf16.gmra.mxu0 %v8953_v0  ;;  %4021 = vmatmul.bf16.gmra.mxu2 %v8955_v1  ;;  %v6011_v0 = vld [vmem:[#allocation8 + $0xe8] sm:$0xf0] }
 0x550   : > { %3932 = vmatmul.bf16.gmra.mxu1 %v8954_v11  ;;  %4110 = vmatmul.bf16.gmra.mxu3 %v8956_v14  ;;  %v8959_v11 = vld [vmem:[#allocation79_spill] sm:$0xff] }
 0x551   : > { %v3982_v32 = vpop.f32.mrf.mxu2 }
 0x552   : > { %v3983_v5 = vadd.f32 %v3982_v32, %v3894_v51  ;;  %v8960_v51 = vld [vmem:[#allocation80_spill] sm:$0xff]  ;;  %v6587_v32 = vld [vmem:[#allocation8 + $0x164] sm:$0xf] }
 0x553   : > { %v4071_v12 = vpop.f32.mrf.mxu3  ;;  %v3806_v26 = vpop.f32.mrf.mxu0 }
 0x554   : > { %v3807_v37 = vadd.f32 %v3806_v26, %v8072_v63  ;;  %v8155_v4 = vadd.f32 %v4071_v12, %v3983_v5  ;;  %v6075_v5 = vld [vmem:[#allocation8 + $0x168] sm:$0xf0]  ;;  %v6555_v12 = vld [vmem:[#allocation8 + $0x64] sm:$0xf] }
 0x555   : > { %v3895_v59 = vpop.f32.mrf.mxu1  ;;  %v6078_v26 = vor.u32 %v6587_v32, %v6075_v5 }
 0x556   : > { %8957 = vst [vmem:[#allocation129_spill] sm:$0xff] %v8155_v4  ;;  %v3896_v9 = vadd.f32 %v3895_v59, %v3807_v37  ;;  %v5947_v37 = vld [vmem:[#allocation8 + $0x68] sm:$0xf0]  ;;  %v6603_v59 = vld [vmem:[#allocation8 + $0x1e4] sm:$0xf] }
 0x557   : > { %4651 = vmatpush.bf16.msra.mxu2 %v6078_v26 }
 0x559   : > { %v3984_v24 = vpop.f32.mrf.mxu2 }
 0x55a   : > { %v3985_v58 = vadd.f32 %v3984_v24, %v3896_v9  ;;  %v6139_v9 = vld [vmem:[#allocation8 + $0x1e8] sm:$0xf0] }
 0x55b   : > { %v4073_v42 = vpop.f32.mrf.mxu3  ;;  %v3809_v56 = vpop.f32.mrf.mxu0 }
 0x55c   : > { %v3810_v10 = vadd.f32 %v3809_v56, %v8072_v63  ;;  %v8158_v1 = vadd.f32 %v4073_v42, %v3985_v58  ;;  %v5950_v56 = vor.u32 %v6555_v12, %v5947_v37  ;;  %v6142_v58 = vor.u32 %v6603_v59, %v6139_v9 }
 0x55d   : > { %v3898_v29 = vpop.f32.mrf.mxu1 }
 0x55e   : > { %8958 = vst [vmem:[#allocation130_spill] sm:$0xff] %v8158_v1  ;;  %v3899_v14 = vadd.f32 %v3898_v29, %v3810_v10  ;;  %4124 = vmatmul.bf16.vlgmr.msrb.gmra.mxu0 %v8959_v11  ;;  %4302 = vmatmul.bf16.vlgmr.msrb.gmra.mxu2 %v7889_v6  ;;  %v6571_v6 = vld [vmem:[#allocation8 + $0xe4] sm:$0xf] }
 0x55f   : > { %4473 = vmatpush.bf16.msra.mxu0 %v5950_v56  ;;  %4740 = vmatpush.bf16.msra.mxu3 %v6142_v58  ;;  %v6014_v5 = vor.u32 %v6571_v6, %v6011_v0  ;;  %v8962_v56 = vld [vmem:[#allocation82_spill] sm:$0xff] }
 0x560   : > { %4213 = vmatmul.bf16.vlgmr.msrb.gmra.mxu1 %v8960_v51  ;;  %4391 = vmatmul.bf16.vlgmr.msrb.gmra.mxu3 %v7897_v36 }
 0x561   : > { %v3987_v24 = vpop.f32.mrf.mxu2  ;;  %4562 = vmatpush.bf16.msra.mxu1 %v6014_v5 }
 0x562   : > { %v3988_v42 = vadd.f32 %v3987_v24, %v3899_v14  ;;  %v8961_v24 = vld [vmem:[#allocation81_spill] sm:$0xff] }
 0x563   : > { %v4076_v10 = vpop.f32.mrf.mxu3  ;;  %v3811_v29 = vpop.f32.mrf.mxu0 }
 0x564   : > { %v3812_v51 = vadd.f32 %v3811_v29, %v8072_v63  ;;  %v8165_v36 = vadd.f32 %v4076_v10, %v3988_v42 }
 0x565   : > { %v3900_v11 = vpop.f32.mrf.mxu1 }
 0x566   : > { %v3901_v32 = vadd.f32 %v3900_v11, %v3812_v51 }
 0x569   : > { %v3989_v1 = vpop.f32.mrf.mxu2 }
 0x56a   : > { %v3990_v4 = vadd.f32 %v3989_v1, %v3901_v32 }
 0x56b   : > { %v4078_v12 = vpop.f32.mrf.mxu3  ;;  %v3814_v37 = vpop.f32.mrf.mxu0 }
 0x56c   : > { %v3815_v14 = vadd.f32 %v3814_v37, %v8072_v63  ;;  %v8168_v26 = vadd.f32 %v4078_v12, %v3990_v4 }
 0x56d   : > { %v3903_v59 = vpop.f32.mrf.mxu1 }
 0x56e   : > { %v3904_v9 = vadd.f32 %v3903_v59, %v3815_v14  ;;  %4129 = vmatmul.bf16.gmra.mxu0 %v8961_v24  ;;  %4307 = vmatmul.bf16.gmra.mxu2 %v7901_v20  ;;  %v6003_v20 = vld [vmem:[#allocation8 + $0xd8] sm:$0xf0] }
 0x570   : > { %4218 = vmatmul.bf16.gmra.mxu1 %v8962_v56  ;;  %4396 = vmatmul.bf16.gmra.mxu3 %v7909_v27  ;;  %v8963_v27 = vld [vmem:[#allocation83_spill] sm:$0xff] }
 0x571   : > { %v3992_v6 = vpop.f32.mrf.mxu2 }
 0x572   : > { %v3993_v0 = vadd.f32 %v3992_v6, %v3904_v9  ;;  %v8964_v9 = vld [vmem:[#allocation84_spill] sm:$0xff]  ;;  %v6585_v6 = vld [vmem:[#allocation8 + $0x154] sm:$0xf] }
 0x573   : > { %v4081_v11 = vpop.f32.mrf.mxu3  ;;  %v3816_v1 = vpop.f32.mrf.mxu0 }
 0x574   : > { %v3817_v51 = vadd.f32 %v3816_v1, %v8072_v63  ;;  %v8175_v42 = vadd.f32 %v4081_v11, %v3993_v0  ;;  %v6067_v0 = vld [vmem:[#allocation8 + $0x158] sm:$0xf0]  ;;  %v6553_v11 = vld [vmem:[#allocation8 + $0x54] sm:$0xf] }
 0x575   : > { %v3905_v58 = vpop.f32.mrf.mxu1  ;;  %v6070_v1 = vor.u32 %v6585_v6, %v6067_v0 }
 0x576   : > { %v3906_v4 = vadd.f32 %v3905_v58, %v3817_v51  ;;  %v5939_v51 = vld [vmem:[#allocation8 + $0x58] sm:$0xf0]  ;;  %v6601_v58 = vld [vmem:[#allocation8 + $0x1d4] sm:$0xf] }
 0x577   : > { %4652 = vmatpush.bf16.msra.mxu2 %v6070_v1 }
 0x579   : > { %v3994_v10 = vpop.f32.mrf.mxu2 }
 0x57a   : > { %v3995_v29 = vadd.f32 %v3994_v10, %v3906_v4  ;;  %v6131_v4 = vld [vmem:[#allocation8 + $0x1d8] sm:$0xf0] }
 0x57b   : > { %v4083_v32 = vpop.f32.mrf.mxu3  ;;  %v3819_v5 = vpop.f32.mrf.mxu0 }
 0x57c   : > { %v3820_v12 = vadd.f32 %v3819_v5, %v8072_v63  ;;  %v8178_v14 = vadd.f32 %v4083_v32, %v3995_v29  ;;  %v5942_v5 = vor.u32 %v6553_v11, %v5939_v51  ;;  %v6134_v29 = vor.u32 %v6601_v58, %v6131_v4 }
 0x57d   : > { %v3908_v37 = vpop.f32.mrf.mxu1 }
 0x57e   : > { %v3909_v59 = vadd.f32 %v3908_v37, %v3820_v12  ;;  %4134 = vmatmul.bf16.gmra.mxu0 %v8963_v27  ;;  %4312 = vmatmul.bf16.gmra.mxu2 %v7913_v62  ;;  %v6569_v62 = vld [vmem:[#allocation8 + $0xd4] sm:$0xf] }
 0x57f   : > { %4474 = vmatpush.bf16.msra.mxu0 %v5942_v5  ;;  %4741 = vmatpush.bf16.msra.mxu3 %v6134_v29  ;;  %v6006_v0 = vor.u32 %v6569_v62, %v6003_v20  ;;  %v8966_v5 = vld [vmem:[#allocation86_spill] sm:$0xff] }
 0x580   : > { %4223 = vmatmul.bf16.gmra.mxu1 %v8964_v9  ;;  %4401 = vmatmul.bf16.gmra.mxu3 %v7921_v41 }
 0x581   : > { %v3997_v10 = vpop.f32.mrf.mxu2  ;;  %4563 = vmatpush.bf16.msra.mxu1 %v6006_v0 }
 0x582   : > { %v3998_v32 = vadd.f32 %v3997_v10, %v3909_v59  ;;  %v8965_v10 = vld [vmem:[#allocation85_spill] sm:$0xff] }
 0x583   : > { %v4086_v12 = vpop.f32.mrf.mxu3  ;;  %v3821_v37 = vpop.f32.mrf.mxu0 }
 0x584   : > { %v3822_v9 = vadd.f32 %v3821_v37, %v8072_v63  ;;  %v8185_v41 = vadd.f32 %v4086_v12, %v3998_v32 }
 0x585   : > { %v3910_v27 = vpop.f32.mrf.mxu1 }
 0x586   : > { %v3911_v6 = vadd.f32 %v3910_v27, %v3822_v9 }
 0x589   : > { %v3999_v56 = vpop.f32.mrf.mxu2 }
 0x58a   : > { %v4000_v24 = vadd.f32 %v3999_v56, %v3911_v6 }
 0x58b   : > { %v4088_v11 = vpop.f32.mrf.mxu3  ;;  %v3824_v51 = vpop.f32.mrf.mxu0 }
 0x58c   : > { %v3825_v59 = vadd.f32 %v3824_v51, %v8072_v63  ;;  %v8188_v1 = vadd.f32 %v4088_v11, %v4000_v24 }
 0x58d   : > { %v3913_v58 = vpop.f32.mrf.mxu1 }
 0x58e   : > { %v3914_v4 = vadd.f32 %v3913_v58, %v3825_v59  ;;  %4139 = vmatmul.bf16.gmra.mxu0 %v8965_v10  ;;  %4317 = vmatmul.bf16.gmra.mxu2 %v7925_v52  ;;  %v5995_v52 = vld [vmem:[#allocation8 + $0xc8] sm:$0xf0] }
 0x590   : > { %4228 = vmatmul.bf16.gmra.mxu1 %v8966_v5  ;;  %4406 = vmatmul.bf16.gmra.mxu3 %v7933_v28  ;;  %v8967_v28 = vld [vmem:[#allocation87_spill] sm:$0xff] }
 0x591   : > { %v4002_v20 = vpop.f32.mrf.mxu2 }
 0x592   : > { %v4003_v27 = vadd.f32 %v4002_v20, %v3914_v4  ;;  %v8968_v4 = vld [vmem:[#allocation88_spill] sm:$0xff]  ;;  %v6583_v20 = vld [vmem:[#allocation8 + $0x144] sm:$0xf] }
 0x593   : > { %v4091_v62 = vpop.f32.mrf.mxu3  ;;  %v3826_v56 = vpop.f32.mrf.mxu0 }
 0x594   : > { %v3827_v9 = vadd.f32 %v3826_v56, %v8072_v63  ;;  %v8195_v32 = vadd.f32 %v4091_v62, %v4003_v27  ;;  %v6059_v27 = vld [vmem:[#allocation8 + $0x148] sm:$0xf0]  ;;  %v6551_v62 = vld [vmem:[#allocation8 + $0x44] sm:$0xf] }
 0x595   : > { %v3915_v29 = vpop.f32.mrf.mxu1  ;;  %v6062_v56 = vor.u32 %v6583_v20, %v6059_v27 }
 0x596   : > { %v3916_v24 = vadd.f32 %v3915_v29, %v3827_v9  ;;  %v5931_v9 = vld [vmem:[#allocation8 + $0x48] sm:$0xf0]  ;;  %v6599_v29 = vld [vmem:[#allocation8 + $0x1c4] sm:$0xf] }
 0x597   : > { %4653 = vmatpush.bf16.msra.mxu2 %v6062_v56 }
 0x599   : > { %v4004_v12 = vpop.f32.mrf.mxu2 }
 0x59a   : > { %v4005_v37 = vadd.f32 %v4004_v12, %v3916_v24  ;;  %v6123_v24 = vld [vmem:[#allocation8 + $0x1c8] sm:$0xf0] }
 0x59b   : > { %v4093_v6 = vpop.f32.mrf.mxu3  ;;  %v3829_v0 = vpop.f32.mrf.mxu0 }
 0x59c   : > { %v3830_v11 = vadd.f32 %v3829_v0, %v8072_v63  ;;  %v8198_v59 = vadd.f32 %v4093_v6, %v4005_v37  ;;  %v5934_v0 = vor.u32 %v6551_v62, %v5931_v9  ;;  %v6126_v37 = vor.u32 %v6599_v29, %v6123_v24 }
 0x59d   : > { %v3918_v51 = vpop.f32.mrf.mxu1 }
 0x59e   : > { %v3919_v58 = vadd.f32 %v3918_v51, %v3830_v11  ;;  %4144 = vmatmul.bf16.gmra.mxu0 %v8967_v28  ;;  %4322 = vmatmul.bf16.gmra.mxu2 %v7937_v17  ;;  %v6567_v17 = vld [vmem:[#allocation8 + $0xc4] sm:$0xf] }
 0x59f   : > { %4475 = vmatpush.bf16.msra.mxu0 %v5934_v0  ;;  %4742 = vmatpush.bf16.msra.mxu3 %v6126_v37  ;;  %v5998_v27 = vor.u32 %v6567_v17, %v5995_v52  ;;  %v8970_v0 = vld [vmem:[#allocation90_spill] sm:$0xff] }
 0x5a0   : > { %4233 = vmatmul.bf16.gmra.mxu1 %v8968_v4  ;;  %4411 = vmatmul.bf16.gmra.mxu3 %v7945_v7 }
 0x5a1   : > { %v4007_v12 = vpop.f32.mrf.mxu2  ;;  %4564 = vmatpush.bf16.msra.mxu1 %v5998_v27 }
 0x5a2   : > { %v4008_v6 = vadd.f32 %v4007_v12, %v3919_v58  ;;  %v8969_v12 = vld [vmem:[#allocation89_spill] sm:$0xff] }
 0x5a3   : > { %v4096_v11 = vpop.f32.mrf.mxu3  ;;  %v3831_v51 = vpop.f32.mrf.mxu0 }
 0x5a4   : > { %v3832_v4 = vadd.f32 %v3831_v51, %v8072_v63  ;;  %v8205_v7 = vadd.f32 %v4096_v11, %v4008_v6 }
 0x5a5   : > { %v3920_v28 = vpop.f32.mrf.mxu1 }
 0x5a6   : > { %v3921_v20 = vadd.f32 %v3920_v28, %v3832_v4 }
 0x5a9   : > { %v4009_v5 = vpop.f32.mrf.mxu2 }
 0x5aa   : > { %v4010_v10 = vadd.f32 %v4009_v5, %v3921_v20 }
 0x5ab   : > { %v4098_v62 = vpop.f32.mrf.mxu3  ;;  %v3834_v9 = vpop.f32.mrf.mxu0 }
 0x5ac   : > { %v3835_v58 = vadd.f32 %v3834_v9, %v8072_v63  ;;  %v8208_v56 = vadd.f32 %v4098_v62, %v4010_v10 }
 0x5ad   : > { %v3923_v29 = vpop.f32.mrf.mxu1 }
 0x5ae   : > { %v3924_v24 = vadd.f32 %v3923_v29, %v3835_v58  ;;  %4149 = vmatmul.bf16.gmra.mxu0 %v8969_v12  ;;  %4327 = vmatmul.bf16.gmra.mxu2 %v7949_v53 }
 0x5b0   : > { %4238 = vmatmul.bf16.gmra.mxu1 %v8970_v0  ;;  %4416 = vmatmul.bf16.gmra.mxu3 %v7957_v55  ;;  %v6565_v55 = vld [vmem:[#allocation8 + $0xb4] sm:$0xf] }
 0x5b1   : > { %v4012_v52 = vpop.f32.mrf.mxu2 }
 0x5b2   : > { %v4013_v28 = vadd.f32 %v4012_v52, %v3924_v24  ;;  %v8971_v24 = vld [vmem:[#allocation92_spill] sm:$0xff]  ;;  %v6581_v52 = vld [vmem:[#allocation8 + $0x134] sm:$0xf] }
 0x5b3   : > { %v4101_v17 = vpop.f32.mrf.mxu3  ;;  %v3836_v5 = vpop.f32.mrf.mxu0 }
 0x5b4   : > { %v3837_v4 = vadd.f32 %v3836_v5, %v8072_v63  ;;  %v8215_v6 = vadd.f32 %v4101_v17, %v4013_v28  ;;  %v6051_v28 = vld [vmem:[#allocation8 + $0x138] sm:$0xf0]  ;;  %v6549_v17 = vld [vmem:[#allocation8 + $0x34] sm:$0xf] }
 0x5b5   : > { %v3925_v37 = vpop.f32.mrf.mxu1  ;;  %v6054_v5 = vor.u32 %v6581_v52, %v6051_v28  ;;  %v5987_v52 = vld [vmem:[#allocation8 + $0xb8] sm:$0xf0] }
 0x5b6   : > { %v3926_v10 = vadd.f32 %v3925_v37, %v3837_v4  ;;  %v5923_v4 = vld [vmem:[#allocation8 + $0x38] sm:$0xf0]  ;;  %v6597_v37 = vld [vmem:[#allocation8 + $0x1b4] sm:$0xf]  ;;  %v5990_v28 = vor.u32 %v6565_v55, %v5987_v52 }
 0x5b7   : > { %4654 = vmatpush.bf16.msra.mxu2 %v6054_v5 }
 0x5b8   : > { %4565 = vmatpush.bf16.msra.mxu1 %v5990_v28 }
 0x5b9   : > { %v4014_v11 = vpop.f32.mrf.mxu2 }
 0x5ba   : > { %v4015_v51 = vadd.f32 %v4014_v11, %v3926_v10  ;;  %v6115_v10 = vld [vmem:[#allocation8 + $0x1b8] sm:$0xf0] }
 0x5bb   : > { %v4103_v20 = vpop.f32.mrf.mxu3  ;;  %v3839_v27 = vpop.f32.mrf.mxu0 }
 0x5bc   : > { %v3840_v62 = vadd.f32 %v3839_v27, %v8072_v63  ;;  %v8218_v58 = vadd.f32 %v4103_v20, %v4015_v51  ;;  %v5926_v27 = vor.u32 %v6549_v17, %v5923_v4  ;;  %v6118_v51 = vor.u32 %v6597_v37, %v6115_v10 }
 0x5bd   : > { %v3928_v9 = vpop.f32.mrf.mxu1 }
 0x5be   : > { %v3929_v29 = vadd.f32 %v3928_v9, %v3840_v62  ;;  %4154 = vmatmul.bf16.gmra.mxu0 %v7765_v46  ;;  %4332 = vmatmul.bf16.gmra.mxu2 %v7961_v8 }
 0x5bf   : > { %4476 = vmatpush.bf16.msra.mxu0 %v5926_v27  ;;  %4743 = vmatpush.bf16.msra.mxu3 %v6118_v51 }
 0x5c0   : > { %4243 = vmatmul.bf16.gmra.mxu1 %v8971_v24  ;;  %4421 = vmatmul.bf16.gmra.mxu3 %v7969_v50 }
 0x5c1   : > { %v4017_v11 = vpop.f32.mrf.mxu2 }
 0x5c2   : > { %v4018_v20 = vadd.f32 %v4017_v11, %v3929_v29  ;;  %v8972_v11 = vld [vmem:[#allocation93_spill] sm:$0xff] }
 0x5c3   : > { %v4106_v62 = vpop.f32.mrf.mxu3  ;;  %v3841_v9 = vpop.f32.mrf.mxu0 }
 0x5c4   : > { %v3842_v24 = vadd.f32 %v3841_v9, %v8072_v63  ;;  %v8225_v50 = vadd.f32 %v4106_v62, %v4018_v20 }
 0x5c5   : > { %v3930_v46 = vpop.f32.mrf.mxu1 }
 0x5c6   : > { %v3931_v8 = vadd.f32 %v3930_v46, %v3842_v24 }
 0x5c9   : > { %v4019_v53 = vpop.f32.mrf.mxu2 }
 0x5ca   : > { %v4020_v0 = vadd.f32 %v4019_v53, %v3931_v8 }
 0x5cb   : > { %v4108_v17 = vpop.f32.mrf.mxu3  ;;  %v3844_v4 = vpop.f32.mrf.mxu0 }
 0x5cc   : > { %v3845_v29 = vadd.f32 %v3844_v4, %v8072_v63  ;;  %v8228_v5 = vadd.f32 %v4108_v17, %v4020_v0 }
 0x5cd   : > { %v3933_v37 = vpop.f32.mrf.mxu1 }
 0x5ce   : > { %v3934_v10 = vadd.f32 %v3933_v37, %v3845_v29  ;;  %4159 = vmatmul.bf16.gmra.mxu0 %v7777_v30  ;;  %4337 = vmatmul.bf16.gmra.mxu2 %v7973_v13  ;;  %v6043_v29 = vld [vmem:[#allocation8 + $0x128] sm:$0xf0]  ;;  %v6547_v37 = vld [vmem:[#allocation8 + $0x24] sm:$0xf] }
 0x5d0   : > { %4248 = vmatmul.bf16.gmra.mxu1 %v8972_v11  ;;  %4426 = vmatmul.bf16.gmra.mxu3 %v7981_v44 }
 0x5d1   : > { %v4022_v46 = vpop.f32.mrf.mxu2 }
 0x5d2   : > { %v4023_v55 = vadd.f32 %v4022_v46, %v3934_v10 }
 0x5d3   : > { %v4111_v24 = vpop.f32.mrf.mxu3  ;;  %v3846_v53 = vpop.f32.mrf.mxu0 }
 0x5d4   : > { %v3847_v8 = vadd.f32 %v3846_v53, %v8072_v63  ;;  %v8235_v51 = vadd.f32 %v4111_v24, %v4023_v55  ;;  %v6579_v63 = vld [vmem:[#allocation8 + $0x124] sm:$0xf]  ;;  %v5915_v55 = vld [vmem:[#allocation8 + $0x28] sm:$0xf0] }
 0x5d5   : > { %v3935_v27 = vpop.f32.mrf.mxu1  ;;  %v6046_v46 = vor.u32 %v6579_v63, %v6043_v29  ;;  %v6595_v24 = vld [vmem:[#allocation8 + $0x1a4] sm:$0xf]  ;;  %v6107_v53 = vld [vmem:[#allocation8 + $0x1a8] sm:$0xf0] }
 0x5d6   : > { %v3936_v0 = vadd.f32 %v3935_v27, %v3847_v8  ;;  %v5918_v27 = vor.u32 %v6547_v37, %v5915_v55 }
 0x5d7   : > { %4655 = vmatpush.bf16.msra.mxu2 %v6046_v46 }
 0x5d8   : > { %4477 = vmatpush.bf16.msra.mxu0 %v5918_v27 }
 0x5d9   : > { %v4024_v20 = vpop.f32.mrf.mxu2 }
 0x5da   : > { %v4025_v62 = vadd.f32 %v4024_v20, %v3936_v0 }
 0x5db   : > { %v4113_v9 = vpop.f32.mrf.mxu3  ;;  %v4125_v52 = vpop.f32.mrf.mxu0 }
 0x5dc   : > { %v8237_v17 = vadd.f32 %v4113_v9, %v4025_v62  ;;  %v4126_v4 = vadd.f32 %v4125_v52, %v8085_v18  ;;  %v6110_v18 = vor.u32 %v6595_v24, %v6107_v53 }
 0x5dd   : > { %v4214_v28 = vpop.f32.mrf.mxu1 }
 0x5de   : > { %4164 = vmatmul.bf16.gmra.mxu0 %v7789_v21  ;;  %4342 = vmatmul.bf16.gmra.mxu2 %v7985_v35  ;;  %v4215_v10 = vadd.f32 %v4214_v28, %v4126_v4  ;;  %v6563_v28 = vld [vmem:[#allocation8 + $0xa4] sm:$0xf]  ;;  %v5979_v4 = vld [vmem:[#allocation8 + $0xa8] sm:$0xf0] }
 0x5df   : > { %4744 = vmatpush.bf16.msra.mxu3 %v6110_v18  ;;  %v5982_v63 = vor.u32 %v6563_v28, %v5979_v4 }
 0x5e0   : > { %4253 = vmatmul.bf16.gmra.mxu1 %v7797_v54  ;;  %4431 = vmatmul.bf16.gmra.mxu3 %v7993_v25 }
 0x5e1   : > { %v4303_v8 = vpop.f32.mrf.mxu2  ;;  %4566 = vmatpush.bf16.msra.mxu1 %v5982_v63 }
 0x5e2   : > { %v4304_v0 = vadd.f32 %v4303_v8, %v4215_v10 }
 0x5e3   : > { %v4392_v20 = vpop.f32.mrf.mxu3  ;;  %v4127_v62 = vpop.f32.mrf.mxu0 }
 0x5e4   : > { %v4393_v52 = vadd.f32 %v4392_v20, %v4304_v0  ;;  %v4128_v25 = vadd.f32 %v4127_v62, %v8088_v16 }
 0x5e5   : > { %v4216_v9 = vpop.f32.mrf.mxu1 }
 0x5e6   : > { %5184 = vst [vmem:[%s8247_s16] sm:$0xff] %v4393_v52  ;;  %v4217_v29 = vadd.f32 %v4216_v9, %v4128_v25 }
 0x5e9   : > { %v4305_v37 = vpop.f32.mrf.mxu2 }
 0x5ea   : > { %v4306_v10 = vadd.f32 %v4305_v37, %v4217_v29 }
 0x5eb   : > { %v4394_v46 = vpop.f32.mrf.mxu3  ;;  %v4130_v55 = vpop.f32.mrf.mxu0 }
 0x5ec   : > { %v4395_v53 = vadd.f32 %v4394_v46, %v4306_v10  ;;  %v4131_v16 = vadd.f32 %v4130_v55, %v8095_v48  ;;  %v6035_v46 = vld [vmem:[#allocation8 + $0x118] sm:$0xf0]  ;;  %v6545_v55 = vld [vmem:[#allocation8 + $0x14] sm:$0xf] }
 0x5ed   : > { %v4219_v24 = vpop.f32.mrf.mxu1 }
 0x5ee   : > { %4169 = vmatmul.bf16.gmra.mxu0 %v7801_v19  ;;  %5186 = vst [vmem:[%s8247_s16 + $0x10] sm:$0xff] %v4395_v53  ;;  %4347 = vmatmul.bf16.gmra.mxu2 %v7997_v60  ;;  %v4220_v25 = vadd.f32 %v4219_v24, %v4131_v16  ;;  %v5907_v16 = vld [vmem:[#allocation8 + $0x18] sm:$0xf0] }
 0x5f0   : > { %4258 = vmatmul.bf16.gmra.mxu1 %v7809_v34  ;;  %4436 = vmatmul.bf16.gmra.mxu3 %v8005_v57 }
 0x5f1   : > { %v4308_v8 = vpop.f32.mrf.mxu2 }
 0x5f2   : > { %v4309_v27 = vadd.f32 %v4308_v8, %v4220_v25  ;;  %v6593_v25 = vld [vmem:[#allocation8 + $0x194] sm:$0xf]  ;;  %v6099_v8 = vld [vmem:[#allocation8 + $0x198] sm:$0xf0] }
 0x5f3   : > { %v4397_v18 = vpop.f32.mrf.mxu3  ;;  %v4132_v0 = vpop.f32.mrf.mxu0 }
 0x5f4   : > { %v4398_v62 = vadd.f32 %v4397_v18, %v4309_v27  ;;  %v4133_v9 = vadd.f32 %v4132_v0, %v8098_v3  ;;  %v6577_v3 = vld [vmem:[#allocation8 + $0x114] sm:$0xf]  ;;  %v6102_v18 = vor.u32 %v6593_v25, %v6099_v8 }
 0x5f5   : > { %v4221_v20 = vpop.f32.mrf.mxu1  ;;  %v6038_v53 = vor.u32 %v6577_v3, %v6035_v46 }
 0x5f6   : > { %5188 = vst [vmem:[%s8247_s16 + $0x20] sm:$0xff] %v4398_v62  ;;  %v4222_v48 = vadd.f32 %v4221_v20, %v4133_v9  ;;  %4745 = vmatpush.bf16.msra.mxu3 %v6102_v18 }
 0x5f7   : > { %4656 = vmatpush.bf16.msra.mxu2 %v6038_v53 }
 0x5f9   : > { %v4310_v52 = vpop.f32.mrf.mxu2 }
 0x5fa   : > { %v4311_v28 = vadd.f32 %v4310_v52, %v4222_v48 }
 0x5fb   : > { %v4399_v4 = vpop.f32.mrf.mxu3  ;;  %v4135_v63 = vpop.f32.mrf.mxu0 }
 0x5fc   : > { %v4400_v37 = vadd.f32 %v4399_v4, %v4311_v28  ;;  %v4136_v10 = vadd.f32 %v4135_v63, %v8105_v23  ;;  %v5910_v23 = vor.u32 %v6545_v55, %v5907_v16  ;;  %v6561_v28 = vld [vmem:[#allocation8 + $0x94] sm:$0xf]  ;;  %v5971_v4 = vld [vmem:[#allocation8 + $0x98] sm:$0xf0] }
 0x5fd   : > { %v4224_v29 = vpop.f32.mrf.mxu1  ;;  %v5974_v63 = vor.u32 %v6561_v28, %v5971_v4  ;;  %v8973_v4 = vld [vmem:[#allocation125_spill] sm:$0xff] }
 0x5fe   : > { %4174 = vmatmul.bf16.gmra.mxu0 %v7813_v31  ;;  %5190 = vst [vmem:[%s8247_s16 + $0x30] sm:$0xff] %v4400_v37  ;;  %4352 = vmatmul.bf16.gmra.mxu2 %v8009_v40  ;;  %v4225_v24 = vadd.f32 %v4224_v29, %v4136_v10 }
 0x5ff   : > { %4478 = vmatpush.bf16.msra.mxu0 %v5910_v23  ;;  %4567 = vmatpush.bf16.msra.mxu1 %v5974_v63 }
 0x600   : > { %4263 = vmatmul.bf16.gmra.mxu1 %v7821_v39  ;;  %4441 = vmatmul.bf16.gmra.mxu3 %v8017_v61 }
 0x601   : > { %v4313_v27 = vpop.f32.mrf.mxu2 }
 0x602   : > { %v4314_v0 = vadd.f32 %v4313_v27, %v4225_v24 }
 0x603   : > { %v4402_v20 = vpop.f32.mrf.mxu3  ;;  %v4137_v62 = vpop.f32.mrf.mxu0 }
 0x604   : > { %v4403_v48 = vadd.f32 %v4402_v20, %v4314_v0  ;;  %v4138_v52 = vadd.f32 %v4137_v62, %v8108_v22 }
 0x605   : > { %v4226_v9 = vpop.f32.mrf.mxu1 }
 0x606   : > { %5192 = vst [vmem:[%s8247_s16 + $0x40] sm:$0xff] %v4403_v48  ;;  %v4227_v29 = vadd.f32 %v4226_v9, %v4138_v52 }
 0x609   : > { %v4315_v37 = vpop.f32.mrf.mxu2 }
 0x60a   : > { %v4316_v10 = vadd.f32 %v4315_v37, %v4227_v29  ;;  %v8974_v29 = vld [vmem:[#allocation94_spill] sm:$0xff]  ;;  %v8975_v37 = vld [vmem:[#allocation95_spill] sm:$0xff] }
 0x60b   : > { %v4404_v3 = vpop.f32.mrf.mxu3  ;;  %v4140_v46 = vpop.f32.mrf.mxu0 }
 0x60c   : > { %v4405_v24 = vadd.f32 %v4404_v3, %v4316_v10  ;;  %v4141_v53 = vadd.f32 %v4140_v46, %v8115_v15  ;;  %v8976_v10 = vld [vmem:[#allocation117_spill] sm:$0xff]  ;;  %v8977_v3 = vld [vmem:[#allocation118_spill] sm:$0xff]  ;;  %v6027_v46 = vld [vmem:[#allocation8 + $0x108] sm:$0xf0] }
 0x60d   : > { %v4229_v55 = vpop.f32.mrf.mxu1 }
 0x60e   : > { %4179 = vmatmul.bf16.gmra.mxu0 %v7825_v47  ;;  %5194 = vst [vmem:[%s8247_s16 + $0x50] sm:$0xff] %v4405_v24  ;;  %4357 = vmatmul.bf16.gmra.mxu2 %v8021_v45  ;;  %v4230_v22 = vadd.f32 %v4229_v55, %v4141_v53  ;;  %v6543_v55 = vld [vmem:[#allocation8 + $0x4] sm:$0xf] }
 0x610   : > { %4268 = vmatmul.bf16.gmra.mxu1 %v7833_v43  ;;  %4446 = vmatmul.bf16.gmra.mxu3 %v8029_v38 }
 0x611   : > { %v4318_v16 = vpop.f32.mrf.mxu2 }
 0x612   : > { %v4319_v25 = vadd.f32 %v4318_v16, %v4230_v22  ;;  %v5899_v22 = vld [vmem:[#allocation8 + $0x8] sm:$0xf0]  ;;  %v6591_v16 = vld [vmem:[#allocation8 + $0x184] sm:$0xf] }
 0x613   : > { %v4407_v8 = vpop.f32.mrf.mxu3  ;;  %v4142_v27 = vpop.f32.mrf.mxu0 }
 0x614   : > { %v4408_v18 = vadd.f32 %v4407_v8, %v4319_v25  ;;  %v4143_v0 = vadd.f32 %v4142_v27, %v8118_v49  ;;  %v6575_v49 = vld [vmem:[#allocation8 + $0x104] sm:$0xf]  ;;  %v6091_v25 = vld [vmem:[#allocation8 + $0x188] sm:$0xf0]  ;;  %v5902_v27 = vor.u32 %v6543_v55, %v5899_v22 }
 0x615   : > { %v4231_v23 = vpop.f32.mrf.mxu1  ;;  %v6030_v53 = vor.u32 %v6575_v49, %v6027_v46 }
 0x616   : > { %5196 = vst [vmem:[%s8247_s16 + $0x60] sm:$0xff] %v4408_v18  ;;  %v4232_v15 = vadd.f32 %v4231_v23, %v4143_v0  ;;  %v6094_v23 = vor.u32 %v6591_v16, %v6091_v25  ;;  %4479 = vmatpush.bf16.msra.mxu0 %v5902_v27  ;;  %v8979_v16 = vld [vmem:[#allocation127_spill] sm:$0xff]  ;;  %v8981_v27 = vld [vmem:[#allocation97_spill] sm:$0xff] }
 0x617   : > { %4657 = vmatpush.bf16.msra.mxu2 %v6030_v53 }
 0x618   : > { %4746 = vmatpush.bf16.msra.mxu3 %v6094_v23  ;;  %v8982_v23 = vld [vmem:[#allocation119_spill] sm:$0xff] }
 0x619   : > { %v4320_v20 = vpop.f32.mrf.mxu2 }
 0x61a   : > { %v4321_v62 = vadd.f32 %v4320_v20, %v4232_v15 }
 0x61b   : > { %v4409_v9 = vpop.f32.mrf.mxu3  ;;  %v4145_v48 = vpop.f32.mrf.mxu0 }
 0x61c   : > { %v4410_v28 = vadd.f32 %v4409_v9, %v4321_v62  ;;  %v4146_v63 = vadd.f32 %v4145_v48, %v8973_v4  ;;  %v8978_v9 = vld [vmem:[#allocation126_spill] sm:$0xff] }
 0x61d   : > { %v4234_v52 = vpop.f32.mrf.mxu1 }
 0x61e   : > { %4184 = vmatmul.bf16.gmra.mxu0 %v8974_v29  ;;  %5198 = vst [vmem:[%s8247_s16 + $0x70] sm:$0xff] %v4410_v28  ;;  %4362 = vmatmul.bf16.gmra.mxu2 %v8976_v10  ;;  %v4235_v24 = vadd.f32 %v4234_v52, %v4146_v63  ;;  %v6559_v52 = vld [vmem:[#allocation8 + $0x84] sm:$0xf]  ;;  %v5963_v28 = vld [vmem:[#allocation8 + $0x88] sm:$0xf0] }
 0x61f   : > { %v5966_v4 = vor.u32 %v6559_v52, %v5963_v28  ;;  %v8984_v28 = vld [vmem:[#allocation128_spill] sm:$0xff] }
 0x620   : > { %4273 = vmatmul.bf16.gmra.mxu1 %v8975_v37  ;;  %4451 = vmatmul.bf16.gmra.mxu3 %v8977_v3 }
 0x621   : > { %v4323_v8 = vpop.f32.mrf.mxu2  ;;  %4568 = vmatpush.bf16.msra.mxu1 %v5966_v4 }
 0x622   : > { %v4324_v18 = vadd.f32 %v4323_v8, %v4235_v24  ;;  %v8980_v8 = vld [vmem:[#allocation96_spill] sm:$0xff] }
 0x623   : > { %v4412_v0 = vpop.f32.mrf.mxu3  ;;  %v4147_v15 = vpop.f32.mrf.mxu0 }
 0x624   : > { %v4413_v62 = vadd.f32 %v4412_v0, %v4324_v18  ;;  %v4148_v48 = vadd.f32 %v4147_v15, %v8978_v9  ;;  %v8983_v18 = vld [vmem:[#allocation120_spill] sm:$0xff] }
 0x625   : > { %v4236_v20 = vpop.f32.mrf.mxu1 }
 0x626   : > { %5200 = vst [vmem:[%s8247_s16 + $0x80] sm:$0xff] %v4413_v62  ;;  %v4237_v63 = vadd.f32 %v4236_v20, %v4148_v48 }
 0x629   : > { %v4325_v49 = vpop.f32.mrf.mxu2 }
 0x62a   : > { %v4326_v46 = vadd.f32 %v4325_v49, %v4237_v63 }
 0x62b   : > { %v4414_v55 = vpop.f32.mrf.mxu3  ;;  %v4150_v24 = vpop.f32.mrf.mxu0 }
 0x62c   : > { %v4415_v53 = vadd.f32 %v4414_v55, %v4326_v46  ;;  %v4151_v25 = vadd.f32 %v4150_v24, %v8979_v16 }
 0x62d   : > { %v4239_v22 = vpop.f32.mrf.mxu1 }
 0x62e   : > { %4189 = vmatmul.bf16.gmra.mxu0 %v8980_v8  ;;  %5202 = vst [vmem:[%s8247_s16 + $0x90] sm:$0xff] %v4415_v53  ;;  %4367 = vmatmul.bf16.gmra.mxu2 %v8982_v23  ;;  %v4240_v0 = vadd.f32 %v4239_v22, %v4151_v25  ;;  %v8985_v22 = vld [vmem:[#allocation98_spill] sm:$0xff]  ;;  %v8986_v25 = vld [vmem:[#allocation99_spill] sm:$0xff] }
 0x630   : > { %4278 = vmatmul.bf16.gmra.mxu1 %v8981_v27  ;;  %4456 = vmatmul.bf16.gmra.mxu3 %v8983_v18 }
 0x631   : > { %v4328_v15 = vpop.f32.mrf.mxu2 }
 0x632   : > { %v4329_v20 = vadd.f32 %v4328_v15, %v4240_v0  ;;  %v8987_v0 = vld [vmem:[#allocation121_spill] sm:$0xff]  ;;  %v8988_v15 = vld [vmem:[#allocation122_spill] sm:$0xff] }
 0x633   : > { %v4417_v62 = vpop.f32.mrf.mxu3  ;;  %v4152_v9 = vpop.f32.mrf.mxu0 }
 0x634   : > { %v4418_v52 = vadd.f32 %v4417_v62, %v4329_v20  ;;  %v4153_v4 = vadd.f32 %v4152_v9, %v8984_v28  ;;  %v6653_v20 = vld [vmem:[#allocation8 + $0x374] sm:$0xf]  ;;  %v6339_v62 = vld [vmem:[#allocation8 + $0x378] sm:$0xf0] }
 0x635   : > { %v4241_v48 = vpop.f32.mrf.mxu1  ;;  %v6621_v9 = vld [vmem:[#allocation8 + $0x274] sm:$0xf]  ;;  %v6211_v28 = vld [vmem:[#allocation8 + $0x278] sm:$0xf0] }
 0x636   : > { %5204 = vst [vmem:[%s8247_s16 + $0xa0] sm:$0xff] %v4418_v52  ;;  %v4242_v63 = vadd.f32 %v4241_v48, %v4153_v4  ;;  %v6342_v52 = vor.u32 %v6653_v20, %v6339_v62  ;;  %v6669_v4 = vld [vmem:[#allocation8 + $0x3f4] sm:$0xf] }
 0x638   : > { %5006 = vmatpush.bf16.msrb.mxu2 %v6342_v52 }
 0x639   : > { %v4330_v49 = vpop.f32.mrf.mxu2 }
 0x63a   : > { %v4331_v46 = vadd.f32 %v4330_v49, %v4242_v63  ;;  %v6403_v63 = vld [vmem:[#allocation8 + $0x3f8] sm:$0xf0] }
 0x63b   : > { %v4419_v55 = vpop.f32.mrf.mxu3  ;;  %v4155_v24 = vpop.f32.mrf.mxu0 }
 0x63c   : > { %v4420_v16 = vadd.f32 %v4419_v55, %v4331_v46  ;;  %v4156_v18 = vadd.f32 %v4155_v24, %v8145_v2  ;;  %v6214_v2 = vor.u32 %v6621_v9, %v6211_v28  ;;  %v6406_v46 = vor.u32 %v6669_v4, %v6403_v63  ;;  %v8989_v63 = vld [vmem:[#allocation129_spill] sm:$0xff] }
 0x63d   : > { %v4244_v53 = vpop.f32.mrf.mxu1 }
 0x63e   : > { %4194 = vmatmul.bf16.gmra.mxu0 %v8985_v22  ;;  %5206 = vst [vmem:[%s8247_s16 + $0xb0] sm:$0xff] %v4420_v16  ;;  %4372 = vmatmul.bf16.gmra.mxu2 %v8987_v0  ;;  %v4245_v48 = vadd.f32 %v4244_v53, %v4156_v18  ;;  %v6637_v18 = vld [vmem:[#allocation8 + $0x2f4] sm:$0xf]  ;;  %v6275_v53 = vld [vmem:[#allocation8 + $0x2f8] sm:$0xf0] }
 0x63f   : > { %4828 = vmatpush.bf16.msrb.mxu0 %v6214_v2  ;;  %5095 = vmatpush.bf16.msrb.mxu3 %v6406_v46  ;;  %v6278_v20 = vor.u32 %v6637_v18, %v6275_v53  ;;  %v8990_v2 = vld [vmem:[#allocation100_spill] sm:$0xff]  ;;  %v8991_v46 = vld [vmem:[#allocation101_spill] sm:$0xff]  ;;  %v8994_v53 = vld [vmem:[#allocation130_spill] sm:$0xff] }
 0x640   : > { %4283 = vmatmul.bf16.gmra.mxu1 %v8986_v25  ;;  %4461 = vmatmul.bf16.gmra.mxu3 %v8988_v15 }
 0x641   : > { %v4333_v49 = vpop.f32.mrf.mxu2  ;;  %4917 = vmatpush.bf16.msrb.mxu1 %v6278_v20 }
 0x642   : > { %v4334_v55 = vadd.f32 %v4333_v49, %v4245_v48 }
 0x643   : > { %v4422_v24 = vpop.f32.mrf.mxu3  ;;  %v4157_v16 = vpop.f32.mrf.mxu0 }
 0x644   : > { %v4423_v15 = vadd.f32 %v4422_v24, %v4334_v55  ;;  %v4158_v0 = vadd.f32 %v4157_v16, %v8148_v33  ;;  %v8992_v33 = vld [vmem:[#allocation123_spill] sm:$0xff] }
 0x645   : > { %v4246_v25 = vpop.f32.mrf.mxu1 }
 0x646   : > { %5208 = vst [vmem:[%s8247_s16 + $0xc0] sm:$0xff] %v4423_v15  ;;  %v4247_v62 = vadd.f32 %v4246_v25, %v4158_v0  ;;  %v8993_v15 = vld [vmem:[#allocation124_spill] sm:$0xff] }
 0x649   : > { %v4335_v22 = vpop.f32.mrf.mxu2 }
 0x64a   : > { %v4336_v9 = vadd.f32 %v4335_v22, %v4247_v62 }
 0x64b   : > { %v4424_v28 = vpop.f32.mrf.mxu3  ;;  %v4160_v48 = vpop.f32.mrf.mxu0 }
 0x64c   : > { %v4425_v52 = vadd.f32 %v4424_v28, %v4336_v9  ;;  %v4161_v49 = vadd.f32 %v4160_v48, %v8989_v63 }
 0x64d   : > { %v4249_v4 = vpop.f32.mrf.mxu1 }
 0x64e   : > { %4199 = vmatmul.bf16.gmra.mxu0 %v8990_v2  ;;  %5210 = vst [vmem:[%s8247_s16 + $0xd0] sm:$0xff] %v4425_v52  ;;  %4377 = vmatmul.bf16.gmra.mxu2 %v8992_v33  ;;  %v4250_v25 = vadd.f32 %v4249_v4, %v4161_v49  ;;  %v8995_v4 = vld [vmem:[#allocation15_spill] sm:$0xff]  ;;  %v8996_v49 = vld [vmem:[#allocation16_spill] sm:$0xff] }
 0x650   : > { %4288 = vmatmul.bf16.gmra.mxu1 %v8991_v46  ;;  %4466 = vmatmul.bf16.gmra.mxu3 %v8993_v15 }
 0x651   : > { %v4338_v0 = vpop.f32.mrf.mxu2 }
 0x652   : > { %v4339_v55 = vadd.f32 %v4338_v0, %v4250_v25  ;;  %v8997_v25 = vld [vmem:[#allocation47_spill] sm:$0xff]  ;;  %v8998_v0 = vld [vmem:[#allocation48_spill] sm:$0xff] }
 0x653   : > { %v4427_v22 = vpop.f32.mrf.mxu3  ;;  %v4162_v24 = vpop.f32.mrf.mxu0 }
 0x654   : > { %v4428_v18 = vadd.f32 %v4427_v22, %v4339_v55  ;;  %v4163_v20 = vadd.f32 %v4162_v24, %v8994_v53  ;;  %v6651_v55 = vld [vmem:[#allocation8 + $0x364] sm:$0xf]  ;;  %v6331_v22 = vld [vmem:[#allocation8 + $0x368] sm:$0xf0] }
 0x655   : > { %v4251_v16 = vpop.f32.mrf.mxu1  ;;  %v6619_v24 = vld [vmem:[#allocation8 + $0x264] sm:$0xf]  ;;  %v6203_v53 = vld [vmem:[#allocation8 + $0x268] sm:$0xf0] }
 0x656   : > { %5212 = vst [vmem:[%s8247_s16 + $0xe0] sm:$0xff] %v4428_v18  ;;  %v4252_v62 = vadd.f32 %v4251_v16, %v4163_v20  ;;  %v6334_v18 = vor.u32 %v6651_v55, %v6331_v22  ;;  %v6667_v20 = vld [vmem:[#allocation8 + $0x3e4] sm:$0xf] }
 0x658   : > { %5007 = vmatpush.bf16.msrb.mxu2 %v6334_v18 }
 0x659   : > { %v4340_v9 = vpop.f32.mrf.mxu2 }
 0x65a   : > { %v4341_v28 = vadd.f32 %v4340_v9, %v4252_v62  ;;  %v6395_v62 = vld [vmem:[#allocation8 + $0x3e8] sm:$0xf0] }
 0x65b   : > { %v4429_v48 = vpop.f32.mrf.mxu3  ;;  %v4165_v52 = vpop.f32.mrf.mxu0 }
 0x65c   : > { %v4430_v33 = vadd.f32 %v4429_v48, %v4341_v28  ;;  %v4166_v15 = vadd.f32 %v4165_v52, %v8165_v36  ;;  %v6206_v36 = vor.u32 %v6619_v24, %v6203_v53  ;;  %v6398_v28 = vor.u32 %v6667_v20, %v6395_v62 }
 0x65d   : > { %v4254_v63 = vpop.f32.mrf.mxu1 }
 0x65e   : > { %4480 = vmatmul.bf16.vlgmr.msra.gmra.mxu0 %v8995_v4  ;;  %5214 = vst [vmem:[%s8247_s16 + $0xf0] sm:$0xff] %v4430_v33  ;;  %4658 = vmatmul.bf16.vlgmr.msra.gmra.mxu2 %v8997_v25  ;;  %v4255_v16 = vadd.f32 %v4254_v63, %v4166_v15  ;;  %v6635_v15 = vld [vmem:[#allocation8 + $0x2e4] sm:$0xf]  ;;  %v6267_v63 = vld [vmem:[#allocation8 + $0x2e8] sm:$0xf0] }
 0x65f   : > { %4829 = vmatpush.bf16.msrb.mxu0 %v6206_v36  ;;  %5096 = vmatpush.bf16.msrb.mxu3 %v6398_v28  ;;  %v9000_v36 = vld [vmem:[#allocation18_spill] sm:$0xff] }
 0x660   : > { %4569 = vmatmul.bf16.vlgmr.msra.gmra.mxu1 %v8996_v49  ;;  %4747 = vmatmul.bf16.vlgmr.msra.gmra.mxu3 %v8998_v0  ;;  %v6270_v0 = vor.u32 %v6635_v15, %v6267_v63  ;;  %v9002_v28 = vld [vmem:[#allocation50_spill] sm:$0xff] }
 0x661   : > { %v4343_v9 = vpop.f32.mrf.mxu2 }
 0x662   : > { %v4344_v48 = vadd.f32 %v4343_v9, %v4255_v16  ;;  %4918 = vmatpush.bf16.msrb.mxu1 %v6270_v0  ;;  %v8999_v9 = vld [vmem:[#allocation17_spill] sm:$0xff] }
 0x663   : > { %v4432_v33 = vpop.f32.mrf.mxu3  ;;  %v4167_v52 = vpop.f32.mrf.mxu0 }
 0x664   : > { %v4433_v49 = vadd.f32 %v4432_v33, %v4344_v48  ;;  %v4168_v25 = vadd.f32 %v4167_v52, %v8168_v26  ;;  %v9001_v26 = vld [vmem:[#allocation49_spill] sm:$0xff] }
 0x665   : > { %v4256_v4 = vpop.f32.mrf.mxu1 }
 0x666   : > { %5216 = vst [vmem:[%s8247_s16 + $0x100] sm:$0xff] %v4433_v49  ;;  %v4257_v55 = vadd.f32 %v4256_v4, %v4168_v25 }
 0x669   : > { %v4345_v22 = vpop.f32.mrf.mxu2 }
 0x66a   : > { %v4346_v24 = vadd.f32 %v4345_v22, %v4257_v55 }
 0x66b   : > { %v4434_v53 = vpop.f32.mrf.mxu3  ;;  %v4170_v16 = vpop.f32.mrf.mxu0 }
 0x66c   : > { %v4435_v18 = vadd.f32 %v4434_v53, %v4346_v24  ;;  %v4171_v62 = vadd.f32 %v4170_v16, %v8175_v42 }
 0x66d   : > { %v4259_v20 = vpop.f32.mrf.mxu1 }
 0x66e   : > { %4485 = vmatmul.bf16.gmra.mxu0 %v8999_v9  ;;  %5218 = vst [vmem:[%s8247_s16 + $0x110] sm:$0xff] %v4435_v18  ;;  %4663 = vmatmul.bf16.gmra.mxu2 %v9001_v26  ;;  %v4260_v48 = vadd.f32 %v4259_v20, %v4171_v62  ;;  %v9003_v20 = vld [vmem:[#allocation19_spill] sm:$0xff]  ;;  %v9004_v62 = vld [vmem:[#allocation20_spill] sm:$0xff]  ;;  %v6323_v26 = vld [vmem:[#allocation8 + $0x358] sm:$0xf0] }
 0x66f   : > { %v9005_v9 = vld [vmem:[#allocation51_spill] sm:$0xff] }
 0x670   : > { %4574 = vmatmul.bf16.gmra.mxu1 %v9000_v36  ;;  %4752 = vmatmul.bf16.gmra.mxu3 %v9002_v28  ;;  %v9006_v36 = vld [vmem:[#allocation52_spill] sm:$0xff]  ;;  %v6617_v28 = vld [vmem:[#allocation8 + $0x254] sm:$0xf] }
 0x671   : > { %v4348_v33 = vpop.f32.mrf.mxu2 }
 0x672   : > { %v4349_v52 = vadd.f32 %v4348_v33, %v4260_v48 }
 0x673   : > { %v4437_v4 = vpop.f32.mrf.mxu3  ;;  %v4172_v49 = vpop.f32.mrf.mxu0 }
 0x674   : > { %v4438_v15 = vadd.f32 %v4437_v4, %v4349_v52  ;;  %v4173_v63 = vadd.f32 %v4172_v49, %v8178_v14  ;;  %v6649_v14 = vld [vmem:[#allocation8 + $0x354] sm:$0xf]  ;;  %v6195_v52 = vld [vmem:[#allocation8 + $0x258] sm:$0xf0] }
 0x675   : > { %v4261_v25 = vpop.f32.mrf.mxu1  ;;  %v6326_v33 = vor.u32 %v6649_v14, %v6323_v26  ;;  %v6665_v4 = vld [vmem:[#allocation8 + $0x3d4] sm:$0xf]  ;;  %v6387_v49 = vld [vmem:[#allocation8 + $0x3d8] sm:$0xf0] }
 0x676   : > { %5220 = vst [vmem:[%s8247_s16 + $0x120] sm:$0xff] %v4438_v15  ;;  %v4262_v42 = vadd.f32 %v4261_v25, %v4173_v63  ;;  %v6390_v15 = vor.u32 %v6665_v4, %v6387_v49  ;;  %v9010_v4 = vld [vmem:[#allocation54_spill] sm:$0xff] }
 0x677   : > { %5008 = vmatpush.bf16.msrb.mxu2 %v6326_v33  ;;  %v9007_v33 = vld [vmem:[#allocation21_spill] sm:$0xff] }
 0x678   : > { %5097 = vmatpush.bf16.msrb.mxu3 %v6390_v15 }
 0x679   : > { %v4350_v0 = vpop.f32.mrf.mxu2 }
 0x67a   : > { %v4351_v55 = vadd.f32 %v4350_v0, %v4262_v42 }
 0x67b   : > { %v4439_v22 = vpop.f32.mrf.mxu3  ;;  %v4175_v24 = vpop.f32.mrf.mxu0 }
 0x67c   : > { %v4440_v16 = vadd.f32 %v4439_v22, %v4351_v55  ;;  %v4176_v18 = vadd.f32 %v4175_v24, %v8185_v41  ;;  %v6198_v41 = vor.u32 %v6617_v28, %v6195_v52  ;;  %v9008_v52 = vld [vmem:[#allocation22_spill] sm:$0xff] }
 0x67d   : > { %v4264_v53 = vpop.f32.mrf.mxu1 }
 0x67e   : > { %4490 = vmatmul.bf16.gmra.mxu0 %v9003_v20  ;;  %5222 = vst [vmem:[%s8247_s16 + $0x130] sm:$0xff] %v4440_v16  ;;  %4668 = vmatmul.bf16.gmra.mxu2 %v9005_v9  ;;  %v4265_v48 = vadd.f32 %v4264_v53, %v4176_v18  ;;  %v6633_v53 = vld [vmem:[#allocation8 + $0x2d4] sm:$0xf]  ;;  %v6259_v16 = vld [vmem:[#allocation8 + $0x2d8] sm:$0xf0] }
 0x67f   : > { %4830 = vmatpush.bf16.msrb.mxu0 %v6198_v41  ;;  %v6262_v18 = vor.u32 %v6633_v53, %v6259_v16 }
 0x680   : > { %4579 = vmatmul.bf16.gmra.mxu1 %v9004_v62  ;;  %4757 = vmatmul.bf16.gmra.mxu3 %v9006_v36 }
 0x681   : > { %v4353_v25 = vpop.f32.mrf.mxu2  ;;  %4919 = vmatpush.bf16.msrb.mxu1 %v6262_v18 }
 0x682   : > { %v4354_v63 = vadd.f32 %v4353_v25, %v4265_v48 }
 0x683   : > { %v4442_v42 = vpop.f32.mrf.mxu3  ;;  %v4177_v0 = vpop.f32.mrf.mxu0 }
 0x684   : > { %v4443_v22 = vadd.f32 %v4442_v42, %v4354_v63  ;;  %v4178_v24 = vadd.f32 %v4177_v0, %v8188_v1  ;;  %v9009_v1 = vld [vmem:[#allocation53_spill] sm:$0xff] }
 0x685   : > { %v4266_v55 = vpop.f32.mrf.mxu1 }
 0x686   : > { %5224 = vst [vmem:[%s8247_s16 + $0x140] sm:$0xff] %v4443_v22  ;;  %v4267_v20 = vadd.f32 %v4266_v55, %v4178_v24 }
 0x689   : > { %v4355_v62 = vpop.f32.mrf.mxu2 }
 0x68a   : > { %v4356_v9 = vadd.f32 %v4355_v62, %v4267_v20 }
 0x68b   : > { %v4444_v36 = vpop.f32.mrf.mxu3  ;;  %v4180_v14 = vpop.f32.mrf.mxu0 }
 0x68c   : > { %v4445_v28 = vadd.f32 %v4444_v36, %v4356_v9  ;;  %v4181_v48 = vadd.f32 %v4180_v14, %v8195_v32  ;;  %v9011_v9 = vld [vmem:[#allocation23_spill] sm:$0xff]  ;;  %v9012_v36 = vld [vmem:[#allocation24_spill] sm:$0xff] }
 0x68d   : > { %v4269_v26 = vpop.f32.mrf.mxu1  ;;  %v9013_v14 = vld [vmem:[#allocation55_spill] sm:$0xff] }
 0x68e   : > { %4495 = vmatmul.bf16.gmra.mxu0 %v9007_v33  ;;  %5226 = vst [vmem:[%s8247_s16 + $0x150] sm:$0xff] %v4445_v28  ;;  %4673 = vmatmul.bf16.gmra.mxu2 %v9009_v1  ;;  %v4270_v49 = vadd.f32 %v4269_v26, %v4181_v48  ;;  %v9014_v26 = vld [vmem:[#allocation56_spill] sm:$0xff]  ;;  %v6615_v48 = vld [vmem:[#allocation8 + $0x244] sm:$0xf] }
 0x68f   : > { %v6315_v28 = vld [vmem:[#allocation8 + $0x348] sm:$0xf0] }
 0x690   : > { %4584 = vmatmul.bf16.gmra.mxu1 %v9008_v52  ;;  %4762 = vmatmul.bf16.gmra.mxu3 %v9010_v4  ;;  %v6187_v1 = vld [vmem:[#allocation8 + $0x248] sm:$0xf0]  ;;  %v6663_v4 = vld [vmem:[#allocation8 + $0x3c4] sm:$0xf] }
 0x691   : > { %v4358_v25 = vpop.f32.mrf.mxu2 }
 0x692   : > { %v4359_v41 = vadd.f32 %v4358_v25, %v4270_v49  ;;  %v6379_v49 = vld [vmem:[#allocation8 + $0x3c8] sm:$0xf0] }
 0x693   : > { %v4447_v15 = vpop.f32.mrf.mxu3  ;;  %v4182_v63 = vpop.f32.mrf.mxu0 }
 0x694   : > { %v4448_v0 = vadd.f32 %v4447_v15, %v4359_v41  ;;  %v4183_v55 = vadd.f32 %v4182_v63, %v8198_v59  ;;  %v6647_v59 = vld [vmem:[#allocation8 + $0x344] sm:$0xf]  ;;  %v6382_v41 = vor.u32 %v6663_v4, %v6379_v49 }
 0x695   : > { %v4271_v42 = vpop.f32.mrf.mxu1  ;;  %v6318_v52 = vor.u32 %v6647_v59, %v6315_v28  ;;  %v9015_v59 = vld [vmem:[#allocation25_spill] sm:$0xff]  ;;  %v9016_v28 = vld [vmem:[#allocation26_spill] sm:$0xff] }
 0x696   : > { %5228 = vst [vmem:[%s8247_s16 + $0x160] sm:$0xff] %v4448_v0  ;;  %v4272_v32 = vadd.f32 %v4271_v42, %v4183_v55  ;;  %5098 = vmatpush.bf16.msrb.mxu3 %v6382_v41 }
 0x697   : > { %5009 = vmatpush.bf16.msrb.mxu2 %v6318_v52 }
 0x699   : > { %v4360_v22 = vpop.f32.mrf.mxu2 }
 0x69a   : > { %v4361_v24 = vadd.f32 %v4360_v22, %v4272_v32  ;;  %v6631_v22 = vld [vmem:[#allocation8 + $0x2c4] sm:$0xf] }
 0x69b   : > { %v4449_v53 = vpop.f32.mrf.mxu3  ;;  %v4185_v16 = vpop.f32.mrf.mxu0 }
 0x69c   : > { %v4450_v20 = vadd.f32 %v4449_v53, %v4361_v24  ;;  %v4186_v62 = vadd.f32 %v4185_v16, %v8205_v7  ;;  %v6190_v7 = vor.u32 %v6615_v48, %v6187_v1  ;;  %v6251_v24 = vld [vmem:[#allocation8 + $0x2c8] sm:$0xf0]  ;;  %v9018_v48 = vld [vmem:[#allocation58_spill] sm:$0xff] }
 0x69d   : > { %v4274_v18 = vpop.f32.mrf.mxu1  ;;  %v6254_v53 = vor.u32 %v6631_v22, %v6251_v24  ;;  %v9019_v24 = vld [vmem:[#allocation27_spill] sm:$0xff] }
 0x69e   : > { %4500 = vmatmul.bf16.gmra.mxu0 %v9011_v9  ;;  %5230 = vst [vmem:[%s8247_s16 + $0x170] sm:$0xff] %v4450_v20  ;;  %4678 = vmatmul.bf16.gmra.mxu2 %v9013_v14  ;;  %v4275_v33 = vadd.f32 %v4274_v18, %v4186_v62 }
 0x69f   : > { %4831 = vmatpush.bf16.msrb.mxu0 %v6190_v7  ;;  %4920 = vmatpush.bf16.msrb.mxu1 %v6254_v53  ;;  %v9020_v53 = vld [vmem:[#allocation28_spill] sm:$0xff] }
 0x6a0   : > { %4589 = vmatmul.bf16.gmra.mxu1 %v9012_v36  ;;  %4767 = vmatmul.bf16.gmra.mxu3 %v9014_v26 }
 0x6a1   : > { %v4363_v25 = vpop.f32.mrf.mxu2 }
 0x6a2   : > { %v4364_v15 = vadd.f32 %v4363_v25, %v4275_v33 }
 0x6a3   : > { %v4452_v63 = vpop.f32.mrf.mxu3  ;;  %v4187_v42 = vpop.f32.mrf.mxu0 }
 0x6a4   : > { %v4453_v55 = vadd.f32 %v4452_v63, %v4364_v15  ;;  %v4188_v32 = vadd.f32 %v4187_v42, %v8208_v56  ;;  %v9017_v56 = vld [vmem:[#allocation57_spill] sm:$0xff] }
 0x6a5   : > { %v4276_v0 = vpop.f32.mrf.mxu1 }
 0x6a6   : > { %5232 = vst [vmem:[%s8247_s16 + $0x180] sm:$0xff] %v4453_v55  ;;  %v4277_v16 = vadd.f32 %v4276_v0, %v4188_v32 }
 0x6a9   : > { %v4365_v18 = vpop.f32.mrf.mxu2 }
 0x6aa   : > { %v4366_v20 = vadd.f32 %v4365_v18, %v4277_v16  ;;  %v9021_v16 = vld [vmem:[#allocation59_spill] sm:$0xff]  ;;  %v9022_v18 = vld [vmem:[#allocation60_spill] sm:$0xff] }
 0x6ab   : > { %v4454_v62 = vpop.f32.mrf.mxu3  ;;  %v4190_v9 = vpop.f32.mrf.mxu0 }
 0x6ac   : > { %v4455_v14 = vadd.f32 %v4454_v62, %v4366_v20  ;;  %v4191_v26 = vadd.f32 %v4190_v9, %v8215_v6  ;;  %v6307_v20 = vld [vmem:[#allocation8 + $0x338] sm:$0xf0]  ;;  %v6613_v62 = vld [vmem:[#allocation8 + $0x234] sm:$0xf] }
 0x6ad   : > { %v4279_v36 = vpop.f32.mrf.mxu1 }
 0x6ae   : > { %4505 = vmatmul.bf16.gmra.mxu0 %v9015_v59  ;;  %5234 = vst [vmem:[%s8247_s16 + $0x190] sm:$0xff] %v4455_v14  ;;  %4683 = vmatmul.bf16.gmra.mxu2 %v9017_v56  ;;  %v4280_v33 = vadd.f32 %v4279_v36, %v4191_v26  ;;  %v6179_v14 = vld [vmem:[#allocation8 + $0x238] sm:$0xf0]  ;;  %v6661_v26 = vld [vmem:[#allocation8 + $0x3b4] sm:$0xf] }
 0x6af   : > { %v6371_v59 = vld [vmem:[#allocation8 + $0x3b8] sm:$0xf0] }
 0x6b0   : > { %4594 = vmatmul.bf16.gmra.mxu1 %v9016_v28  ;;  %4772 = vmatmul.bf16.gmra.mxu3 %v9018_v48  ;;  %v6374_v56 = vor.u32 %v6661_v26, %v6371_v59 }
 0x6b1   : > { %v4368_v52 = vpop.f32.mrf.mxu2 }
 0x6b2   : > { %v4369_v1 = vadd.f32 %v4368_v52, %v4280_v33  ;;  %5099 = vmatpush.bf16.msrb.mxu3 %v6374_v56 }
 0x6b3   : > { %v4457_v4 = vpop.f32.mrf.mxu3  ;;  %v4192_v49 = vpop.f32.mrf.mxu0 }
 0x6b4   : > { %v4458_v7 = vadd.f32 %v4457_v4, %v4369_v1  ;;  %v4193_v41 = vadd.f32 %v4192_v49, %v8218_v58  ;;  %v6645_v58 = vld [vmem:[#allocation8 + $0x334] sm:$0xf] }
 0x6b5   : > { %v4281_v25 = vpop.f32.mrf.mxu1  ;;  %v6310_v36 = vor.u32 %v6645_v58, %v6307_v20 }
 0x6b6   : > { %5236 = vst [vmem:[%s8247_s16 + $0x1a0] sm:$0xff] %v4458_v7  ;;  %v4282_v6 = vadd.f32 %v4281_v25, %v4193_v41  ;;  %v6629_v25 = vld [vmem:[#allocation8 + $0x2b4] sm:$0xf]  ;;  %v6243_v7 = vld [vmem:[#allocation8 + $0x2b8] sm:$0xf0] }
 0x6b7   : > { %5010 = vmatpush.bf16.msrb.mxu2 %v6310_v36  ;;  %v6246_v41 = vor.u32 %v6629_v25, %v6243_v7  ;;  %v9027_v25 = vld [vmem:[#allocation31_spill] sm:$0xff] }
 0x6b8   : > { %v9029_v7 = vld [vmem:[#allocation63_spill] sm:$0xff] }
 0x6b9   : > { %v4370_v15 = vpop.f32.mrf.mxu2  ;;  %4921 = vmatpush.bf16.msrb.mxu1 %v6246_v41  ;;  %v9030_v41 = vld [vmem:[#allocation64_spill] sm:$0xff] }
 0x6ba   : > { %v4371_v63 = vadd.f32 %v4370_v15, %v4282_v6 }
 0x6bb   : > { %v4459_v42 = vpop.f32.mrf.mxu3  ;;  %v4195_v0 = vpop.f32.mrf.mxu0 }
 0x6bc   : > { %v4460_v32 = vadd.f32 %v4459_v42, %v4371_v63  ;;  %v4196_v22 = vadd.f32 %v4195_v0, %v8225_v50  ;;  %v6182_v50 = vor.u32 %v6613_v62, %v6179_v14 }
 0x6bd   : > { %v4284_v55 = vpop.f32.mrf.mxu1 }
 0x6be   : > { %4510 = vmatmul.bf16.gmra.mxu0 %v9019_v24  ;;  %5238 = vst [vmem:[%s8247_s16 + $0x1b0] sm:$0xff] %v4460_v32  ;;  %4688 = vmatmul.bf16.gmra.mxu2 %v9021_v16  ;;  %v4285_v9 = vadd.f32 %v4284_v55, %v4196_v22  ;;  %v9023_v24 = vld [vmem:[#allocation29_spill] sm:$0xff]  ;;  %v9026_v16 = vld [vmem:[#allocation62_spill] sm:$0xff] }
 0x6bf   : > { %4832 = vmatpush.bf16.msrb.mxu0 %v6182_v50 }
 0x6c0   : > { %4599 = vmatmul.bf16.gmra.mxu1 %v9020_v53  ;;  %4777 = vmatmul.bf16.gmra.mxu3 %v9022_v18  ;;  %v9024_v53 = vld [vmem:[#allocation30_spill] sm:$0xff] }
 0x6c1   : > { %v4373_v28 = vpop.f32.mrf.mxu2 }
 0x6c2   : > { %v4374_v48 = vadd.f32 %v4373_v28, %v4285_v9 }
 0x6c3   : > { %v4462_v33 = vpop.f32.mrf.mxu3  ;;  %v4197_v52 = vpop.f32.mrf.mxu0 }
 0x6c4   : > { %v4463_v4 = vadd.f32 %v4462_v33, %v4374_v48  ;;  %v4198_v49 = vadd.f32 %v4197_v52, %v8228_v5  ;;  %v9025_v5 = vld [vmem:[#allocation61_spill] sm:$0xff] }
 0x6c5   : > { %v4286_v1 = vpop.f32.mrf.mxu1 }
 0x6c6   : > { %5240 = vst [vmem:[%s8247_s16 + $0x1c0] sm:$0xff] %v4463_v4  ;;  %v4287_v6 = vadd.f32 %v4286_v1, %v4198_v49 }
 0x6c9   : > { %v4375_v15 = vpop.f32.mrf.mxu2 }
 0x6ca   : > { %v4376_v63 = vadd.f32 %v4375_v15, %v4287_v6  ;;  %v6643_v6 = vld [vmem:[#allocation8 + $0x324] sm:$0xf]  ;;  %v6299_v15 = vld [vmem:[#allocation8 + $0x328] sm:$0xf0] }
 0x6cb   : > { %v4464_v42 = vpop.f32.mrf.mxu3  ;;  %v4200_v0 = vpop.f32.mrf.mxu0 }
 0x6cc   : > { %v4465_v32 = vadd.f32 %v4464_v42, %v4376_v63  ;;  %v4201_v22 = vadd.f32 %v4200_v0, %v8235_v51  ;;  %v6761_v51 = vld [vmem:[%s8670_s4] sm:$0x3]  ;;  %v6611_v63 = vld [vmem:[#allocation8 + $0x224] sm:$0xf]  ;;  %v6302_v42 = vor.u32 %v6643_v6, %v6299_v15  ;;  %v6171_v0 = vld [vmem:[#allocation8 + $0x228] sm:$0xf0] }
 0x6cd   : > { %v4289_v55 = vpop.f32.mrf.mxu1  ;;  %v8373_v59 = vperm.slane %v6761_v51, 1 }
 0x6ce   : > { %4515 = vmatmul.bf16.gmra.mxu0 %v9023_v24  ;;  %5242 = vst [vmem:[%s8247_s16 + $0x1d0] sm:$0xff] %v4465_v32  ;;  %4693 = vmatmul.bf16.gmra.mxu2 %v9025_v5  ;;  %v4290_v18 = vadd.f32 %v4289_v55, %v4201_v22  ;;  %v6659_v55 = vld [vmem:[#allocation8 + $0x3a4] sm:$0xf]  ;;  %v6363_v32 = vld [vmem:[#allocation8 + $0x3a8] sm:$0xf0]  ;;  %v6174_v24 = vor.u32 %v6611_v63, %v6171_v0 }
 0x6cf   : > { %5011 = vmatpush.bf16.msrb.mxu2 %v6302_v42 }
 0x6d0   : > { %4604 = vmatmul.bf16.gmra.mxu1 %v9024_v53  ;;  %4782 = vmatmul.bf16.gmra.mxu3 %v9026_v16  ;;  %v6366_v53 = vor.u32 %v6659_v55, %v6363_v32 }
 0x6d1   : > { %v4378_v58 = vpop.f32.mrf.mxu2  ;;  %4833 = vmatpush.bf16.msrb.mxu0 %v6174_v24 }
 0x6d2   : > { %v4379_v20 = vadd.f32 %v4378_v58, %v4290_v18  ;;  %5100 = vmatpush.bf16.msrb.mxu3 %v6366_v53 }
 0x6d3   : > { %v4467_v62 = vpop.f32.mrf.mxu3  ;;  %v4202_v9 = vpop.f32.mrf.mxu0 }
 0x6d4   : > { %v4468_v14 = vadd.f32 %v4467_v62, %v4379_v20  ;;  %v4203_v26 = vadd.f32 %v4202_v9, %v8237_v17  ;;  %v9028_v17 = vld [vmem:[#allocation32_spill] sm:$0xff]  ;;  %v6627_v9 = vld [vmem:[#allocation8 + $0x2a4] sm:$0xf] }
 0x6d5   : > { %v4291_v36 = vpop.f32.mrf.mxu1 }
 0x6d6   : > { %5244 = vst [vmem:[%s8247_s16 + $0x1e0] sm:$0xff] %v4468_v14  ;;  %v4292_v28 = vadd.f32 %v4291_v36, %v4203_v26  ;;  %v6235_v36 = vld [vmem:[#allocation8 + $0x2a8] sm:$0xf0] }
 0x6d7   : > { %v6238_v26 = vor.u32 %v6627_v9, %v6235_v36  ;;  %v9036_v9 = vld [vmem:[#allocation36_spill] sm:$0xff]  ;;  %v9037_v36 = vld [vmem:[#allocation67_spill] sm:$0xff] }
 0x6d9   : > { %v4380_v50 = vpop.f32.mrf.mxu2  ;;  %4922 = vmatpush.bf16.msrb.mxu1 %v6238_v26  ;;  %v6641_v26 = vld [vmem:[#allocation8 + $0x314] sm:$0xf] }
 0x6da   : > { %v4381_v56 = vadd.f32 %v4380_v50, %v4292_v28 }
 0x6db   : > { %v4469_v48 = vpop.f32.mrf.mxu3  ;;  %v4481_v33 = vpop.f32.mrf.mxu0 }
 0x6dc   : > { %v4482_v52 = vadd.f32 %v4481_v33, %v8373_v59  ;;  %v4470_v4 = vadd.f32 %v4469_v48, %v4381_v56 }
 0x6dd   : > { %v4570_v1 = vpop.f32.mrf.mxu1 }
 0x6de   : > { %v4571_v49 = vadd.f32 %v4570_v1, %v4482_v52  ;;  %4520 = vmatmul.bf16.gmra.mxu0 %v9027_v25  ;;  %5246 = vst [vmem:[%s8247_s16 + $0x1f0] sm:$0xff] %v4470_v4  ;;  %4698 = vmatmul.bf16.gmra.mxu2 %v9029_v7  ;;  %v9031_v4 = vld [vmem:[#allocation33_spill] sm:$0xff] }
 0x6df   : > { %v9033_v25 = vld [vmem:[#allocation65_spill] sm:$0xff] }
 0x6e0   : > { %4609 = vmatmul.bf16.gmra.mxu1 %v9028_v17  ;;  %4787 = vmatmul.bf16.gmra.mxu3 %v9030_v41  ;;  %v9034_v17 = vld [vmem:[#allocation66_spill] sm:$0xff] }
 0x6e1   : > { %v4659_v22 = vpop.f32.mrf.mxu2 }
 0x6e2   : > { %v4660_v5 = vadd.f32 %v4659_v22, %v4571_v49  ;;  %v9032_v49 = vld [vmem:[#allocation34_spill] sm:$0xff] }
 0x6e3   : > { %v4748_v16 = vpop.f32.mrf.mxu3  ;;  %v4483_v18 = vpop.f32.mrf.mxu0 }
 0x6e4   : > { %v4484_v58 = vadd.f32 %v4483_v18, %v8373_v59  ;;  %v8382_v62 = vadd.f32 %v4748_v16, %v4660_v5 }
 0x6e5   : > { %v4572_v20 = vpop.f32.mrf.mxu1 }
 0x6e6   : > { %v4573_v14 = vadd.f32 %v4572_v20, %v4484_v58  ;;  %v9035_v20 = vld [vmem:[#allocation35_spill] sm:$0xff] }
 0x6e9   : > { %v4661_v51 = vpop.f32.mrf.mxu2 }
 0x6ea   : > { %v4662_v28 = vadd.f32 %v4661_v51, %v4573_v14  ;;  %v9038_v14 = vld [vmem:[#allocation68_spill] sm:$0xff]  ;;  %v6291_v51 = vld [vmem:[#allocation8 + $0x318] sm:$0xf0] }
 0x6eb   : > { %v4750_v50 = vpop.f32.mrf.mxu3  ;;  %v4486_v56 = vpop.f32.mrf.mxu0 }
 0x6ec   : > { %v4487_v48 = vadd.f32 %v4486_v56, %v8373_v59  ;;  %v8385_v52 = vadd.f32 %v4750_v50, %v4662_v28  ;;  %v6609_v28 = vld [vmem:[#allocation8 + $0x214] sm:$0xf]  ;;  %v6294_v50 = vor.u32 %v6641_v26, %v6291_v51  ;;  %v6163_v56 = vld [vmem:[#allocation8 + $0x218] sm:$0xf0] }
 0x6ed   : > { %v4575_v33 = vpop.f32.mrf.mxu1  ;;  %v9041_v26 = vld [vmem:[#allocation69_spill] sm:$0xff]  ;;  %v9042_v51 = vld [vmem:[#allocation70_spill] sm:$0xff] }
 0x6ee   : > { %v4576_v1 = vadd.f32 %v4575_v33, %v4487_v48  ;;  %4525 = vmatmul.bf16.gmra.mxu0 %v9031_v4  ;;  %4703 = vmatmul.bf16.gmra.mxu2 %v9033_v25  ;;  %v6657_v48 = vld [vmem:[#allocation8 + $0x394] sm:$0xf]  ;;  %v6355_v33 = vld [vmem:[#allocation8 + $0x398] sm:$0xf0]  ;;  %v6166_v4 = vor.u32 %v6609_v28, %v6163_v56 }
 0x6ef   : > { %5012 = vmatpush.bf16.msrb.mxu2 %v6294_v50 }
 0x6f0   : > { %4614 = vmatmul.bf16.gmra.mxu1 %v9032_v49  ;;  %4792 = vmatmul.bf16.gmra.mxu3 %v9034_v17  ;;  %v6358_v49 = vor.u32 %v6657_v48, %v6355_v33 }
 0x6f1   : > { %v4664_v7 = vpop.f32.mrf.mxu2  ;;  %4834 = vmatpush.bf16.msrb.mxu0 %v6166_v4 }
 0x6f2   : > { %v4665_v41 = vadd.f32 %v4664_v7, %v4576_v1  ;;  %5101 = vmatpush.bf16.msrb.mxu3 %v6358_v49 }
 0x6f3   : > { %v4753_v6 = vpop.f32.mrf.mxu3  ;;  %v4488_v15 = vpop.f32.mrf.mxu0 }
 0x6f4   : > { %v4489_v63 = vadd.f32 %v4488_v15, %v8373_v59  ;;  %v8392_v0 = vadd.f32 %v4753_v6, %v4665_v41 }
 0x6f5   : > { %v4577_v42 = vpop.f32.mrf.mxu1 }
 0x6f6   : > { %v4578_v55 = vadd.f32 %v4577_v42, %v4489_v63  ;;  %v6625_v63 = vld [vmem:[#allocation8 + $0x294] sm:$0xf]  ;;  %v6227_v42 = vld [vmem:[#allocation8 + $0x298] sm:$0xf0] }
 0x6f9   : > { %v4666_v32 = vpop.f32.mrf.mxu2 }
 0x6fa   : > { %v4667_v22 = vadd.f32 %v4666_v32, %v4578_v55  ;;  %v6230_v32 = vor.u32 %v6625_v63, %v6227_v42 }
 0x6fb   : > { %v4755_v24 = vpop.f32.mrf.mxu3  ;;  %v4491_v53 = vpop.f32.mrf.mxu0 }
 0x6fc   : > { %v4492_v5 = vadd.f32 %v4491_v53, %v8373_v59  ;;  %v8395_v18 = vadd.f32 %v4755_v24, %v4667_v22  ;;  %4923 = vmatpush.bf16.msrb.mxu1 %v6230_v32  ;;  %v9043_v32 = vld [vmem:[#allocation39_spill] sm:$0xff] }
 0x6fd   : > { %v4580_v16 = vpop.f32.mrf.mxu1 }
 0x6fe   : > { %v4581_v58 = vadd.f32 %v4580_v16, %v4492_v5  ;;  %4530 = vmatmul.bf16.gmra.mxu0 %v9035_v20  ;;  %4708 = vmatmul.bf16.gmra.mxu2 %v9037_v36  ;;  %v9039_v36 = vld [vmem:[#allocation37_spill] sm:$0xff] }
 0x700   : > { %4619 = vmatmul.bf16.gmra.mxu1 %v9036_v9  ;;  %4797 = vmatmul.bf16.gmra.mxu3 %v9038_v14  ;;  %v9040_v14 = vld [vmem:[#allocation38_spill] sm:$0xff] }
 0x701   : > { %v4669_v1 = vpop.f32.mrf.mxu2 }
 0x702   : > { %v4670_v25 = vadd.f32 %v4669_v1, %v4581_v58 }
 0x703   : > { %v4758_v17 = vpop.f32.mrf.mxu3  ;;  %v4493_v7 = vpop.f32.mrf.mxu0 }
 0x704   : > { %v4494_v41 = vadd.f32 %v4493_v7, %v8373_v59  ;;  %v8402_v15 = vadd.f32 %v4758_v17, %v4670_v25 }
 0x705   : > { %v4582_v6 = vpop.f32.mrf.mxu1 }
 0x706   : > { %v4583_v55 = vadd.f32 %v4582_v6, %v4494_v41 }
 0x709   : > { %v4671_v22 = vpop.f32.mrf.mxu2 }
 0x70a   : > { %v4672_v24 = vadd.f32 %v4671_v22, %v4583_v55  ;;  %v9044_v22 = vld [vmem:[#allocation40_spill] sm:$0xff] }
 0x70b   : > { %v4760_v53 = vpop.f32.mrf.mxu3  ;;  %v4496_v5 = vpop.f32.mrf.mxu0 }
 0x70c   : > { %v4497_v16 = vadd.f32 %v4496_v5, %v8373_v59  ;;  %v8405_v20 = vadd.f32 %v4760_v53, %v4672_v24  ;;  %v9045_v24 = vld [vmem:[#allocation71_spill] sm:$0xff]  ;;  %v9046_v53 = vld [vmem:[#allocation72_spill] sm:$0xff] }
 0x70d   : > { %v4585_v58 = vpop.f32.mrf.mxu1  ;;  %v6639_v5 = vld [vmem:[#allocation8 + $0x304] sm:$0xf] }
 0x70e   : > { %v4586_v9 = vadd.f32 %v4585_v58, %v4497_v16  ;;  %4535 = vmatmul.bf16.gmra.mxu0 %v9039_v36  ;;  %4713 = vmatmul.bf16.gmra.mxu2 %v9041_v26  ;;  %v6283_v16 = vld [vmem:[#allocation8 + $0x308] sm:$0xf0]  ;;  %v6607_v58 = vld [vmem:[#allocation8 + $0x204] sm:$0xf] }
 0x70f   : > { %v6155_v36 = vld [vmem:[#allocation8 + $0x208] sm:$0xf0] }
 0x710   : > { %4624 = vmatmul.bf16.gmra.mxu1 %v9040_v14  ;;  %4802 = vmatmul.bf16.gmra.mxu3 %v9042_v51  ;;  %v6655_v14 = vld [vmem:[#allocation8 + $0x384] sm:$0xf]  ;;  %v6347_v26 = vld [vmem:[#allocation8 + $0x388] sm:$0xf0] }
 0x711   : > { %v4674_v28 = vpop.f32.mrf.mxu2 }
 0x712   : > { %v4675_v50 = vadd.f32 %v4674_v28, %v4586_v9  ;;  %v6286_v9 = vor.u32 %v6639_v5, %v6283_v16  ;;  %v6158_v28 = vor.u32 %v6607_v58, %v6155_v36  ;;  %v9047_v58 = vld [vmem:[#allocation41_spill] sm:$0xff] }
 0x713   : > { %v4763_v56 = vpop.f32.mrf.mxu3  ;;  %v4498_v48 = vpop.f32.mrf.mxu0  ;;  %v9049_v36 = vld [vmem:[#allocation73_spill] sm:$0xff] }
 0x714   : > { %v4499_v33 = vadd.f32 %v4498_v48, %v8373_v59  ;;  %v8412_v4 = vadd.f32 %v4763_v56, %v4675_v50  ;;  %v6350_v50 = vor.u32 %v6655_v14, %v6347_v26  ;;  %5013 = vmatpush.bf16.msrb.mxu2 %v6286_v9  ;;  %4835 = vmatpush.bf16.msrb.mxu0 %v6158_v28  ;;  %v9048_v9 = vld [vmem:[#allocation42_spill] sm:$0xff] }
 0x715   : > { %v4587_v1 = vpop.f32.mrf.mxu1  ;;  %v9050_v14 = vld [vmem:[#allocation74_spill] sm:$0xff] }
 0x716   : > { %v4588_v49 = vadd.f32 %v4587_v1, %v4499_v33  ;;  %5102 = vmatpush.bf16.msrb.mxu3 %v6350_v50 }
 0x719   : > { %v4676_v25 = vpop.f32.mrf.mxu2 }
 0x71a   : > { %v4677_v17 = vadd.f32 %v4676_v25, %v4588_v49 }
 0x71b   : > { %v4765_v7 = vpop.f32.mrf.mxu3  ;;  %v4501_v41 = vpop.f32.mrf.mxu0 }
 0x71c   : > { %v4502_v6 = vadd.f32 %v4501_v41, %v8373_v59  ;;  %v8415_v42 = vadd.f32 %v4765_v7, %v4677_v17  ;;  %v6623_v17 = vld [vmem:[#allocation8 + $0x284] sm:$0xf]  ;;  %v6219_v7 = vld [vmem:[#allocation8 + $0x288] sm:$0xf0] }
 0x71d   : > { %v4590_v63 = vpop.f32.mrf.mxu1 }
 0x71e   : > { %v4591_v55 = vadd.f32 %v4590_v63, %v4502_v6  ;;  %4540 = vmatmul.bf16.gmra.mxu0 %v9043_v32  ;;  %4718 = vmatmul.bf16.gmra.mxu2 %v9045_v24  ;;  %v6222_v6 = vor.u32 %v6623_v17, %v6219_v7 }
 0x720   : > { %4629 = vmatmul.bf16.gmra.mxu1 %v9044_v22  ;;  %4807 = vmatmul.bf16.gmra.mxu3 %v9046_v53 }
 0x721   : > { %v4679_v51 = vpop.f32.mrf.mxu2  ;;  %4924 = vmatpush.bf16.msrb.mxu1 %v6222_v6 }
 0x722   : > { %v4680_v56 = vadd.f32 %v4679_v51, %v4591_v55 }
 0x723   : > { %v4768_v48 = vpop.f32.mrf.mxu3  ;;  %v4503_v33 = vpop.f32.mrf.mxu0 }
 0x724   : > { %v4504_v1 = vadd.f32 %v4503_v33, %v8373_v59  ;;  %v8422_v25 = vadd.f32 %v4768_v48, %v4680_v56 }
 0x725   : > { %v4592_v49 = vpop.f32.mrf.mxu1 }
 0x726   : > { %v4593_v41 = vadd.f32 %v4592_v49, %v4504_v1 }
 0x729   : > { %v4681_v63 = vpop.f32.mrf.mxu2 }
 0x72a   : > { %v4682_v32 = vadd.f32 %v4681_v63, %v4593_v41 }
 0x72b   : > { %v4770_v22 = vpop.f32.mrf.mxu3  ;;  %v4506_v24 = vpop.f32.mrf.mxu0 }
 0x72c   : > { %v4507_v55 = vadd.f32 %v4506_v24, %v8373_v59  ;;  %v8425_v5 = vadd.f32 %v4770_v22, %v4682_v32  ;;  %v9051_v24 = vld [vmem:[#allocation43_spill] sm:$0xff] }
 0x72d   : > { %v4595_v53 = vpop.f32.mrf.mxu1 }
 0x72e   : > { %v4596_v16 = vadd.f32 %v4595_v53, %v4507_v55  ;;  %4545 = vmatmul.bf16.gmra.mxu0 %v9047_v58  ;;  %4723 = vmatmul.bf16.gmra.mxu2 %v9049_v36  ;;  %v9052_v55 = vld [vmem:[#allocation44_spill] sm:$0xff]  ;;  %v9053_v53 = vld [vmem:[#allocation75_spill] sm:$0xff] }
 0x730   : > { %4634 = vmatmul.bf16.gmra.mxu1 %v9048_v9  ;;  %4812 = vmatmul.bf16.gmra.mxu3 %v9050_v14 }
 0x731   : > { %v4684_v26 = vpop.f32.mrf.mxu2 }
 0x732   : > { %v4685_v51 = vadd.f32 %v4684_v26, %v4596_v16  ;;  %v9054_v16 = vld [vmem:[#allocation76_spill] sm:$0xff] }
 0x733   : > { %v4773_v28 = vpop.f32.mrf.mxu3  ;;  %v4508_v50 = vpop.f32.mrf.mxu0 }
 0x734   : > { %v4509_v56 = vadd.f32 %v4508_v50, %v8373_v59  ;;  %v8432_v33 = vadd.f32 %v4773_v28, %v4685_v51 }
 0x735   : > { %v4597_v48 = vpop.f32.mrf.mxu1 }
 0x736   : > { %v4598_v1 = vadd.f32 %v4597_v48, %v4509_v56 }
 0x739   : > { %v4686_v49 = vpop.f32.mrf.mxu2 }
 0x73a   : > { %v4687_v17 = vadd.f32 %v4686_v49, %v4598_v1 }
 0x73b   : > { %v4775_v7 = vpop.f32.mrf.mxu3  ;;  %v4511_v41 = vpop.f32.mrf.mxu0 }
 0x73c   : > { %v4512_v6 = vadd.f32 %v4511_v41, %v8373_v59  ;;  %v8435_v32 = vadd.f32 %v4775_v7, %v4687_v17 }
 0x73d   : > { %v4600_v63 = vpop.f32.mrf.mxu1 }
 0x73e   : > { %v4601_v22 = vadd.f32 %v4600_v63, %v4512_v6  ;;  %4550 = vmatmul.bf16.gmra.mxu0 %v9051_v24  ;;  %4728 = vmatmul.bf16.gmra.mxu2 %v9053_v53  ;;  %v9055_v63 = vld [vmem:[#allocation45_spill] sm:$0xff] }
 0x73f   : > { %v9057_v24 = vld [vmem:[#allocation77_spill] sm:$0xff] }
 0x740   : > { %4639 = vmatmul.bf16.gmra.mxu1 %v9052_v55  ;;  %4817 = vmatmul.bf16.gmra.mxu3 %v9054_v16  ;;  %v9058_v55 = vld [vmem:[#allocation78_spill] sm:$0xff] }
 0x741   : > { %v4689_v58 = vpop.f32.mrf.mxu2 }
 0x742   : > { %v4690_v9 = vadd.f32 %v4689_v58, %v4601_v22  ;;  %v9056_v22 = vld [vmem:[#allocation46_spill] sm:$0xff] }
 0x743   : > { %v4778_v36 = vpop.f32.mrf.mxu3  ;;  %v4513_v14 = vpop.f32.mrf.mxu0 }
 0x744   : > { %v4514_v26 = vadd.f32 %v4513_v14, %v8373_v59  ;;  %v8442_v28 = vadd.f32 %v4778_v36, %v4690_v9 }
 0x745   : > { %v4602_v51 = vpop.f32.mrf.mxu1 }
 0x746   : > { %v4603_v50 = vadd.f32 %v4602_v51, %v4514_v26 }
 0x749   : > { %v4691_v56 = vpop.f32.mrf.mxu2 }
 0x74a   : > { %v4692_v48 = vadd.f32 %v4691_v56, %v4603_v50 }
 0x74b   : > { %v4780_v1 = vpop.f32.mrf.mxu3  ;;  %v4516_v49 = vpop.f32.mrf.mxu0 }
 0x74c   : > { %v4517_v17 = vadd.f32 %v4516_v49, %v8373_v59  ;;  %v8445_v41 = vadd.f32 %v4780_v1, %v4692_v48 }
 0x74d   : > { %v4605_v7 = vpop.f32.mrf.mxu1 }
 0x74e   : > { %v4606_v6 = vadd.f32 %v4605_v7, %v4517_v17  ;;  %4555 = vmatmul.bf16.gmra.mxu0 %v9055_v63  ;;  %4733 = vmatmul.bf16.gmra.mxu2 %v9057_v24  ;;  %v9061_v24 = vld [vmem:[#allocation102_spill] sm:$0xff] }
 0x750   : > { %4644 = vmatmul.bf16.gmra.mxu1 %v9056_v22  ;;  %4822 = vmatmul.bf16.gmra.mxu3 %v9058_v55  ;;  %v9059_v22 = vld [vmem:[#allocation79_spill] sm:$0xff] }
 0x751   : > { %v4694_v53 = vpop.f32.mrf.mxu2  ;;  %v9062_v55 = vld [vmem:[#allocation103_spill] sm:$0xff] }
 0x752   : > { %v4695_v16 = vadd.f32 %v4694_v53, %v4606_v6  ;;  %v9060_v6 = vld [vmem:[#allocation80_spill] sm:$0xff] }
 0x753   : > { %v4783_v58 = vpop.f32.mrf.mxu3  ;;  %v4518_v9 = vpop.f32.mrf.mxu0 }
 0x754   : > { %v4519_v36 = vadd.f32 %v4518_v9, %v8373_v59  ;;  %v8452_v26 = vadd.f32 %v4783_v58, %v4695_v16 }
 0x755   : > { %v4607_v14 = vpop.f32.mrf.mxu1 }
 0x756   : > { %v4608_v51 = vadd.f32 %v4607_v14, %v4519_v36 }
 0x759   : > { %v4696_v50 = vpop.f32.mrf.mxu2 }
 0x75a   : > { %v4697_v56 = vadd.f32 %v4696_v50, %v4608_v51 }
 0x75b   : > { %v4785_v48 = vpop.f32.mrf.mxu3  ;;  %v4521_v1 = vpop.f32.mrf.mxu0 }
 0x75c   : > { %v4522_v49 = vadd.f32 %v4521_v1, %v8373_v59  ;;  %v8455_v7 = vadd.f32 %v4785_v48, %v4697_v56 }
 0x75d   : > { %v4610_v17 = vpop.f32.mrf.mxu1 }
 0x75e   : > { %v4611_v63 = vadd.f32 %v4610_v17, %v4522_v49  ;;  %4836 = vmatmul.bf16.vlgmr.msrb.gmra.mxu0 %v9059_v22  ;;  %5014 = vmatmul.bf16.vlgmr.msrb.gmra.mxu2 %v9061_v24 }
 0x760   : > { %4925 = vmatmul.bf16.vlgmr.msrb.gmra.mxu1 %v9060_v6  ;;  %5103 = vmatmul.bf16.vlgmr.msrb.gmra.mxu3 %v9062_v55  ;;  %v9065_v55 = vld [vmem:[#allocation81_spill] sm:$0xff] }
 0x761   : > { %v4699_v53 = vpop.f32.mrf.mxu2 }
 0x762   : > { %v4700_v16 = vadd.f32 %v4699_v53, %v4611_v63  ;;  %v9066_v63 = vld [vmem:[#allocation82_spill] sm:$0xff]  ;;  %v9067_v53 = vld [vmem:[#allocation104_spill] sm:$0xff] }
 0x763   : > { %v4788_v58 = vpop.f32.mrf.mxu3  ;;  %v4523_v9 = vpop.f32.mrf.mxu0 }
 0x764   : > { %v4524_v36 = vadd.f32 %v4523_v9, %v8373_v59  ;;  %v8462_v51 = vadd.f32 %v4788_v58, %v4700_v16  ;;  %v9068_v9 = vld [vmem:[#allocation105_spill] sm:$0xff] }
 0x765   : > { %v4612_v14 = vpop.f32.mrf.mxu1 }
 0x766   : > { %9063 = vst [vmem:[#allocation89_spill] sm:$0xff] %v8462_v51  ;;  %v4613_v50 = vadd.f32 %v4612_v14, %v4524_v36  ;;  %v9071_v51 = vld [vmem:[#allocation83_spill] sm:$0xff] }
 0x769   : > { %v4701_v56 = vpop.f32.mrf.mxu2 }
 0x76a   : > { %v4702_v48 = vadd.f32 %v4701_v56, %v4613_v50 }
 0x76b   : > { %v4790_v1 = vpop.f32.mrf.mxu3  ;;  %v4526_v49 = vpop.f32.mrf.mxu0 }
 0x76c   : > { %v4527_v17 = vadd.f32 %v4526_v49, %v8373_v59  ;;  %v8465_v6 = vadd.f32 %v4790_v1, %v4702_v48 }
 0x76d   : > { %v4615_v22 = vpop.f32.mrf.mxu1 }
 0x76e   : > { %9064 = vst [vmem:[#allocation93_spill] sm:$0xff] %v8465_v6  ;;  %v4616_v24 = vadd.f32 %v4615_v22, %v4527_v17  ;;  %4841 = vmatmul.bf16.gmra.mxu0 %v9065_v55  ;;  %5019 = vmatmul.bf16.gmra.mxu2 %v9067_v53 }
 0x770   : > { %4930 = vmatmul.bf16.gmra.mxu1 %v9066_v63  ;;  %5108 = vmatmul.bf16.gmra.mxu3 %v9068_v9 }
 0x771   : > { %v4704_v16 = vpop.f32.mrf.mxu2 }
 0x772   : > { %v4705_v58 = vadd.f32 %v4704_v16, %v4616_v24  ;;  %v9072_v24 = vld [vmem:[#allocation84_spill] sm:$0xff]  ;;  %v9073_v16 = vld [vmem:[#allocation106_spill] sm:$0xff] }
 0x773   : > { %v4793_v36 = vpop.f32.mrf.mxu3  ;;  %v4528_v14 = vpop.f32.mrf.mxu0 }
 0x774   : > { %v4529_v50 = vadd.f32 %v4528_v14, %v8373_v59  ;;  %v8472_v49 = vadd.f32 %v4793_v36, %v4705_v58  ;;  %v9074_v14 = vld [vmem:[#allocation107_spill] sm:$0xff] }
 0x775   : > { %v4617_v56 = vpop.f32.mrf.mxu1 }
 0x776   : > { %9069 = vst [vmem:[#allocation125_spill] sm:$0xff] %v8472_v49  ;;  %v4618_v48 = vadd.f32 %v4617_v56, %v4529_v50  ;;  %v9077_v49 = vld [vmem:[#allocation85_spill] sm:$0xff] }
 0x779   : > { %v4706_v1 = vpop.f32.mrf.mxu2 }
 0x77a   : > { %v4707_v17 = vadd.f32 %v4706_v1, %v4618_v48 }
 0x77b   : > { %v4795_v22 = vpop.f32.mrf.mxu3  ;;  %v4531_v55 = vpop.f32.mrf.mxu0 }
 0x77c   : > { %v4532_v63 = vadd.f32 %v4531_v55, %v8373_v59  ;;  %v8475_v53 = vadd.f32 %v4795_v22, %v4707_v17 }
 0x77d   : > { %v4620_v6 = vpop.f32.mrf.mxu1 }
 0x77e   : > { %9070 = vst [vmem:[#allocation94_spill] sm:$0xff] %v8475_v53  ;;  %v4621_v9 = vadd.f32 %v4620_v6, %v4532_v63  ;;  %4846 = vmatmul.bf16.gmra.mxu0 %v9071_v51  ;;  %5024 = vmatmul.bf16.gmra.mxu2 %v9073_v16 }
 0x780   : > { %4935 = vmatmul.bf16.gmra.mxu1 %v9072_v24  ;;  %5113 = vmatmul.bf16.gmra.mxu3 %v9074_v14 }
 0x781   : > { %v4709_v58 = vpop.f32.mrf.mxu2 }
 0x782   : > { %v4710_v36 = vadd.f32 %v4709_v58, %v4621_v9  ;;  %v9078_v9 = vld [vmem:[#allocation86_spill] sm:$0xff]  ;;  %v9079_v58 = vld [vmem:[#allocation108_spill] sm:$0xff] }
 0x783   : > { %v4798_v50 = vpop.f32.mrf.mxu3  ;;  %v4533_v56 = vpop.f32.mrf.mxu0 }
 0x784   : > { %v4534_v48 = vadd.f32 %v4533_v56, %v8373_v59  ;;  %v8482_v55 = vadd.f32 %v4798_v50, %v4710_v36  ;;  %v9080_v56 = vld [vmem:[#allocation109_spill] sm:$0xff] }
 0x785   : > { %v4622_v1 = vpop.f32.mrf.mxu1 }
 0x786   : > { %9075 = vst [vmem:[#allocation95_spill] sm:$0xff] %v8482_v55  ;;  %v4623_v17 = vadd.f32 %v4622_v1, %v4534_v48  ;;  %v9082_v55 = vld [vmem:[#allocation87_spill] sm:$0xff] }
 0x789   : > { %v4711_v22 = vpop.f32.mrf.mxu2 }
 0x78a   : > { %v4712_v6 = vadd.f32 %v4711_v22, %v4623_v17 }
 0x78b   : > { %v4800_v63 = vpop.f32.mrf.mxu3  ;;  %v4536_v51 = vpop.f32.mrf.mxu0 }
 0x78c   : > { %v4537_v24 = vadd.f32 %v4536_v51, %v8373_v59  ;;  %v8485_v16 = vadd.f32 %v4800_v63, %v4712_v6 }
 0x78d   : > { %v4625_v53 = vpop.f32.mrf.mxu1 }
 0x78e   : > { %9076 = vst [vmem:[#allocation117_spill] sm:$0xff] %v8485_v16  ;;  %v4626_v14 = vadd.f32 %v4625_v53, %v4537_v24  ;;  %4851 = vmatmul.bf16.gmra.mxu0 %v9077_v49  ;;  %5029 = vmatmul.bf16.gmra.mxu2 %v9079_v58 }
 0x790   : > { %4940 = vmatmul.bf16.gmra.mxu1 %v9078_v9  ;;  %5118 = vmatmul.bf16.gmra.mxu3 %v9080_v56 }
 0x791   : > { %v4714_v36 = vpop.f32.mrf.mxu2 }
 0x792   : > { %v4715_v50 = vadd.f32 %v4714_v36, %v4626_v14  ;;  %v9083_v14 = vld [vmem:[#allocation88_spill] sm:$0xff]  ;;  %v9084_v36 = vld [vmem:[#allocation110_spill] sm:$0xff] }
 0x793   : > { %v4803_v48 = vpop.f32.mrf.mxu3  ;;  %v4538_v1 = vpop.f32.mrf.mxu0 }
 0x794   : > { %v4539_v17 = vadd.f32 %v4538_v1, %v8373_v59  ;;  %v8492_v51 = vadd.f32 %v4803_v48, %v4715_v50  ;;  %v9085_v1 = vld [vmem:[#allocation111_spill] sm:$0xff] }
 0x795   : > { %v4627_v22 = vpop.f32.mrf.mxu1 }
 0x796   : > { %v4628_v6 = vadd.f32 %v4627_v22, %v4539_v17 }
 0x799   : > { %v4716_v63 = vpop.f32.mrf.mxu2 }
 0x79a   : > { %v4717_v53 = vadd.f32 %v4716_v63, %v4628_v6 }
 0x79b   : > { %v4805_v24 = vpop.f32.mrf.mxu3  ;;  %v4541_v49 = vpop.f32.mrf.mxu0 }
 0x79c   : > { %v4542_v9 = vadd.f32 %v4541_v49, %v8373_v59  ;;  %v8495_v58 = vadd.f32 %v4805_v24, %v4717_v53 }
 0x79d   : > { %v4630_v16 = vpop.f32.mrf.mxu1 }
 0x79e   : > { %9081 = vst [vmem:[#allocation118_spill] sm:$0xff] %v8495_v58  ;;  %v4631_v56 = vadd.f32 %v4630_v16, %v4542_v9  ;;  %4856 = vmatmul.bf16.gmra.mxu0 %v9082_v55  ;;  %5034 = vmatmul.bf16.gmra.mxu2 %v9084_v36 }
 0x7a0   : > { %4945 = vmatmul.bf16.gmra.mxu1 %v9083_v14  ;;  %5123 = vmatmul.bf16.gmra.mxu3 %v9085_v1 }
 0x7a1   : > { %v4719_v50 = vpop.f32.mrf.mxu2 }
 0x7a2   : > { %v4720_v48 = vadd.f32 %v4719_v50, %v4631_v56  ;;  %v9088_v56 = vld [vmem:[#allocation90_spill] sm:$0xff]  ;;  %v9089_v50 = vld [vmem:[#allocation112_spill] sm:$0xff] }
 0x7a3   : > { %v4808_v17 = vpop.f32.mrf.mxu3  ;;  %v4543_v22 = vpop.f32.mrf.mxu0 }
 0x7a4   : > { %v4544_v6 = vadd.f32 %v4543_v22, %v8373_v59  ;;  %v8502_v49 = vadd.f32 %v4808_v17, %v4720_v48  ;;  %v9090_v22 = vld [vmem:[#allocation113_spill] sm:$0xff] }
 0x7a5   : > { %v4632_v63 = vpop.f32.mrf.mxu1 }
 0x7a6   : > { %9086 = vst [vmem:[#allocation126_spill] sm:$0xff] %v8502_v49  ;;  %v4633_v53 = vadd.f32 %v4632_v63, %v4544_v6  ;;  %v9092_v49 = vld [vmem:[#allocation91_spill] sm:$0xff] }
 0x7a9   : > { %v4721_v24 = vpop.f32.mrf.mxu2 }
 0x7aa   : > { %v4722_v16 = vadd.f32 %v4721_v24, %v4633_v53 }
 0x7ab   : > { %v4810_v9 = vpop.f32.mrf.mxu3  ;;  %v4546_v55 = vpop.f32.mrf.mxu0 }
 0x7ac   : > { %v4547_v14 = vadd.f32 %v4546_v55, %v8373_v59  ;;  %v8505_v36 = vadd.f32 %v4810_v9, %v4722_v16 }
 0x7ad   : > { %v4635_v58 = vpop.f32.mrf.mxu1 }
 0x7ae   : > { %9087 = vst [vmem:[#allocation127_spill] sm:$0xff] %v8505_v36  ;;  %v4636_v1 = vadd.f32 %v4635_v58, %v4547_v14  ;;  %4861 = vmatmul.bf16.gmra.mxu0 %v8969_v12  ;;  %5039 = vmatmul.bf16.gmra.mxu2 %v9089_v50 }
 0x7b0   : > { %4950 = vmatmul.bf16.gmra.mxu1 %v9088_v56  ;;  %5128 = vmatmul.bf16.gmra.mxu3 %v9090_v22 }
 0x7b1   : > { %v4724_v48 = vpop.f32.mrf.mxu2 }
 0x7b2   : > { %v4725_v17 = vadd.f32 %v4724_v48, %v4636_v1  ;;  %v9093_v1 = vld [vmem:[#allocation92_spill] sm:$0xff]  ;;  %v9094_v48 = vld [vmem:[#allocation114_spill] sm:$0xff] }
 0x7b3   : > { %v4813_v6 = vpop.f32.mrf.mxu3  ;;  %v4548_v63 = vpop.f32.mrf.mxu0 }
 0x7b4   : > { %v4549_v53 = vadd.f32 %v4548_v63, %v8373_v59  ;;  %v8512_v55 = vadd.f32 %v4813_v6, %v4725_v17  ;;  %v9095_v63 = vld [vmem:[#allocation115_spill] sm:$0xff] }
 0x7b5   : > { %v4637_v24 = vpop.f32.mrf.mxu1 }
 0x7b6   : > { %v4638_v16 = vadd.f32 %v4637_v24, %v4549_v53 }
 0x7b9   : > { %v4726_v9 = vpop.f32.mrf.mxu2 }
 0x7ba   : > { %v4727_v58 = vadd.f32 %v4726_v9, %v4638_v16 }
 0x7bb   : > { %v4815_v14 = vpop.f32.mrf.mxu3  ;;  %v4551_v12 = vpop.f32.mrf.mxu0 }
 0x7bc   : > { %v4552_v56 = vadd.f32 %v4551_v12, %v8373_v59  ;;  %v8515_v50 = vadd.f32 %v4815_v14, %v4727_v58 }
 0x7bd   : > { %v4640_v36 = vpop.f32.mrf.mxu1 }
 0x7be   : > { %9091 = vst [vmem:[#allocation96_spill] sm:$0xff] %v8515_v50  ;;  %v4641_v22 = vadd.f32 %v4640_v36, %v4552_v56  ;;  %4866 = vmatmul.bf16.gmra.mxu0 %v9092_v49  ;;  %5044 = vmatmul.bf16.gmra.mxu2 %v9094_v48 }
 0x7c0   : > { %4955 = vmatmul.bf16.gmra.mxu1 %v9093_v1  ;;  %5133 = vmatmul.bf16.gmra.mxu3 %v9095_v63 }
 0x7c1   : > { %v4729_v17 = vpop.f32.mrf.mxu2 }
 0x7c2   : > { %v4730_v6 = vadd.f32 %v4729_v17, %v4641_v22 }
 0x7c3   : > { %v4818_v53 = vpop.f32.mrf.mxu3  ;;  %v4553_v24 = vpop.f32.mrf.mxu0 }
 0x7c4   : > { %v4554_v16 = vadd.f32 %v4553_v24, %v8373_v59  ;;  %v8522_v12 = vadd.f32 %v4818_v53, %v4730_v6 }
 0x7c5   : > { %v4642_v9 = vpop.f32.mrf.mxu1 }
 0x7c6   : > { %v4643_v58 = vadd.f32 %v4642_v9, %v4554_v16 }
 0x7c9   : > { %v4731_v14 = vpop.f32.mrf.mxu2 }
 0x7ca   : > { %v4732_v36 = vadd.f32 %v4731_v14, %v4643_v58 }
 0x7cb   : > { %v4820_v56 = vpop.f32.mrf.mxu3  ;;  %v4556_v49 = vpop.f32.mrf.mxu0 }
 0x7cc   : > { %v4557_v1 = vadd.f32 %v4556_v49, %v8373_v59  ;;  %v8525_v48 = vadd.f32 %v4820_v56, %v4732_v36 }
 0x7cd   : > { %v4645_v50 = vpop.f32.mrf.mxu1 }
 0x7ce   : > { %v4646_v63 = vadd.f32 %v4645_v50, %v4557_v1  ;;  %4871 = vmatmul.bf16.gmra.mxu0 %v7777_v30  ;;  %5049 = vmatmul.bf16.gmra.mxu2 %v7973_v13 }
 0x7d0   : > { %4960 = vmatmul.bf16.gmra.mxu1 %v8972_v11  ;;  %5138 = vmatmul.bf16.gmra.mxu3 %v7981_v44  ;;  %v9096_v44 = vld [vmem:[#allocation116_spill] sm:$0xff] }
 0x7d1   : > { %v4734_v22 = vpop.f32.mrf.mxu2 }
 0x7d2   : > { %v4735_v17 = vadd.f32 %v4734_v22, %v4646_v63 }
 0x7d3   : > { %v4823_v6 = vpop.f32.mrf.mxu3  ;;  %v4558_v53 = vpop.f32.mrf.mxu0 }
 0x7d4   : > { %v4559_v24 = vadd.f32 %v4558_v53, %v8373_v59  ;;  %v8532_v9 = vadd.f32 %v4823_v6, %v4735_v17 }
 0x7d5   : > { %v4647_v16 = vpop.f32.mrf.mxu1 }
 0x7d6   : > { %v4648_v58 = vadd.f32 %v4647_v16, %v4559_v24 }
 0x7d9   : > { %v4736_v14 = vpop.f32.mrf.mxu2 }
 0x7da   : > { %v4737_v50 = vadd.f32 %v4736_v14, %v4648_v58 }
 0x7db   : > { %v4825_v36 = vpop.f32.mrf.mxu3  ;;  %v4837_v30 = vpop.f32.mrf.mxu0 }
 0x7dc   : > { %v8534_v56 = vadd.f32 %v4825_v36, %v4737_v50  ;;  %v4838_v13 = vadd.f32 %v4837_v30, %v8382_v62 }
 0x7dd   : > { %v4926_v11 = vpop.f32.mrf.mxu1 }
 0x7de   : > { %4876 = vmatmul.bf16.gmra.mxu0 %v7789_v21  ;;  %5054 = vmatmul.bf16.gmra.mxu2 %v7985_v35  ;;  %v4927_v59 = vadd.f32 %v4926_v11, %v4838_v13 }
 0x7e0   : > { %4965 = vmatmul.bf16.gmra.mxu1 %v7797_v54  ;;  %5143 = vmatmul.bf16.gmra.mxu3 %v9096_v44 }
 0x7e1   : > { %v5015_v49 = vpop.f32.mrf.mxu2 }
 0x7e2   : > { %v5016_v1 = vadd.f32 %v5015_v49, %v4927_v59 }
 0x7e3   : > { %v5104_v63 = vpop.f32.mrf.mxu3  ;;  %v4839_v22 = vpop.f32.mrf.mxu0 }
 0x7e4   : > { %v5105_v6 = vadd.f32 %v5104_v63, %v5016_v1  ;;  %v4840_v53 = vadd.f32 %v4839_v22, %v8385_v52 }
 0x7e5   : > { %v4928_v17 = vpop.f32.mrf.mxu1 }
 0x7e6   : > { %5185 = vst [vmem:[%s8247_s16 + $0x8] sm:$0xff] %v5105_v6  ;;  %v4929_v62 = vadd.f32 %v4928_v17, %v4840_v53 }
 0x7e9   : > { %v5017_v24 = vpop.f32.mrf.mxu2 }
 0x7ea   : > { %v5018_v21 = vadd.f32 %v5017_v24, %v4929_v62 }
 0x7eb   : > { %v5106_v16 = vpop.f32.mrf.mxu3  ;;  %v4842_v54 = vpop.f32.mrf.mxu0 }
 0x7ec   : > { %v5107_v35 = vadd.f32 %v5106_v16, %v5018_v21  ;;  %v4843_v14 = vadd.f32 %v4842_v54, %v8392_v0 }
 0x7ed   : > { %v4931_v58 = vpop.f32.mrf.mxu1 }
 0x7ee   : > { %4881 = vmatmul.bf16.gmra.mxu0 %v7801_v19  ;;  %5187 = vst [vmem:[%s8247_s16 + $0x18] sm:$0xff] %v5107_v35  ;;  %5059 = vmatmul.bf16.gmra.mxu2 %v7997_v60  ;;  %v4932_v52 = vadd.f32 %v4931_v58, %v4843_v14 }
 0x7f0   : > { %4970 = vmatmul.bf16.gmra.mxu1 %v7809_v34  ;;  %5148 = vmatmul.bf16.gmra.mxu3 %v8005_v57 }
 0x7f1   : > { %v5020_v50 = vpop.f32.mrf.mxu2 }
 0x7f2   : > { %v5021_v36 = vadd.f32 %v5020_v50, %v4932_v52 }
 0x7f3   : > { %v5109_v30 = vpop.f32.mrf.mxu3  ;;  %v4844_v11 = vpop.f32.mrf.mxu0 }
 0x7f4   : > { %v5110_v44 = vadd.f32 %v5109_v30, %v5021_v36  ;;  %v4845_v59 = vadd.f32 %v4844_v11, %v8395_v18 }
 0x7f5   : > { %v4933_v13 = vpop.f32.mrf.mxu1 }
 0x7f6   : > { %5189 = vst [vmem:[%s8247_s16 + $0x28] sm:$0xff] %v5110_v44  ;;  %v4934_v0 = vadd.f32 %v4933_v13, %v4845_v59 }
 0x7f9   : > { %v5022_v19 = vpop.f32.mrf.mxu2 }
 0x7fa   : > { %v5023_v49 = vadd.f32 %v5022_v19, %v4934_v0 }
 0x7fb   : > { %v5111_v1 = vpop.f32.mrf.mxu3  ;;  %v4847_v34 = vpop.f32.mrf.mxu0 }
 0x7fc   : > { %v5112_v60 = vadd.f32 %v5111_v1, %v5023_v49  ;;  %v4848_v57 = vadd.f32 %v4847_v34, %v8402_v15 }
 0x7fd   : > { %v4936_v63 = vpop.f32.mrf.mxu1 }
 0x7fe   : > { %4886 = vmatmul.bf16.gmra.mxu0 %v7813_v31  ;;  %5191 = vst [vmem:[%s8247_s16 + $0x38] sm:$0xff] %v5112_v60  ;;  %5064 = vmatmul.bf16.gmra.mxu2 %v8009_v40  ;;  %v4937_v18 = vadd.f32 %v4936_v63, %v4848_v57 }
 0x800   : > { %4975 = vmatmul.bf16.gmra.mxu1 %v7821_v39  ;;  %5153 = vmatmul.bf16.gmra.mxu3 %v8017_v61 }
 0x801   : > { %v5025_v22 = vpop.f32.mrf.mxu2 }
 0x802   : > { %v5026_v17 = vadd.f32 %v5025_v22, %v4937_v18 }
 0x803   : > { %v5114_v6 = vpop.f32.mrf.mxu3  ;;  %v4849_v53 = vpop.f32.mrf.mxu0 }
 0x804   : > { %v5115_v24 = vadd.f32 %v5114_v6, %v5026_v17  ;;  %v4850_v21 = vadd.f32 %v4849_v53, %v8405_v20  ;;  %v9097_v17 = vld [vmem:[#allocation120_spill] sm:$0xff] }
 0x805   : > { %v4938_v62 = vpop.f32.mrf.mxu1 }
 0x806   : > { %5193 = vst [vmem:[%s8247_s16 + $0x48] sm:$0xff] %v5115_v24  ;;  %v4939_v15 = vadd.f32 %v4938_v62, %v4850_v21 }
 0x809   : > { %v5027_v31 = vpop.f32.mrf.mxu2 }
 0x80a   : > { %v5028_v16 = vadd.f32 %v5027_v31, %v4939_v15 }
 0x80b   : > { %v5116_v54 = vpop.f32.mrf.mxu3  ;;  %v4852_v39 = vpop.f32.mrf.mxu0 }
 0x80c   : > { %v5117_v40 = vadd.f32 %v5116_v54, %v5028_v16  ;;  %v4853_v61 = vadd.f32 %v4852_v39, %v8412_v4 }
 0x80d   : > { %v4941_v58 = vpop.f32.mrf.mxu1 }
 0x80e   : > { %4891 = vmatmul.bf16.gmra.mxu0 %v7825_v47  ;;  %5195 = vst [vmem:[%s8247_s16 + $0x58] sm:$0xff] %v5117_v40  ;;  %5069 = vmatmul.bf16.gmra.mxu2 %v8021_v45  ;;  %v4942_v20 = vadd.f32 %v4941_v58, %v4853_v61  ;;  %v9098_v40 = vld [vmem:[#allocation98_spill] sm:$0xff]  ;;  %v9099_v61 = vld [vmem:[#allocation99_spill] sm:$0xff] }
 0x810   : > { %4980 = vmatmul.bf16.gmra.mxu1 %v7833_v43  ;;  %5158 = vmatmul.bf16.gmra.mxu3 %v8029_v38 }
 0x811   : > { %v5030_v35 = vpop.f32.mrf.mxu2 }
 0x812   : > { %v5031_v14 = vadd.f32 %v5030_v35, %v4942_v20  ;;  %v9100_v20 = vld [vmem:[#allocation121_spill] sm:$0xff]  ;;  %v9101_v35 = vld [vmem:[#allocation122_spill] sm:$0xff] }
 0x813   : > { %v5119_v52 = vpop.f32.mrf.mxu3  ;;  %v4854_v50 = vpop.f32.mrf.mxu0 }
 0x814   : > { %v5120_v30 = vadd.f32 %v5119_v52, %v5031_v14  ;;  %v4855_v11 = vadd.f32 %v4854_v50, %v8415_v42 }
 0x815   : > { %v4943_v36 = vpop.f32.mrf.mxu1 }
 0x816   : > { %5197 = vst [vmem:[%s8247_s16 + $0x68] sm:$0xff] %v5120_v30  ;;  %v4944_v4 = vadd.f32 %v4943_v36, %v4855_v11 }
 0x819   : > { %v5032_v47 = vpop.f32.mrf.mxu2 }
 0x81a   : > { %v5033_v13 = vadd.f32 %v5032_v47, %v4944_v4 }
 0x81b   : > { %v5121_v44 = vpop.f32.mrf.mxu3  ;;  %v4857_v43 = vpop.f32.mrf.mxu0 }
 0x81c   : > { %v5122_v45 = vadd.f32 %v5121_v44, %v5033_v13  ;;  %v4858_v38 = vadd.f32 %v4857_v43, %v8422_v25 }
 0x81d   : > { %v4946_v59 = vpop.f32.mrf.mxu1 }
 0x81e   : > { %4896 = vmatmul.bf16.gmra.mxu0 %v8974_v29  ;;  %5199 = vst [vmem:[%s8247_s16 + $0x78] sm:$0xff] %v5122_v45  ;;  %5074 = vmatmul.bf16.gmra.mxu2 %v8976_v10  ;;  %v4947_v42 = vadd.f32 %v4946_v59, %v4858_v38 }
 0x820   : > { %4985 = vmatmul.bf16.gmra.mxu1 %v8975_v37  ;;  %5163 = vmatmul.bf16.gmra.mxu3 %v8977_v3 }
 0x821   : > { %v5035_v0 = vpop.f32.mrf.mxu2 }
 0x822   : > { %v5036_v19 = vadd.f32 %v5035_v0, %v4947_v42  ;;  %v9102_v42 = vld [vmem:[#allocation123_spill] sm:$0xff]  ;;  %v9103_v0 = vld [vmem:[#allocation124_spill] sm:$0xff] }
 0x823   : > { %v5124_v49 = vpop.f32.mrf.mxu3  ;;  %v4859_v1 = vpop.f32.mrf.mxu0 }
 0x824   : > { %v5125_v63 = vadd.f32 %v5124_v49, %v5036_v19  ;;  %v4860_v60 = vadd.f32 %v4859_v1, %v8425_v5 }
 0x825   : > { %v4948_v34 = vpop.f32.mrf.mxu1 }
 0x826   : > { %5201 = vst [vmem:[%s8247_s16 + $0x88] sm:$0xff] %v5125_v63  ;;  %v4949_v25 = vadd.f32 %v4948_v34, %v4860_v60 }
 0x829   : > { %v5037_v29 = vpop.f32.mrf.mxu2 }
 0x82a   : > { %v5038_v57 = vadd.f32 %v5037_v29, %v4949_v25 }
 0x82b   : > { %v5126_v18 = vpop.f32.mrf.mxu3  ;;  %v4862_v37 = vpop.f32.mrf.mxu0 }
 0x82c   : > { %v5127_v10 = vadd.f32 %v5126_v18, %v5038_v57  ;;  %v4863_v3 = vadd.f32 %v4862_v37, %v8432_v33 }
 0x82d   : > { %v4951_v22 = vpop.f32.mrf.mxu1 }
 0x82e   : > { %4901 = vmatmul.bf16.gmra.mxu0 %v8980_v8  ;;  %5203 = vst [vmem:[%s8247_s16 + $0x98] sm:$0xff] %v5127_v10  ;;  %5079 = vmatmul.bf16.gmra.mxu2 %v8982_v23  ;;  %v4952_v5 = vadd.f32 %v4951_v22, %v4863_v3  ;;  %v9104_v22 = vld [vmem:[#allocation89_spill] sm:$0xff] }
 0x830   : > { %4990 = vmatmul.bf16.gmra.mxu1 %v8981_v27  ;;  %5168 = vmatmul.bf16.gmra.mxu3 %v9097_v17 }
 0x831   : > { %v5040_v6 = vpop.f32.mrf.mxu2 }
 0x832   : > { %v5041_v53 = vadd.f32 %v5040_v6, %v4952_v5 }
 0x833   : > { %v5129_v62 = vpop.f32.mrf.mxu3  ;;  %v4864_v24 = vpop.f32.mrf.mxu0 }
 0x834   : > { %v5130_v15 = vadd.f32 %v5129_v62, %v5041_v53  ;;  %v4865_v31 = vadd.f32 %v4864_v24, %v8435_v32  ;;  %v9105_v24 = vld [vmem:[#allocation93_spill] sm:$0xff] }
 0x835   : > { %v4953_v21 = vpop.f32.mrf.mxu1 }
 0x836   : > { %5205 = vst [vmem:[%s8247_s16 + $0xa8] sm:$0xff] %v5130_v15  ;;  %v4954_v33 = vadd.f32 %v4953_v21, %v4865_v31 }
 0x839   : > { %v5042_v8 = vpop.f32.mrf.mxu2 }
 0x83a   : > { %v5043_v16 = vadd.f32 %v5042_v8, %v4954_v33 }
 0x83b   : > { %v5131_v54 = vpop.f32.mrf.mxu3  ;;  %v4867_v27 = vpop.f32.mrf.mxu0 }
 0x83c   : > { %v5132_v23 = vadd.f32 %v5131_v54, %v5043_v16  ;;  %v4868_v58 = vadd.f32 %v4867_v27, %v8442_v28 }
 0x83d   : > { %v4956_v39 = vpop.f32.mrf.mxu1 }
 0x83e   : > { %4906 = vmatmul.bf16.gmra.mxu0 %v9098_v40  ;;  %5207 = vst [vmem:[%s8247_s16 + $0xb8] sm:$0xff] %v5132_v23  ;;  %5084 = vmatmul.bf16.gmra.mxu2 %v9100_v20  ;;  %v4957_v32 = vadd.f32 %v4956_v39, %v4868_v58  ;;  %v9106_v39 = vld [vmem:[#allocation125_spill] sm:$0xff] }
 0x840   : > { %4995 = vmatmul.bf16.gmra.mxu1 %v9099_v61  ;;  %5173 = vmatmul.bf16.gmra.mxu3 %v9101_v35 }
 0x841   : > { %v5045_v14 = vpop.f32.mrf.mxu2 }
 0x842   : > { %v5046_v52 = vadd.f32 %v5045_v14, %v4957_v32 }
 0x843   : > { %v5134_v50 = vpop.f32.mrf.mxu3  ;;  %v4869_v36 = vpop.f32.mrf.mxu0 }
 0x844   : > { %v5135_v11 = vadd.f32 %v5134_v50, %v5046_v52  ;;  %v4870_v4 = vadd.f32 %v4869_v36, %v8445_v41  ;;  %v9107_v52 = vld [vmem:[#allocation94_spill] sm:$0xff] }
 0x845   : > { %v4958_v30 = vpop.f32.mrf.mxu1 }
 0x846   : > { %5209 = vst [vmem:[%s8247_s16 + $0xc8] sm:$0xff] %v5135_v11  ;;  %v4959_v28 = vadd.f32 %v4958_v30, %v4870_v4 }
 0x849   : > { %v5047_v47 = vpop.f32.mrf.mxu2 }
 0x84a   : > { %v5048_v13 = vadd.f32 %v5047_v47, %v4959_v28 }
 0x84b   : > { %v5136_v44 = vpop.f32.mrf.mxu3  ;;  %v4872_v43 = vpop.f32.mrf.mxu0 }
 0x84c   : > { %v5137_v45 = vadd.f32 %v5136_v44, %v5048_v13  ;;  %v4873_v38 = vadd.f32 %v4872_v43, %v8452_v26  ;;  %v9108_v44 = vld [vmem:[#allocation95_spill] sm:$0xff] }
 0x84d   : > { %v4961_v59 = vpop.f32.mrf.mxu1 }
 0x84e   : > { %4911 = vmatmul.bf16.gmra.mxu0 %v8990_v2  ;;  %5211 = vst [vmem:[%s8247_s16 + $0xd8] sm:$0xff] %v5137_v45  ;;  %5089 = vmatmul.bf16.gmra.mxu2 %v9102_v42  ;;  %v4962_v41 = vadd.f32 %v4961_v59, %v4873_v38 }
 0x850   : > { %5000 = vmatmul.bf16.gmra.mxu1 %v8991_v46  ;;  %5178 = vmatmul.bf16.gmra.mxu3 %v9103_v0 }
 0x851   : > { %v5050_v19 = vpop.f32.mrf.mxu2 }
 0x852   : > { %v5051_v49 = vadd.f32 %v5050_v19, %v4962_v41 }
 0x853   : > { %v5139_v1 = vpop.f32.mrf.mxu3  ;;  %v4874_v34 = vpop.f32.mrf.mxu0 }
 0x854   : > { %v5140_v60 = vadd.f32 %v5139_v1, %v5051_v49  ;;  %v4875_v25 = vadd.f32 %v4874_v34, %v8455_v7  ;;  %v9109_v49 = vld [vmem:[#allocation117_spill] sm:$0xff] }
 0x855   : > { %v4963_v63 = vpop.f32.mrf.mxu1 }
 0x856   : > { %5213 = vst [vmem:[%s8247_s16 + $0xe8] sm:$0xff] %v5140_v60  ;;  %v4964_v26 = vadd.f32 %v4963_v63, %v4875_v25 }
 0x859   : > { %v5052_v2 = vpop.f32.mrf.mxu2 }
 0x85a   : > { %v5053_v29 = vadd.f32 %v5052_v2, %v4964_v26 }
 0x85b   : > { %v5141_v46 = vpop.f32.mrf.mxu3  ;;  %v4877_v57 = vpop.f32.mrf.mxu0 }
 0x85c   : > { %v5142_v37 = vadd.f32 %v5141_v46, %v5053_v29  ;;  %v4878_v10 = vadd.f32 %v4877_v57, %v9104_v22 }
 0x85d   : > { %v4966_v18 = vpop.f32.mrf.mxu1 }
 0x85e   : > { %5215 = vst [vmem:[%s8247_s16 + $0xf8] sm:$0xff] %v5142_v37  ;;  %v4967_v3 = vadd.f32 %v4966_v18, %v4878_v10 }
 0x861   : > { %v5055_v17 = vpop.f32.mrf.mxu2 }
 0x862   : > { %v5056_v5 = vadd.f32 %v5055_v17, %v4967_v3 }
 0x863   : > { %v5144_v6 = vpop.f32.mrf.mxu3  ;;  %v4879_v53 = vpop.f32.mrf.mxu0 }
 0x864   : > { %v5145_v7 = vadd.f32 %v5144_v6, %v5056_v5  ;;  %v4880_v21 = vadd.f32 %v4879_v53, %v9105_v24  ;;  %v9110_v5 = vld [vmem:[#allocation118_spill] sm:$0xff] }
 0x865   : > { %v4968_v62 = vpop.f32.mrf.mxu1 }
 0x866   : > { %5217 = vst [vmem:[%s8247_s16 + $0x108] sm:$0xff] %v5145_v7  ;;  %v4969_v15 = vadd.f32 %v4968_v62, %v4880_v21 }
 0x869   : > { %v5057_v31 = vpop.f32.mrf.mxu2 }
 0x86a   : > { %v5058_v33 = vadd.f32 %v5057_v31, %v4969_v15  ;;  %v9111_v31 = vld [vmem:[#allocation126_spill] sm:$0xff] }
 0x86b   : > { %v5146_v8 = vpop.f32.mrf.mxu3  ;;  %v4882_v16 = vpop.f32.mrf.mxu0 }
 0x86c   : > { %v5147_v27 = vadd.f32 %v5146_v8, %v5058_v33  ;;  %v4883_v23 = vadd.f32 %v4882_v16, %v9106_v39 }
 0x86d   : > { %v4971_v54 = vpop.f32.mrf.mxu1 }
 0x86e   : > { %5219 = vst [vmem:[%s8247_s16 + $0x118] sm:$0xff] %v5147_v27  ;;  %v4972_v58 = vadd.f32 %v4971_v54, %v4883_v23 }
 0x871   : > { %v5060_v40 = vpop.f32.mrf.mxu2 }
 0x872   : > { %v5061_v61 = vadd.f32 %v5060_v40, %v4972_v58  ;;  %v9112_v40 = vld [vmem:[#allocation127_spill] sm:$0xff] }
 0x873   : > { %v5149_v20 = vpop.f32.mrf.mxu3  ;;  %v4884_v35 = vpop.f32.mrf.mxu0 }
 0x874   : > { %v5150_v14 = vadd.f32 %v5149_v20, %v5061_v61  ;;  %v4885_v50 = vadd.f32 %v4884_v35, %v9107_v52 }
 0x875   : > { %v4973_v32 = vpop.f32.mrf.mxu1 }
 0x876   : > { %5221 = vst [vmem:[%s8247_s16 + $0x128] sm:$0xff] %v5150_v14  ;;  %v4974_v36 = vadd.f32 %v4973_v32, %v4885_v50 }
 0x879   : > { %v5062_v30 = vpop.f32.mrf.mxu2 }
 0x87a   : > { %v5063_v11 = vadd.f32 %v5062_v30, %v4974_v36 }
 0x87b   : > { %v5151_v4 = vpop.f32.mrf.mxu3  ;;  %v4887_v28 = vpop.f32.mrf.mxu0 }
 0x87c   : > { %v5152_v13 = vadd.f32 %v5151_v4, %v5063_v11  ;;  %v4888_v43 = vadd.f32 %v4887_v28, %v9108_v44 }
 0x87d   : > { %v4976_v47 = vpop.f32.mrf.mxu1 }
 0x87e   : > { %5223 = vst [vmem:[%s8247_s16 + $0x138] sm:$0xff] %v5152_v13  ;;  %v4977_v59 = vadd.f32 %v4976_v47, %v4888_v43 }
 0x881   : > { %v5065_v45 = vpop.f32.mrf.mxu2 }
 0x882   : > { %v5066_v38 = vadd.f32 %v5065_v45, %v4977_v59  ;;  %v9113_v59 = vld [vmem:[#allocation96_spill] sm:$0xff] }
 0x883   : > { %v5154_v42 = vpop.f32.mrf.mxu3  ;;  %v4889_v0 = vpop.f32.mrf.mxu0 }
 0x884   : > { %v5155_v19 = vadd.f32 %v5154_v42, %v5066_v38  ;;  %v4890_v1 = vadd.f32 %v4889_v0, %v9109_v49 }
 0x885   : > { %v4978_v41 = vpop.f32.mrf.mxu1 }
 0x886   : > { %5225 = vst [vmem:[%s8247_s16 + $0x148] sm:$0xff] %v5155_v19  ;;  %v4979_v34 = vadd.f32 %v4978_v41, %v4890_v1 }
 0x889   : > { %v5067_v63 = vpop.f32.mrf.mxu2 }
 0x88a   : > { %v5068_v60 = vadd.f32 %v5067_v63, %v4979_v34 }
 0x88b   : > { %v5156_v25 = vpop.f32.mrf.mxu3  ;;  %v4892_v26 = vpop.f32.mrf.mxu0 }
 0x88c   : > { %v5157_v29 = vadd.f32 %v5156_v25, %v5068_v60  ;;  %v4893_v46 = vadd.f32 %v4892_v26, %v8492_v51 }
 0x88d   : > { %v4981_v2 = vpop.f32.mrf.mxu1 }
 0x88e   : > { %5227 = vst [vmem:[%s8247_s16 + $0x158] sm:$0xff] %v5157_v29  ;;  %v4982_v57 = vadd.f32 %v4981_v2, %v4893_v46 }
 0x891   : > { %v5070_v18 = vpop.f32.mrf.mxu2 }
 0x892   : > { %v5071_v37 = vadd.f32 %v5070_v18, %v4982_v57 }
 0x893   : > { %v5159_v22 = vpop.f32.mrf.mxu3  ;;  %v4894_v10 = vpop.f32.mrf.mxu0 }
 0x894   : > { %v5160_v17 = vadd.f32 %v5159_v22, %v5071_v37  ;;  %v4895_v6 = vadd.f32 %v4894_v10, %v9110_v5 }
 0x895   : > { %v4983_v3 = vpop.f32.mrf.mxu1 }
 0x896   : > { %5229 = vst [vmem:[%s8247_s16 + $0x168] sm:$0xff] %v5160_v17  ;;  %v4984_v53 = vadd.f32 %v4983_v3, %v4895_v6 }
 0x899   : > { %v5072_v62 = vpop.f32.mrf.mxu2 }
 0x89a   : > { %v5073_v7 = vadd.f32 %v5072_v62, %v4984_v53 }
 0x89b   : > { %v5161_v24 = vpop.f32.mrf.mxu3  ;;  %v4897_v21 = vpop.f32.mrf.mxu0 }
 0x89c   : > { %v5162_v51 = vadd.f32 %v5161_v24, %v5073_v7  ;;  %v4898_v33 = vadd.f32 %v4897_v21, %v9111_v31 }
 0x89d   : > { %v4986_v15 = vpop.f32.mrf.mxu1 }
 0x89e   : > { %5231 = vst [vmem:[%s8247_s16 + $0x178] sm:$0xff] %v5162_v51  ;;  %v4987_v8 = vadd.f32 %v4986_v15, %v4898_v33 }
 0x8a1   : > { %v5075_v16 = vpop.f32.mrf.mxu2 }
 0x8a2   : > { %v5076_v54 = vadd.f32 %v5075_v16, %v4987_v8 }
 0x8a3   : > { %v5164_v27 = vpop.f32.mrf.mxu3  ;;  %v4899_v39 = vpop.f32.mrf.mxu0 }
 0x8a4   : > { %v5165_v58 = vadd.f32 %v5164_v27, %v5076_v54  ;;  %v4900_v61 = vadd.f32 %v4899_v39, %v9112_v40 }
 0x8a5   : > { %v4988_v23 = vpop.f32.mrf.mxu1 }
 0x8a6   : > { %5233 = vst [vmem:[%s8247_s16 + $0x188] sm:$0xff] %v5165_v58  ;;  %v4989_v20 = vadd.f32 %v4988_v23, %v4900_v61 }
 0x8a9   : > { %v5077_v35 = vpop.f32.mrf.mxu2 }
 0x8aa   : > { %v5078_v32 = vadd.f32 %v5077_v35, %v4989_v20 }
 0x8ab   : > { %v5166_v14 = vpop.f32.mrf.mxu3  ;;  %v4902_v52 = vpop.f32.mrf.mxu0 }
 0x8ac   : > { %v5167_v36 = vadd.f32 %v5166_v14, %v5078_v32  ;;  %v4903_v30 = vadd.f32 %v4902_v52, %v8512_v55 }
 0x8ad   : > { %v4991_v50 = vpop.f32.mrf.mxu1 }
 0x8ae   : > { %5235 = vst [vmem:[%s8247_s16 + $0x198] sm:$0xff] %v5167_v36  ;;  %v4992_v11 = vadd.f32 %v4991_v50, %v4903_v30 }
 0x8b1   : > { %v5080_v4 = vpop.f32.mrf.mxu2 }
 0x8b2   : > { %v5081_v28 = vadd.f32 %v5080_v4, %v4992_v11 }
 0x8b3   : > { %v5169_v47 = vpop.f32.mrf.mxu3  ;;  %v4904_v13 = vpop.f32.mrf.mxu0 }
 0x8b4   : > { %v5170_v43 = vadd.f32 %v5169_v47, %v5081_v28  ;;  %v4905_v45 = vadd.f32 %v4904_v13, %v9113_v59 }
 0x8b5   : > { %v4993_v44 = vpop.f32.mrf.mxu1 }
 0x8b6   : > { %5237 = vst [vmem:[%s8247_s16 + $0x1a8] sm:$0xff] %v5170_v43  ;;  %v4994_v38 = vadd.f32 %v4993_v44, %v4905_v45 }
 0x8b9   : > { %v5082_v42 = vpop.f32.mrf.mxu2 }
 0x8ba   : > { %v5083_v0 = vadd.f32 %v5082_v42, %v4994_v38 }
 0x8bb   : > { %v5171_v41 = vpop.f32.mrf.mxu3  ;;  %v4907_v19 = vpop.f32.mrf.mxu0 }
 0x8bc   : > { %v5172_v55 = vadd.f32 %v5171_v41, %v5083_v0  ;;  %v4908_v1 = vadd.f32 %v4907_v19, %v8522_v12 }
 0x8bd   : > { %v4996_v49 = vpop.f32.mrf.mxu1 }
 0x8be   : > { %5239 = vst [vmem:[%s8247_s16 + $0x1b8] sm:$0xff] %v5172_v55  ;;  %v4997_v34 = vadd.f32 %v4996_v49, %v4908_v1 }
 0x8c1   : > { %v5085_v63 = vpop.f32.mrf.mxu2 }
 0x8c2   : > { %v5086_v60 = vadd.f32 %v5085_v63, %v4997_v34 }
 0x8c3   : > { %v5174_v25 = vpop.f32.mrf.mxu3  ;;  %v4909_v26 = vpop.f32.mrf.mxu0 }
 0x8c4   : > { %v5175_v29 = vadd.f32 %v5174_v25, %v5086_v60  ;;  %v4910_v46 = vadd.f32 %v4909_v26, %v8525_v48 }
 0x8c5   : > { %v4998_v2 = vpop.f32.mrf.mxu1 }
 0x8c6   : > { %5241 = vst [vmem:[%s8247_s16 + $0x1c8] sm:$0xff] %v5175_v29  ;;  %v4999_v57 = vadd.f32 %v4998_v2, %v4910_v46 }
 0x8c9   : > { %v5087_v18 = vpop.f32.mrf.mxu2 }
 0x8ca   : > { %v5088_v37 = vadd.f32 %v5087_v18, %v4999_v57 }
 0x8cb   : > { %v5176_v22 = vpop.f32.mrf.mxu3  ;;  %v4912_v10 = vpop.f32.mrf.mxu0 }
 0x8cc   : > { %v5177_v12 = vadd.f32 %v5176_v22, %v5088_v37  ;;  %v4913_v3 = vadd.f32 %v4912_v10, %v8532_v9 }
 0x8cd   : > { %v5001_v17 = vpop.f32.mrf.mxu1 }
 0x8ce   : > { %5243 = vst [vmem:[%s8247_s16 + $0x1d8] sm:$0xff] %v5177_v12  ;;  %v5002_v5 = vadd.f32 %v5001_v17, %v4913_v3 }
 0x8d1   : > { %v5090_v6 = vpop.f32.mrf.mxu2 }
 0x8d2   : > { %v5091_v53 = vadd.f32 %v5090_v6, %v5002_v5 }
 0x8d3   : > { %v5179_v62 = vpop.f32.mrf.mxu3  ;;  %v4914_v7 = vpop.f32.mrf.mxu0 }
 0x8d4   : > { %v5180_v48 = vadd.f32 %v5179_v62, %v5091_v53  ;;  %v4915_v24 = vadd.f32 %v4914_v7, %v8534_v56 }
 0x8d5   : > { %v5003_v21 = vpop.f32.mrf.mxu1 }
 0x8d6   : > { %5245 = vst [vmem:[%s8247_s16 + $0x1e8] sm:$0xff] %v5180_v48  ;;  %v5004_v9 = vadd.f32 %v5003_v21, %v4915_v24 }
 0x8d9   : > { %v5092_v15 = vpop.f32.mrf.mxu2 }
 0x8da   : > { %v5093_v51 = vadd.f32 %v5092_v15, %v5004_v9 }
 0x8db   : > { %v5181_v31 = vpop.f32.mrf.mxu3 }
 0x8dc   : > { %v5182_v33 = vadd.f32 %v5181_v31, %v5093_v51 }
 0x8de   : > { %5247 = vst [vmem:[%s8247_s16 + $0x1f8] sm:$0xff] %v5182_v33 }
 0x8df   : > { %6909 = shalt.err (!%p6906_p10)
}
 0x8e0   : > { %s6967_s17 = smov 256   ;;  %s6968_s16 = smov 16  }
 0x8e1   : > { %6687 = dma.vmem_to_hbm [thread:$0]  (%p7082_p7), %s5263_s14, 8192, %s5265_s7, %s5249_s22, %s6967_s17, %s6967_s17, %s6968_s16  }
 0x8e2 PF: > { %s5279_s26 = sand.u32 1, %s6944_s18   ;;  %p9114_p12 = scmp.ge.s32.totalorder %s6956_s21, 2 }
 0x8e3   : > { %s5280_s27 = scalar_lea.sflag [#allocation4], %s5279_s26 }
 0x8e4   : > { %p6704_p13 = pnand %p9114_p12, %p7034_p6 }
 0x8e6   : > { %p6705_p0 = pneg %p6704_p13 }
 0x8e8   : > { %6939 = dma.done.wait (%p6705_p0), %s5280_s27, 8192  }
 0x8e9   : > { %6941 = vsyncadd (%p6705_p0), %s5280_s27, 4294959104  ;;  %p20_p3 = scmp.ge.s32.totalorder %s7068_s30, 4   ;;  %s9115_s18 = smov %s6948_s19 }
 0x8ea   : > { %s9116_s19 = smov %s6952_s20  ;;  %s9117_s20 = smov %s7078_s9 }
 0x8eb   : > { %s9118_s21 = smov %s7068_s30  ;;  %22 = sbr.rel (!%p20_p3) target bundleno = 7 (0x7), region = 97 }
 0x8f0   :  { %5286 = vsyncpa [#allocation3], 1 }
 0x8f1   :  { %5288 = vsyncpa [#allocation3 + $0x1], 1 }
 0x8f2   :  { %5289 = vsyncpa [#allocation6], 1 }
 0x8f3   :  { %5290 = vsyncpa [#allocation9], 1 }
 0x8f4   :  { %5291 = vsyncpa [#allocation4], 1 }
 0x8f5   :  { %5293 = vsyncpa [#allocation4 + $0x1], 1 }

</bundles_post_ra>
